<compile_context>
chip_gen: v5e
topology: v5e:2x2
jax: 0.10.0
libtpu: 0.0.40
codegen_flags: <defaults>
</compile_context>

<pallas_src>
import math

import jax
import jax.numpy as jnp
from jax import lax
from jax.experimental import pallas as pl
from jax.experimental.pallas import tpu as pltpu

IMAGE_DIM = 1000
IMAGE_DIM_PAD = 1024        # lane/MXU-K aligned image feature width
TEXT_DIM = 768
HIDDEN_DIM = 256            # CrossModalAttention hidden_dim
CLS_HIDDEN = 2 * HIDDEN_DIM  # 512, classifier2 hidden width
NUM_CLASSES = 3
OUT_PAD = 128               # lane-dense padded output width


# ----------------------------------------------------------------------------
# Pallas kernel: cross-modal attention + fusion classifier
# ----------------------------------------------------------------------------
def fusion_kernel(img_ref, txt_ref,
                  w_img_ref, b_img_ref,       # (1024, 768), (1, 768)
                  w_txt_ref, b_txt_ref,       # (768, 1024), (1, 1024)
                  w1_att_ref,                 # (256, 512)
                  w2_ref, b2_ref,             # (512, 128),  (1, 128)
                  out_ref):                   # (B, 128)
    f32 = jnp.float32
    bf16 = jnp.bfloat16

    img = img_ref[...]            # (B, 1024) bf16 (zero-padded 1000 -> 1024)
    txt = txt_ref[...]            # (B, 768)  bf16

    # --- fused projections (one MXU pass per activation) ---------------------
    # img @ [Wq | W1_img] + [bq | b1]
    proj_i = jnp.dot(img, w_img_ref[...], preferred_element_type=f32) \
        + b_img_ref[...]                                       # (B, 768)
    # txt @ [Wk | Wv | W1_txt] + [bk | bv | 0]
    proj_t = jnp.dot(txt, w_txt_ref[...], preferred_element_type=f32) \
        + b_txt_ref[...]                                       # (B, 1024)

    # lane-aligned (128-multiple) slices -> free views, no VMEM copies
    q = proj_i[:, :HIDDEN_DIM]                                 # (B, 256)
    h_img = proj_i[:, HIDDEN_DIM:]                             # (B, 512) + b1
    k = proj_t[:, :HIDDEN_DIM]                                 # (B, 256)
    v = proj_t[:, HIDDEN_DIM:2 * HIDDEN_DIM]                   # (B, 256)
    h_txt = proj_t[:, 2 * HIDDEN_DIM:]                         # (B, 512)

    # --- CrossModalAttention --------------------------------------------------
    scale = 1.0 / math.sqrt(float(HIDDEN_DIM))
    # contract over the feature dim directly (no k.T materialization)
    scores = lax.dot_general(q, k, (((1,), (1,)), ((), ())),
                             preferred_element_type=f32) * scale   # (B, B)
    scores = scores - jnp.max(scores, axis=-1, keepdims=True)
    e = jnp.exp(scores)
    denom = jnp.sum(e, axis=-1, keepdims=True)
    attn = e * pl.reciprocal(denom, approx=False)                  # EUP recip
    attended = jnp.dot(attn.astype(bf16), v.astype(bf16),
                       preferred_element_type=f32)                 # (B, 256)

    # --- classifier2: concat([img, txt, attended]) @ W1 + b1 (split matmul) ---
    h = (h_img + h_txt
         + jnp.dot(attended.astype(bf16), w1_att_ref[...],
                   preferred_element_type=f32))
    h = jnp.maximum(h, 0.0)                                        # ReLU

    # lane-dense padded output (B, 128); real logits live in columns [:3]
    out_ref[...] = (jnp.dot(h.astype(bf16), w2_ref[...],
                            preferred_element_type=f32) + b2_ref[...])


def fusion_forward(image_features, text_features, kparams):
    """Call the Pallas kernel on pre-packed (bf16, padded, fused) parameters.

    Everything fits VMEM comfortably at these shapes (~3.5 MiB bf16 weights),
    so a single grid point with full-array VMEM blocks is used.
    """
    B = image_features.shape[0]
    bf16 = jnp.bfloat16

    # per-call activation prep only (weight packing is hoisted into
    # prepare_kernel_params, done once)
    img_p = jnp.pad(image_features,
                    ((0, 0), (0, IMAGE_DIM_PAD - IMAGE_DIM))).astype(bf16)
    txt_p = text_features.astype(bf16)

    inputs = (
        img_p, txt_p,
        kparams["w_img"], kparams["b_img"],
        kparams["w_txt"], kparams["b_txt"],
        kparams["w1_att"],
        kparams["w2"], kparams["b2"],
    )
    vmem_spec = pl.BlockSpec(memory_space=pltpu.MemorySpace.VMEM)
    out_padded = pl.pallas_call(
        fusion_kernel,
        out_shape=jax.ShapeDtypeStruct((B, OUT_PAD), jnp.float32),
        in_specs=[vmem_spec] * len(inputs),
        out_specs=vmem_spec,
    )(*inputs)
    return out_padded[:, :NUM_CLASSES]


# ----------------------------------------------------------------------------
# Deterministic parameter init (PyTorch-style uniform(-1/sqrt(fan_in), ...))
# ----------------------------------------------------------------------------
def _linear(key, fan_in, fan_out):
    kw, kb = jax.random.split(key)
    bound = 1.0 / math.sqrt(fan_in)
    w = jax.random.uniform(kw, (fan_in, fan_out), jnp.float32, -bound, bound)
    b = jax.random.uniform(kb, (1, fan_out), jnp.float32, -bound, bound)
    return w, b


def init_params(key):
    keys = jax.random.split(key, 5)
    wq, bq = _linear(keys[0], IMAGE_DIM, HIDDEN_DIM)
    wk, bk = _linear(keys[1], TEXT_DIM, HIDDEN_DIM)
    wv, bv = _linear(keys[2], TEXT_DIM, HIDDEN_DIM)
    fused_dim = IMAGE_DIM + TEXT_DIM + HIDDEN_DIM  # 2024
    w1, b1 = _linear(keys[3], fused_dim, CLS_HIDDEN)
    w2, b2 = _linear(keys[4], CLS_HIDDEN, NUM_CLASSES)
    return {
        "wq": wq, "bq": bq, "wk": wk, "bk": bk, "wv": wv, "bv": bv,
        # split W1 along its input axis to avoid an in-kernel concat
        "w1_img": w1[:IMAGE_DIM],
        "w1_txt": w1[IMAGE_DIM:IMAGE_DIM + TEXT_DIM],
        "w1_att": w1[IMAGE_DIM + TEXT_DIM:],
        "b1": b1, "w2": w2, "b2": b2,
    }


def prepare_kernel_params(p):
    """One-time packing: pad to lane-friendly shapes, fuse all projections
    sharing an activation, cast matmul weights to bf16 (biases stay f32;
    they add into f32 accumulators)."""
    bf16 = jnp.bfloat16

    def pad_img_rows(w):
        return jnp.pad(w, ((0, IMAGE_DIM_PAD - IMAGE_DIM), (0, 0)))

    # image path:  img @ [Wq | W1_img] + [bq | b1]       -> (B, 768)
    w_img = jnp.concatenate([pad_img_rows(p["wq"]),
                             pad_img_rows(p["w1_img"])], axis=1)     # (1024, 768)
    b_img = jnp.concatenate([p["bq"], p["b1"]], axis=1)              # (1, 768)

    # text path:   txt @ [Wk | Wv | W1_txt] + [bk | bv | 0] -> (B, 1024)
    w_txt = jnp.concatenate([p["wk"], p["wv"], p["w1_txt"]], axis=1)  # (768, 1024)
    b_txt = jnp.concatenate([p["bk"], p["bv"],
                             jnp.zeros((1, CLS_HIDDEN), jnp.float32)], axis=1)

    return {
        "w_img": w_img.astype(bf16),
        "b_img": b_img,                                              # f32
        "w_txt": w_txt.astype(bf16),
        "b_txt": b_txt,                                              # f32
        "w1_att": p["w1_att"].astype(bf16),                          # (256, 512)
        "w2": jnp.pad(p["w2"],
                      ((0, 0), (0, OUT_PAD - NUM_CLASSES))).astype(bf16),  # (512, 128)
        "b2": jnp.pad(p["b2"], ((0, 0), (0, OUT_PAD - NUM_CLASSES))),      # (1, 128)
    }


# ----------------------------------------------------------------------------
# Stub backbones (glue, plain JAX).
# TODO(synk): pretrained ResNet-50 / BERT backbones have no Pallas equivalent
#             here; replaced by deterministic projection stubs with the same
#             output shapes ((B, 1000) and (B, 768)).
# ----------------------------------------------------------------------------
def stub_image_extractor(image, w_img_proj):
    pooled = jnp.mean(image, axis=(2, 3))         # NCHW -> (B, 3)
    return jnp.tanh(pooled @ w_img_proj)          # (B, 1000)


def stub_text_extractor(input_ids, attention_mask, emb_table, w_pool):
    emb = emb_table[input_ids]                    # (B, S, 768)
    mask = attention_mask[..., None].astype(jnp.float32)
    pooled = (emb * mask).sum(1) / jnp.maximum(mask.sum(1), 1.0)
    return jnp.tanh(pooled @ w_pool)              # (B, 768)


# ----------------------------------------------------------------------------
# References for correctness checks
# ----------------------------------------------------------------------------
def reference_forward_f32(img, txt, p):
    """Original (full-f32) module semantics."""
    q = img @ p["wq"] + p["bq"]
    k = txt @ p["wk"] + p["bk"]
    v = txt @ p["wv"] + p["bv"]
    s = (q @ k.T) / math.sqrt(HIDDEN_DIM)
    a = jax.nn.softmax(s, axis=-1)
    att = a @ v
    fused = jnp.concatenate([img, txt, att], axis=-1)
    w1 = jnp.concatenate([p["w1_img"], p["w1_txt"], p["w1_att"]], axis=0)
    h = jax.nn.relu(fused @ w1 + p["b1"])
    return h @ p["w2"] + p["b2"]


def reference_forward_bf16(img, txt, kp):
    """Plain-JAX reference that mirrors the kernel's bf16-input / f32-accum
    numerics (checks kernel correctness, not quantization error)."""
    f32, bf16 = jnp.float32, jnp.bfloat16
    img_p = jnp.pad(img, ((0, 0), (0, IMAGE_DIM_PAD - IMAGE_DIM))).astype(bf16)
    txt_p = txt.astype(bf16)

    proj_i = jnp.dot(img_p, kp["w_img"], preferred_element_type=f32) + kp["b_img"]
    proj_t = jnp.dot(txt_p, kp["w_txt"], preferred_element_type=f32) + kp["b_txt"]
    q, h_img = proj_i[:, :HIDDEN_DIM], proj_i[:, HIDDEN_DIM:]
    k = proj_t[:, :HIDDEN_DIM]
    v = proj_t[:, HIDDEN_DIM:2 * HIDDEN_DIM]
    h_txt = proj_t[:, 2 * HIDDEN_DIM:]

    s = lax.dot_general(q, k, (((1,), (1,)), ((), ())),
                        preferred_element_type=f32) / math.sqrt(HIDDEN_DIM)
    a = jax.nn.softmax(s, axis=-1)
    att = jnp.dot(a.astype(bf16), v.astype(bf16), preferred_element_type=f32)

    h = (h_img + h_txt
         + jnp.dot(att.astype(bf16), kp["w1_att"], preferred_element_type=f32))
    h = jnp.maximum(h, 0.0)
    out = jnp.dot(h.astype(bf16), kp["w2"], preferred_element_type=f32) + kp["b2"]
    return out[:, :NUM_CLASSES]


if __name__ == "__main__":
    key = jax.random.PRNGKey(0)
    k_param, k_img, k_ids, k_proj1, k_emb, k_pool = jax.random.split(key, 6)

    B, C, H, W, S, VOCAB = 2, 3, 16, 16, 8, 100

    image = jax.random.normal(k_img, (B, C, H, W), jnp.float32)        # NCHW
    input_ids = jax.random.randint(k_ids, (B, S), 0, VOCAB, jnp.int32)
    attention_mask = jnp.ones((B, S), jnp.int32)

    # stub backbone params
    w_img_proj = jax.random.normal(k_proj1, (C, IMAGE_DIM), jnp.float32) * 0.1
    emb_table = jax.random.normal(k_emb, (VOCAB, TEXT_DIM), jnp.float32) * 0.1
    w_pool = jax.random.normal(k_pool, (TEXT_DIM, TEXT_DIM), jnp.float32) * 0.05

    image_features = stub_image_extractor(image, w_img_proj)           # (B, 1000)
    text_features = stub_text_extractor(input_ids, attention_mask,
                                        emb_table, w_pool)             # (B, 768)

    params = init_params(k_param)
    kparams = prepare_kernel_params(params)   # one-time pack/pad/fuse/bf16 cast

    out = fusion_forward(image_features, text_features, kparams)
    out = jax.block_until_ready(out)
    assert out.shape == (B, NUM_CLASSES)

    # exact-numerics check against the bf16-mirroring reference
    ref_bf16 = reference_forward_bf16(image_features, text_features, kparams)
    assert jnp.allclose(out, ref_bf16, atol=1e-4, rtol=1e-3), (out, ref_bf16)

    # sanity check against the full-f32 original-module reference
    ref_f32 = reference_forward_f32(image_features, text_features, params)
    assert jnp.allclose(out, ref_f32, atol=2e-2, rtol=2e-2), (out, ref_f32)

    print("KERNEL_OK")
</pallas_src>

<mosaic_0001>
module attributes {stable_mosaic.version = 11 : i64} {
  func.func @fusion_kernel(%arg0: memref<2x1024xbf16, #tpu.memory_space<vmem>>, %arg1: memref<2x768xbf16, #tpu.memory_space<vmem>>, %arg2: memref<1024x768xbf16, #tpu.memory_space<vmem>>, %arg3: memref<1x768xf32, #tpu.memory_space<vmem>>, %arg4: memref<768x1024xbf16, #tpu.memory_space<vmem>>, %arg5: memref<1x1024xf32, #tpu.memory_space<vmem>>, %arg6: memref<256x512xbf16, #tpu.memory_space<vmem>>, %arg7: memref<512x128xbf16, #tpu.memory_space<vmem>>, %arg8: memref<1x128xf32, #tpu.memory_space<vmem>>, %arg9: memref<2x128xf32, #tpu.memory_space<vmem>>) attributes {dimension_semantics = [], scalar_prefetch = 0 : i64, scratch_operands = 0 : i64, tpu.core_type = #tpu.core_type<tc>} {
    %c0 = arith.constant 0 : index
    %c0_0 = arith.constant 0 : index
    %0 = vector.load %arg0[%c0, %c0_0] : memref<2x1024xbf16, #tpu.memory_space<vmem>>, vector<2x1024xbf16>
    %c0_1 = arith.constant 0 : index
    %c0_2 = arith.constant 0 : index
    %1 = vector.load %arg1[%c0_1, %c0_2] : memref<2x768xbf16, #tpu.memory_space<vmem>>, vector<2x768xbf16>
    %c0_3 = arith.constant 0 : index
    %c0_4 = arith.constant 0 : index
    %2 = vector.load %arg2[%c0_3, %c0_4] : memref<1024x768xbf16, #tpu.memory_space<vmem>>, vector<1024x768xbf16>
    %cst = arith.constant dense<0.000000e+00> : vector<2x768xf32>
    %3 = tpu.matmul %0, %2, %cst {dimension_numbers = #tpu.dot_dimension_numbers<[1], [0], [0], [1], [0, 0, 1, 1], [], []>} : vector<2x1024xbf16>, vector<1024x768xbf16>, vector<2x768xf32> -> vector<2x768xf32>
    %c0_5 = arith.constant 0 : index
    %c0_6 = arith.constant 0 : index
    %4 = vector.load %arg3[%c0_5, %c0_6] : memref<1x768xf32, #tpu.memory_space<vmem>>, vector<1x768xf32>
    %5 = vector.broadcast %4 : vector<1x768xf32> to vector<2x768xf32>
    %6 = arith.addf %3, %5 : vector<2x768xf32>
    %c0_7 = arith.constant 0 : index
    %c0_8 = arith.constant 0 : index
    %7 = vector.load %arg4[%c0_7, %c0_8] : memref<768x1024xbf16, #tpu.memory_space<vmem>>, vector<768x1024xbf16>
    %cst_9 = arith.constant dense<0.000000e+00> : vector<2x1024xf32>
    %8 = tpu.matmul %1, %7, %cst_9 {dimension_numbers = #tpu.dot_dimension_numbers<[1], [0], [0], [1], [0, 0, 1, 1], [], []>} : vector<2x768xbf16>, vector<768x1024xbf16>, vector<2x1024xf32> -> vector<2x1024xf32>
    %c0_10 = arith.constant 0 : index
    %c0_11 = arith.constant 0 : index
    %9 = vector.load %arg5[%c0_10, %c0_11] : memref<1x1024xf32, #tpu.memory_space<vmem>>, vector<1x1024xf32>
    %10 = vector.broadcast %9 : vector<1x1024xf32> to vector<2x1024xf32>
    %11 = arith.addf %8, %10 : vector<2x1024xf32>
    %12 = vector.extract_strided_slice %6 {offsets = [0, 0], sizes = [2, 256], strides = [1, 1]} : vector<2x768xf32> to vector<2x256xf32>
    %13 = vector.extract_strided_slice %6 {offsets = [0, 256], sizes = [2, 512], strides = [1, 1]} : vector<2x768xf32> to vector<2x512xf32>
    %14 = vector.extract_strided_slice %11 {offsets = [0, 0], sizes = [2, 256], strides = [1, 1]} : vector<2x1024xf32> to vector<2x256xf32>
    %15 = vector.extract_strided_slice %11 {offsets = [0, 256], sizes = [2, 256], strides = [1, 1]} : vector<2x1024xf32> to vector<2x256xf32>
    %16 = vector.extract_strided_slice %11 {offsets = [0, 512], sizes = [2, 512], strides = [1, 1]} : vector<2x1024xf32> to vector<2x512xf32>
    %cst_12 = arith.constant dense<0.000000e+00> : vector<2x2xf32>
    %17 = tpu.matmul %12, %14, %cst_12 {dimension_numbers = #tpu.dot_dimension_numbers<[1], [1], [0], [0], [0, 0, 1, 0], [], []>} : vector<2x256xf32>, vector<2x256xf32>, vector<2x2xf32> -> vector<2x2xf32>
    %cst_13 = arith.constant 6.250000e-02 : f32
    %18 = vector.broadcast %cst_13 : f32 to vector<2x2xf32>
    %19 = arith.mulf %17, %18 : vector<2x2xf32>
    %cst_14 = arith.constant dense<0xFF800000> : vector<2xf32>
    %20 = vector.multi_reduction <maximumf>, %19, %cst_14 [1] : vector<2x2xf32> to vector<2xf32>
    %21 = vector.shape_cast %20 : vector<2xf32> to vector<2x1xf32>
    %22 = vector.broadcast %21 : vector<2x1xf32> to vector<2x2xf32>
    %23 = arith.subf %19, %22 : vector<2x2xf32>
    %24 = math.exp %23 : vector<2x2xf32>
    %cst_15 = arith.constant dense<0.000000e+00> : vector<2xf32>
    %25 = vector.multi_reduction <add>, %24, %cst_15 [1] : vector<2x2xf32> to vector<2xf32>
    %26 = vector.shape_cast %25 : vector<2xf32> to vector<2x1xf32>
    %27 = tpu.reciprocal %26 : vector<2x1xf32> -> vector<2x1xf32>
    %28 = vector.broadcast %27 : vector<2x1xf32> to vector<2x2xf32>
    %29 = arith.mulf %24, %28 : vector<2x2xf32>
    %30 = arith.truncf %29 : vector<2x2xf32> to vector<2x2xbf16>
    %31 = arith.truncf %15 : vector<2x256xf32> to vector<2x256xbf16>
    %cst_16 = arith.constant dense<0.000000e+00> : vector<2x256xf32>
    %32 = tpu.matmul %30, %31, %cst_16 {dimension_numbers = #tpu.dot_dimension_numbers<[1], [0], [0], [1], [0, 0, 1, 1], [], []>} : vector<2x2xbf16>, vector<2x256xbf16>, vector<2x256xf32> -> vector<2x256xf32>
    %33 = arith.addf %13, %16 : vector<2x512xf32>
    %34 = arith.truncf %32 : vector<2x256xf32> to vector<2x256xbf16>
    %c0_17 = arith.constant 0 : index
    %c0_18 = arith.constant 0 : index
    %35 = vector.load %arg6[%c0_17, %c0_18] : memref<256x512xbf16, #tpu.memory_space<vmem>>, vector<256x512xbf16>
    %cst_19 = arith.constant dense<0.000000e+00> : vector<2x512xf32>
    %36 = tpu.matmul %34, %35, %cst_19 {dimension_numbers = #tpu.dot_dimension_numbers<[1], [0], [0], [1], [0, 0, 1, 1], [], []>} : vector<2x256xbf16>, vector<256x512xbf16>, vector<2x512xf32> -> vector<2x512xf32>
    %37 = arith.addf %33, %36 : vector<2x512xf32>
    %cst_20 = arith.constant 0.000000e+00 : f32
    %38 = vector.broadcast %cst_20 : f32 to vector<2x512xf32>
    %39 = arith.maximumf %37, %38 : vector<2x512xf32>
    %40 = arith.truncf %39 : vector<2x512xf32> to vector<2x512xbf16>
    %c0_21 = arith.constant 0 : index
    %c0_22 = arith.constant 0 : index
    %41 = vector.load %arg7[%c0_21, %c0_22] : memref<512x128xbf16, #tpu.memory_space<vmem>>, vector<512x128xbf16>
    %cst_23 = arith.constant dense<0.000000e+00> : vector<2x128xf32>
    %42 = tpu.matmul %40, %41, %cst_23 {dimension_numbers = #tpu.dot_dimension_numbers<[1], [0], [0], [1], [0, 0, 1, 1], [], []>} : vector<2x512xbf16>, vector<512x128xbf16>, vector<2x128xf32> -> vector<2x128xf32>
    %c0_24 = arith.constant 0 : index
    %c0_25 = arith.constant 0 : index
    %43 = vector.load %arg8[%c0_24, %c0_25] : memref<1x128xf32, #tpu.memory_space<vmem>>, vector<1x128xf32>
    %44 = vector.broadcast %43 : vector<1x128xf32> to vector<2x128xf32>
    %45 = arith.addf %42, %44 : vector<2x128xf32>
    %c0_26 = arith.constant 0 : index
    %c0_27 = arith.constant 0 : index
    %46 = vector.load %arg9[%c0_26, %c0_27] : memref<2x128xf32, #tpu.memory_space<vmem>>, vector<2x128xf32>
    tpu.vector_store %arg9[%c0_26, %c0_27], %45 {strides = array<i32>} : memref<2x128xf32, #tpu.memory_space<vmem>>, vector<2x128xf32>,
    return
  }
}

</mosaic_0001>

<bundles_post_ra>
// kernel: tpu_custom_call.1
= control target key start
LH: loop header
LB: loop body
LE: loop exit
PB: predicated region body
PF: predicated region fallthrough
CT: control target
= control target key end

     0   :  { %14 = vsyncpa [#allocation3], 0  ;;  %s12024_s0 = inlined_call_operand.hbm [shape: bf16[2,1024], index: 0, kind: input, shape index: {}]   ;;  %s12025_s1 = inlined_call_operand.hbm [shape: bf16[2,768], index: 1, kind: input, shape index: {}]   ;;  %s12026_s2 = inlined_call_operand.hbm [shape: bf16[1024,768], index: 2, kind: input, shape index: {}]   ;;  %s12027_s3 = inlined_call_operand.hbm [shape: f32[1,768], index: 3, kind: input, shape index: {}]   ;;  %s12028_s4 = inlined_call_operand.hbm [shape: bf16[768,1024], index: 4, kind: input, shape index: {}]   ;;  %s12029_s5 = inlined_call_operand.hbm [shape: f32[1,1024], index: 5, kind: input, shape index: {}]   ;;  %s12030_s6 = inlined_call_operand.hbm [shape: bf16[256,512], index: 6, kind: input, shape index: {}]   ;;  %s12031_s7 = inlined_call_operand.hbm [shape: bf16[512,128], index: 7, kind: input, shape index: {}]   ;;  %s12032_s8 = inlined_call_operand.hbm [shape: f32[1,128], index: 8, kind: input, shape index: {}]   ;;  %s12033_s9 = inlined_call_operand.hbm [shape: f32[2,128], index: 9, kind: output, shape index: {}]  }
   0x1   :  { %15 = vsyncpa [#allocation6], 0 }
   0x2   :  { %16 = vsyncpa [#allocation9], 0 }
   0x3   :  { %17 = vsyncpa [#allocation12], 0 }
   0x4   :  { %18 = vsyncpa [#allocation15], 0  ;;  %s36_s11 = sshll.u32 %s12025_s1, 4  ;;  %s37_s11 = int_to_ptr.hbm [resolvable:$true] %s36_s11 }
   0x5   :  { %19 = vsyncpa [#allocation4], 0  ;;  %s11644_s12 = smov [#allocation5]   ;;  %s60_s16 = sshll.u32 %s12027_s3, 4  ;;  %s61_s16 = int_to_ptr.hbm [resolvable:$true] %s60_s16 }
   0x6   :  { %s38_s13 = sshll.u32 %s11644_s12, 4  ;;  %s11645_s17 = smov [#allocation8]   ;;  %s39_s13 = int_to_ptr.vmem [resolvable:$true] %s38_s13 }
   0x7   :  { %41 = dma.hbm_to_vmem [thread:$0]  %s37_s11, 96, %s39_s13, [#allocation6]  }
   0x8   :  { %s62_s18 = sshll.u32 %s11645_s17, 4  ;;  %s84_s21 = sshll.u32 %s12029_s5, 4  ;;  %s63_s18 = int_to_ptr.vmem [resolvable:$true] %s62_s18  ;;  %s85_s21 = int_to_ptr.hbm [resolvable:$true] %s84_s21 }
   0x9   :  { %65 = dma.hbm_to_vmem [thread:$0]  %s61_s16, 96, %s63_s18, [#allocation9]  }
   0xa   :  { %s107_s23 = sshll.u32 %s12031_s7, 4  ;;  %s11646_s24 = smov [#allocation11]   ;;  %s108_s23 = int_to_ptr.hbm [resolvable:$true] %s107_s23 }
   0xb   :  { %s86_s25 = sshll.u32 %s11646_s24, 4  ;;  %s11647_s3 = smov [#allocation14]   ;;  %s87_s25 = int_to_ptr.vmem [resolvable:$true] %s86_s25 }
   0xc   :  { %89 = dma.hbm_to_vmem [thread:$0]  %s85_s21, 128, %s87_s25, [#allocation12]  }
   0xd   :  { %s109_s26 = sshll.u32 %s11647_s3, 4  ;;  %s11648_s27 = smov 64   ;;  %s110_s26 = int_to_ptr.vmem [resolvable:$true] %s109_s26 }
   0xe   :  { %s11649_s28 = smov 4   ;;  %s25_s30 = sshll.u32 %s12024_s0, 4  ;;  %s26_s30 = int_to_ptr.hbm [resolvable:$true] %s25_s30 }
   0xf   :  { %115 = dma.hbm_to_vmem [thread:$0]  %s108_s23, 4096, %s110_s26, [#allocation15], %s11648_s27, %s11648_s27, %s11649_s28  }
  0x10   :  { %s11650_s10 = smov [#allocation2]   ;;  %s46_s13 = sshll.u32 %s12026_s2, 4  ;;  %s47_s13 = int_to_ptr.hbm [resolvable:$true] %s46_s13 }
  0x11   :  { %s27_s11 = sshll.u32 %s11650_s10, 4  ;;  %s11651_s14 = smov [#allocation7]   ;;  %s28_s11 = int_to_ptr.vmem [resolvable:$true] %s27_s11 }
  0x12   :  { %30 = dma.hbm_to_vmem [thread:$0]  %s26_s30, 128, %s28_s11, [#allocation3]  }
  0x13   :  { %s48_s15 = sshll.u32 %s11651_s14, 4  ;;  %s11652_s16 = smov 384   ;;  %s49_s15 = int_to_ptr.vmem [resolvable:$true] %s48_s15 }
  0x14   :  { %s11653_s17 = smov 24   ;;  %s70_s0 = sshll.u32 %s12028_s4, 4  ;;  %s71_s0 = int_to_ptr.hbm [resolvable:$true] %s70_s0 }
  0x15   :  { %54 = dma.hbm_to_vmem [thread:$0]  %s47_s13, 49152, %s49_s15, [#allocation6], %s11652_s16, %s11652_s16, %s11653_s17  }
  0x16   :  { %s11654_s20 = smov [#allocation10]   ;;  %s94_s2 = sshll.u32 %s12030_s6, 4  ;;  %s95_s2 = int_to_ptr.hbm [resolvable:$true] %s94_s2 }
  0x17   :  { %s72_s21 = sshll.u32 %s11654_s20, 4  ;;  %s11655_s23 = smov 512   ;;  %s73_s21 = int_to_ptr.vmem [resolvable:$true] %s72_s21 }
  0x18   :  { %s11656_s24 = smov 32   ;;  %s11657_s25 = smov [#allocation13]  }
  0x19   :  { %78 = dma.hbm_to_vmem [thread:$0]  %s71_s0, 49152, %s73_s21, [#allocation9], %s11655_s23, %s11655_s23, %s11656_s24  }
  0x1a   :  { %s96_s3 = sshll.u32 %s11657_s25, 4  ;;  %s11658_s26 = smov 256   ;;  %s97_s3 = int_to_ptr.vmem [resolvable:$true] %s96_s3 }
  0x1b   :  { %s11659_s27 = smov 16   ;;  %s121_s29 = sshll.u32 %s12032_s8, 4  ;;  %s122_s29 = int_to_ptr.hbm [resolvable:$true] %s121_s29 }
  0x1c   :  { %102 = dma.hbm_to_vmem [thread:$0]  %s95_s2, 8192, %s97_s3, [#allocation12], %s11658_s26, %s11658_s26, %s11659_s27  }
  0x1d   :  { %s11660_s5 = smov [#allocation16]  }
  0x1e   :  { %s123_s30 = sshll.u32 %s11660_s5, 4  ;;  %s124_s30 = int_to_ptr.vmem [resolvable:$true] %s123_s30 }
  0x1f   :  { %126 = dma.hbm_to_vmem [thread:$0]  %s122_s29, 16, %s124_s30, [#allocation15]  }
  0x20   :  { %11632 = dma.done.wait [#allocation3], 128  }
  0x21   :  { %11633 = vsyncadd [#allocation3], 4294967168 }
  0x22   :  { %11634 = dma.done.wait [#allocation6], 49248  }
  0x23   :  { %11635 = vsyncadd [#allocation6], 4294918048 }
  0x24   :  { %11636 = dma.done.wait [#allocation9], 49248  }
  0x25   :  { %11637 = vsyncadd [#allocation9], 4294918048 }
  0x26   :  { %11638 = dma.done.wait [#allocation12], 8320  }
  0x27   :  { %11639 = vsyncadd [#allocation12], 4294958976 }
  0x28   :  { %11640 = dma.done.wait [#allocation15], 4112  }
  0x29   :  { %11641 = vsyncadd [#allocation15], 4294963184  ;;  %v7202_v0 = vld [vmem:[#allocation7 + $0x150] sm:$0xf]  ;;  %v10535_v1 = vld [vmem:[#allocation7 + $0x164] sm:$0xf0] }
  0x2a   :  { %v7394_v2 = vld [vmem:[#allocation7 + $0x2d0] sm:$0xf]  ;;  %v7203_v3 = vor.u32 %v10535_v1, %v7202_v0  ;;  %v10583_v4 = vld [vmem:[#allocation7 + $0x2e4] sm:$0xf0]  ;;  %v7178_v11 = vld [vmem:[#allocation7 + $0x120] sm:$0xf] }
  0x2b   :  { %v7586_v5 = vld [vmem:[#allocation7 + $0x450] sm:$0xf]  ;;  %v10631_v6 = vld [vmem:[#allocation7 + $0x464] sm:$0xf0]  ;;  %v7395_v7 = vor.u32 %v10583_v4, %v7394_v2  ;;  %v10529_v13 = vld [vmem:[#allocation7 + $0x134] sm:$0xf0] }
  0x2c   :  { %v7587_v8 = vor.u32 %v10631_v6, %v7586_v5  ;;  %v7778_v9 = vld [vmem:[#allocation7 + $0x5d0] sm:$0xf]  ;;  %v10679_v10 = vld [vmem:[#allocation7 + $0x5e4] sm:$0xf0]  ;;  %2502 = vmatpush.bf16.msra.mxu0 %v7203_v3  ;;  %v7370_v14 = vld [vmem:[#allocation7 + $0x2a0] sm:$0xf]  ;;  %v7179_v16 = vor.u32 %v10529_v13, %v7178_v11 }
  0x2d   :  { %v7779_v12 = vor.u32 %v10679_v10, %v7778_v9  ;;  %v10577_v15 = vld [vmem:[#allocation7 + $0x2b4] sm:$0xf0]  ;;  %2515 = vmatpush.bf16.msra.mxu1 %v7395_v7  ;;  %v7562_v18 = vld [vmem:[#allocation7 + $0x420] sm:$0xf]  ;;  %v7154_v23 = vld [vmem:[#allocation7 + $0xf0] sm:$0xf] }
  0x2e   :  { %2528 = vmatpush.bf16.msra.mxu2 %v7587_v8  ;;  %v7371_v17 = vor.u32 %v10577_v15, %v7370_v14  ;;  %v10625_v19 = vld [vmem:[#allocation7 + $0x434] sm:$0xf0]  ;;  %v7754_v20 = vld [vmem:[#allocation7 + $0x5a0] sm:$0xf]  ;;  %v10523_v24 = vld [vmem:[#allocation7 + $0x104] sm:$0xf0] }
  0x2f   :  { %2541 = vmatpush.bf16.msra.mxu3 %v7779_v12  ;;  %v7563_v21 = vor.u32 %v10625_v19, %v7562_v18  ;;  %v10673_v22 = vld [vmem:[#allocation7 + $0x5b4] sm:$0xf0]  ;;  %v7346_v26 = vld [vmem:[#allocation7 + $0x270] sm:$0xf]  ;;  %v10571_v27 = vld [vmem:[#allocation7 + $0x284] sm:$0xf0]  ;;  %v7155_v29 = vor.u32 %v10523_v24, %v7154_v23 }
  0x30   :  { %v7755_v25 = vor.u32 %v10673_v22, %v7754_v20  ;;  %v7538_v28 = vld [vmem:[#allocation7 + $0x3f0] sm:$0xf]  ;;  %2503 = vmatpush.bf16.msra.mxu0 %v7179_v16  ;;  %v10619_v30 = vld [vmem:[#allocation7 + $0x404] sm:$0xf0]  ;;  %v7347_v33 = vor.u32 %v10571_v27, %v7346_v26  ;;  %v7130_v35 = vld [vmem:[#allocation7 + $0xc0] sm:$0xf] }
  0x31   :  { %v7730_v31 = vld [vmem:[#allocation7 + $0x570] sm:$0xf]  ;;  %v10667_v32 = vld [vmem:[#allocation7 + $0x584] sm:$0xf0]  ;;  %2516 = vmatpush.bf16.msra.mxu1 %v7371_v17  ;;  %v7539_v34 = vor.u32 %v10619_v30, %v7538_v28  ;;  %v10517_v36 = vld [vmem:[#allocation7 + $0xd4] sm:$0xf0] }
  0x32   :  { %2529 = vmatpush.bf16.msra.mxu2 %v7563_v21  ;;  %v7322_v37 = vld [vmem:[#allocation7 + $0x240] sm:$0xf]  ;;  %v7731_v38 = vor.u32 %v10667_v32, %v7730_v31  ;;  %v10565_v39 = vld [vmem:[#allocation7 + $0x254] sm:$0xf0]  ;;  %v7131_v44 = vor.u32 %v10517_v36, %v7130_v35  ;;  %v7106_v47 = vld [vmem:[#allocation7 + $0x90] sm:$0xf] }
  0x33   :  { %2542 = vmatpush.bf16.msra.mxu3 %v7755_v25  ;;  %v7514_v40 = vld [vmem:[#allocation7 + $0x3c0] sm:$0xf]  ;;  %v10613_v41 = vld [vmem:[#allocation7 + $0x3d4] sm:$0xf0]  ;;  %v7323_v45 = vor.u32 %v10565_v39, %v7322_v37  ;;  %v10511_v48 = vld [vmem:[#allocation7 + $0xa4] sm:$0xf0] }
  0x34   :  { %v7706_v42 = vld [vmem:[#allocation7 + $0x540] sm:$0xf]  ;;  %v10661_v43 = vld [vmem:[#allocation7 + $0x554] sm:$0xf0]  ;;  %2504 = vmatpush.bf16.msra.mxu0 %v7155_v29  ;;  %v7515_v46 = vor.u32 %v10613_v41, %v7514_v40  ;;  %v7298_v49 = vld [vmem:[#allocation7 + $0x210] sm:$0xf]  ;;  %v7107_v56 = vor.u32 %v10511_v48, %v7106_v47 }
  0x35   :  { %2517 = vmatpush.bf16.msra.mxu1 %v7347_v33  ;;  %v7707_v50 = vor.u32 %v10661_v43, %v7706_v42  ;;  %v10559_v51 = vld [vmem:[#allocation7 + $0x224] sm:$0xf0]  ;;  %v7490_v52 = vld [vmem:[#allocation7 + $0x390] sm:$0xf]  ;;  %v7082_v59 = vld [vmem:[#allocation7 + $0x60] sm:$0xf] }
  0x36   :  { %2530 = vmatpush.bf16.msra.mxu2 %v7539_v34  ;;  %v10607_v53 = vld [vmem:[#allocation7 + $0x3a4] sm:$0xf0]  ;;  %v7682_v54 = vld [vmem:[#allocation7 + $0x510] sm:$0xf]  ;;  %v7299_v57 = vor.u32 %v10559_v51, %v7298_v49  ;;  %v10505_v60 = vld [vmem:[#allocation7 + $0x74] sm:$0xf0] }
  0x37   :  { %2543 = vmatpush.bf16.msra.mxu3 %v7731_v38  ;;  %v10655_v55 = vld [vmem:[#allocation7 + $0x524] sm:$0xf0]  ;;  %v7491_v58 = vor.u32 %v10607_v53, %v7490_v52  ;;  %v7274_v61 = vld [vmem:[#allocation7 + $0x1e0] sm:$0xf]  ;;  %v10553_v63 = vld [vmem:[#allocation7 + $0x1f4] sm:$0xf0]  ;;  %v7083_v4 = vor.u32 %v10505_v60, %v7082_v59 }
  0x38   :  { %2505 = vmatpush.bf16.msra.mxu0 %v7131_v44  ;;  %v7683_v62 = vor.u32 %v10655_v55, %v7682_v54  ;;  %v7466_v0 = vld [vmem:[#allocation7 + $0x360] sm:$0xf]  ;;  %v10601_v1 = vld [vmem:[#allocation7 + $0x374] sm:$0xf0]  ;;  %v7275_v5 = vor.u32 %v10553_v63, %v7274_v61  ;;  %v7058_v7 = vld [vmem:[#allocation7 + $0x30] sm:$0xf] }
  0x39   :  { %2518 = vmatpush.bf16.msra.mxu1 %v7323_v45  ;;  %v7658_v2 = vld [vmem:[#allocation7 + $0x4e0] sm:$0xf]  ;;  %v10649_v3 = vld [vmem:[#allocation7 + $0x4f4] sm:$0xf0]  ;;  %v7467_v6 = vor.u32 %v10601_v1, %v7466_v0  ;;  %v10499_v8 = vld [vmem:[#allocation7 + $0x44] sm:$0xf0] }
  0x3a   :  { %2531 = vmatpush.bf16.msra.mxu2 %v7515_v46  ;;  %v7250_v9 = vld [vmem:[#allocation7 + $0x1b0] sm:$0xf]  ;;  %v7659_v10 = vor.u32 %v10649_v3, %v7658_v2  ;;  %v10547_v11 = vld [vmem:[#allocation7 + $0x1c4] sm:$0xf0]  ;;  %v7059_v16 = vor.u32 %v10499_v8, %v7058_v7  ;;  %v7034_v17 = vld [vmem:[#allocation7] sm:$0xf] }
  0x3b   :  { %2544 = vmatpush.bf16.msra.mxu3 %v7707_v50  ;;  %v7442_v12 = vld [vmem:[#allocation7 + $0x330] sm:$0xf]  ;;  %v10595_v13 = vld [vmem:[#allocation7 + $0x344] sm:$0xf0]  ;;  %v10493_v18 = vld [vmem:[#allocation7 + $0x14] sm:$0xf0]  ;;  %v7251_v19 = vor.u32 %v10547_v11, %v7250_v9 }
  0x3c   :  { %2506 = vmatpush.bf16.msra.mxu0 %v7107_v56  ;;  %v7634_v14 = vld [vmem:[#allocation7 + $0x4b0] sm:$0xf]  ;;  %v10643_v15 = vld [vmem:[#allocation7 + $0x4c4] sm:$0xf0]  ;;  %v7443_v20 = vor.u32 %v10595_v13, %v7442_v12  ;;  %v7226_v21 = vld [vmem:[#allocation7 + $0x180] sm:$0xf]  ;;  %v7035_v31 = vor.u32 %v10493_v18, %v7034_v17 }
  0x3d   :  { %2519 = vmatpush.bf16.msra.mxu1 %v7299_v57  ;;  %v10541_v22 = vld [vmem:[#allocation7 + $0x194] sm:$0xf0]  ;;  %v7418_v23 = vld [vmem:[#allocation7 + $0x300] sm:$0xf]  ;;  %v7635_v24 = vor.u32 %v10643_v15, %v7634_v14  ;;  %v7970_v28 = vld [vmem:[#allocation7 + $0x750] sm:$0xf] }
  0x3e   :  { %2532 = vmatpush.bf16.msra.mxu2 %v7491_v58  ;;  %v10589_v25 = vld [vmem:[#allocation7 + $0x314] sm:$0xf0]  ;;  %v7610_v26 = vld [vmem:[#allocation7 + $0x480] sm:$0xf]  ;;  %v10727_v29 = vld [vmem:[#allocation7 + $0x764] sm:$0xf0]  ;;  %v7227_v35 = vor.u32 %v10541_v22, %v7226_v21 }
  0x3f   :  { %2545 = vmatpush.bf16.msra.mxu3 %v7683_v62  ;;  %v10637_v27 = vld [vmem:[#allocation7 + $0x494] sm:$0xf0]  ;;  %v8162_v30 = vld [vmem:[#allocation7 + $0x8d0] sm:$0xf]  ;;  %v10775_v32 = vld [vmem:[#allocation7 + $0x8e4] sm:$0xf0]  ;;  %v7419_v36 = vor.u32 %v10589_v25, %v7418_v23  ;;  %v7971_v40 = vor.u32 %v10727_v29, %v7970_v28 }
  0x40   :  { %2507 = vmatpush.bf16.msra.mxu0 %v7083_v4  ;;  %v8354_v33 = vld [vmem:[#allocation7 + $0xa50] sm:$0xf]  ;;  %v10823_v34 = vld [vmem:[#allocation7 + $0xa64] sm:$0xf0]  ;;  %v7611_v39 = vor.u32 %v10637_v27, %v7610_v26  ;;  %v8163_v41 = vor.u32 %v10775_v32, %v8162_v30  ;;  %v7946_v43 = vld [vmem:[#allocation7 + $0x720] sm:$0xf] }
  0x41   :  { %2520 = vmatpush.bf16.msra.mxu1 %v7275_v5  ;;  %v8546_v37 = vld [vmem:[#allocation7 + $0xbd0] sm:$0xf]  ;;  %v10871_v38 = vld [vmem:[#allocation7 + $0xbe4] sm:$0xf0]  ;;  %v8355_v42 = vor.u32 %v10823_v34, %v8354_v33  ;;  %v10721_v44 = vld [vmem:[#allocation7 + $0x734] sm:$0xf0] }
  0x42   :  { %2533 = vmatpush.bf16.msra.mxu2 %v7467_v6  ;;  %v8138_v45 = vld [vmem:[#allocation7 + $0x8a0] sm:$0xf]  ;;  %v8547_v46 = vor.u32 %v10871_v38, %v8546_v37  ;;  %v10769_v47 = vld [vmem:[#allocation7 + $0x8b4] sm:$0xf0]  ;;  %v7947_v52 = vor.u32 %v10721_v44, %v7946_v43  ;;  %v7922_v53 = vld [vmem:[#allocation7 + $0x6f0] sm:$0xf] }
  0x43   :  { %2546 = vmatpush.bf16.msra.mxu3 %v7659_v10  ;;  %v8330_v48 = vld [vmem:[#allocation7 + $0xa20] sm:$0xf]  ;;  %v10817_v49 = vld [vmem:[#allocation7 + $0xa34] sm:$0xf0]  ;;  %v10715_v54 = vld [vmem:[#allocation7 + $0x704] sm:$0xf0]  ;;  %v8139_v55 = vor.u32 %v10769_v47, %v8138_v45 }
  0x44   :  { %2508 = vmatpush.bf16.msra.mxu0 %v7059_v16  ;;  %v8522_v50 = vld [vmem:[#allocation7 + $0xba0] sm:$0xf]  ;;  %v10865_v51 = vld [vmem:[#allocation7 + $0xbb4] sm:$0xf0]  ;;  %v8331_v56 = vor.u32 %v10817_v49, %v8330_v48  ;;  %v8114_v57 = vld [vmem:[#allocation7 + $0x870] sm:$0xf]  ;;  %v7923_v1 = vor.u32 %v10715_v54, %v7922_v53 }
  0x45   :  { %2521 = vmatpush.bf16.msra.mxu1 %v7251_v19  ;;  %v10763_v58 = vld [vmem:[#allocation7 + $0x884] sm:$0xf0]  ;;  %v164_v59 = vld [vmem:[#allocation2] sm:$0xff]  ;;  %v8523_v60 = vor.u32 %v10865_v51, %v8522_v50  ;;  %v7898_v4 = vld [vmem:[#allocation7 + $0x6c0] sm:$0xf]  ;;  %vm6159_vm0 = vcmask 1040384  }
  0x46   :  { %2534 = vmatpush.bf16.msra.mxu2 %v7443_v20  ;;  %v8306_v61 = vld [vmem:[#allocation7 + $0x9f0] sm:$0xf]  ;;  %v10811_v62 = vld [vmem:[#allocation7 + $0xa04] sm:$0xf0]  ;;  %565 = vst [vmem:[#allocation1] ss:$9 sm:$0xff] %v164_v59  ;;  %v8115_v2 = vor.u32 %v10763_v58, %v8114_v57 }
  0x47   :  { %2547 = vmatpush.bf16.msra.mxu3 %v7635_v24  ;;  %v8498_v63 = vld [vmem:[#allocation7 + $0xb70] sm:$0xf]  ;;  %v10859_v0 = vld [vmem:[#allocation7 + $0xb84] sm:$0xf0]  ;;  %v8307_v3 = vor.u32 %v10811_v62, %v8306_v61  ;;  %v10709_v5 = vld [vmem:[#allocation7 + $0x6d4] sm:$0xf0] }
  0x48   :  { %2509 = vmatpush.bf16.msra.mxu0 %v7035_v31  ;;  %v8090_v6 = vld [vmem:[#allocation7 + $0x840] sm:$0xf]  ;;  %v8499_v7 = vor.u32 %v10859_v0, %v8498_v63  ;;  %v10757_v8 = vld [vmem:[#allocation7 + $0x854] sm:$0xf0]  ;;  %v7874_v13 = vld [vmem:[#allocation7 + $0x690] sm:$0xf]  ;;  %v7899_v14 = vor.u32 %v10709_v5, %v7898_v4 }
  0x49   :  { %2522 = vmatpush.bf16.msra.mxu1 %v7227_v35  ;;  %v8282_v9 = vld [vmem:[#allocation7 + $0x9c0] sm:$0xf]  ;;  %v10805_v10 = vld [vmem:[#allocation7 + $0x9d4] sm:$0xf0]  ;;  %v10703_v15 = vld [vmem:[#allocation7 + $0x6a4] sm:$0xf0]  ;;  %v8091_v18 = vor.u32 %v10757_v8, %v8090_v6 }
  0x4a   :  { %2535 = vmatpush.bf16.msra.mxu2 %v7419_v36  ;;  %v8474_v11 = vld [vmem:[#allocation7 + $0xb40] sm:$0xf]  ;;  %v10853_v12 = vld [vmem:[#allocation7 + $0xb54] sm:$0xf0]  ;;  %v8066_v16 = vld [vmem:[#allocation7 + $0x810] sm:$0xf]  ;;  %v8283_v19 = vor.u32 %v10805_v10, %v8282_v9  ;;  %v7875_v29 = vor.u32 %v10703_v15, %v7874_v13 }
  0x4b   :  { %2548 = vmatpush.bf16.msra.mxu3 %v7611_v39  ;;  %v10751_v17 = vld [vmem:[#allocation7 + $0x824] sm:$0xf0]  ;;  %v8475_v23 = vor.u32 %v10853_v12, %v8474_v11  ;;  %v8258_v24 = vld [vmem:[#allocation7 + $0x990] sm:$0xf]  ;;  %v7850_v30 = vld [vmem:[#allocation7 + $0x660] sm:$0xf] }
  0x4c   :  { %2554 = vmatpush.bf16.msrb.mxu0 %v7971_v40  ;;  %v10799_v25 = vld [vmem:[#allocation7 + $0x9a4] sm:$0xf0]  ;;  %v8450_v27 = vld [vmem:[#allocation7 + $0xb10] sm:$0xf]  ;;  %v8067_v31 = vor.u32 %v10751_v17, %v8066_v16  ;;  %v10697_v33 = vld [vmem:[#allocation7 + $0x674] sm:$0xf0] }
  0x4d   :  { %2567 = vmatpush.bf16.msrb.mxu1 %v8163_v41  ;;  %v11739_v20 = vld [vmem:[#allocation1 + $0x12] sm:$0xff]  ;;  %v11741_v21 = vld [vmem:[#allocation1] sm:$0xff]  ;;  %v11746_v26 = vld [vmem:[#allocation1 + $0x9] sm:$0xff]  ;;  %v8259_v32 = vor.u32 %v10799_v25, %v8258_v24  ;;  %v7851_v43 = vor.u32 %v10697_v33, %v7850_v30  ;;  %vm6127_vm1 = vcmask 9216   ;;  %vm6155_vm6 = vcmask 15360   ;;  %s11661_s6 = smov [#allocation17]  }
  0x4e   :  { %2580 = vmatpush.bf16.msrb.mxu2 %v8355_v42  ;;  %v11743_v22 = vld [vmem:[#allocation1 + $0x1b] sm:$0xff]  ;;  %2510 = vmatmul.bf16.vlgmr.msra.gmra.mxu0 %v11741_v21  ;;  %v8042_v34 = vld [vmem:[#allocation7 + $0x7e0] sm:$0xf]  ;;  %v10745_v35 = vld [vmem:[#allocation7 + $0x7f4] sm:$0xf0]  ;;  %s7016_s8 = sshll.u32 %s11661_s6, 4  ;;  %s7017_s8 = int_to_ptr.vmem [resolvable:$true] %s7016_s8 }
  0x4f   :  { %2593 = vmatpush.bf16.msrb.mxu3 %v8547_v46  ;;  %2536 = vmatmul.bf16.vlgmr.msra.gmra.mxu2 %v11739_v20  ;;  %v10847_v28 = vld [vmem:[#allocation7 + $0xb24] sm:$0xf0]  ;;  %v8234_v37 = vld [vmem:[#allocation7 + $0x960] sm:$0xf]  ;;  %v10793_v38 = vld [vmem:[#allocation7 + $0x974] sm:$0xf0]  ;;  %v8043_v47 = vor.u32 %v10745_v35, %v8042_v34 }
  0x50   :  { %2555 = vmatpush.bf16.msrb.mxu0 %v7947_v52  ;;  %2549 = vmatmul.bf16.vlgmr.msra.gmra.mxu3 %v11743_v22  ;;  %v8451_v36 = vor.u32 %v10847_v28, %v8450_v27  ;;  %v8426_v39 = vld [vmem:[#allocation7 + $0xae0] sm:$0xf]  ;;  %v10841_v40 = vld [vmem:[#allocation7 + $0xaf4] sm:$0xf0]  ;;  %v7826_v41 = vld [vmem:[#allocation7 + $0x630] sm:$0xf]  ;;  %v8235_v48 = vor.u32 %v10793_v38, %v8234_v37 }
  0x51   :  { %2568 = vmatpush.bf16.msrb.mxu1 %v8139_v55  ;;  %v10691_v42 = vld [vmem:[#allocation7 + $0x644] sm:$0xf0]  ;;  %v8018_v44 = vld [vmem:[#allocation7 + $0x7b0] sm:$0xf]  ;;  %v11751_v50 = vld [vmem:[#allocation1 + $0x36] sm:$0xff]  ;;  %v8427_v52 = vor.u32 %v10841_v40, %v8426_v39  ;;  %s7018_s7 = sshll.u32 %s12033_s9, 4  ;;  %s7019_s7 = int_to_ptr.hbm [resolvable:$true] %s7018_s7 }
  0x52   :  { %2581 = vmatpush.bf16.msrb.mxu2 %v8331_v56  ;;  %2523 = vmatmul.bf16.vlgmr.msra.gmra.mxu1 %v11746_v26  ;;  %v10739_v45 = vld [vmem:[#allocation7 + $0x7c4] sm:$0xf0]  ;;  %v8210_v46 = vld [vmem:[#allocation7 + $0x930] sm:$0xf]  ;;  %v165_v54 = vld [vmem:[#allocation5] sm:$0x3f]  ;;  %v7827_v58 = vor.u32 %v10691_v42, %v7826_v41 }
  0x53   :  { %2594 = vmatpush.bf16.msrb.mxu3 %v8523_v60  ;;  %v10787_v49 = vld [vmem:[#allocation7 + $0x944] sm:$0xf0]  ;;  %v11753_v51 = vld [vmem:[#allocation1 + $0x24] sm:$0xff]  ;;  %v11757_v55 = vld [vmem:[#allocation1 + $0x2d] sm:$0xff]  ;;  %v8019_v61 = vor.u32 %v10739_v45, %v8018_v44 }
  0x54   :  { %2556 = vmatpush.bf16.msrb.mxu0 %v7923_v1  ;;  %v11755_v53 = vld [vmem:[#allocation1 + $0x3f] sm:$0xff]  ;;  %v7802_v59 = vld [vmem:[#allocation7 + $0x600] sm:$0xf]  ;;  %v10685_v60 = vld [vmem:[#allocation7 + $0x614] sm:$0xf0]  ;;  %v8211_v62 = vor.u32 %v10787_v49, %v8210_v46 }
  0x55   :  { %2569 = vmatpush.bf16.msrb.mxu1 %v8115_v2  ;;  %v8402_v56 = vld [vmem:[#allocation7 + $0xab0] sm:$0xf]  ;;  %v10835_v57 = vld [vmem:[#allocation7 + $0xac4] sm:$0xf0]  ;;  %3529 = vst [vmem:[#allocation1] ss:$9 sm:$0xff] %v165_v54  ;;  %v7803_v9 = vor.u32 %v10685_v60, %v7802_v59 }
  0x56   :  { %2582 = vmatpush.bf16.msrb.mxu2 %v8307_v3  ;;  %v7994_v63 = vld [vmem:[#allocation7 + $0x780] sm:$0xf]  ;;  %v10733_v0 = vld [vmem:[#allocation7 + $0x794] sm:$0xf0]  ;;  %v8403_v2 = vor.u32 %v10835_v57, %v8402_v56  ;;  %v10532_v6 = vld [vmem:[#allocation7 + $0x154] sm:$0xf] }
  0x57   :  { %2595 = vmatpush.bf16.msrb.mxu3 %v8499_v7  ;;  %v8186_v1 = vld [vmem:[#allocation7 + $0x900] sm:$0xf]  ;;  %v10781_v3 = vld [vmem:[#allocation7 + $0x914] sm:$0xf0]  ;;  %v7204_v7 = vld [vmem:[#allocation7 + $0x168] sm:$0xf0]  ;;  %v7995_v13 = vor.u32 %v10733_v0, %v7994_v63 }
  0x58   :  { %2557 = vmatpush.bf16.msrb.mxu0 %v7899_v14  ;;  %v8378_v4 = vld [vmem:[#allocation7 + $0xa80] sm:$0xf]  ;;  %v10829_v5 = vld [vmem:[#allocation7 + $0xa94] sm:$0xf0]  ;;  %v10580_v8 = vld [vmem:[#allocation7 + $0x2d4] sm:$0xf]  ;;  %v8187_v14 = vor.u32 %v10781_v3, %v8186_v1 }
  0x59   :  { %2570 = vmatpush.bf16.msrb.mxu1 %v8091_v18  ;;  %v7396_v10 = vld [vmem:[#allocation7 + $0x2e8] sm:$0xf0]  ;;  %v10628_v11 = vld [vmem:[#allocation7 + $0x454] sm:$0xf]  ;;  %v8379_v17 = vor.u32 %v10829_v5, %v8378_v4  ;;  %v7207_v18 = vor.u32 %v10532_v6, %v7204_v7  ;;  %v10526_v24 = vld [vmem:[#allocation7 + $0x124] sm:$0xf] }
  0x5a   :  { %2583 = vmatpush.bf16.msrb.mxu2 %v8283_v19  ;;  %v7588_v12 = vld [vmem:[#allocation7 + $0x468] sm:$0xf0]  ;;  %v10676_v15 = vld [vmem:[#allocation7 + $0x5d4] sm:$0xf]  ;;  %v7399_v19 = vor.u32 %v10580_v8, %v7396_v10  ;;  %v7180_v25 = vld [vmem:[#allocation7 + $0x138] sm:$0xf0] }
  0x5b   :  { %2596 = vmatpush.bf16.msrb.mxu3 %v8475_v23  ;;  %v7780_v16 = vld [vmem:[#allocation7 + $0x5e8] sm:$0xf0]  ;;  %v7591_v23 = vor.u32 %v10628_v11, %v7588_v12  ;;  %v10574_v27 = vld [vmem:[#allocation7 + $0x2a4] sm:$0xf]  ;;  %v7756_v33 = vld [vmem:[#allocation7 + $0x5b8] sm:$0xf0]  ;;  %v7183_v34 = vor.u32 %v10526_v24, %v7180_v25 }
  0x5c   :  { %2558 = vmatpush.bf16.msrb.mxu0 %v7875_v29  ;;  %v7783_v28 = vor.u32 %v10676_v15, %v7780_v16  ;;  %v7372_v29 = vld [vmem:[#allocation7 + $0x2b8] sm:$0xf0]  ;;  %v10622_v30 = vld [vmem:[#allocation7 + $0x424] sm:$0xf]  ;;  %v10520_v37 = vld [vmem:[#allocation7 + $0xf4] sm:$0xf] }
  0x5d   :  { %2571 = vmatpush.bf16.msrb.mxu1 %v8067_v31  ;;  %v7564_v31 = vld [vmem:[#allocation7 + $0x438] sm:$0xf0]  ;;  %v7375_v35 = vor.u32 %v10574_v27, %v7372_v29  ;;  %v7156_v38 = vld [vmem:[#allocation7 + $0x108] sm:$0xf0]  ;;  %v10568_v39 = vld [vmem:[#allocation7 + $0x274] sm:$0xf] }
  0x5e   :  { %2584 = vmatpush.bf16.msrb.mxu2 %v8259_v32  ;;  %v10670_v32 = vld [vmem:[#allocation7 + $0x5a4] sm:$0xf]  ;;  %v7348_v41 = vld [vmem:[#allocation7 + $0x288] sm:$0xf0]  ;;  %v10616_v42 = vld [vmem:[#allocation7 + $0x3f4] sm:$0xf]  ;;  %v7159_v46 = vor.u32 %v10520_v37, %v7156_v38 }
  0x5f   :  { %2597 = vmatpush.bf16.msrb.mxu3 %v8451_v36  ;;  %v7567_v36 = vor.u32 %v10622_v30, %v7564_v31  ;;  %v7759_v40 = vor.u32 %v10670_v32, %v7756_v33  ;;  %v10664_v44 = vld [vmem:[#allocation7 + $0x574] sm:$0xf]  ;;  %v7732_v45 = vld [vmem:[#allocation7 + $0x588] sm:$0xf0]  ;;  %v10514_v49 = vld [vmem:[#allocation7 + $0xc4] sm:$0xf] }
  0x60   :  { %2559 = vmatpush.bf16.msrb.mxu0 %v7851_v43  ;;  %v7540_v43 = vld [vmem:[#allocation7 + $0x408] sm:$0xf0]  ;;  %v10562_v54 = vld [vmem:[#allocation7 + $0x244] sm:$0xf]  ;;  %v7735_v56 = vor.u32 %v10664_v44, %v7732_v45  ;;  %v7324_v57 = vld [vmem:[#allocation7 + $0x258] sm:$0xf0] }
  0x61   :  { %2572 = vmatpush.bf16.msrb.mxu1 %v8043_v47  ;;  %v7351_v47 = vor.u32 %v10568_v39, %v7348_v41  ;;  %v7516_v59 = vld [vmem:[#allocation7 + $0x3d8] sm:$0xf0]  ;;  %v10658_v60 = vld [vmem:[#allocation7 + $0x544] sm:$0xf]  ;;  %v7327_v63 = vor.u32 %v10562_v54, %v7324_v57  ;;  %v10508_v1 = vld [vmem:[#allocation7 + $0x94] sm:$0xf] }
  0x62   :  { %2585 = vmatpush.bf16.msrb.mxu2 %v8235_v48  ;;  %v7543_v48 = vor.u32 %v10616_v42, %v7540_v43  ;;  %v10556_v3 = vld [vmem:[#allocation7 + $0x214] sm:$0xf]  ;;  %v7300_v5 = vld [vmem:[#allocation7 + $0x228] sm:$0xf0]  ;;  %v10550_v15 = vld [vmem:[#allocation7 + $0x1e4] sm:$0xf] }
  0x63   :  { %2598 = vmatpush.bf16.msrb.mxu3 %v8427_v52  ;;  %v7132_v52 = vld [vmem:[#allocation7 + $0xd8] sm:$0xf0]  ;;  %v10604_v6 = vld [vmem:[#allocation7 + $0x394] sm:$0xf]  ;;  %v7492_v7 = vld [vmem:[#allocation7 + $0x3a8] sm:$0xf0]  ;;  %v7303_v11 = vor.u32 %v10556_v3, %v7300_v5 }
  0x64   :  { %2560 = vmatpush.bf16.msrb.mxu0 %v7827_v58  ;;  %v10610_v58 = vld [vmem:[#allocation7 + $0x3c4] sm:$0xf]  ;;  %v10652_v8 = vld [vmem:[#allocation7 + $0x514] sm:$0xf]  ;;  %v7495_v12 = vor.u32 %v10604_v6, %v7492_v7  ;;  %v7660_v24 = vld [vmem:[#allocation7 + $0x4f8] sm:$0xf0] }
  0x65   :  { %2573 = vmatpush.bf16.msrb.mxu1 %v8019_v61  ;;  %v7708_v61 = vld [vmem:[#allocation7 + $0x558] sm:$0xf0]  ;;  %v7519_v0 = vor.u32 %v10610_v58, %v7516_v59  ;;  %v10496_v29 = vld [vmem:[#allocation7 + $0x34] sm:$0xf]  ;;  %v7060_v30 = vld [vmem:[#allocation7 + $0x48] sm:$0xf0] }
  0x66   :  { %2586 = vmatpush.bf16.msrb.mxu2 %v8211_v62  ;;  %v7135_v62 = vor.u32 %v10514_v49, %v7132_v52  ;;  %v7711_v4 = vor.u32 %v10658_v60, %v7708_v61  ;;  %v10544_v31 = vld [vmem:[#allocation7 + $0x1b4] sm:$0xf]  ;;  %v7252_v33 = vld [vmem:[#allocation7 + $0x1c8] sm:$0xf0]  ;;  %v7063_v38 = vor.u32 %v10496_v29, %v7060_v30  ;;  %v10490_v39 = vld [vmem:[#allocation7 + $0x4] sm:$0xf] }
  0x67   :  { %2599 = vmatpush.bf16.msrb.mxu3 %v8403_v2  ;;  %v7108_v2 = vld [vmem:[#allocation7 + $0xa8] sm:$0xf0]  ;;  %v10538_v41 = vld [vmem:[#allocation7 + $0x184] sm:$0xf]  ;;  %v7255_v42 = vor.u32 %v10544_v31, %v7252_v33  ;;  %v7228_v44 = vld [vmem:[#allocation7 + $0x198] sm:$0xf0] }
  0x68   :  { %2561 = vmatpush.bf16.msrb.mxu0 %v7803_v9  ;;  %v7684_v9 = vld [vmem:[#allocation7 + $0x528] sm:$0xf0]  ;;  %v7111_v10 = vor.u32 %v10508_v1, %v7108_v2  ;;  %v10586_v45 = vld [vmem:[#allocation7 + $0x304] sm:$0xf]  ;;  %v7612_v49 = vld [vmem:[#allocation7 + $0x498] sm:$0xf0]  ;;  %v7231_v61 = vor.u32 %v10538_v41, %v7228_v44 }
  0x69   :  { %2574 = vmatpush.bf16.msrb.mxu1 %v7995_v13  ;;  %v10502_v13 = vld [vmem:[#allocation7 + $0x64] sm:$0xf]  ;;  %v7687_v16 = vor.u32 %v10652_v8, %v7684_v9  ;;  %v7636_v37 = vld [vmem:[#allocation7 + $0x4c8] sm:$0xf0]  ;;  %v10724_v52 = vld [vmem:[#allocation7 + $0x754] sm:$0xf] }
  0x6a   :  { %2587 = vmatpush.bf16.msrb.mxu2 %v8187_v14  ;;  %v7084_v14 = vld [vmem:[#allocation7 + $0x78] sm:$0xf0]  ;;  %v7972_v54 = vld [vmem:[#allocation7 + $0x768] sm:$0xf0]  ;;  %v10820_v59 = vld [vmem:[#allocation7 + $0xa54] sm:$0xf] }
  0x6b   :  { %2600 = vmatpush.bf16.msrb.mxu3 %v8379_v17  ;;  %2562 = vmatmul.bf16.vlgmr.msrb.gmra.mxu0 %v11753_v51  ;;  %v7276_v17 = vld [vmem:[#allocation7 + $0x1f8] sm:$0xf0]  ;;  %v7087_v25 = vor.u32 %v10502_v13, %v7084_v14  ;;  %v8164_v58 = vld [vmem:[#allocation7 + $0x8e8] sm:$0xf0]  ;;  %v7975_v2 = vor.u32 %v10724_v52, %v7972_v54  ;;  %v10718_v5 = vld [vmem:[#allocation7 + $0x724] sm:$0xf] }
  0x6c   :  { %2606 = vmatpush.bf16.msra.mxu0 %v7207_v18  ;;  %2575 = vmatmul.bf16.vlgmr.msrb.gmra.mxu1 %v11757_v55  ;;  %v10598_v18 = vld [vmem:[#allocation7 + $0x364] sm:$0xf]  ;;  %v7279_v27 = vor.u32 %v10550_v15, %v7276_v17  ;;  %v8356_v60 = vld [vmem:[#allocation7 + $0xa68] sm:$0xf0]  ;;  %v7948_v6 = vld [vmem:[#allocation7 + $0x738] sm:$0xf0] }
  0x6d   :  { %2619 = vmatpush.bf16.msra.mxu1 %v7399_v19  ;;  %2588 = vmatmul.bf16.vlgmr.msrb.gmra.mxu2 %v11751_v50  ;;  %v7468_v19 = vld [vmem:[#allocation7 + $0x378] sm:$0xf0]  ;;  %v10766_v7 = vld [vmem:[#allocation7 + $0x8a4] sm:$0xf]  ;;  %v7951_v14 = vor.u32 %v10718_v5, %v7948_v6  ;;  %v10712_v17 = vld [vmem:[#allocation7 + $0x6f4] sm:$0xf] }
  0x6e   :  { %2632 = vmatpush.bf16.msra.mxu2 %v7591_v23  ;;  %2601 = vmatmul.bf16.vlgmr.msrb.gmra.mxu3 %v11755_v53  ;;  %v10646_v23 = vld [vmem:[#allocation7 + $0x4e4] sm:$0xf]  ;;  %v8140_v9 = vld [vmem:[#allocation7 + $0x8b8] sm:$0xf0]  ;;  %v8500_v29 = vld [vmem:[#allocation7 + $0xb88] sm:$0xf0] }
  0x6f   :  { %2645 = vmatpush.bf16.msra.mxu3 %v7783_v28  ;;  %v7471_v28 = vor.u32 %v10598_v18, %v7468_v19  ;;  %v7663_v32 = vor.u32 %v10646_v23, %v7660_v24  ;;  %v8524_v13 = vld [vmem:[#allocation7 + $0xbb8] sm:$0xf0]  ;;  %v8143_v15 = vor.u32 %v10766_v7, %v8140_v9  ;;  %v7924_v18 = vld [vmem:[#allocation7 + $0x708] sm:$0xf0]  ;;  %v10760_v19 = vld [vmem:[#allocation7 + $0x874] sm:$0xf] }
  0x70   :  { %2607 = vmatpush.bf16.msra.mxu0 %v7183_v34  ;;  %v10592_v34 = vld [vmem:[#allocation7 + $0x334] sm:$0xf]  ;;  %v8116_v24 = vld [vmem:[#allocation7 + $0x888] sm:$0xf0]  ;;  %v7927_v30 = vor.u32 %v10712_v17, %v7924_v18  ;;  %v10706_v33 = vld [vmem:[#allocation7 + $0x6c4] sm:$0xf] }
  0x71   :  { %2620 = vmatpush.bf16.msra.mxu1 %v7375_v35  ;;  %v7444_v35 = vld [vmem:[#allocation7 + $0x348] sm:$0xf0]  ;;  %v8119_v31 = vor.u32 %v10760_v19, %v8116_v24  ;;  %v8476_v41 = vld [vmem:[#allocation7 + $0xb58] sm:$0xf0]  ;;  %v10796_v52 = vld [vmem:[#allocation7 + $0x994] sm:$0xf] }
  0x72   :  { %2633 = vmatpush.bf16.msra.mxu2 %v7567_v36  ;;  %v10640_v36 = vld [vmem:[#allocation7 + $0x4b4] sm:$0xf]  ;;  %v7447_v43 = vor.u32 %v10592_v34, %v7444_v35  ;;  %v7900_v34 = vld [vmem:[#allocation7 + $0x6d8] sm:$0xf0]  ;;  %v10754_v35 = vld [vmem:[#allocation7 + $0x844] sm:$0xf] }
  0x73   :  { %2646 = vmatpush.bf16.msra.mxu3 %v7759_v40  ;;  %v7036_v40 = vld [vmem:[#allocation7 + $0x18] sm:$0xf0]  ;;  %v8260_v54 = vld [vmem:[#allocation7 + $0x9a8] sm:$0xf0]  ;;  %v10688_v9 = vld [vmem:[#allocation7 + $0x634] sm:$0xf] }
  0x74   :  { %2608 = vmatpush.bf16.msra.mxu0 %v7159_v46  ;;  %v7420_v46 = vld [vmem:[#allocation7 + $0x318] sm:$0xf0]  ;;  %v7039_v57 = vor.u32 %v10490_v39, %v7036_v40  ;;  %v10850_v40 = vld [vmem:[#allocation7 + $0xb44] sm:$0xf]  ;;  %v8404_v17 = vld [vmem:[#allocation7 + $0xac8] sm:$0xf0] }
  0x75   :  { %2621 = vmatpush.bf16.msra.mxu1 %v7351_v47  ;;  %v7639_v47 = vor.u32 %v10640_v36, %v7636_v37  ;;  %v8092_v37 = vld [vmem:[#allocation7 + $0x858] sm:$0xf0]  ;;  %v10682_v19 = vld [vmem:[#allocation7 + $0x604] sm:$0xf] }
  0x76   :  { %2634 = vmatpush.bf16.msra.mxu2 %v7543_v48  ;;  %v10634_v48 = vld [vmem:[#allocation7 + $0x484] sm:$0xf]  ;;  %v8284_v39 = vld [vmem:[#allocation7 + $0x9d8] sm:$0xf0] }
  0x77   :  { %2647 = vmatpush.bf16.msra.mxu3 %v7735_v56  ;;  %v10772_v56 = vld [vmem:[#allocation7 + $0x8d4] sm:$0xf]  ;;  %v7615_v1 = vor.u32 %v10634_v48, %v7612_v49  ;;  %v8479_v48 = vor.u32 %v10850_v40, %v8476_v41  ;;  %v8068_v49 = vld [vmem:[#allocation7 + $0x828] sm:$0xf0]  ;;  %v8428_v5 = vld [vmem:[#allocation7 + $0xaf8] sm:$0xf0] }
  0x78   :  { %2609 = vmatpush.bf16.msra.mxu0 %v7135_v62  ;;  %v7423_v62 = vor.u32 %v10586_v45, %v7420_v46  ;;  %v8167_v3 = vor.u32 %v10772_v56, %v8164_v58  ;;  %v10700_v45 = vld [vmem:[#allocation7 + $0x694] sm:$0xf]  ;;  %v7876_v46 = vld [vmem:[#allocation7 + $0x6a8] sm:$0xf0]  ;;  %v10632_v40 = vld [vmem:[#allocation7 + $0x46c] sm:$0xf0] }
  0x79   :  { %2622 = vmatpush.bf16.msra.mxu1 %v7327_v63  ;;  %v10868_v63 = vld [vmem:[#allocation7 + $0xbd4] sm:$0xf]  ;;  %v7879_v58 = vor.u32 %v10700_v45, %v7876_v46 }
  0x7a   :  { %2635 = vmatpush.bf16.msra.mxu2 %v7519_v0  ;;  %v8548_v0 = vld [vmem:[#allocation7 + $0xbe8] sm:$0xf0]  ;;  %v10844_v56 = vld [vmem:[#allocation7 + $0xb14] sm:$0xf] }
  0x7b   :  { %2648 = vmatpush.bf16.msra.mxu3 %v7711_v4  ;;  %v8359_v4 = vor.u32 %v10820_v59, %v8356_v60  ;;  %v8551_v8 = vor.u32 %v10868_v63, %v8548_v0  ;;  %v8263_v60 = vor.u32 %v10796_v52, %v8260_v54  ;;  %v10742_v63 = vld [vmem:[#allocation7 + $0x7e4] sm:$0xf]  ;;  %v10530_v52 = vld [vmem:[#allocation7 + $0x13c] sm:$0xf0]  ;;  %v7378_v54 = vld [vmem:[#allocation7 + $0x2a8] sm:$0xf] }
  0x7c   :  { %2610 = vmatpush.bf16.msra.mxu0 %v7111_v10  ;;  %v10814_v10 = vld [vmem:[#allocation7 + $0xa24] sm:$0xf] }
  0x7d   :  { %2623 = vmatpush.bf16.msra.mxu1 %v7303_v11  ;;  %v8332_v11 = vld [vmem:[#allocation7 + $0xa38] sm:$0xf0] }
  0x7e   :  { %2636 = vmatpush.bf16.msra.mxu2 %v7495_v12  ;;  %v10862_v12 = vld [vmem:[#allocation7 + $0xba4] sm:$0xf] }
  0x7f   :  { %2649 = vmatpush.bf16.msra.mxu3 %v7687_v16  ;;  %v8335_v16 = vor.u32 %v10814_v10, %v8332_v11  ;;  %v8527_v23 = vor.u32 %v10862_v12, %v8524_v13  ;;  %v7828_v10 = vld [vmem:[#allocation7 + $0x648] sm:$0xf0]  ;;  %v10736_v11 = vld [vmem:[#allocation7 + $0x7b4] sm:$0xf] }
  0x80   :  { %2611 = vmatpush.bf16.msra.mxu0 %v7087_v25  ;;  %v10808_v25 = vld [vmem:[#allocation7 + $0x9f4] sm:$0xf]  ;;  %v8020_v13 = vld [vmem:[#allocation7 + $0x7c8] sm:$0xf0]  ;;  %v7831_v18 = vor.u32 %v10688_v9, %v7828_v10  ;;  %v10668_v9 = vld [vmem:[#allocation7 + $0x58c] sm:$0xf0] }
  0x81   :  { %2624 = vmatpush.bf16.msra.mxu1 %v7279_v27  ;;  %v8308_v27 = vld [vmem:[#allocation7 + $0xa08] sm:$0xf0]  ;;  %v8023_v24 = vor.u32 %v10736_v11, %v8020_v13  ;;  %v7138_v13 = vld [vmem:[#allocation7 + $0xc8] sm:$0xf] }
  0x82   :  { %2637 = vmatpush.bf16.msra.mxu2 %v7471_v28  ;;  %v10856_v28 = vld [vmem:[#allocation7 + $0xb74] sm:$0xf] }
  0x83   :  { %2650 = vmatpush.bf16.msra.mxu3 %v7663_v32  ;;  %v8311_v32 = vor.u32 %v10808_v25, %v8308_v27  ;;  %v8503_v36 = vor.u32 %v10856_v28, %v8500_v29  ;;  %v10730_v27 = vld [vmem:[#allocation7 + $0x784] sm:$0xf]  ;;  %v7996_v28 = vld [vmem:[#allocation7 + $0x798] sm:$0xf0] }
  0x84   :  { %2612 = vmatpush.bf16.msra.mxu0 %v7063_v38  ;;  %v10802_v38 = vld [vmem:[#allocation7 + $0x9c4] sm:$0xf]  ;;  %v7999_v41 = vor.u32 %v10730_v27, %v7996_v28 }
  0x85   :  { %2625 = vmatpush.bf16.msra.mxu1 %v7255_v42  ;;  %v7903_v42 = vor.u32 %v10706_v33, %v7900_v34  ;;  %v8287_v44 = vor.u32 %v10802_v38, %v8284_v39  ;;  %v10778_v29 = vld [vmem:[#allocation7 + $0x904] sm:$0xf]  ;;  %v8380_v33 = vld [vmem:[#allocation7 + $0xa98] sm:$0xf0]  ;;  %v7210_v34 = vld [vmem:[#allocation7 + $0x158] sm:$0xf] }
  0x86   :  { %2638 = vmatpush.bf16.msra.mxu2 %v7447_v43  ;;  %v8095_v43 = vor.u32 %v10754_v35, %v8092_v37  ;;  %v10536_v35 = vld [vmem:[#allocation7 + $0x16c] sm:$0xf0]  ;;  %v7594_v39 = vld [vmem:[#allocation7 + $0x458] sm:$0xf] }
  0x87   :  { %2651 = vmatpush.bf16.msra.mxu3 %v7639_v47  ;;  %v10748_v47 = vld [vmem:[#allocation7 + $0x814] sm:$0xf]  ;;  %v10584_v38 = vld [vmem:[#allocation7 + $0x2ec] sm:$0xf0]  ;;  %v7211_v46 = vor.u32 %v10536_v35, %v7210_v34  ;;  %v7498_v34 = vld [vmem:[#allocation7 + $0x398] sm:$0xf] }
  0x88   :  { %2613 = vmatpush.bf16.msra.mxu0 %v7039_v57  ;;  %v8452_v57 = vld [vmem:[#allocation7 + $0xb28] sm:$0xf0]  ;;  %v8071_v59 = vor.u32 %v10748_v47, %v8068_v49  ;;  %v7186_v49 = vld [vmem:[#allocation7 + $0x128] sm:$0xf]  ;;  %v10608_v35 = vld [vmem:[#allocation7 + $0x3ac] sm:$0xf0] }
  0x89   :  { %2626 = vmatpush.bf16.msra.mxu1 %v7231_v61  ;;  %v10694_v61 = vld [vmem:[#allocation7 + $0x664] sm:$0xf]  ;;  %v8455_v0 = vor.u32 %v10844_v56, %v8452_v57  ;;  %v10578_v57 = vld [vmem:[#allocation7 + $0x2bc] sm:$0xf0] }
  0x8a   :  { %2639 = vmatpush.bf16.msra.mxu2 %v7423_v62  ;;  %v7852_v62 = vld [vmem:[#allocation7 + $0x678] sm:$0xf0] }
  0x8b   :  { %2652 = vmatpush.bf16.msra.mxu3 %v7615_v1  ;;  %2614 = vmatmul.bf16.vlgmr.msra.gmra.mxu0 %v11741_v21  ;;  %v8044_v1 = vld [vmem:[#allocation7 + $0x7f8] sm:$0xf0]  ;;  %v7855_v6 = vor.u32 %v10694_v61, %v7852_v62  ;;  %v10674_v61 = vld [vmem:[#allocation7 + $0x5bc] sm:$0xf0]  ;;  %v7187_v62 = vor.u32 %v10530_v52, %v7186_v49 }
  0x8c   :  { %2658 = vmatpush.bf16.msrb.mxu0 %v7975_v2  ;;  %2627 = vmatmul.bf16.vlgmr.msra.gmra.mxu1 %v11746_v26  ;;  %v10790_v2 = vld [vmem:[#allocation7 + $0x964] sm:$0xf]  ;;  %v8047_v7 = vor.u32 %v10742_v63, %v8044_v1  ;;  %v7379_v63 = vor.u32 %v10578_v57, %v7378_v54  ;;  %v7162_v1 = vld [vmem:[#allocation7 + $0xf8] sm:$0xf]  ;;  %v10650_v49 = vld [vmem:[#allocation7 + $0x4fc] sm:$0xf0] }
  0x8d   :  { %2671 = vmatpush.bf16.msrb.mxu1 %v8167_v3  ;;  %2640 = vmatmul.bf16.vlgmr.msra.gmra.mxu2 %v11739_v20  ;;  %v8236_v3 = vld [vmem:[#allocation7 + $0x978] sm:$0xf0]  ;;  %v7066_v57 = vld [vmem:[#allocation7 + $0x38] sm:$0xf] }
  0x8e   :  { %2684 = vmatpush.bf16.msrb.mxu2 %v8359_v4  ;;  %2653 = vmatmul.bf16.vlgmr.msra.gmra.mxu3 %v11743_v22  ;;  %v10838_v4 = vld [vmem:[#allocation7 + $0xae4] sm:$0xf] }
  0x8f   :  { %2697 = vmatpush.bf16.msrb.mxu3 %v8551_v8  ;;  %v8239_v8 = vor.u32 %v10790_v2, %v8236_v3  ;;  %v8431_v12 = vor.u32 %v10838_v4, %v8428_v5  ;;  %v10524_v2 = vld [vmem:[#allocation7 + $0x10c] sm:$0xf0]  ;;  %v7354_v3 = vld [vmem:[#allocation7 + $0x278] sm:$0xf] }
  0x90   :  { %2659 = vmatpush.bf16.msrb.mxu0 %v7951_v14  ;;  %v10784_v14 = vld [vmem:[#allocation7 + $0x934] sm:$0xf]  ;;  %v10572_v5 = vld [vmem:[#allocation7 + $0x28c] sm:$0xf0]  ;;  %v7163_v10 = vor.u32 %v10524_v2, %v7162_v1 }
  0x91   :  { %2672 = vmatpush.bf16.msrb.mxu1 %v8143_v15  ;;  %v8212_v15 = vld [vmem:[#allocation7 + $0x948] sm:$0xf0]  ;;  %v7355_v11 = vor.u32 %v10572_v5, %v7354_v3  ;;  %v10644_v1 = vld [vmem:[#allocation7 + $0x4cc] sm:$0xf0]  ;;  %v7042_v3 = vld [vmem:[#allocation7 + $0x8] sm:$0xf] }
  0x92   :  { %2685 = vmatpush.bf16.msrb.mxu2 %v8335_v16  ;;  %v10832_v16 = vld [vmem:[#allocation7 + $0xab4] sm:$0xf]  ;;  %v8215_v25 = vor.u32 %v10784_v14, %v8212_v15  ;;  %v10518_v14 = vld [vmem:[#allocation7 + $0xdc] sm:$0xf0]  ;;  %v7330_v15 = vld [vmem:[#allocation7 + $0x248] sm:$0xf] }
  0x93   :  { %2698 = vmatpush.bf16.msrb.mxu3 %v8527_v23  ;;  %v7804_v23 = vld [vmem:[#allocation7 + $0x618] sm:$0xf0] }
  0x94   :  { %2660 = vmatpush.bf16.msrb.mxu0 %v7927_v30  ;;  %v8407_v30 = vor.u32 %v10832_v16, %v8404_v17  ;;  %v7807_v37 = vor.u32 %v10682_v19, %v7804_v23  ;;  %v10566_v17 = vld [vmem:[#allocation7 + $0x25c] sm:$0xf0]  ;;  %v7714_v23 = vld [vmem:[#allocation7 + $0x548] sm:$0xf] }
  0x95   :  { %2673 = vmatpush.bf16.msrb.mxu1 %v8119_v31  ;;  %v8188_v31 = vld [vmem:[#allocation7 + $0x918] sm:$0xf0]  ;;  %v10614_v19 = vld [vmem:[#allocation7 + $0x3dc] sm:$0xf0]  ;;  %v7331_v27 = vor.u32 %v10566_v17, %v7330_v15  ;;  %v10728_v15 = vld [vmem:[#allocation7 + $0x76c] sm:$0xf0] }
  0x96   :  { %2686 = vmatpush.bf16.msrb.mxu2 %v8311_v32  ;;  %v10826_v32 = vld [vmem:[#allocation7 + $0xa84] sm:$0xf] }
  0x97   :  { %2699 = vmatpush.bf16.msrb.mxu3 %v8503_v36  ;;  %v7402_v36 = vld [vmem:[#allocation7 + $0x2d8] sm:$0xf]  ;;  %v8383_v45 = vor.u32 %v10826_v32, %v8380_v33  ;;  %v10560_v33 = vld [vmem:[#allocation7 + $0x22c] sm:$0xf0] }
  0x98   :  { %2661 = vmatpush.bf16.msrb.mxu0 %v7903_v42  ;;  %v8191_v42 = vor.u32 %v10778_v29, %v8188_v31  ;;  %v7403_v47 = vor.u32 %v10584_v38, %v7402_v36  ;;  %v7114_v29 = vld [vmem:[#allocation7 + $0x98] sm:$0xf] }
  0x99   :  { %2674 = vmatpush.bf16.msrb.mxu1 %v8095_v43  ;;  %v7786_v43 = vld [vmem:[#allocation7 + $0x5d8] sm:$0xf] }
  0x9a   :  { %2687 = vmatpush.bf16.msrb.mxu2 %v8287_v44  ;;  %v10680_v44 = vld [vmem:[#allocation7 + $0x5ec] sm:$0xf0]  ;;  %v7306_v31 = vld [vmem:[#allocation7 + $0x218] sm:$0xf] }
  0x9b   :  { %2700 = vmatpush.bf16.msrb.mxu3 %v8479_v48  ;;  %v7595_v48 = vor.u32 %v10632_v40, %v7594_v39  ;;  %v7787_v56 = vor.u32 %v10680_v44, %v7786_v43  ;;  %v7690_v36 = vld [vmem:[#allocation7 + $0x518] sm:$0xf]  ;;  %v7307_v39 = vor.u32 %v10560_v33, %v7306_v31  ;;  %v7499_v40 = vor.u32 %v10608_v35, %v7498_v34  ;;  %v7282_v43 = vld [vmem:[#allocation7 + $0x1e8] sm:$0xf]  ;;  %v10722_v34 = vld [vmem:[#allocation7 + $0x73c] sm:$0xf0] }
  0x9c   :  { %2662 = vmatpush.bf16.msrb.mxu0 %v7879_v58  ;;  %v7570_v58 = vld [vmem:[#allocation7 + $0x428] sm:$0xf] }
  0x9d   :  { %2675 = vmatpush.bf16.msrb.mxu1 %v8071_v59  ;;  %v10626_v59 = vld [vmem:[#allocation7 + $0x43c] sm:$0xf0]  ;;  %v7954_v33 = vld [vmem:[#allocation7 + $0x728] sm:$0xf] }
  0x9e   :  { %2688 = vmatpush.bf16.msrb.mxu2 %v8263_v60  ;;  %v7762_v60 = vld [vmem:[#allocation7 + $0x5a8] sm:$0xf] }
  0x9f   :  { %2701 = vmatpush.bf16.msrb.mxu3 %v8455_v0  ;;  %v7571_v0 = vor.u32 %v10626_v59, %v7570_v58  ;;  %v7763_v4 = vor.u32 %v10674_v61, %v7762_v60  ;;  %v10500_v58 = vld [vmem:[#allocation7 + $0x4c] sm:$0xf0]  ;;  %v7258_v59 = vld [vmem:[#allocation7 + $0x1b8] sm:$0xf]  ;;  %v8146_v35 = vld [vmem:[#allocation7 + $0x8a8] sm:$0xf] }
  0xa0   :  { %2663 = vmatpush.bf16.msrb.mxu0 %v7855_v6  ;;  %v7546_v6 = vld [vmem:[#allocation7 + $0x3f8] sm:$0xf]  ;;  %v10548_v61 = vld [vmem:[#allocation7 + $0x1cc] sm:$0xf0]  ;;  %v7067_v2 = vor.u32 %v10500_v58, %v7066_v57 }
  0xa1   :  { %2676 = vmatpush.bf16.msrb.mxu1 %v8047_v7  ;;  %v10620_v7 = vld [vmem:[#allocation7 + $0x40c] sm:$0xf0]  ;;  %v7259_v5 = vor.u32 %v10548_v61, %v7258_v59  ;;  %v7906_v61 = vld [vmem:[#allocation7 + $0x6c8] sm:$0xf] }
  0xa2   :  { %2689 = vmatpush.bf16.msrb.mxu2 %v8239_v8  ;;  %v7738_v8 = vld [vmem:[#allocation7 + $0x578] sm:$0xf]  ;;  %v10860_v57 = vld [vmem:[#allocation7 + $0xb8c] sm:$0xf0] }
  0xa3   :  { %2702 = vmatpush.bf16.msrb.mxu3 %v8431_v12  ;;  %v7547_v12 = vor.u32 %v10620_v7, %v7546_v6  ;;  %v7739_v16 = vor.u32 %v10668_v9, %v7738_v8  ;;  %v7234_v7 = vld [vmem:[#allocation7 + $0x188] sm:$0xf]  ;;  %v10542_v8 = vld [vmem:[#allocation7 + $0x19c] sm:$0xf0] }
  0xa4   :  { %2664 = vmatpush.bf16.msrb.mxu0 %v7831_v18  ;;  %v7522_v18 = vld [vmem:[#allocation7 + $0x3c8] sm:$0xf] }
  0xa5   :  { %2677 = vmatpush.bf16.msrb.mxu1 %v8023_v24  ;;  %v10662_v24 = vld [vmem:[#allocation7 + $0x55c] sm:$0xf0]  ;;  %v7523_v28 = vor.u32 %v10614_v19, %v7522_v18  ;;  %v7426_v9 = vld [vmem:[#allocation7 + $0x308] sm:$0xf]  ;;  %v10776_v18 = vld [vmem:[#allocation7 + $0x8ec] sm:$0xf0] }
  0xa6   :  { %2690 = vmatpush.bf16.msrb.mxu2 %v8215_v25  ;;  %v7139_v25 = vor.u32 %v10518_v14, %v7138_v13  ;;  %v7715_v32 = vor.u32 %v10662_v24, %v7714_v23  ;;  %v10638_v13 = vld [vmem:[#allocation7 + $0x49c] sm:$0xf0]  ;;  %v7978_v14 = vld [vmem:[#allocation7 + $0x758] sm:$0xf]  ;;  %v10824_v23 = vld [vmem:[#allocation7 + $0xa6c] sm:$0xf0]  ;;  %v7235_v24 = vor.u32 %v10542_v8, %v7234_v7 }
  0xa7   :  { %2703 = vmatpush.bf16.msrb.mxu3 %v8407_v30  ;;  %v10512_v30 = vld [vmem:[#allocation7 + $0xac] sm:$0xf0]  ;;  %v8362_v19 = vld [vmem:[#allocation7 + $0xa58] sm:$0xf] }
  0xa8   :  { %2665 = vmatpush.bf16.msrb.mxu0 %v7807_v37  ;;  %v10656_v37 = vld [vmem:[#allocation7 + $0x52c] sm:$0xf0]  ;;  %v7115_v38 = vor.u32 %v10512_v30, %v7114_v29  ;;  %v7979_v30 = vor.u32 %v10728_v15, %v7978_v14  ;;  %v7882_v7 = vld [vmem:[#allocation7 + $0x698] sm:$0xf] }
  0xa9   :  { %2678 = vmatpush.bf16.msrb.mxu1 %v7999_v41  ;;  %v7090_v41 = vld [vmem:[#allocation7 + $0x68] sm:$0xf]  ;;  %v7691_v44 = vor.u32 %v10656_v37, %v7690_v36  ;;  %v10770_v37 = vld [vmem:[#allocation7 + $0x8bc] sm:$0xf0]  ;;  %v8266_v14 = vld [vmem:[#allocation7 + $0x998] sm:$0xf] }
  0xaa   :  { %2691 = vmatpush.bf16.msrb.mxu2 %v8191_v42  ;;  %v10506_v42 = vld [vmem:[#allocation7 + $0x7c] sm:$0xf0]  ;;  %v10800_v15 = vld [vmem:[#allocation7 + $0x9ac] sm:$0xf0] }
  0xab   :  { %2704 = vmatpush.bf16.msrb.mxu3 %v8383_v45  ;;  %2666 = vmatmul.bf16.vlgmr.msrb.gmra.mxu0 %v11753_v51  ;;  %v10554_v45 = vld [vmem:[#allocation7 + $0x1fc] sm:$0xf0]  ;;  %v7091_v52 = vor.u32 %v10506_v42, %v7090_v41  ;;  %v7955_v42 = vor.u32 %v10722_v34, %v7954_v33  ;;  %v8434_v34 = vld [vmem:[#allocation7 + $0xae8] sm:$0xf] }
  0xac   :  { %2710 = vmatpush.bf16.msra.mxu0 %v7211_v46  ;;  %2679 = vmatmul.bf16.vlgmr.msrb.gmra.mxu1 %v11757_v55  ;;  %v7474_v46 = vld [vmem:[#allocation7 + $0x368] sm:$0xf]  ;;  %v7283_v54 = vor.u32 %v10554_v45, %v7282_v43  ;;  %v10866_v41 = vld [vmem:[#allocation7 + $0xbbc] sm:$0xf0]  ;;  %v8147_v43 = vor.u32 %v10770_v37, %v8146_v35  ;;  %v7930_v45 = vld [vmem:[#allocation7 + $0x6f8] sm:$0xf] }
  0xad   :  { %2723 = vmatpush.bf16.msra.mxu1 %v7403_v47  ;;  %2692 = vmatmul.bf16.vlgmr.msrb.gmra.mxu2 %v11751_v50  ;;  %v10602_v47 = vld [vmem:[#allocation7 + $0x37c] sm:$0xf0] }
  0xae   :  { %2736 = vmatpush.bf16.msra.mxu2 %v7595_v48  ;;  %2705 = vmatmul.bf16.vlgmr.msrb.gmra.mxu3 %v11755_v53  ;;  %v7666_v48 = vld [vmem:[#allocation7 + $0x4e8] sm:$0xf]  ;;  %v10794_v33 = vld [vmem:[#allocation7 + $0x97c] sm:$0xf0] }
  0xaf   :  { %2749 = vmatpush.bf16.msra.mxu3 %v7787_v56  ;;  %v7475_v56 = vor.u32 %v10602_v47, %v7474_v46  ;;  %v7667_v60 = vor.u32 %v10650_v49, %v7666_v48  ;;  %v10716_v46 = vld [vmem:[#allocation7 + $0x70c] sm:$0xf0]  ;;  %v8122_v47 = vld [vmem:[#allocation7 + $0x878] sm:$0xf]  ;;  %v10842_v35 = vld [vmem:[#allocation7 + $0xafc] sm:$0xf0] }
  0xb0   :  { %2711 = vmatpush.bf16.msra.mxu0 %v7187_v62  ;;  %v7450_v62 = vld [vmem:[#allocation7 + $0x338] sm:$0xf]  ;;  %v10764_v49 = vld [vmem:[#allocation7 + $0x88c] sm:$0xf0]  ;;  %v7931_v58 = vor.u32 %v10716_v46, %v7930_v45  ;;  %v8435_v45 = vor.u32 %v10842_v35, %v8434_v34  ;;  %v7380_v34 = vld [vmem:[#allocation7 + $0x2c0] sm:$0xf0] }
  0xb1   :  { %2724 = vmatpush.bf16.msra.mxu1 %v7379_v63  ;;  %v10596_v63 = vld [vmem:[#allocation7 + $0x34c] sm:$0xf0]  ;;  %v8123_v59 = vor.u32 %v10764_v49, %v8122_v47  ;;  %v8218_v47 = vld [vmem:[#allocation7 + $0x938] sm:$0xf]  ;;  %v10623_v35 = vld [vmem:[#allocation7 + $0x42c] sm:$0xf] }
  0xb2   :  { %2737 = vmatpush.bf16.msra.mxu2 %v7571_v0  ;;  %v7642_v0 = vld [vmem:[#allocation7 + $0x4b8] sm:$0xf]  ;;  %v7451_v6 = vor.u32 %v10596_v63, %v7450_v62  ;;  %v10710_v62 = vld [vmem:[#allocation7 + $0x6dc] sm:$0xf0]  ;;  %v8098_v63 = vld [vmem:[#allocation7 + $0x848] sm:$0xf] }
  0xb3   :  { %2750 = vmatpush.bf16.msra.mxu3 %v7763_v4  ;;  %v10494_v4 = vld [vmem:[#allocation7 + $0x1c] sm:$0xf0]  ;;  %v10740_v46 = vld [vmem:[#allocation7 + $0x7cc] sm:$0xf0]  ;;  %v8410_v49 = vld [vmem:[#allocation7 + $0xab8] sm:$0xf] }
  0xb4   :  { %2712 = vmatpush.bf16.msra.mxu0 %v7163_v10  ;;  %v7643_v10 = vor.u32 %v10644_v1, %v7642_v0  ;;  %v7043_v17 = vor.u32 %v10494_v4, %v7042_v3  ;;  %v10758_v1 = vld [vmem:[#allocation7 + $0x85c] sm:$0xf0]  ;;  %v8482_v4 = vld [vmem:[#allocation7 + $0xb48] sm:$0xf] }
  0xb5   :  { %2725 = vmatpush.bf16.msra.mxu1 %v7355_v11  ;;  %v10590_v11 = vld [vmem:[#allocation7 + $0x31c] sm:$0xf0]  ;;  %v8099_v8 = vor.u32 %v10758_v1, %v8098_v63  ;;  %v8194_v63 = vld [vmem:[#allocation7 + $0x908] sm:$0xf] }
  0xb6   :  { %2738 = vmatpush.bf16.msra.mxu2 %v7547_v12  ;;  %v7618_v12 = vld [vmem:[#allocation7 + $0x488] sm:$0xf]  ;;  %v10806_v3 = vld [vmem:[#allocation7 + $0x9dc] sm:$0xf0] }
  0xb7   :  { %2751 = vmatpush.bf16.msra.mxu3 %v7739_v16  ;;  %v8170_v16 = vld [vmem:[#allocation7 + $0x8d8] sm:$0xf]  ;;  %v7619_v29 = vor.u32 %v10638_v13, %v7618_v12  ;;  %v10752_v12 = vld [vmem:[#allocation7 + $0x82c] sm:$0xf0] }
  0xb8   :  { %2713 = vmatpush.bf16.msra.mxu0 %v7139_v25  ;;  %v7427_v25 = vor.u32 %v10590_v11, %v7426_v9  ;;  %v8171_v31 = vor.u32 %v10776_v18, %v8170_v16  ;;  %v8074_v11 = vld [vmem:[#allocation7 + $0x818] sm:$0xf]  ;;  %v11775_v16 = vld [vmem:[#allocation8] sm:$0x3f]  ;;  %v10848_v18 = vld [vmem:[#allocation7 + $0xb2c] sm:$0xf0] }
  0xb9   :  { %2726 = vmatpush.bf16.msra.mxu1 %v7331_v27  ;;  %v8554_v27 = vld [vmem:[#allocation7 + $0xbd8] sm:$0xf] }
  0xba   :  { %2739 = vmatpush.bf16.msra.mxu2 %v7523_v28  ;;  %v10872_v28 = vld [vmem:[#allocation7 + $0xbec] sm:$0xf0] }
  0xbb   :  { %2752 = vmatpush.bf16.msra.mxu3 %v7715_v32  ;;  %v8363_v32 = vor.u32 %v10824_v23, %v8362_v19  ;;  %v8555_v36 = vor.u32 %v10872_v28, %v8554_v27  ;;  %v7858_v23 = vld [vmem:[#allocation7 + $0x668] sm:$0xf]  ;;  %v10698_v27 = vld [vmem:[#allocation7 + $0x67c] sm:$0xf0] }
  0xbc   :  { %2714 = vmatpush.bf16.msra.mxu0 %v7115_v38  ;;  %v8338_v38 = vld [vmem:[#allocation7 + $0xa28] sm:$0xf] }
  0xbd   :  { %2727 = vmatpush.bf16.msra.mxu1 %v7307_v39  ;;  %v10818_v39 = vld [vmem:[#allocation7 + $0xa3c] sm:$0xf0]  ;;  %v8050_v28 = vld [vmem:[#allocation7 + $0x7e8] sm:$0xf] }
  0xbe   :  { %2740 = vmatpush.bf16.msra.mxu2 %v7499_v40  ;;  %v8530_v40 = vld [vmem:[#allocation7 + $0xba8] sm:$0xf] }
  0xbf   :  { %2753 = vmatpush.bf16.msra.mxu3 %v7691_v44  ;;  %v8339_v44 = vor.u32 %v10818_v39, %v8338_v38  ;;  %v8531_v48 = vor.u32 %v10866_v41, %v8530_v40  ;;  %v7834_v40 = vld [vmem:[#allocation7 + $0x638] sm:$0xf]  ;;  %v10692_v41 = vld [vmem:[#allocation7 + $0x64c] sm:$0xf0] }
  0xc0   :  { %2715 = vmatpush.bf16.msra.mxu0 %v7091_v52  ;;  %v8314_v52 = vld [vmem:[#allocation7 + $0x9f8] sm:$0xf] }
  0xc1   :  { %2728 = vmatpush.bf16.msra.mxu1 %v7283_v54  ;;  %v10812_v54 = vld [vmem:[#allocation7 + $0xa0c] sm:$0xf0] }
  0xc2   :  { %2741 = vmatpush.bf16.msra.mxu2 %v7475_v56  ;;  %v8506_v56 = vld [vmem:[#allocation7 + $0xb78] sm:$0xf] }
  0xc3   :  { %2754 = vmatpush.bf16.msra.mxu3 %v7667_v60  ;;  %v8315_v60 = vor.u32 %v10812_v54, %v8314_v52  ;;  %v8507_v0 = vor.u32 %v10860_v57, %v8506_v56  ;;  %v10836_v52 = vld [vmem:[#allocation7 + $0xacc] sm:$0xf0]  ;;  %v7835_v56 = vor.u32 %v10692_v41, %v7834_v40  ;;  %v7810_v57 = vld [vmem:[#allocation7 + $0x608] sm:$0xf] }
  0xc4   :  { %2716 = vmatpush.bf16.msra.mxu0 %v7067_v2  ;;  %v8290_v2 = vld [vmem:[#allocation7 + $0x9c8] sm:$0xf]  ;;  %v8411_v1 = vor.u32 %v10836_v52, %v8410_v49  ;;  %v10617_v49 = vld [vmem:[#allocation7 + $0x3fc] sm:$0xf]  ;;  %v7548_v52 = vld [vmem:[#allocation7 + $0x410] sm:$0xf0] }
  0xc5   :  { %2729 = vmatpush.bf16.msra.mxu1 %v7259_v5  ;;  %v10854_v5 = vld [vmem:[#allocation7 + $0xb5c] sm:$0xf0]  ;;  %v8291_v9 = vor.u32 %v10806_v3, %v8290_v2  ;;  %v8386_v3 = vld [vmem:[#allocation7 + $0xa88] sm:$0xf] }
  0xc6   :  { %2742 = vmatpush.bf16.msra.mxu2 %v7451_v6  ;;  %v7907_v6 = vor.u32 %v10710_v62, %v7906_v61  ;;  %v8483_v13 = vor.u32 %v10854_v5, %v8482_v4  ;;  %v8002_v61 = vld [vmem:[#allocation7 + $0x788] sm:$0xf]  ;;  %v10734_v62 = vld [vmem:[#allocation7 + $0x79c] sm:$0xf0] }
  0xc7   :  { %2755 = vmatpush.bf16.msra.mxu3 %v7643_v10  ;;  %v10704_v10 = vld [vmem:[#allocation7 + $0x6ac] sm:$0xf0]  ;;  %v10782_v2 = vld [vmem:[#allocation7 + $0x91c] sm:$0xf0] }
  0xc8   :  { %2717 = vmatpush.bf16.msra.mxu0 %v7043_v17  ;;  %v8458_v17 = vld [vmem:[#allocation7 + $0xb18] sm:$0xf]  ;;  %v7883_v19 = vor.u32 %v10704_v10, %v7882_v7  ;;  %v10830_v4 = vld [vmem:[#allocation7 + $0xa9c] sm:$0xf0]  ;;  %v10533_v7 = vld [vmem:[#allocation7 + $0x15c] sm:$0xf] }
  0xc9   :  { %2730 = vmatpush.bf16.msra.mxu1 %v7235_v24  ;;  %v8075_v24 = vor.u32 %v10752_v12, %v8074_v11  ;;  %v7404_v11 = vld [vmem:[#allocation7 + $0x2f0] sm:$0xf0]  ;;  %v10629_v12 = vld [vmem:[#allocation7 + $0x45c] sm:$0xf] }
  0xca   :  { %2743 = vmatpush.bf16.msra.mxu2 %v7427_v25  ;;  %v8267_v25 = vor.u32 %v10800_v15, %v8266_v14 }
  0xcb   :  { %2756 = vmatpush.bf16.msra.mxu3 %v7619_v29  ;;  %2718 = vmatmul.bf16.vlgmr.msra.gmra.mxu0 %v11741_v21  ;;  %v552_v29 = vperm.slane %v11775_v16, 0  ;;  %v2511_v37 = vpop.f32.mrf.mxu0 }
  0xcc   :  { %2762 = vmatpush.bf16.msrb.mxu0 %v7979_v30  ;;  %2731 = vmatmul.bf16.vlgmr.msra.gmra.mxu1 %v11746_v26  ;;  %v8459_v30 = vor.u32 %v10848_v18, %v8458_v17  ;;  %v8003_v17 = vor.u32 %v10734_v62, %v8002_v61  ;;  %v8195_v18 = vor.u32 %v10782_v2, %v8194_v63  ;;  %v7140_v61 = vld [vmem:[#allocation7 + $0xe0] sm:$0xf0]  ;;  %v10563_v62 = vld [vmem:[#allocation7 + $0x24c] sm:$0xf] }
  0xcd   :  { %2775 = vmatpush.bf16.msrb.mxu1 %v8171_v31  ;;  %2744 = vmatmul.bf16.vlgmr.msra.gmra.mxu2 %v11739_v20  ;;  %v10746_v31 = vld [vmem:[#allocation7 + $0x7fc] sm:$0xf0]  ;;  %v7524_v2 = vld [vmem:[#allocation7 + $0x3e0] sm:$0xf0] }
  0xce   :  { %2788 = vmatpush.bf16.msrb.mxu2 %v8363_v32  ;;  %2757 = vmatmul.bf16.vlgmr.msra.gmra.mxu3 %v11743_v22  ;;  %v8242_v32 = vld [vmem:[#allocation7 + $0x968] sm:$0xf]  ;;  %v8051_v38 = vor.u32 %v10746_v31, %v8050_v28  ;;  %v7188_v31 = vld [vmem:[#allocation7 + $0x140] sm:$0xf0] }
  0xcf   :  { %2801 = vmatpush.bf16.msrb.mxu3 %v8555_v36  ;;  %v7859_v36 = vor.u32 %v10698_v27, %v7858_v23  ;;  %v8243_v39 = vor.u32 %v10794_v33, %v8242_v32  ;;  %v7788_v23 = vld [vmem:[#allocation7 + $0x5f0] sm:$0xf0]  ;;  %v10575_v32 = vld [vmem:[#allocation7 + $0x2ac] sm:$0xf] }
  0xd0   :  { %2763 = vmatpush.bf16.msrb.mxu0 %v7955_v42  ;;  %v8026_v42 = vld [vmem:[#allocation7 + $0x7b8] sm:$0xf] }
  0xd1   :  { %2776 = vmatpush.bf16.msrb.mxu1 %v8147_v43  ;;  %v2512_v43 = vadd.f32 %v2511_v37, %v552_v29  ;;  %v10671_v37 = vld [vmem:[#allocation7 + $0x5ac] sm:$0xf] }
  0xd2   :  { %2789 = vmatpush.bf16.msrb.mxu2 %v8339_v44  ;;  %v2524_v44 = vpop.f32.mrf.mxu1 }
  0xd3   :  { %2802 = vmatpush.bf16.msrb.mxu3 %v8531_v48  ;;  %v10788_v48 = vld [vmem:[#allocation7 + $0x94c] sm:$0xf0]  ;;  %v2525_v54 = vadd.f32 %v2524_v44, %v2512_v43  ;;  %v2513_v15 = vpop.f32.mrf.mxu0  ;;  %v10521_v44 = vld [vmem:[#allocation7 + $0xfc] sm:$0xf] }
  0xd4   :  { %2764 = vmatpush.bf16.msrb.mxu0 %v7931_v58  ;;  %v10686_v58 = vld [vmem:[#allocation7 + $0x61c] sm:$0xf0] }
  0xd5   :  { %2777 = vmatpush.bf16.msrb.mxu1 %v8123_v59  ;;  %v8027_v59 = vor.u32 %v10740_v46, %v8026_v42  ;;  %v7811_v10 = vor.u32 %v10686_v58, %v7810_v57  ;;  %v7383_v42 = vor.u32 %v10575_v32, %v7380_v34  ;;  %v10569_v46 = vld [vmem:[#allocation7 + $0x27c] sm:$0xf]  ;;  %v10551_v32 = vld [vmem:[#allocation7 + $0x1ec] sm:$0xf] }
  0xd6   :  { %2790 = vmatpush.bf16.msrb.mxu2 %v8315_v60  ;;  %v8219_v60 = vor.u32 %v10788_v48, %v8218_v47  ;;  %v7356_v48 = vld [vmem:[#allocation7 + $0x290] sm:$0xf0] }
  0xd7   :  { %2803 = vmatpush.bf16.msrb.mxu3 %v8507_v0  ;;  %v2537_v0 = vpop.f32.mrf.mxu2  ;;  %v7359_v58 = vor.u32 %v10569_v46, %v7356_v48  ;;  %v10497_v46 = vld [vmem:[#allocation7 + $0x3c] sm:$0xf] }
  0xd8   :  { %2765 = vmatpush.bf16.msrb.mxu0 %v7907_v6  ;;  %v2538_v5 = vadd.f32 %v2537_v0, %v2525_v54  ;;  %v2550_v6 = vpop.f32.mrf.mxu3  ;;  %v10665_v54 = vld [vmem:[#allocation7 + $0x57c] sm:$0xf]  ;;  %v7332_v0 = vld [vmem:[#allocation7 + $0x260] sm:$0xf0] }
  0xd9   :  { %2778 = vmatpush.bf16.msrb.mxu1 %v8099_v8  ;;  %v7212_v8 = vld [vmem:[#allocation7 + $0x170] sm:$0xf0]  ;;  %v10545_v48 = vld [vmem:[#allocation7 + $0x1bc] sm:$0xf] }
  0xda   :  { %2791 = vmatpush.bf16.msrb.mxu2 %v8291_v9  ;;  %v10581_v9 = vld [vmem:[#allocation7 + $0x2dc] sm:$0xf]  ;;  %v11778_v14 = vadd.f32 %v2550_v6, %v2538_v5  ;;  %v7215_v27 = vor.u32 %v10533_v7, %v7212_v8  ;;  %v7335_v7 = vor.u32 %v10563_v62, %v7332_v0  ;;  %v7044_v62 = vld [vmem:[#allocation7 + $0x20] sm:$0xf0] }
  0xdb   :  { %2804 = vmatpush.bf16.msrb.mxu3 %v8483_v13  ;;  %v7596_v13 = vld [vmem:[#allocation7 + $0x470] sm:$0xf0]  ;;  %v7407_v28 = vor.u32 %v10581_v9, %v7404_v11 }
  0xdc   :  { %2766 = vmatpush.bf16.msrb.mxu0 %v7883_v19  ;;  %v10677_v19 = vld [vmem:[#allocation7 + $0x5dc] sm:$0xf]  ;;  %v7599_v29 = vor.u32 %v10629_v12, %v7596_v13  ;;  %v7116_v11 = vld [vmem:[#allocation7 + $0xb0] sm:$0xf0] }
  0xdd   :  { %2779 = vmatpush.bf16.msrb.mxu1 %v8075_v24  ;;  %v2526_v24 = vpop.f32.mrf.mxu1  ;;  %v7791_v33 = vor.u32 %v10677_v19, %v7788_v23  ;;  %v10557_v12 = vld [vmem:[#allocation7 + $0x21c] sm:$0xf]  ;;  %v7500_v19 = vld [vmem:[#allocation7 + $0x3b0] sm:$0xf0] }
  0xde   :  { %2792 = vmatpush.bf16.msrb.mxu2 %v8267_v25  ;;  %v8387_v25 = vor.u32 %v10830_v4, %v8386_v3  ;;  %v10659_v3 = vld [vmem:[#allocation7 + $0x54c] sm:$0xf]  ;;  %v7716_v4 = vld [vmem:[#allocation7 + $0x560] sm:$0xf0]  ;;  %v10653_v23 = vld [vmem:[#allocation7 + $0x51c] sm:$0xf] }
  0xdf   :  { %2805 = vmatpush.bf16.msrb.mxu3 %v8459_v30  ;;  %v10527_v30 = vld [vmem:[#allocation7 + $0x12c] sm:$0xf]  ;;  %v7719_v15 = vor.u32 %v10659_v3, %v7716_v4  ;;  %v7692_v24 = vld [vmem:[#allocation7 + $0x530] sm:$0xf0] }
  0xe0   :  { %2767 = vmatpush.bf16.msrb.mxu0 %v7859_v36  ;;  %v7572_v36 = vld [vmem:[#allocation7 + $0x440] sm:$0xf0]  ;;  %v7191_v40 = vor.u32 %v10527_v30, %v7188_v31  ;;  %v2552_v41 = vpop.f32.mrf.mxu3  ;;  %v10587_v3 = vld [vmem:[#allocation7 + $0x30c] sm:$0xf] }
  0xe1   :  { %2780 = vmatpush.bf16.msrb.mxu1 %v8051_v38  ;;  %v7764_v38 = vld [vmem:[#allocation7 + $0x5c0] sm:$0xf0]  ;;  %v7575_v43 = vor.u32 %v10623_v35, %v7572_v36  ;;  %v10599_v36 = vld [vmem:[#allocation7 + $0x36c] sm:$0xf] }
  0xe2   :  { %2793 = vmatpush.bf16.msrb.mxu2 %v8243_v39  ;;  %v2539_v39 = vpop.f32.mrf.mxu2  ;;  %v7767_v47 = vor.u32 %v10671_v37, %v7764_v38  ;;  %v7092_v31 = vld [vmem:[#allocation7 + $0x80] sm:$0xf0] }
  0xe3   :  { %2806 = vmatpush.bf16.msrb.mxu3 %v8435_v45  ;;  %v7164_v45 = vld [vmem:[#allocation7 + $0x110] sm:$0xf0]  ;;  %v7284_v35 = vld [vmem:[#allocation7 + $0x200] sm:$0xf0]  ;;  %v10647_v39 = vld [vmem:[#allocation7 + $0x4ec] sm:$0xf] }
  0xe4   :  { %2768 = vmatpush.bf16.msrb.mxu0 %v7835_v56  ;;  %v7740_v56 = vld [vmem:[#allocation7 + $0x590] sm:$0xf0]  ;;  %v7167_v57 = vor.u32 %v10521_v44, %v7164_v45  ;;  %v7476_v37 = vld [vmem:[#allocation7 + $0x380] sm:$0xf0]  ;;  %v7287_v44 = vor.u32 %v10551_v32, %v7284_v35  ;;  %v10767_v32 = vld [vmem:[#allocation7 + $0x8ac] sm:$0xf] }
  0xe5   :  { %2781 = vmatpush.bf16.msrb.mxu1 %v8027_v59  ;;  %v7551_v59 = vor.u32 %v10617_v49, %v7548_v52  ;;  %v7743_v63 = vor.u32 %v10665_v54, %v7740_v56  ;;  %v7479_v45 = vor.u32 %v10599_v36, %v7476_v37  ;;  %v7260_v54 = vld [vmem:[#allocation7 + $0x1d0] sm:$0xf0]  ;;  %v10593_v56 = vld [vmem:[#allocation7 + $0x33c] sm:$0xf]  ;;  %v10815_v35 = vld [vmem:[#allocation7 + $0xa2c] sm:$0xf] }
  0xe6   :  { %2794 = vmatpush.bf16.msrb.mxu2 %v8219_v60  ;;  %v10515_v60 = vld [vmem:[#allocation7 + $0xcc] sm:$0xf]  ;;  %v8340_v36 = vld [vmem:[#allocation7 + $0xa40] sm:$0xf0] }
  0xe7   :  { %2807 = vmatpush.bf16.msrb.mxu3 %v8411_v1  ;;  %v10611_v1 = vld [vmem:[#allocation7 + $0x3cc] sm:$0xf]  ;;  %v7143_v5 = vor.u32 %v10515_v60, %v7140_v61 }
  0xe8   :  { %2769 = vmatpush.bf16.msrb.mxu0 %v7811_v10  ;;  %v2563_v6 = vpop.f32.mrf.mxu0  ;;  %v7527_v8 = vor.u32 %v10611_v1, %v7524_v2  ;;  %v10509_v10 = vld [vmem:[#allocation7 + $0x9c] sm:$0xf]  ;;  %v10491_v61 = vld [vmem:[#allocation7 + $0xc] sm:$0xf]  ;;  %v7236_v2 = vld [vmem:[#allocation7 + $0x1a0] sm:$0xf0] }
  0xe9   :  { %2782 = vmatpush.bf16.msrb.mxu1 %v8003_v17  ;;  %v2564_v9 = vadd.f32 %v2563_v6, %v11778_v14  ;;  %v2576_v13 = vpop.f32.mrf.mxu1  ;;  %v7308_v17 = vld [vmem:[#allocation7 + $0x230] sm:$0xf0]  ;;  %v10503_v14 = vld [vmem:[#allocation7 + $0x6c] sm:$0xf]  ;;  %v7428_v6 = vld [vmem:[#allocation7 + $0x320] sm:$0xf0] }
  0xea   :  { %2795 = vmatpush.bf16.msrb.mxu2 %v8195_v18  ;;  %v10605_v18 = vld [vmem:[#allocation7 + $0x39c] sm:$0xf]  ;;  %v7095_v41 = vor.u32 %v10503_v14, %v7092_v31  ;;  %v10539_v1 = vld [vmem:[#allocation7 + $0x18c] sm:$0xf]  ;;  %v7956_v31 = vld [vmem:[#allocation7 + $0x740] sm:$0xf0] }
  0xeb   :  { %2808 = vmatpush.bf16.msrb.mxu3 %v8387_v25  ;;  %2770 = vmatmul.bf16.vlgmr.msrb.gmra.mxu0 %v11753_v51  ;;  %v2577_v25 = vadd.f32 %v2576_v13, %v2564_v9  ;;  %v7047_v13 = vor.u32 %v10491_v61, %v7044_v62  ;;  %v10719_v14 = vld [vmem:[#allocation7 + $0x72c] sm:$0xf]  ;;  %v553_v62 = vperm.slane %v11775_v16, 1 }
  0xec   :  { %2814 = vmatpush.bf16.msra.mxu0 %v7215_v27  ;;  %2783 = vmatmul.bf16.vlgmr.msrb.gmra.mxu1 %v11757_v55  ;;  %v7119_v27 = vor.u32 %v10509_v10, %v7116_v11  ;;  %v10725_v10 = vld [vmem:[#allocation7 + $0x75c] sm:$0xf]  ;;  %v7980_v11 = vld [vmem:[#allocation7 + $0x770] sm:$0xf0]  ;;  %v10863_v37 = vld [vmem:[#allocation7 + $0xbac] sm:$0xf] }
  0xed   :  { %2827 = vmatpush.bf16.msra.mxu1 %v7407_v28  ;;  %2796 = vmatmul.bf16.vlgmr.msrb.gmra.mxu2 %v11751_v50  ;;  %v7311_v28 = vor.u32 %v10557_v12, %v7308_v17  ;;  %v10773_v12 = vld [vmem:[#allocation7 + $0x8dc] sm:$0xf]  ;;  %v10755_v61 = vld [vmem:[#allocation7 + $0x84c] sm:$0xf] }
  0xee   :  { %2840 = vmatpush.bf16.msra.mxu2 %v7599_v29  ;;  %2809 = vmatmul.bf16.vlgmr.msrb.gmra.mxu3 %v11755_v53  ;;  %v7503_v29 = vor.u32 %v10605_v18, %v7500_v19  ;;  %v10821_v17 = vld [vmem:[#allocation7 + $0xa5c] sm:$0xf]  ;;  %v8364_v18 = vld [vmem:[#allocation7 + $0xa70] sm:$0xf0]  ;;  %v7239_v19 = vor.u32 %v10539_v1, %v7236_v2  ;;  %v10803_v1 = vld [vmem:[#allocation7 + $0x9cc] sm:$0xf] }
  0xef   :  { %2853 = vmatpush.bf16.msra.mxu3 %v7791_v33  ;;  %v7695_v33 = vor.u32 %v10653_v23, %v7692_v24  ;;  %v7431_v23 = vor.u32 %v10587_v3, %v7428_v6  ;;  %v10869_v24 = vld [vmem:[#allocation7 + $0xbdc] sm:$0xf]  ;;  %v8292_v2 = vld [vmem:[#allocation7 + $0x9e0] sm:$0xf0]  ;;  %v10851_v3 = vld [vmem:[#allocation7 + $0xb4c] sm:$0xf] }
  0xf0   :  { %2815 = vmatpush.bf16.msra.mxu0 %v7191_v40  ;;  %v2589_v30 = vpop.f32.mrf.mxu2  ;;  %v7668_v40 = vld [vmem:[#allocation7 + $0x500] sm:$0xf0] }
  0xf1   :  { %2828 = vmatpush.bf16.msra.mxu1 %v7383_v42  ;;  %v2590_v34 = vadd.f32 %v2589_v30, %v2577_v25  ;;  %v2602_v38 = vpop.f32.mrf.mxu3  ;;  %v2578_v49 = vpop.f32.mrf.mxu1  ;;  %v7671_v52 = vor.u32 %v10647_v39, %v7668_v40  ;;  %v8556_v25 = vld [vmem:[#allocation7 + $0xbf0] sm:$0xf0]  ;;  %v8367_v30 = vor.u32 %v10821_v17, %v8364_v18  ;;  %v7959_v39 = vor.u32 %v10719_v14, %v7956_v31  ;;  %v10797_v17 = vld [vmem:[#allocation7 + $0x99c] sm:$0xf]  ;;  %v10743_v14 = vld [vmem:[#allocation7 + $0x7ec] sm:$0xf] }
  0xf2   :  { %2841 = vmatpush.bf16.msra.mxu2 %v7575_v43  ;;  %v2565_v43 = vpop.f32.mrf.mxu0  ;;  %v8316_v49 = vld [vmem:[#allocation7 + $0xa10] sm:$0xf0] }
  0xf3   :  { %2854 = vmatpush.bf16.msra.mxu3 %v7767_v47  ;;  %v11785_v42 = vadd.f32 %v2602_v38, %v2590_v34  ;;  %v7068_v47 = vld [vmem:[#allocation7 + $0x50] sm:$0xf0]  ;;  %v8148_v34 = vld [vmem:[#allocation7 + $0x8c0] sm:$0xf0]  ;;  %v10713_v43 = vld [vmem:[#allocation7 + $0x6fc] sm:$0xf] }
  0xf4   :  { %2816 = vmatpush.bf16.msra.mxu0 %v7167_v57  ;;  %v7452_v57 = vld [vmem:[#allocation7 + $0x350] sm:$0xf0]  ;;  %v7071_v60 = vor.u32 %v10497_v46, %v7068_v47  ;;  %v8532_v38 = vld [vmem:[#allocation7 + $0xbc0] sm:$0xf0]  ;;  %v8151_v40 = vor.u32 %v10767_v32, %v8148_v34  ;;  %v10791_v34 = vld [vmem:[#allocation7 + $0x96c] sm:$0xf] }
  0xf5   :  { %2829 = vmatpush.bf16.msra.mxu1 %v7359_v58  ;;  %v10641_v58 = vld [vmem:[#allocation7 + $0x4bc] sm:$0xf]  ;;  %v7455_v0 = vor.u32 %v10593_v56, %v7452_v57  ;;  %v8535_v46 = vor.u32 %v10863_v37, %v8532_v38  ;;  %v8124_v47 = vld [vmem:[#allocation7 + $0x890] sm:$0xf0]  ;;  %v10707_v57 = vld [vmem:[#allocation7 + $0x6cc] sm:$0xf] }
  0xf6   :  { %2842 = vmatpush.bf16.msra.mxu2 %v7551_v59  ;;  %v7644_v59 = vld [vmem:[#allocation7 + $0x4d0] sm:$0xf0]  ;;  %v10839_v38 = vld [vmem:[#allocation7 + $0xaec] sm:$0xf] }
  0xf7   :  { %2855 = vmatpush.bf16.msra.mxu3 %v7743_v63  ;;  %v7263_v63 = vor.u32 %v10545_v48, %v7260_v54  ;;  %v10809_v48 = vld [vmem:[#allocation7 + $0x9fc] sm:$0xf]  ;;  %v8508_v54 = vld [vmem:[#allocation7 + $0xb90] sm:$0xf0] }
  0xf8   :  { %2817 = vmatpush.bf16.msra.mxu0 %v7143_v5  ;;  %v2591_v4 = vpop.f32.mrf.mxu2  ;;  %v7647_v5 = vor.u32 %v10641_v58, %v7644_v59  ;;  %v8319_v59 = vor.u32 %v10809_v48, %v8316_v49  ;;  %v8268_v18 = vld [vmem:[#allocation7 + $0x9b0] sm:$0xf0]  ;;  %v10737_v48 = vld [vmem:[#allocation7 + $0x7bc] sm:$0xf] }
  0xf9   :  { %2830 = vmatpush.bf16.msra.mxu1 %v7335_v7  ;;  %v10635_v7 = vld [vmem:[#allocation7 + $0x48c] sm:$0xf]  ;;  %v2604_v9 = vpop.f32.mrf.mxu3  ;;  %v8484_v4 = vld [vmem:[#allocation7 + $0xb60] sm:$0xf0] }
  0xfa   :  { %2843 = vmatpush.bf16.msra.mxu2 %v7527_v8  ;;  %v7620_v8 = vld [vmem:[#allocation7 + $0x4a0] sm:$0xf0]  ;;  %v10701_v9 = vld [vmem:[#allocation7 + $0x69c] sm:$0xf]  ;;  %v8487_v16 = vor.u32 %v10851_v3, %v8484_v4  ;;  %v10779_v3 = vld [vmem:[#allocation7 + $0x90c] sm:$0xf] }
  0xfb   :  { %2856 = vmatpush.bf16.msra.mxu3 %v7719_v15  ;;  %v8172_v15 = vld [vmem:[#allocation7 + $0x8f0] sm:$0xf0] }
  0xfc   :  { %2818 = vmatpush.bf16.msra.mxu0 %v7119_v27  ;;  %v7623_v27 = vor.u32 %v10635_v7, %v7620_v8  ;;  %v8295_v8 = vor.u32 %v10803_v1, %v8292_v2  ;;  %v10731_v1 = vld [vmem:[#allocation7 + $0x78c] sm:$0xf]  ;;  %v8004_v2 = vld [vmem:[#allocation7 + $0x7a0] sm:$0xf0] }
  0xfd   :  { %2831 = vmatpush.bf16.msra.mxu1 %v7311_v28  ;;  %v7983_v28 = vor.u32 %v10725_v10, %v7980_v11  ;;  %v7884_v10 = vld [vmem:[#allocation7 + $0x6b0] sm:$0xf0]  ;;  %v10749_v11 = vld [vmem:[#allocation7 + $0x81c] sm:$0xf] }
  0xfe   :  { %2844 = vmatpush.bf16.msra.mxu2 %v7503_v29  ;;  %v8175_v29 = vor.u32 %v10773_v12, %v8172_v15  ;;  %v8076_v15 = vld [vmem:[#allocation7 + $0x830] sm:$0xf0] }
  0xff   :  { %2857 = vmatpush.bf16.msra.mxu3 %v7695_v33  ;;  %v8559_v33 = vor.u32 %v10869_v24, %v8556_v25  ;;  %v7887_v25 = vor.u32 %v10701_v9, %v7884_v10  ;;  %v7218_v10 = vld [vmem:[#allocation7 + $0x160] sm:$0xf] }
 0x100   :  { %2819 = vmatpush.bf16.msra.mxu0 %v7095_v41  ;;  %v8343_v41 = vor.u32 %v10815_v35, %v8340_v36  ;;  %v8244_v35 = vld [vmem:[#allocation7 + $0x980] sm:$0xf0] }
 0x101   :  { %2832 = vmatpush.bf16.msra.mxu1 %v7287_v44  ;;  %v7932_v44 = vld [vmem:[#allocation7 + $0x710] sm:$0xf0] }
 0x102   :  { %2845 = vmatpush.bf16.msra.mxu2 %v7479_v45  ;;  %v10761_v45 = vld [vmem:[#allocation7 + $0x87c] sm:$0xf]  ;;  %v7935_v56 = vor.u32 %v10713_v43, %v7932_v44 }
 0x103   :  { %2858 = vmatpush.bf16.msra.mxu3 %v7671_v52  ;;  %v10857_v52 = vld [vmem:[#allocation7 + $0xb7c] sm:$0xf]  ;;  %v8127_v58 = vor.u32 %v10761_v45, %v8124_v47  ;;  %v8247_v45 = vor.u32 %v10791_v34, %v8244_v35  ;;  %v7836_v47 = vld [vmem:[#allocation7 + $0x650] sm:$0xf0]  ;;  %v7578_v34 = vld [vmem:[#allocation7 + $0x430] sm:$0xf] }
 0x104   :  { %2820 = vmatpush.bf16.msra.mxu0 %v7071_v60  ;;  %v7908_v60 = vld [vmem:[#allocation7 + $0x6e0] sm:$0xf0]  ;;  %v10627_v35 = vld [vmem:[#allocation7 + $0x444] sm:$0xf0] }
 0x105   :  { %2833 = vmatpush.bf16.msra.mxu1 %v7263_v63  ;;  %v8511_v63 = vor.u32 %v10857_v52, %v8508_v54  ;;  %v8028_v54 = vld [vmem:[#allocation7 + $0x7d0] sm:$0xf0] }
 0x106   :  { %2846 = vmatpush.bf16.msra.mxu2 %v7455_v0  ;;  %v8100_v0 = vld [vmem:[#allocation7 + $0x860] sm:$0xf0] }
 0x107   :  { %2859 = vmatpush.bf16.msra.mxu3 %v7647_v5  ;;  %v7911_v5 = vor.u32 %v10707_v57, %v7908_v60  ;;  %v8103_v7 = vor.u32 %v10755_v61, %v8100_v0  ;;  %v8220_v57 = vld [vmem:[#allocation7 + $0x950] sm:$0xf0]  ;;  %v10683_v61 = vld [vmem:[#allocation7 + $0x60c] sm:$0xf] }
 0x108   :  { %2821 = vmatpush.bf16.msra.mxu0 %v7047_v13  ;;  %v2615_v6 = vpop.f32.mrf.mxu0 }
 0x109   :  { %2834 = vmatpush.bf16.msra.mxu1 %v7239_v19  ;;  %v2616_v12 = vadd.f32 %v2615_v6, %v553_v62  ;;  %v2628_v13 = vpop.f32.mrf.mxu1  ;;  %v10845_v19 = vld [vmem:[#allocation7 + $0xb1c] sm:$0xf]  ;;  %v7812_v62 = vld [vmem:[#allocation7 + $0x620] sm:$0xf0] }
 0x10a   :  { %2847 = vmatpush.bf16.msra.mxu2 %v7431_v23  ;;  %v8460_v23 = vld [vmem:[#allocation7 + $0xb30] sm:$0xf0]  ;;  %v8196_v6 = vld [vmem:[#allocation7 + $0x920] sm:$0xf0] }
 0x10b   :  { %2860 = vmatpush.bf16.msra.mxu3 %v7623_v27  ;;  %2822 = vmatmul.bf16.vlgmr.msra.gmra.mxu0 %v11741_v21  ;;  %v2629_v24 = vadd.f32 %v2628_v13, %v2616_v12  ;;  %v8079_v27 = vor.u32 %v10749_v11, %v8076_v15  ;;  %v8463_v32 = vor.u32 %v10845_v19, %v8460_v23  ;;  %v10537_v11 = vld [vmem:[#allocation7 + $0x174] sm:$0xf0]  ;;  %v7410_v12 = vld [vmem:[#allocation7 + $0x2e0] sm:$0xf] }
 0x10c   :  { %2866 = vmatpush.bf16.msrb.mxu0 %v7983_v28  ;;  %2835 = vmatmul.bf16.vlgmr.msra.gmra.mxu1 %v11746_v26  ;;  %v8271_v28 = vor.u32 %v10797_v17, %v8268_v18  ;;  %v7815_v13 = vor.u32 %v10683_v61, %v7812_v62  ;;  %v7602_v15 = vld [vmem:[#allocation7 + $0x460] sm:$0xf]  ;;  %v10633_v17 = vld [vmem:[#allocation7 + $0x474] sm:$0xf0]  ;;  %v8007_v18 = vor.u32 %v10731_v1, %v8004_v2  ;;  %v7338_v61 = vld [vmem:[#allocation7 + $0x250] sm:$0xf] }
 0x10d   :  { %2879 = vmatpush.bf16.msrb.mxu1 %v8175_v29  ;;  %2848 = vmatmul.bf16.vlgmr.msra.gmra.mxu2 %v11739_v20  ;;  %v10695_v29 = vld [vmem:[#allocation7 + $0x66c] sm:$0xf]  ;;  %v8199_v19 = vor.u32 %v10779_v3, %v8196_v6  ;;  %v7794_v23 = vld [vmem:[#allocation7 + $0x5e0] sm:$0xf]  ;;  %v10615_v1 = vld [vmem:[#allocation7 + $0x3e4] sm:$0xf0] }
 0x10e   :  { %2892 = vmatpush.bf16.msrb.mxu2 %v8367_v30  ;;  %2861 = vmatmul.bf16.vlgmr.msra.gmra.mxu3 %v11743_v22  ;;  %v7860_v30 = vld [vmem:[#allocation7 + $0x680] sm:$0xf0]  ;;  %v7722_v2 = vld [vmem:[#allocation7 + $0x550] sm:$0xf]  ;;  %v10663_v3 = vld [vmem:[#allocation7 + $0x564] sm:$0xf0] }
 0x10f   :  { %2905 = vmatpush.bf16.msrb.mxu3 %v8559_v33  ;;  %v8052_v33 = vld [vmem:[#allocation7 + $0x800] sm:$0xf0] }
 0x110   :  { %2867 = vmatpush.bf16.msrb.mxu0 %v7959_v39  ;;  %v2641_v31 = vpop.f32.mrf.mxu2  ;;  %v8436_v39 = vld [vmem:[#allocation7 + $0xb00] sm:$0xf0]  ;;  %v2617_v43 = vpop.f32.mrf.mxu0  ;;  %v8055_v44 = vor.u32 %v10743_v14, %v8052_v33  ;;  %v10531_v14 = vld [vmem:[#allocation7 + $0x144] sm:$0xf0] }
 0x111   :  { %2880 = vmatpush.bf16.msrb.mxu1 %v8151_v40  ;;  %v2642_v36 = vadd.f32 %v2641_v31, %v2629_v24  ;;  %v2654_v37 = vpop.f32.mrf.mxu3  ;;  %v7863_v40 = vor.u32 %v10695_v29, %v7860_v30  ;;  %v2630_v49 = vpop.f32.mrf.mxu1  ;;  %v8439_v52 = vor.u32 %v10839_v38, %v8436_v39  ;;  %v10681_v24 = vld [vmem:[#allocation7 + $0x5f4] sm:$0xf0]  ;;  %v7603_v29 = vor.u32 %v10633_v17, %v7602_v15  ;;  %v7194_v30 = vld [vmem:[#allocation7 + $0x130] sm:$0xf]  ;;  %v10579_v33 = vld [vmem:[#allocation7 + $0x2c4] sm:$0xf0] }
 0x112   :  { %2893 = vmatpush.bf16.msrb.mxu2 %v8343_v41  ;;  %v7386_v31 = vld [vmem:[#allocation7 + $0x2b0] sm:$0xf]  ;;  %v7195_v38 = vor.u32 %v10531_v14, %v7194_v30  ;;  %v7170_v43 = vld [vmem:[#allocation7 + $0x100] sm:$0xf]  ;;  %v10621_v49 = vld [vmem:[#allocation7 + $0x414] sm:$0xf0] }
 0x113   :  { %2906 = vmatpush.bf16.msrb.mxu3 %v8535_v46  ;;  %v11792_v41 = vadd.f32 %v2654_v37, %v2642_v36  ;;  %v10689_v46 = vld [vmem:[#allocation7 + $0x63c] sm:$0xf]  ;;  %v7770_v36 = vld [vmem:[#allocation7 + $0x5b0] sm:$0xf]  ;;  %v10675_v37 = vld [vmem:[#allocation7 + $0x5c4] sm:$0xf0]  ;;  %v7387_v39 = vor.u32 %v10579_v33, %v7386_v31 }
 0x114   :  { %2868 = vmatpush.bf16.msrb.mxu0 %v7935_v56  ;;  %v10785_v56 = vld [vmem:[#allocation7 + $0x93c] sm:$0xf]  ;;  %v7839_v60 = vor.u32 %v10689_v46, %v7836_v47  ;;  %v7771_v46 = vor.u32 %v10675_v37, %v7770_v36  ;;  %v10573_v47 = vld [vmem:[#allocation7 + $0x294] sm:$0xf0]  ;;  %v7506_v15 = vld [vmem:[#allocation7 + $0x3a0] sm:$0xf] }
 0x115   :  { %2881 = vmatpush.bf16.msrb.mxu1 %v8127_v58  ;;  %v10833_v58 = vld [vmem:[#allocation7 + $0xabc] sm:$0xf]  ;;  %v8223_v0 = vor.u32 %v10785_v56, %v8220_v57  ;;  %v10609_v17 = vld [vmem:[#allocation7 + $0x3b4] sm:$0xf0]  ;;  %v7290_v30 = vld [vmem:[#allocation7 + $0x1f0] sm:$0xf] }
 0x116   :  { %2894 = vmatpush.bf16.msrb.mxu2 %v8319_v59  ;;  %v8412_v59 = vld [vmem:[#allocation7 + $0xad0] sm:$0xf0]  ;;  %v7482_v33 = vld [vmem:[#allocation7 + $0x370] sm:$0xf]  ;;  %v10651_v37 = vld [vmem:[#allocation7 + $0x504] sm:$0xf0] }
 0x117   :  { %2907 = vmatpush.bf16.msrb.mxu3 %v8511_v63  ;;  %v8031_v63 = vor.u32 %v10737_v48, %v8028_v54  ;;  %v7554_v48 = vld [vmem:[#allocation7 + $0x400] sm:$0xf]  ;;  %v10669_v54 = vld [vmem:[#allocation7 + $0x594] sm:$0xf0]  ;;  %v7674_v36 = vld [vmem:[#allocation7 + $0x4f0] sm:$0xf] }
 0x118   :  { %2869 = vmatpush.bf16.msrb.mxu0 %v7911_v5  ;;  %v2643_v4 = vpop.f32.mrf.mxu2  ;;  %v8415_v5 = vor.u32 %v10833_v58, %v8412_v59  ;;  %v7555_v58 = vor.u32 %v10621_v49, %v7554_v48  ;;  %v7146_v59 = vld [vmem:[#allocation7 + $0xd0] sm:$0xf]  ;;  %v7675_v49 = vor.u32 %v10651_v37, %v7674_v36 }
 0x119   :  { %2882 = vmatpush.bf16.msrb.mxu1 %v8103_v7  ;;  %v10827_v7 = vld [vmem:[#allocation7 + $0xa8c] sm:$0xf]  ;;  %v2656_v9 = vpop.f32.mrf.mxu3 }
 0x11a   :  { %2895 = vmatpush.bf16.msrb.mxu2 %v8295_v8  ;;  %v8388_v8 = vld [vmem:[#allocation7 + $0xaa0] sm:$0xf0]  ;;  %v7122_v9 = vld [vmem:[#allocation7 + $0xa0] sm:$0xf] }
 0x11b   :  { %2908 = vmatpush.bf16.msrb.mxu3 %v8487_v16  ;;  %v10585_v16 = vld [vmem:[#allocation7 + $0x2f4] sm:$0xf0] }
 0x11c   :  { %2870 = vmatpush.bf16.msrb.mxu0 %v7887_v25  ;;  %v8391_v25 = vor.u32 %v10827_v7, %v8388_v8 }
 0x11d   :  { %2883 = vmatpush.bf16.msrb.mxu1 %v8079_v27  ;;  %v7219_v27 = vor.u32 %v10537_v11, %v7218_v10  ;;  %v10513_v10 = vld [vmem:[#allocation7 + $0xb4] sm:$0xf0]  ;;  %v7314_v11 = vld [vmem:[#allocation7 + $0x220] sm:$0xf] }
 0x11e   :  { %2896 = vmatpush.bf16.msrb.mxu2 %v8271_v28  ;;  %v7411_v28 = vor.u32 %v10585_v16, %v7410_v12  ;;  %v10561_v16 = vld [vmem:[#allocation7 + $0x234] sm:$0xf0] }
 0x11f   :  { %2909 = vmatpush.bf16.msrb.mxu3 %v8463_v32  ;;  %v7795_v32 = vor.u32 %v10681_v24, %v7794_v23  ;;  %v7123_v24 = vor.u32 %v10513_v10, %v7122_v9  ;;  %v7986_v9 = vld [vmem:[#allocation7 + $0x760] sm:$0xf]  ;;  %v10729_v10 = vld [vmem:[#allocation7 + $0x774] sm:$0xf0] }
 0x120   :  { %2871 = vmatpush.bf16.msrb.mxu0 %v7863_v40  ;;  %v7579_v40 = vor.u32 %v10627_v35, %v7578_v34  ;;  %v10603_v34 = vld [vmem:[#allocation7 + $0x384] sm:$0xf0] }
 0x121   :  { %2884 = vmatpush.bf16.msrb.mxu1 %v8055_v44  ;;  %v10525_v44 = vld [vmem:[#allocation7 + $0x114] sm:$0xf0] }
 0x122   :  { %2897 = vmatpush.bf16.msrb.mxu2 %v8247_v45  ;;  %v7362_v45 = vld [vmem:[#allocation7 + $0x280] sm:$0xf]  ;;  %v7171_v56 = vor.u32 %v10525_v44, %v7170_v43  ;;  %v7483_v44 = vor.u32 %v10603_v34, %v7482_v33  ;;  %v10819_v33 = vld [vmem:[#allocation7 + $0xa44] sm:$0xf0]  ;;  %v8538_v34 = vld [vmem:[#allocation7 + $0xbb0] sm:$0xf] }
 0x123   :  { %2910 = vmatpush.bf16.msrb.mxu3 %v8439_v52  ;;  %v7746_v52 = vld [vmem:[#allocation7 + $0x580] sm:$0xf]  ;;  %v7363_v57 = vor.u32 %v10573_v47, %v7362_v45 }
 0x124   :  { %2872 = vmatpush.bf16.msrb.mxu0 %v7839_v60  ;;  %v10519_v60 = vld [vmem:[#allocation7 + $0xe4] sm:$0xf0]  ;;  %v7747_v62 = vor.u32 %v10669_v54, %v7746_v52  ;;  %v7074_v45 = vld [vmem:[#allocation7 + $0x40] sm:$0xf]  ;;  %v10549_v52 = vld [vmem:[#allocation7 + $0x1d4] sm:$0xf0] }
 0x125   :  { %2885 = vmatpush.bf16.msrb.mxu1 %v8031_v63  ;;  %v10567_v63 = vld [vmem:[#allocation7 + $0x264] sm:$0xf0]  ;;  %v7147_v4 = vor.u32 %v10519_v60, %v7146_v59  ;;  %v7266_v47 = vld [vmem:[#allocation7 + $0x1c0] sm:$0xf]  ;;  %v7050_v60 = vld [vmem:[#allocation7 + $0x10] sm:$0xf] }
 0x126   :  { %2898 = vmatpush.bf16.msrb.mxu2 %v8223_v0  ;;  %v7530_v0 = vld [vmem:[#allocation7 + $0x3d0] sm:$0xf]  ;;  %v7339_v6 = vor.u32 %v10567_v63, %v7338_v61  ;;  %v7458_v54 = vld [vmem:[#allocation7 + $0x340] sm:$0xf]  ;;  %v10495_v61 = vld [vmem:[#allocation7 + $0x24] sm:$0xf0] }
 0x127   :  { %2911 = vmatpush.bf16.msrb.mxu3 %v8415_v5  ;;  %v7531_v7 = vor.u32 %v10615_v1, %v7530_v0  ;;  %v7242_v0 = vld [vmem:[#allocation7 + $0x190] sm:$0xf]  ;;  %v10543_v1 = vld [vmem:[#allocation7 + $0x1a4] sm:$0xf0] }
 0x128   :  { %2873 = vmatpush.bf16.msrb.mxu0 %v7815_v13  ;;  %v2667_v5 = vpop.f32.mrf.mxu0  ;;  %v7723_v13 = vor.u32 %v10663_v3, %v7722_v2  ;;  %v7434_v2 = vld [vmem:[#allocation7 + $0x310] sm:$0xf] }
 0x129   :  { %2886 = vmatpush.bf16.msrb.mxu1 %v8007_v18  ;;  %v2668_v8 = vadd.f32 %v2667_v5, %v11792_v41  ;;  %v2680_v12 = vpop.f32.mrf.mxu1  ;;  %v7698_v18 = vld [vmem:[#allocation7 + $0x520] sm:$0xf]  ;;  %v7098_v41 = vld [vmem:[#allocation7 + $0x70] sm:$0xf]  ;;  %v10591_v5 = vld [vmem:[#allocation7 + $0x324] sm:$0xf0] }
 0x12a   :  { %2899 = vmatpush.bf16.msrb.mxu2 %v8199_v19  ;;  %v10657_v19 = vld [vmem:[#allocation7 + $0x534] sm:$0xf0] }
 0x12b   :  { %2912 = vmatpush.bf16.msrb.mxu3 %v8391_v25  ;;  %2874 = vmatmul.bf16.vlgmr.msrb.gmra.mxu0 %v11753_v51  ;;  %v2681_v23 = vadd.f32 %v2680_v12, %v2668_v8  ;;  %v7315_v25 = vor.u32 %v10561_v16, %v7314_v11  ;;  %v7699_v14 = vor.u32 %v10657_v19, %v7698_v18  ;;  %v8178_v11 = vld [vmem:[#allocation7 + $0x8e0] sm:$0xf] }
 0x12c   :  { %2918 = vmatpush.bf16.msra.mxu0 %v7219_v27  ;;  %2887 = vmatmul.bf16.vlgmr.msrb.gmra.mxu1 %v11757_v55  ;;  %v7507_v27 = vor.u32 %v10609_v17, %v7506_v15  ;;  %v7051_v12 = vor.u32 %v10495_v61, %v7050_v60  ;;  %v8370_v16 = vld [vmem:[#allocation7 + $0xa60] sm:$0xf]  ;;  %v10825_v15 = vld [vmem:[#allocation7 + $0xa74] sm:$0xf0]  ;;  %v7243_v17 = vor.u32 %v10543_v1, %v7242_v0  ;;  %v8106_v60 = vld [vmem:[#allocation7 + $0x850] sm:$0xf] }
 0x12d   :  { %2931 = vmatpush.bf16.msra.mxu1 %v7411_v28  ;;  %2900 = vmatmul.bf16.vlgmr.msrb.gmra.mxu2 %v11751_v50  ;;  %v7435_v18 = vor.u32 %v10591_v5, %v7434_v2  ;;  %v8562_v19 = vld [vmem:[#allocation7 + $0xbe0] sm:$0xf]  ;;  %v10759_v0 = vld [vmem:[#allocation7 + $0x864] sm:$0xf0]  ;;  %v8298_v1 = vld [vmem:[#allocation7 + $0x9d0] sm:$0xf] }
 0x12e   :  { %2944 = vmatpush.bf16.msra.mxu2 %v7603_v29  ;;  %2913 = vmatmul.bf16.vlgmr.msrb.gmra.mxu3 %v11755_v53  ;;  %v10507_v29 = vld [vmem:[#allocation7 + $0x84] sm:$0xf0]  ;;  %v11805_v61 = vld [vmem:[#allocation8] sm:$0x3f] }
 0x12f   :  { %2957 = vmatpush.bf16.msra.mxu3 %v7795_v32  ;;  %v10555_v32 = vld [vmem:[#allocation7 + $0x204] sm:$0xf0] }
 0x130   :  { %2919 = vmatpush.bf16.msra.mxu0 %v7195_v38  ;;  %v2693_v28 = vpop.f32.mrf.mxu2  ;;  %v7099_v38 = vor.u32 %v10507_v29, %v7098_v41  ;;  %v7291_v43 = vor.u32 %v10555_v32, %v7290_v30  ;;  %v7962_v41 = vld [vmem:[#allocation7 + $0x730] sm:$0xf]  ;;  %v10723_v29 = vld [vmem:[#allocation7 + $0x744] sm:$0xf0] }
 0x131   :  { %2932 = vmatpush.bf16.msra.mxu1 %v7387_v39  ;;  %v2694_v31 = vadd.f32 %v2693_v28, %v2681_v23  ;;  %v2706_v35 = vpop.f32.mrf.mxu3  ;;  %v2682_v48 = vpop.f32.mrf.mxu1  ;;  %v10873_v23 = vld [vmem:[#allocation7 + $0xbf4] sm:$0xf0]  ;;  %v8371_v28 = vor.u32 %v10825_v15, %v8370_v16  ;;  %v8154_v30 = vld [vmem:[#allocation7 + $0x8b0] sm:$0xf]  ;;  %v7963_v36 = vor.u32 %v10723_v29, %v7962_v41  ;;  %v10807_v2 = vld [vmem:[#allocation7 + $0x9e4] sm:$0xf0] }
 0x132   :  { %2945 = vmatpush.bf16.msra.mxu2 %v7579_v40  ;;  %v2669_v40 = vpop.f32.mrf.mxu0  ;;  %v8346_v32 = vld [vmem:[#allocation7 + $0xa30] sm:$0xf]  ;;  %v10813_v48 = vld [vmem:[#allocation7 + $0xa14] sm:$0xf0]  ;;  %v10699_v29 = vld [vmem:[#allocation7 + $0x684] sm:$0xf0] }
 0x133   :  { %2958 = vmatpush.bf16.msra.mxu3 %v7771_v46  ;;  %v11799_v39 = vadd.f32 %v2706_v35, %v2694_v31  ;;  %v10501_v46 = vld [vmem:[#allocation7 + $0x54] sm:$0xf0]  ;;  %v10771_v31 = vld [vmem:[#allocation7 + $0x8c4] sm:$0xf0]  ;;  %v7938_v40 = vld [vmem:[#allocation7 + $0x700] sm:$0xf] }
 0x134   :  { %2920 = vmatpush.bf16.msra.mxu0 %v7171_v56  ;;  %v10597_v56 = vld [vmem:[#allocation7 + $0x354] sm:$0xf0]  ;;  %v7075_v59 = vor.u32 %v10501_v46, %v7074_v45  ;;  %v10867_v35 = vld [vmem:[#allocation7 + $0xbc4] sm:$0xf0]  ;;  %v8155_v37 = vor.u32 %v10771_v31, %v8154_v30  ;;  %v7866_v41 = vld [vmem:[#allocation7 + $0x670] sm:$0xf] }
 0x135   :  { %2933 = vmatpush.bf16.msra.mxu1 %v7363_v57  ;;  %v7650_v57 = vld [vmem:[#allocation7 + $0x4c0] sm:$0xf]  ;;  %v7459_v63 = vor.u32 %v10597_v56, %v7458_v54  ;;  %v8539_v45 = vor.u32 %v10867_v35, %v8538_v34  ;;  %v10765_v46 = vld [vmem:[#allocation7 + $0x894] sm:$0xf0]  ;;  %v7914_v56 = vld [vmem:[#allocation7 + $0x6d0] sm:$0xf] }
 0x136   :  { %2946 = vmatpush.bf16.msra.mxu2 %v7555_v58  ;;  %v10645_v58 = vld [vmem:[#allocation7 + $0x4d4] sm:$0xf0]  ;;  %v8058_v30 = vld [vmem:[#allocation7 + $0x7f0] sm:$0xf]  ;;  %v10795_v34 = vld [vmem:[#allocation7 + $0x984] sm:$0xf0] }
 0x137   :  { %2959 = vmatpush.bf16.msra.mxu3 %v7747_v62  ;;  %v7267_v62 = vor.u32 %v10549_v52, %v7266_v47  ;;  %v8322_v47 = vld [vmem:[#allocation7 + $0xa00] sm:$0xf]  ;;  %v10861_v52 = vld [vmem:[#allocation7 + $0xb94] sm:$0xf0] }
 0x138   :  { %2921 = vmatpush.bf16.msra.mxu0 %v7147_v4  ;;  %v2695_v3 = vpop.f32.mrf.mxu2  ;;  %v7651_v4 = vor.u32 %v10645_v58, %v7650_v57  ;;  %v8323_v58 = vor.u32 %v10813_v48, %v8322_v47  ;;  %v10753_v15 = vld [vmem:[#allocation7 + $0x834] sm:$0xf0]  ;;  %v7842_v47 = vld [vmem:[#allocation7 + $0x640] sm:$0xf] }
 0x139   :  { %2934 = vmatpush.bf16.msra.mxu1 %v7339_v6  ;;  %v7626_v6 = vld [vmem:[#allocation7 + $0x490] sm:$0xf]  ;;  %v2708_v8 = vpop.f32.mrf.mxu3  ;;  %v10693_v48 = vld [vmem:[#allocation7 + $0x654] sm:$0xf0] }
 0x13a   :  { %2947 = vmatpush.bf16.msra.mxu2 %v7531_v7  ;;  %v10639_v7 = vld [vmem:[#allocation7 + $0x4a4] sm:$0xf0]  ;;  %v8490_v3 = vld [vmem:[#allocation7 + $0xb50] sm:$0xf]  ;;  %v8299_v8 = vor.u32 %v10807_v2, %v8298_v1 }
 0x13b   :  { %2960 = vmatpush.bf16.msra.mxu3 %v7723_v13  ;;  %v10777_v13 = vld [vmem:[#allocation7 + $0x8f4] sm:$0xf0] }
 0x13c   :  { %2922 = vmatpush.bf16.msra.mxu0 %v7123_v24  ;;  %v7627_v24 = vor.u32 %v10639_v7, %v7626_v6  ;;  %v8107_v7 = vor.u32 %v10759_v0, %v8106_v60  ;;  %v10837_v60 = vld [vmem:[#allocation7 + $0xad4] sm:$0xf0]  ;;  %v10687_v0 = vld [vmem:[#allocation7 + $0x624] sm:$0xf0] }
 0x13d   :  { %2935 = vmatpush.bf16.msra.mxu1 %v7315_v25  ;;  %v7987_v25 = vor.u32 %v10729_v10, %v7986_v9  ;;  %v7890_v9 = vld [vmem:[#allocation7 + $0x6a0] sm:$0xf]  ;;  %v10705_v10 = vld [vmem:[#allocation7 + $0x6b4] sm:$0xf0] }
 0x13e   :  { %2948 = vmatpush.bf16.msra.mxu2 %v7507_v27  ;;  %v8179_v27 = vor.u32 %v10777_v13, %v8178_v11  ;;  %v8082_v11 = vld [vmem:[#allocation7 + $0x820] sm:$0xf] }
 0x13f   :  { %2961 = vmatpush.bf16.msra.mxu3 %v7699_v14  ;;  %v8563_v14 = vor.u32 %v10873_v23, %v8562_v19  ;;  %v8466_v19 = vld [vmem:[#allocation7 + $0xb20] sm:$0xf]  ;;  %v10849_v23 = vld [vmem:[#allocation7 + $0xb34] sm:$0xf0] }
 0x140   :  { %2923 = vmatpush.bf16.msra.mxu0 %v7099_v38  ;;  %v8347_v38 = vor.u32 %v10819_v33, %v8346_v32  ;;  %v8467_v31 = vor.u32 %v10849_v23, %v8466_v19  ;;  %v10747_v32 = vld [vmem:[#allocation7 + $0x804] sm:$0xf0]  ;;  %v8250_v33 = vld [vmem:[#allocation7 + $0x970] sm:$0xf]  ;;  %v7604_v19 = vld [vmem:[#allocation7 + $0x478] sm:$0xf0] }
 0x141   :  { %2936 = vmatpush.bf16.msra.mxu1 %v7291_v43  ;;  %v10717_v43 = vld [vmem:[#allocation7 + $0x714] sm:$0xf0] }
 0x142   :  { %2949 = vmatpush.bf16.msra.mxu2 %v7483_v44  ;;  %v8130_v44 = vld [vmem:[#allocation7 + $0x880] sm:$0xf]  ;;  %v7939_v54 = vor.u32 %v10717_v43, %v7938_v40  ;;  %v7867_v40 = vor.u32 %v10699_v29, %v7866_v41 }
 0x143   :  { %2962 = vmatpush.bf16.msra.mxu3 %v7675_v49  ;;  %v8514_v49 = vld [vmem:[#allocation7 + $0xb80] sm:$0xf]  ;;  %v8131_v57 = vor.u32 %v10765_v46, %v8130_v44  ;;  %v8251_v46 = vor.u32 %v10795_v34, %v8250_v33  ;;  %v7388_v34 = vld [vmem:[#allocation7 + $0x2c8] sm:$0xf0] }
 0x144   :  { %2924 = vmatpush.bf16.msra.mxu0 %v7075_v59  ;;  %v10711_v59 = vld [vmem:[#allocation7 + $0x6e4] sm:$0xf0] }
 0x145   :  { %2937 = vmatpush.bf16.msra.mxu1 %v7267_v62  ;;  %v554_v62 = vperm.slane %v11805_v61, 2  ;;  %v7915_v5 = vor.u32 %v10711_v59, %v7914_v56  ;;  %v10741_v56 = vld [vmem:[#allocation7 + $0x7d4] sm:$0xf0]  ;;  %v8418_v59 = vld [vmem:[#allocation7 + $0xac0] sm:$0xf] }
 0x146   :  { %2950 = vmatpush.bf16.msra.mxu2 %v7459_v63  ;;  %v8515_v63 = vor.u32 %v10861_v52, %v8514_v49  ;;  %v8034_v49 = vld [vmem:[#allocation7 + $0x7c0] sm:$0xf] }
 0x147   :  { %2963 = vmatpush.bf16.msra.mxu3 %v7651_v4  ;;  %v10855_v4 = vld [vmem:[#allocation7 + $0xb64] sm:$0xf0]  ;;  %v8035_v1 = vor.u32 %v10741_v56, %v8034_v49  ;;  %v7556_v56 = vld [vmem:[#allocation7 + $0x418] sm:$0xf0] }
 0x148   :  { %2925 = vmatpush.bf16.msra.mxu0 %v7051_v12  ;;  %v2719_v6 = vpop.f32.mrf.mxu0  ;;  %v8491_v16 = vor.u32 %v10855_v4, %v8490_v3  ;;  %v8010_v3 = vld [vmem:[#allocation7 + $0x790] sm:$0xf]  ;;  %v10735_v4 = vld [vmem:[#allocation7 + $0x7a4] sm:$0xf0] }
 0x149   :  { %2938 = vmatpush.bf16.msra.mxu1 %v7243_v17  ;;  %v2720_v12 = vadd.f32 %v2719_v6, %v554_v62  ;;  %v2732_v13 = vpop.f32.mrf.mxu1  ;;  %v8274_v17 = vld [vmem:[#allocation7 + $0x9a0] sm:$0xf]  ;;  %v7843_v62 = vor.u32 %v10693_v48, %v7842_v47  ;;  %v8011_v23 = vor.u32 %v10735_v4, %v8010_v3  ;;  %v7172_v47 = vld [vmem:[#allocation7 + $0x118] sm:$0xf0]  ;;  %v10570_v48 = vld [vmem:[#allocation7 + $0x284] sm:$0xf] }
 0x14a   :  { %2951 = vmatpush.bf16.msra.mxu2 %v7435_v18  ;;  %v10801_v18 = vld [vmem:[#allocation7 + $0x9b4] sm:$0xf0]  ;;  %v7340_v3 = vld [vmem:[#allocation7 + $0x268] sm:$0xf0]  ;;  %v10612_v4 = vld [vmem:[#allocation7 + $0x3d4] sm:$0xf] }
 0x14b   :  { %2964 = vmatpush.bf16.msra.mxu3 %v7627_v24  ;;  %2926 = vmatmul.bf16.vlgmr.msra.gmra.mxu0 %v11741_v21  ;;  %v2733_v24 = vadd.f32 %v2732_v13, %v2720_v12  ;;  %v10534_v12 = vld [vmem:[#allocation7 + $0x164] sm:$0xf]  ;;  %v7220_v13 = vld [vmem:[#allocation7 + $0x178] sm:$0xf0] }
 0x14c   :  { %2970 = vmatpush.bf16.msrb.mxu0 %v7987_v25  ;;  %2939 = vmatmul.bf16.vlgmr.msra.gmra.mxu1 %v11746_v26  ;;  %v7891_v25 = vor.u32 %v10705_v10, %v7890_v9  ;;  %v8394_v9 = vld [vmem:[#allocation7 + $0xa90] sm:$0xf]  ;;  %v10831_v10 = vld [vmem:[#allocation7 + $0xaa4] sm:$0xf0]  ;;  %v7223_v41 = vor.u32 %v10534_v12, %v7220_v13  ;;  %v10510_v13 = vld [vmem:[#allocation7 + $0xa4] sm:$0xf] }
 0x14d   :  { %2983 = vmatpush.bf16.msrb.mxu1 %v8179_v27  ;;  %2952 = vmatmul.bf16.vlgmr.msra.gmra.mxu2 %v11739_v20  ;;  %v8083_v27 = vor.u32 %v10753_v15, %v8082_v11 }
 0x14e   :  { %2996 = vmatpush.bf16.msrb.mxu2 %v8371_v28  ;;  %2965 = vmatmul.bf16.vlgmr.msra.gmra.mxu3 %v11743_v22  ;;  %v8275_v28 = vor.u32 %v10801_v18, %v8274_v17  ;;  %v7412_v17 = vld [vmem:[#allocation7 + $0x2f8] sm:$0xf0]  ;;  %v10630_v18 = vld [vmem:[#allocation7 + $0x464] sm:$0xf] }
 0x14f   :  { %3009 = vmatpush.bf16.msrb.mxu3 %v8563_v14 }
 0x150   :  { %2971 = vmatpush.bf16.msrb.mxu0 %v7963_v36  ;;  %v2745_v14 = vpop.f32.mrf.mxu2  ;;  %v2721_v44 = vpop.f32.mrf.mxu0 }
 0x151   :  { %2984 = vmatpush.bf16.msrb.mxu1 %v8155_v37  ;;  %v2746_v35 = vadd.f32 %v2745_v14, %v2733_v24  ;;  %v2758_v36 = vpop.f32.mrf.mxu3  ;;  %v8442_v37 = vld [vmem:[#allocation7 + $0xaf0] sm:$0xf]  ;;  %v2734_v52 = vpop.f32.mrf.mxu1  ;;  %v10528_v14 = vld [vmem:[#allocation7 + $0x134] sm:$0xf] }
 0x152   :  { %2997 = vmatpush.bf16.msrb.mxu2 %v8347_v38  ;;  %v10843_v38 = vld [vmem:[#allocation7 + $0xb04] sm:$0xf0]  ;;  %v7364_v52 = vld [vmem:[#allocation7 + $0x298] sm:$0xf0] }
 0x153   :  { %3010 = vmatpush.bf16.msrb.mxu3 %v8539_v45  ;;  %v11808_v43 = vadd.f32 %v2758_v36, %v2746_v35  ;;  %v8059_v45 = vor.u32 %v10747_v32, %v8058_v30  ;;  %v7607_v30 = vor.u32 %v10630_v18, %v7604_v19  ;;  %v10576_v32 = vld [vmem:[#allocation7 + $0x2b4] sm:$0xf]  ;;  %v7580_v36 = vld [vmem:[#allocation7 + $0x448] sm:$0xf0]  ;;  %v7316_v19 = vld [vmem:[#allocation7 + $0x238] sm:$0xf0] }
 0x154   :  { %2972 = vmatpush.bf16.msrb.mxu0 %v7939_v54  ;;  %v8443_v54 = vor.u32 %v10843_v38, %v8442_v37  ;;  %v10624_v35 = vld [vmem:[#allocation7 + $0x434] sm:$0xf]  ;;  %v7772_v38 = vld [vmem:[#allocation7 + $0x5c8] sm:$0xf0]  ;;  %v7391_v44 = vor.u32 %v10576_v32, %v7388_v34 }
 0x155   :  { %2985 = vmatpush.bf16.msrb.mxu1 %v8131_v57  ;;  %v8226_v57 = vld [vmem:[#allocation7 + $0x940] sm:$0xf]  ;;  %v10672_v37 = vld [vmem:[#allocation7 + $0x5b4] sm:$0xf] }
 0x156   :  { %2998 = vmatpush.bf16.msrb.mxu2 %v8323_v58  ;;  %v10789_v58 = vld [vmem:[#allocation7 + $0x954] sm:$0xf0]  ;;  %v7775_v49 = vor.u32 %v10672_v37, %v7772_v38  ;;  %v10552_v32 = vld [vmem:[#allocation7 + $0x1f4] sm:$0xf]  ;;  %v7484_v37 = vld [vmem:[#allocation7 + $0x388] sm:$0xf0] }
 0x157   :  { %3011 = vmatpush.bf16.msrb.mxu3 %v8515_v63  ;;  %v7818_v63 = vld [vmem:[#allocation7 + $0x610] sm:$0xf]  ;;  %v8227_v2 = vor.u32 %v10789_v58, %v8226_v57  ;;  %v10666_v57 = vld [vmem:[#allocation7 + $0x584] sm:$0xf]  ;;  %v7748_v58 = vld [vmem:[#allocation7 + $0x598] sm:$0xf0] }
 0x158   :  { %2973 = vmatpush.bf16.msrb.mxu0 %v7915_v5  ;;  %v8202_v5 = vld [vmem:[#allocation7 + $0x910] sm:$0xf]  ;;  %v2747_v6 = vpop.f32.mrf.mxu2  ;;  %v7819_v15 = vor.u32 %v10687_v0, %v7818_v63  ;;  %v10516_v63 = vld [vmem:[#allocation7 + $0xd4] sm:$0xf]  ;;  %v7148_v0 = vld [vmem:[#allocation7 + $0xe8] sm:$0xf0] }
 0x159   :  { %2986 = vmatpush.bf16.msrb.mxu1 %v8107_v7  ;;  %v8419_v7 = vor.u32 %v10837_v60, %v8418_v59  ;;  %v2760_v11 = vpop.f32.mrf.mxu3  ;;  %v7367_v60 = vor.u32 %v10570_v48, %v7364_v52  ;;  %v10660_v6 = vld [vmem:[#allocation7 + $0x554] sm:$0xf]  ;;  %v10498_v52 = vld [vmem:[#allocation7 + $0x44] sm:$0xf] }
 0x15a   :  { %2999 = vmatpush.bf16.msrb.mxu2 %v8299_v8  ;;  %v10783_v8 = vld [vmem:[#allocation7 + $0x924] sm:$0xf0] }
 0x15b   :  { %3012 = vmatpush.bf16.msrb.mxu3 %v8491_v16  ;;  %v10582_v16 = vld [vmem:[#allocation7 + $0x2e4] sm:$0xf]  ;;  %v8203_v24 = vor.u32 %v10783_v8, %v8202_v5  ;;  %v7532_v5 = vld [vmem:[#allocation7 + $0x3e8] sm:$0xf0]  ;;  %v7151_v8 = vor.u32 %v10516_v63, %v7148_v0  ;;  %v7652_v0 = vld [vmem:[#allocation7 + $0x4d8] sm:$0xf0] }
 0x15c   :  { %2974 = vmatpush.bf16.msrb.mxu0 %v7891_v25  ;;  %v10678_v25 = vld [vmem:[#allocation7 + $0x5e4] sm:$0xf]  ;;  %v7415_v29 = vor.u32 %v10582_v16, %v7412_v17  ;;  %v7535_v11 = vor.u32 %v10612_v4, %v7532_v5  ;;  %v7124_v16 = vld [vmem:[#allocation7 + $0xb8] sm:$0xf0] }
 0x15d   :  { %2987 = vmatpush.bf16.msrb.mxu1 %v8083_v27  ;;  %v7796_v27 = vld [vmem:[#allocation7 + $0x5f8] sm:$0xf0]  ;;  %v10642_v63 = vld [vmem:[#allocation7 + $0x4c4] sm:$0xf] }
 0x15e   :  { %3000 = vmatpush.bf16.msrb.mxu2 %v8275_v28  ;;  %v8395_v28 = vor.u32 %v10831_v10, %v8394_v9  ;;  %v7799_v33 = vor.u32 %v10678_v25, %v7796_v27  ;;  %v10654_v25 = vld [vmem:[#allocation7 + $0x524] sm:$0xf]  ;;  %v7700_v27 = vld [vmem:[#allocation7 + $0x538] sm:$0xf0] }
 0x15f   :  { %3013 = vmatpush.bf16.msrb.mxu3 %v8467_v31  ;;  %v7196_v31 = vld [vmem:[#allocation7 + $0x148] sm:$0xf0] }
 0x160   :  { %2975 = vmatpush.bf16.msrb.mxu0 %v7867_v40  ;;  %v7199_v40 = vor.u32 %v10528_v14, %v7196_v31  ;;  %v7100_v31 = vld [vmem:[#allocation7 + $0x88] sm:$0xf0] }
 0x161   :  { %2988 = vmatpush.bf16.msrb.mxu1 %v8059_v45  ;;  %v7583_v45 = vor.u32 %v10624_v35, %v7580_v36  ;;  %v7292_v35 = vld [vmem:[#allocation7 + $0x208] sm:$0xf0]  ;;  %v10600_v36 = vld [vmem:[#allocation7 + $0x374] sm:$0xf] }
 0x162   :  { %3001 = vmatpush.bf16.msrb.mxu2 %v8251_v46  ;;  %v10522_v46 = vld [vmem:[#allocation7 + $0x104] sm:$0xf]  ;;  %v7295_v48 = vor.u32 %v10552_v32, %v7292_v35  ;;  %v10720_v32 = vld [vmem:[#allocation7 + $0x734] sm:$0xf] }
 0x163   :  { %3014 = vmatpush.bf16.msrb.mxu3 %v8443_v54  ;;  %v10618_v54 = vld [vmem:[#allocation7 + $0x404] sm:$0xf]  ;;  %v7175_v59 = vor.u32 %v10522_v46, %v7172_v47 }
 0x164   :  { %2976 = vmatpush.bf16.msrb.mxu0 %v7843_v62  ;;  %v7559_v62 = vor.u32 %v10618_v54, %v7556_v56  ;;  %v7076_v54 = vld [vmem:[#allocation7 + $0x58] sm:$0xf0]  ;;  %v10546_v56 = vld [vmem:[#allocation7 + $0x1c4] sm:$0xf] }
 0x165   :  { %2989 = vmatpush.bf16.msrb.mxu1 %v8035_v1  ;;  %v10564_v1 = vld [vmem:[#allocation7 + $0x254] sm:$0xf] }
 0x166   :  { %3002 = vmatpush.bf16.msrb.mxu2 %v8227_v2  ;;  %v7751_v2 = vor.u32 %v10666_v57, %v7748_v58  ;;  %v7343_v10 = vor.u32 %v10564_v1, %v7340_v3  ;;  %v7079_v1 = vor.u32 %v10498_v52, %v7076_v54  ;;  %v7052_v3 = vld [vmem:[#allocation7 + $0x28] sm:$0xf0]  ;;  %v7940_v52 = vld [vmem:[#allocation7 + $0x718] sm:$0xf0]  ;;  %v10762_v54 = vld [vmem:[#allocation7 + $0x884] sm:$0xf] }
 0x167   :  { %3015 = vmatpush.bf16.msrb.mxu3 %v8419_v7  ;;  %v7724_v7 = vld [vmem:[#allocation7 + $0x568] sm:$0xf0] }
 0x168   :  { %2977 = vmatpush.bf16.msrb.mxu0 %v7819_v15  ;;  %v2771_v9 = vpop.f32.mrf.mxu0  ;;  %v10558_v15 = vld [vmem:[#allocation7 + $0x224] sm:$0xf]  ;;  %v7727_v18 = vor.u32 %v10660_v6, %v7724_v7  ;;  %v10540_v6 = vld [vmem:[#allocation7 + $0x194] sm:$0xf]  ;;  %v7244_v7 = vld [vmem:[#allocation7 + $0x1a8] sm:$0xf0] }
 0x169   :  { %2990 = vmatpush.bf16.msrb.mxu1 %v8011_v23  ;;  %v2772_v12 = vadd.f32 %v2771_v9, %v11808_v43  ;;  %v2784_v17 = vpop.f32.mrf.mxu1  ;;  %v10606_v23 = vld [vmem:[#allocation7 + $0x3a4] sm:$0xf]  ;;  %v10504_v43 = vld [vmem:[#allocation7 + $0x74] sm:$0xf] }
 0x16a   :  { %3003 = vmatpush.bf16.msrb.mxu2 %v8203_v24  ;;  %v7508_v24 = vld [vmem:[#allocation7 + $0x3b8] sm:$0xf0] }
 0x16b   :  { %3016 = vmatpush.bf16.msrb.mxu3 %v8395_v28  ;;  %2978 = vmatmul.bf16.vlgmr.msrb.gmra.mxu0 %v11753_v51  ;;  %v2785_v28 = vadd.f32 %v2784_v17, %v2772_v12  ;;  %v10636_v12 = vld [vmem:[#allocation7 + $0x494] sm:$0xf]  ;;  %v7988_v17 = vld [vmem:[#allocation7 + $0x778] sm:$0xf0] }
 0x16c   :  { %3022 = vmatpush.bf16.msra.mxu0 %v7223_v41  ;;  %2991 = vmatmul.bf16.vlgmr.msrb.gmra.mxu1 %v11757_v55  ;;  %v7127_v41 = vor.u32 %v10510_v13, %v7124_v16  ;;  %v7628_v13 = vld [vmem:[#allocation7 + $0x4a8] sm:$0xf0] }
 0x16d   :  { %3035 = vmatpush.bf16.msra.mxu1 %v7415_v29  ;;  %3004 = vmatmul.bf16.vlgmr.msrb.gmra.mxu2 %v11751_v50  ;;  %v7319_v29 = vor.u32 %v10558_v15, %v7316_v19  ;;  %v10726_v15 = vld [vmem:[#allocation7 + $0x764] sm:$0xf] }
 0x16e   :  { %3048 = vmatpush.bf16.msra.mxu2 %v7607_v30  ;;  %3017 = vmatmul.bf16.vlgmr.msrb.gmra.mxu3 %v11755_v53  ;;  %v7511_v30 = vor.u32 %v10606_v23, %v7508_v24  ;;  %v8180_v23 = vld [vmem:[#allocation7 + $0x8f8] sm:$0xf0]  ;;  %v10822_v24 = vld [vmem:[#allocation7 + $0xa64] sm:$0xf] }
 0x16f   :  { %3061 = vmatpush.bf16.msra.mxu3 %v7799_v33  ;;  %v7703_v33 = vor.u32 %v10654_v25, %v7700_v27  ;;  %v8372_v25 = vld [vmem:[#allocation7 + $0xa78] sm:$0xf0]  ;;  %v7247_v27 = vor.u32 %v10540_v6, %v7244_v7  ;;  %v8108_v6 = vld [vmem:[#allocation7 + $0x868] sm:$0xf0]  ;;  %v10804_v7 = vld [vmem:[#allocation7 + $0x9d4] sm:$0xf] }
 0x170   :  { %3023 = vmatpush.bf16.msra.mxu0 %v7199_v40  ;;  %v2797_v14 = vpop.f32.mrf.mxu2  ;;  %v10648_v40 = vld [vmem:[#allocation7 + $0x4f4] sm:$0xf]  ;;  %v2773_v47 = vpop.f32.mrf.mxu0 }
 0x171   :  { %3036 = vmatpush.bf16.msra.mxu1 %v7391_v44  ;;  %v2798_v34 = vadd.f32 %v2797_v14, %v2785_v28  ;;  %v2810_v38 = vpop.f32.mrf.mxu3  ;;  %v7676_v44 = vld [vmem:[#allocation7 + $0x508] sm:$0xf0]  ;;  %v2786_v57 = vpop.f32.mrf.mxu1  ;;  %v7991_v14 = vor.u32 %v10726_v15, %v7988_v17 }
 0x172   :  { %3049 = vmatpush.bf16.msra.mxu2 %v7583_v45  ;;  %v7103_v45 = vor.u32 %v10504_v43, %v7100_v31  ;;  %v7679_v58 = vor.u32 %v10648_v40, %v7676_v44  ;;  %v8375_v31 = vor.u32 %v10822_v24, %v8372_v25  ;;  %v10864_v40 = vld [vmem:[#allocation7 + $0xbb4] sm:$0xf]  ;;  %v8540_v44 = vld [vmem:[#allocation7 + $0xbc8] sm:$0xf0]  ;;  %v8132_v57 = vld [vmem:[#allocation7 + $0x898] sm:$0xf0] }
 0x173   :  { %3062 = vmatpush.bf16.msra.mxu3 %v7775_v49  ;;  %v11815_v46 = vadd.f32 %v2810_v38, %v2798_v34  ;;  %v7487_v49 = vor.u32 %v10600_v36, %v7484_v37  ;;  %v10768_v34 = vld [vmem:[#allocation7 + $0x8b4] sm:$0xf]  ;;  %v8156_v36 = vld [vmem:[#allocation7 + $0x8c8] sm:$0xf0]  ;;  %v10846_v24 = vld [vmem:[#allocation7 + $0xb24] sm:$0xf] }
 0x174   :  { %3024 = vmatpush.bf16.msra.mxu0 %v7175_v59  ;;  %v7268_v59 = vld [vmem:[#allocation7 + $0x1d8] sm:$0xf0]  ;;  %v10816_v37 = vld [vmem:[#allocation7 + $0xa34] sm:$0xf]  ;;  %v8348_v38 = vld [vmem:[#allocation7 + $0xa48] sm:$0xf0]  ;;  %v8159_v47 = vor.u32 %v10768_v34, %v8156_v36 }
 0x175   :  { %3037 = vmatpush.bf16.msra.mxu1 %v7367_v60  ;;  %v10594_v60 = vld [vmem:[#allocation7 + $0x344] sm:$0xf]  ;;  %v7271_v4 = vor.u32 %v10546_v56, %v7268_v59  ;;  %v8543_v56 = vor.u32 %v10864_v40, %v8540_v44  ;;  %v8324_v59 = vld [vmem:[#allocation7 + $0xa18] sm:$0xf0]  ;;  %v10792_v34 = vld [vmem:[#allocation7 + $0x974] sm:$0xf] }
 0x176   :  { %3050 = vmatpush.bf16.msra.mxu2 %v7559_v62  ;;  %v7460_v62 = vld [vmem:[#allocation7 + $0x358] sm:$0xf0]  ;;  %v8444_v40 = vld [vmem:[#allocation7 + $0xb08] sm:$0xf0] }
 0x177   :  { %3063 = vmatpush.bf16.msra.mxu3 %v7751_v2  ;;  %v10492_v2 = vld [vmem:[#allocation7 + $0x14] sm:$0xf]  ;;  %v7463_v5 = vor.u32 %v10594_v60, %v7460_v62  ;;  %v10858_v60 = vld [vmem:[#allocation7 + $0xb84] sm:$0xf]  ;;  %v8516_v62 = vld [vmem:[#allocation7 + $0xb98] sm:$0xf0] }
 0x178   :  { %3025 = vmatpush.bf16.msra.mxu0 %v7151_v8  ;;  %v10588_v8 = vld [vmem:[#allocation7 + $0x314] sm:$0xf]  ;;  %v2799_v9 = vpop.f32.mrf.mxu2  ;;  %v7055_v19 = vor.u32 %v10492_v2, %v7052_v3  ;;  %v7916_v3 = vld [vmem:[#allocation7 + $0x6e8] sm:$0xf0]  ;;  %v8468_v25 = vld [vmem:[#allocation7 + $0xb38] sm:$0xf0] }
 0x179   :  { %3038 = vmatpush.bf16.msra.mxu1 %v7343_v10  ;;  %v7655_v10 = vor.u32 %v10642_v63, %v7652_v0  ;;  %v2812_v16 = vpop.f32.mrf.mxu3  ;;  %v10708_v0 = vld [vmem:[#allocation7 + $0x6d4] sm:$0xf] }
 0x17a   :  { %3051 = vmatpush.bf16.msra.mxu2 %v7535_v11  ;;  %v7436_v11 = vld [vmem:[#allocation7 + $0x328] sm:$0xf0]  ;;  %v7919_v9 = vor.u32 %v10708_v0, %v7916_v3  ;;  %v10750_v16 = vld [vmem:[#allocation7 + $0x824] sm:$0xf]  ;;  %v8420_v0 = vld [vmem:[#allocation7 + $0xad8] sm:$0xf0] }
 0x17b   :  { %3064 = vmatpush.bf16.msra.mxu3 %v7727_v18  ;;  %v10774_v18 = vld [vmem:[#allocation7 + $0x8e4] sm:$0xf]  ;;  %v7439_v28 = vor.u32 %v10588_v8, %v7436_v11  ;;  %v10852_v8 = vld [vmem:[#allocation7 + $0xb54] sm:$0xf]  ;;  %v7820_v3 = vld [vmem:[#allocation7 + $0x628] sm:$0xf0] }
 0x17c   :  { %3026 = vmatpush.bf16.msra.mxu0 %v7127_v41  ;;  %v10870_v41 = vld [vmem:[#allocation7 + $0xbe4] sm:$0xf]  ;;  %v8183_v43 = vor.u32 %v10774_v18, %v8180_v23  ;;  %v8084_v18 = vld [vmem:[#allocation7 + $0x838] sm:$0xf0] }
 0x17d   :  { %3039 = vmatpush.bf16.msra.mxu1 %v7319_v29  ;;  %v8564_v29 = vld [vmem:[#allocation7 + $0xbf8] sm:$0xf0] }
 0x17e   :  { %3052 = vmatpush.bf16.msra.mxu2 %v7511_v30  ;;  %v7631_v30 = vor.u32 %v10636_v12, %v7628_v13  ;;  %v8567_v35 = vor.u32 %v10870_v41, %v8564_v29  ;;  %v10702_v12 = vld [vmem:[#allocation7 + $0x6a4] sm:$0xf]  ;;  %v7892_v13 = vld [vmem:[#allocation7 + $0x6b8] sm:$0xf0]  ;;  %v8087_v41 = vor.u32 %v10750_v16, %v8084_v18 }
 0x17f   :  { %3065 = vmatpush.bf16.msra.mxu3 %v7703_v33  ;;  %v7964_v33 = vld [vmem:[#allocation7 + $0x748] sm:$0xf0]  ;;  %v8276_v23 = vld [vmem:[#allocation7 + $0x9b8] sm:$0xf0] }
 0x180   :  { %3027 = vmatpush.bf16.msra.mxu0 %v7103_v45  ;;  %v7967_v45 = vor.u32 %v10720_v32, %v7964_v33  ;;  %v8471_v32 = vor.u32 %v10846_v24, %v8468_v25  ;;  %v8060_v33 = vld [vmem:[#allocation7 + $0x808] sm:$0xf0]  ;;  %v11126_v24 = vld [vmem:[#allocation10 + $0x7dc] sm:$0xf0] }
 0x181   :  { %3040 = vmatpush.bf16.msra.mxu1 %v7295_v48  ;;  %v8351_v48 = vor.u32 %v10816_v37, %v8348_v38  ;;  %v10840_v38 = vld [vmem:[#allocation7 + $0xaf4] sm:$0xf] }
 0x182   :  { %3053 = vmatpush.bf16.msra.mxu2 %v7487_v49  ;;  %v10714_v49 = vld [vmem:[#allocation7 + $0x704] sm:$0xf] }
 0x183   :  { %3066 = vmatpush.bf16.msra.mxu3 %v7679_v58  ;;  %v10810_v58 = vld [vmem:[#allocation7 + $0xa04] sm:$0xf]  ;;  %v7943_v63 = vor.u32 %v10714_v49, %v7940_v52 }
 0x184   :  { %3028 = vmatpush.bf16.msra.mxu0 %v7079_v1  ;;  %v8135_v1 = vor.u32 %v10762_v54, %v8132_v57  ;;  %v8327_v2 = vor.u32 %v10810_v58, %v8324_v59  ;;  %v10690_v52 = vld [vmem:[#allocation7 + $0x644] sm:$0xf]  ;;  %v7844_v54 = vld [vmem:[#allocation7 + $0x658] sm:$0xf0]  ;;  %v8447_v58 = vor.u32 %v10840_v38, %v8444_v40 }
 0x185   :  { %3041 = vmatpush.bf16.msra.mxu1 %v7271_v4  ;;  %v10756_v4 = vld [vmem:[#allocation7 + $0x854] sm:$0xf]  ;;  %v8036_v59 = vld [vmem:[#allocation7 + $0x7d8] sm:$0xf0]  ;;  %v8730_v40 = vld [vmem:[#allocation10 + $0x140] sm:$0xf] }
 0x186   :  { %3054 = vmatpush.bf16.msra.mxu2 %v7463_v5  ;;  %v555_v5 = vperm.slane %v11805_v61, 3 }
 0x187   :  { %3067 = vmatpush.bf16.msra.mxu3 %v7655_v10 }
 0x188   :  { %3029 = vmatpush.bf16.msra.mxu0 %v7055_v19  ;;  %v2823_v10 = vpop.f32.mrf.mxu0  ;;  %v10798_v19 = vld [vmem:[#allocation7 + $0x9a4] sm:$0xf] }
 0x189   :  { %3042 = vmatpush.bf16.msra.mxu1 %v7247_v27  ;;  %v2824_v15 = vadd.f32 %v2823_v10, %v555_v5  ;;  %v2836_v17 = vpop.f32.mrf.mxu1  ;;  %v8279_v29 = vor.u32 %v10798_v19, %v8276_v23  ;;  %v8396_v10 = vld [vmem:[#allocation7 + $0xaa8] sm:$0xf0]  ;;  %v9562_v23 = vld [vmem:[#allocation10 + $0x7c0] sm:$0xf] }
 0x18a   :  { %3055 = vmatpush.bf16.msra.mxu2 %v7439_v28  ;;  %v7895_v28 = vor.u32 %v10702_v12, %v7892_v13  ;;  %v10934_v12 = vld [vmem:[#allocation10 + $0x1dc] sm:$0xf0] }
 0x18b   :  { %3068 = vmatpush.bf16.msra.mxu3 %v7631_v30  ;;  %3030 = vmatmul.bf16.vlgmr.msra.gmra.mxu0 %v11741_v21  ;;  %v8300_v21 = vld [vmem:[#allocation7 + $0x9e8] sm:$0xf0]  ;;  %v2837_v27 = vadd.f32 %v2836_v17, %v2824_v15  ;;  %v10696_v30 = vld [vmem:[#allocation7 + $0x674] sm:$0xf]  ;;  %v9050_v13 = vld [vmem:[#allocation10 + $0x3c0] sm:$0xf] }
 0x18c   :  { %3074 = vmatpush.bf16.msrb.mxu0 %v7991_v14  ;;  %3043 = vmatmul.bf16.vlgmr.msra.gmra.mxu1 %v11746_v26  ;;  %v8111_v26 = vor.u32 %v10756_v4, %v8108_v6  ;;  %v8303_v11 = vor.u32 %v10804_v7, %v8300_v21  ;;  %v7868_v14 = vld [vmem:[#allocation7 + $0x688] sm:$0xf0]  ;;  %v10780_v7 = vld [vmem:[#allocation7 + $0x914] sm:$0xf]  ;;  %v10998_v15 = vld [vmem:[#allocation10 + $0x3dc] sm:$0xf0] }
 0x18d   :  { %3087 = vmatpush.bf16.msrb.mxu1 %v8183_v43  ;;  %3056 = vmatmul.bf16.vlgmr.msra.gmra.mxu2 %v11739_v20  ;;  %v8519_v20 = vor.u32 %v10858_v60, %v8516_v62  ;;  %v10744_v43 = vld [vmem:[#allocation7 + $0x7f4] sm:$0xf]  ;;  %v7871_v44 = vor.u32 %v10696_v30, %v7868_v14  ;;  %v10786_v60 = vld [vmem:[#allocation7 + $0x944] sm:$0xf]  ;;  %v8228_v62 = vld [vmem:[#allocation7 + $0x958] sm:$0xf0] }
 0x18e   :  { %3100 = vmatpush.bf16.msrb.mxu2 %v8375_v31  ;;  %3069 = vmatmul.bf16.vlgmr.msra.gmra.mxu3 %v11743_v22  ;;  %v8492_v22 = vld [vmem:[#allocation7 + $0xb68] sm:$0xf0]  ;;  %v8231_v5 = vor.u32 %v10786_v60, %v8228_v62  ;;  %v9306_v17 = vld [vmem:[#allocation10 + $0x5c0] sm:$0xf] }
 0x18f   :  { %3113 = vmatpush.bf16.msrb.mxu3 %v8567_v35  ;;  %v8495_v61 = vor.u32 %v10852_v8, %v8492_v22  ;;  %v8252_v35 = vld [vmem:[#allocation7 + $0x988] sm:$0xf0]  ;;  %v10926_v30 = vld [vmem:[#allocation10 + $0x19c] sm:$0xf0] }
 0x190   :  { %3075 = vmatpush.bf16.msrb.mxu0 %v7967_v45  ;;  %v2849_v31 = vpop.f32.mrf.mxu2  ;;  %v8255_v49 = vor.u32 %v10792_v34, %v8252_v35  ;;  %v8012_v6 = vld [vmem:[#allocation7 + $0x7a8] sm:$0xf0]  ;;  %v9018_v14 = vld [vmem:[#allocation10 + $0x380] sm:$0xf] }
 0x191   :  { %3088 = vmatpush.bf16.msrb.mxu1 %v8159_v47  ;;  %v2850_v36 = vadd.f32 %v2849_v31, %v2837_v27  ;;  %v2862_v37 = vpop.f32.mrf.mxu3  ;;  %v2825_v47 = vpop.f32.mrf.mxu0  ;;  %v8204_v22 = vld [vmem:[#allocation7 + $0x928] sm:$0xf0]  ;;  %v10990_v31 = vld [vmem:[#allocation10 + $0x39c] sm:$0xf0] }
 0x192   :  { %3101 = vmatpush.bf16.msrb.mxu2 %v8351_v48  ;;  %v8063_v48 = vor.u32 %v10744_v43, %v8060_v33  ;;  %v2838_v57 = vpop.f32.mrf.mxu1  ;;  %v8207_v19 = vor.u32 %v10780_v7, %v8204_v22  ;;  %v9563_v43 = vor.u32 %v11126_v24, %v9562_v23  ;;  %v11054_v33 = vld [vmem:[#allocation10 + $0x59c] sm:$0xf0] }
 0x193   :  { %3114 = vmatpush.bf16.msrb.mxu3 %v8543_v56  ;;  %v11822_v45 = vadd.f32 %v2862_v37, %v2850_v36  ;;  %v10738_v56 = vld [vmem:[#allocation7 + $0x7c4] sm:$0xf]  ;;  %v9019_v37 = vor.u32 %v10990_v31, %v9018_v14 }
 0x194   :  { %3076 = vmatpush.bf16.msrb.mxu0 %v7943_v63  ;;  %v10834_v63 = vld [vmem:[#allocation7 + $0xac4] sm:$0xf]  ;;  %v8039_v4 = vor.u32 %v10738_v56, %v8036_v59 }
 0x195   :  { %3089 = vmatpush.bf16.msrb.mxu1 %v8135_v1  ;;  %v7847_v1 = vor.u32 %v10690_v52, %v7844_v54  ;;  %v8423_v8 = vor.u32 %v10834_v63, %v8420_v0  ;;  %v9530_v34 = vld [vmem:[#allocation10 + $0x780] sm:$0xf] }
 0x196   :  { %3102 = vmatpush.bf16.msrb.mxu2 %v8327_v2  ;;  %v10684_v2 = vld [vmem:[#allocation7 + $0x614] sm:$0xf]  ;;  %v11118_v35 = vld [vmem:[#allocation10 + $0x79c] sm:$0xf0] }
 0x197   :  { %3115 = vmatpush.bf16.msrb.mxu3 %v8519_v20  ;;  %v10732_v20 = vld [vmem:[#allocation7 + $0x794] sm:$0xf]  ;;  %v7823_v16 = vor.u32 %v10684_v2, %v7820_v3  ;;  %v8986_v47 = vld [vmem:[#allocation10 + $0x340] sm:$0xf] }
 0x198   :  { %3077 = vmatpush.bf16.msrb.mxu0 %v7919_v9  ;;  %v2851_v21 = vpop.f32.mrf.mxu2  ;;  %v10828_v9 = vld [vmem:[#allocation7 + $0xa94] sm:$0xf]  ;;  %v8015_v18 = vor.u32 %v10732_v20, %v8012_v6  ;;  %v9242_v52 = vld [vmem:[#allocation10 + $0x540] sm:$0xf] }
 0x199   :  { %3090 = vmatpush.bf16.msrb.mxu1 %v8111_v26  ;;  %v2864_v26 = vpop.f32.mrf.mxu3  ;;  %v8399_v25 = vor.u32 %v10828_v9, %v8396_v10  ;;  %v11046_v54 = vld [vmem:[#allocation10 + $0x55c] sm:$0xf0] }
 0x19a   :  { %3103 = vmatpush.bf16.msrb.mxu2 %v8303_v11  ;;  %v8794_v11 = vld [vmem:[#allocation10 + $0x1c0] sm:$0xf]  ;;  %v9243_v60 = vor.u32 %v11046_v54, %v9242_v52 }
 0x19b   :  { %3116 = vmatpush.bf16.msrb.mxu3 %v8495_v61  ;;  %v11062_v61 = vld [vmem:[#allocation10 + $0x5dc] sm:$0xf0]  ;;  %v8795_v27 = vor.u32 %v10934_v12, %v8794_v11 }
 0x19c   :  { %3078 = vmatpush.bf16.msrb.mxu0 %v7895_v28  ;;  %v9051_v28 = vor.u32 %v10998_v15, %v9050_v13  ;;  %v9498_v56 = vld [vmem:[#allocation10 + $0x740] sm:$0xf] }
 0x19d   :  { %3091 = vmatpush.bf16.msrb.mxu1 %v8087_v41  ;;  %v9307_v41 = vor.u32 %v11062_v61, %v9306_v17  ;;  %v11110_v57 = vld [vmem:[#allocation10 + $0x75c] sm:$0xf0] }
 0x19e   :  { %3104 = vmatpush.bf16.msrb.mxu2 %v8279_v29  ;;  %v8762_v29 = vld [vmem:[#allocation10 + $0x180] sm:$0xf]  ;;  %v9499_v0 = vor.u32 %v11110_v57, %v9498_v56 }
 0x19f   :  { %3117 = vmatpush.bf16.msrb.mxu3 %v8471_v32  ;;  %v9274_v32 = vld [vmem:[#allocation10 + $0x580] sm:$0xf]  ;;  %v8763_v36 = vor.u32 %v10926_v30, %v8762_v29 }
 0x1a0   :  { %3079 = vmatpush.bf16.msrb.mxu0 %v7871_v44  ;;  %v9275_v38 = vor.u32 %v11054_v33, %v9274_v32  ;;  %v10918_v44 = vld [vmem:[#allocation10 + $0x15c] sm:$0xf0] }
 0x1a1   :  { %3092 = vmatpush.bf16.msrb.mxu1 %v8063_v48  ;;  %v9531_v48 = vor.u32 %v11118_v35, %v9530_v34  ;;  %v8698_v62 = vld [vmem:[#allocation10 + $0x100] sm:$0xf] }
 0x1a2   :  { %3105 = vmatpush.bf16.msrb.mxu2 %v8255_v49  ;;  %v10982_v49 = vld [vmem:[#allocation10 + $0x35c] sm:$0xf0] }
 0x1a3   :  { %3118 = vmatpush.bf16.msrb.mxu3 %v8447_v58  ;;  %v8731_v58 = vor.u32 %v10918_v44, %v8730_v40  ;;  %v8987_v59 = vor.u32 %v10982_v49, %v8986_v47  ;;  %v8954_v63 = vld [vmem:[#allocation10 + $0x300] sm:$0xf] }
 0x1a4   :  { %3080 = vmatpush.bf16.msrb.mxu0 %v7847_v1  ;;  %v10974_v1 = vld [vmem:[#allocation10 + $0x31c] sm:$0xf0] }
 0x1a5   :  { %3093 = vmatpush.bf16.msrb.mxu1 %v8039_v4  ;;  %v9210_v2 = vld [vmem:[#allocation10 + $0x500] sm:$0xf] }
 0x1a6   :  { %3106 = vmatpush.bf16.msrb.mxu2 %v8231_v5  ;;  %v9466_v3 = vld [vmem:[#allocation10 + $0x700] sm:$0xf] }
 0x1a7   :  { %3119 = vmatpush.bf16.msrb.mxu3 %v8423_v8  ;;  %v8666_v7 = vld [vmem:[#allocation10 + $0xc0] sm:$0xf] }
 0x1a8   :  { %3081 = vmatpush.bf16.msrb.mxu0 %v7823_v16  ;;  %v2875_v5 = vpop.f32.mrf.mxu0  ;;  %v10902_v21 = vld [vmem:[#allocation10 + $0xdc] sm:$0xf0] }
 0x1a9   :  { %3094 = vmatpush.bf16.msrb.mxu1 %v8015_v18  ;;  %v2876_v6 = vadd.f32 %v2875_v5, %v11822_v45  ;;  %v8922_v8 = vld [vmem:[#allocation10 + $0x2c0] sm:$0xf]  ;;  %v2888_v22 = vpop.f32.mrf.mxu1  ;;  %v8667_v15 = vor.u32 %v10902_v21, %v8666_v7  ;;  %v8796_v7 = vld [vmem:[#allocation10 + $0x1e0] sm:$0xf0] }
 0x1aa   :  { %3107 = vmatpush.bf16.msrb.mxu2 %v8207_v19  ;;  %v10966_v10 = vld [vmem:[#allocation10 + $0x2dc] sm:$0xf0] }
 0x1ab   :  { %3120 = vmatpush.bf16.msrb.mxu3 %v8399_v25  ;;  %3082 = vmatmul.bf16.vlgmr.msrb.gmra.mxu0 %v11753_v51  ;;  %v11038_v51 = vld [vmem:[#allocation10 + $0x51c] sm:$0xf0]  ;;  %v2889_v16 = vadd.f32 %v2888_v22, %v2876_v6  ;;  %v8923_v17 = vor.u32 %v10966_v10, %v8922_v8  ;;  %v10930_v6 = vld [vmem:[#allocation10 + $0x1c4] sm:$0xf] }
 0x1ac   :  { %5462 = vmatpush.bf16.msra.mxu0 %v8795_v27  ;;  %3095 = vmatmul.bf16.vlgmr.msrb.gmra.mxu1 %v11757_v55  ;;  %v8955_v55 = vor.u32 %v10974_v1, %v8954_v63  ;;  %v9211_v20 = vor.u32 %v11038_v51, %v9210_v2  ;;  %v9178_v26 = vld [vmem:[#allocation10 + $0x4c0] sm:$0xf]  ;;  %v10994_v22 = vld [vmem:[#allocation10 + $0x3c4] sm:$0xf] }
 0x1ad   :  { %5475 = vmatpush.bf16.msra.mxu1 %v9051_v28  ;;  %3108 = vmatmul.bf16.vlgmr.msrb.gmra.mxu2 %v11751_v50  ;;  %v10910_v50 = vld [vmem:[#allocation10 + $0x11c] sm:$0xf0] }
 0x1ae   :  { %5488 = vmatpush.bf16.msra.mxu2 %v9307_v41  ;;  %3121 = vmatmul.bf16.vlgmr.msrb.gmra.mxu3 %v11755_v53  ;;  %v11102_v53 = vld [vmem:[#allocation10 + $0x71c] sm:$0xf0]  ;;  %v8699_v4 = vor.u32 %v10910_v50, %v8698_v62 }
 0x1af   :  { %5501 = vmatpush.bf16.msra.mxu3 %v9563_v43  ;;  %v9467_v9 = vor.u32 %v11102_v53, %v9466_v3  ;;  %v11030_v11 = vld [vmem:[#allocation10 + $0x4dc] sm:$0xf0] }
 0x1b0   :  { %5463 = vmatpush.bf16.msra.mxu0 %v8763_v36  ;;  %v9434_v12 = vld [vmem:[#allocation10 + $0x6c0] sm:$0xf]  ;;  %v9179_v61 = vor.u32 %v11030_v11, %v9178_v26  ;;  %v2901_v18 = vpop.f32.mrf.mxu2  ;;  %v2877_v32 = vpop.f32.mrf.mxu0 }
 0x1b1   :  { %5476 = vmatpush.bf16.msra.mxu1 %v9019_v37  ;;  %v11094_v13 = vld [vmem:[#allocation10 + $0x6dc] sm:$0xf0]  ;;  %v2902_v25 = vadd.f32 %v2901_v18, %v2889_v16  ;;  %v2914_v29 = vpop.f32.mrf.mxu3  ;;  %v10922_v18 = vld [vmem:[#allocation10 + $0x184] sm:$0xf] }
 0x1b2   :  { %5489 = vmatpush.bf16.msra.mxu2 %v9275_v38  ;;  %v8634_v45 = vld [vmem:[#allocation10 + $0x80] sm:$0xf]  ;;  %v9435_v24 = vor.u32 %v11094_v13, %v9434_v12  ;;  %v2890_v38 = vpop.f32.mrf.mxu1  ;;  %v8799_v12 = vor.u32 %v10930_v6, %v8796_v7  ;;  %v10898_v6 = vld [vmem:[#allocation10 + $0xc4] sm:$0xf] }
 0x1b3   :  { %5502 = vmatpush.bf16.msra.mxu3 %v9531_v48  ;;  %v10894_v19 = vld [vmem:[#allocation10 + $0x9c] sm:$0xf0]  ;;  %v11829_v31 = vadd.f32 %v2914_v29, %v2902_v25  ;;  %v8988_v38 = vld [vmem:[#allocation10 + $0x360] sm:$0xf0] }
 0x1b4   :  { %5464 = vmatpush.bf16.msra.mxu0 %v8731_v58  ;;  %v8890_v23 = vld [vmem:[#allocation10 + $0x280] sm:$0xf]  ;;  %v8635_v43 = vor.u32 %v10894_v19, %v8634_v45  ;;  %v8764_v45 = vld [vmem:[#allocation10 + $0x1a0] sm:$0xf0] }
 0x1b5   :  { %5477 = vmatpush.bf16.msra.mxu1 %v8987_v59  ;;  %v10958_v27 = vld [vmem:[#allocation10 + $0x29c] sm:$0xf0]  ;;  %v10986_v19 = vld [vmem:[#allocation10 + $0x384] sm:$0xf] }
 0x1b6   :  { %5490 = vmatpush.bf16.msra.mxu2 %v9243_v60  ;;  %v9146_v28 = vld [vmem:[#allocation10 + $0x480] sm:$0xf]  ;;  %v8891_v33 = vor.u32 %v10958_v27, %v8890_v23  ;;  %v9020_v23 = vld [vmem:[#allocation10 + $0x3a0] sm:$0xf0] }
 0x1b7   :  { %5503 = vmatpush.bf16.msra.mxu3 %v9499_v0  ;;  %v11022_v41 = vld [vmem:[#allocation10 + $0x49c] sm:$0xf0]  ;;  %v8668_v7 = vld [vmem:[#allocation10 + $0xe0] sm:$0xf0] }
 0x1b8   :  { %5465 = vmatpush.bf16.msra.mxu0 %v8699_v4  ;;  %v9402_v30 = vld [vmem:[#allocation10 + $0x680] sm:$0xf]  ;;  %v9147_v34 = vor.u32 %v11022_v41, %v9146_v28  ;;  %v2903_v63 = vpop.f32.mrf.mxu2  ;;  %v11833_v28 = vld [vmem:[#allocation1 + $0x9] sm:$0xff]  ;;  %v11835_v41 = vld [vmem:[#allocation1 + $0x12] sm:$0xff] }
 0x1b9   :  { %5478 = vmatpush.bf16.msra.mxu1 %v8955_v55  ;;  %v11086_v14 = vld [vmem:[#allocation10 + $0x69c] sm:$0xf0]  ;;  %v2916_v3 = vpop.f32.mrf.mxu3 }
 0x1ba   :  { %5491 = vmatpush.bf16.msra.mxu2 %v9211_v20  ;;  %v8602_v35 = vld [vmem:[#allocation10 + $0x40] sm:$0xf]  ;;  %v9403_v40 = vor.u32 %v11086_v14, %v9402_v30  ;;  %v8767_v30 = vor.u32 %v10922_v18, %v8764_v45  ;;  %v8636_v18 = vld [vmem:[#allocation10 + $0xa0] sm:$0xf0] }
 0x1bb   :  { %5504 = vmatpush.bf16.msra.mxu3 %v9467_v9  ;;  %v10886_v36 = vld [vmem:[#allocation10 + $0x5c] sm:$0xf0]  ;;  %v9052_v9 = vld [vmem:[#allocation10 + $0x3e0] sm:$0xf0] }
 0x1bc   :  { %5466 = vmatpush.bf16.msra.mxu0 %v8667_v15  ;;  %v8858_v37 = vld [vmem:[#allocation10 + $0x240] sm:$0xf]  ;;  %v8603_v54 = vor.u32 %v10886_v36, %v8602_v35  ;;  %v10914_v35 = vld [vmem:[#allocation10 + $0x144] sm:$0xf] }
 0x1bd   :  { %5479 = vmatpush.bf16.msra.mxu1 %v8923_v17  ;;  %v10950_v44 = vld [vmem:[#allocation10 + $0x25c] sm:$0xf0]  ;;  %v9055_v17 = vor.u32 %v10994_v22, %v9052_v9  ;;  %v8732_v36 = vld [vmem:[#allocation10 + $0x160] sm:$0xf0] }
 0x1be   :  { %5492 = vmatpush.bf16.msra.mxu2 %v9179_v61  ;;  %v9114_v47 = vld [vmem:[#allocation10 + $0x440] sm:$0xf]  ;;  %v8859_v58 = vor.u32 %v10950_v44, %v8858_v37  ;;  %v10978_v37 = vld [vmem:[#allocation10 + $0x344] sm:$0xf] }
 0x1bf   :  { %5505 = vmatpush.bf16.msra.mxu3 %v9435_v24  ;;  %v11014_v48 = vld [vmem:[#allocation10 + $0x45c] sm:$0xf0]  ;;  %v11831_v24 = vld [vmem:[#allocation1] sm:$0xff] }
 0x1c0   :  { %v9370_v49 = vld [vmem:[#allocation10 + $0x640] sm:$0xf]  ;;  %5467 = vmatpush.bf16.msra.mxu0 %v8635_v43  ;;  %v9115_v59 = vor.u32 %v11014_v48, %v9114_v47  ;;  %v8735_v48 = vor.u32 %v10914_v35, %v8732_v36 }
 0x1c1   :  { %v11078_v52 = vld [vmem:[#allocation10 + $0x65c] sm:$0xf0]  ;;  %5480 = vmatpush.bf16.msra.mxu1 %v8891_v33  ;;  %v9023_v33 = vor.u32 %v10986_v19, %v9020_v23  ;;  %v10954_v23 = vld [vmem:[#allocation10 + $0x284] sm:$0xf] }
 0x1c2   :  { %v8570_v56 = vld [vmem:[#allocation10] sm:$0xf]  ;;  %5493 = vmatpush.bf16.msra.mxu2 %v9147_v34  ;;  %v9371_v0 = vor.u32 %v11078_v52, %v9370_v49 }
 0x1c3   :  { %v10878_v57 = vld [vmem:[#allocation10 + $0x1c] sm:$0xf0]  ;;  %5506 = vmatpush.bf16.msra.mxu3 %v9403_v40 }
 0x1c4   :  { %v8826_v60 = vld [vmem:[#allocation10 + $0x200] sm:$0xf]  ;;  %5468 = vmatpush.bf16.msra.mxu0 %v8603_v54  ;;  %v8571_v55 = vor.u32 %v10878_v57, %v8570_v56  ;;  %v11843_v54 = vld [vmem:[#allocation8] sm:$0x3f]  ;;  %v8991_v57 = vor.u32 %v10978_v37, %v8988_v38 }
 0x1c5   :  { %v10942_v62 = vld [vmem:[#allocation10 + $0x21c] sm:$0xf0]  ;;  %5481 = vmatpush.bf16.msra.mxu1 %v8859_v58  ;;  %v556_v56 = vperm.slane %v11843_v54, 4 }
 0x1c6   :  { %v9082_v50 = vld [vmem:[#allocation10 + $0x400] sm:$0xf]  ;;  %5494 = vmatpush.bf16.msra.mxu2 %v9115_v59  ;;  %v8827_v21 = vor.u32 %v10942_v62, %v8826_v60  ;;  %v10906_v59 = vld [vmem:[#allocation10 + $0x104] sm:$0xf] }
 0x1c7   :  { %v11006_v1 = vld [vmem:[#allocation10 + $0x41c] sm:$0xf0]  ;;  %5507 = vmatpush.bf16.msra.mxu3 %v9371_v0  ;;  %v8700_v60 = vld [vmem:[#allocation10 + $0x120] sm:$0xf0] }
 0x1c8   :  { %v9338_v2 = vld [vmem:[#allocation10 + $0x600] sm:$0xf]  ;;  %v9083_v8 = vor.u32 %v11006_v1, %v9082_v50  ;;  %5469 = vmatpush.bf16.msra.mxu0 %v8571_v55  ;;  %v10970_v62 = vld [vmem:[#allocation10 + $0x304] sm:$0xf]  ;;  %v2927_v0 = vpop.f32.mrf.mxu0 }
 0x1c9   :  { %v11070_v51 = vld [vmem:[#allocation10 + $0x61c] sm:$0xf0]  ;;  %5482 = vmatpush.bf16.msra.mxu1 %v8827_v21  ;;  %v8956_v50 = vld [vmem:[#allocation10 + $0x320] sm:$0xf0] }
 0x1ca   :  { %v9818_v53 = vld [vmem:[#allocation10 + $0x9c0] sm:$0xf]  ;;  %v9339_v10 = vor.u32 %v11070_v51, %v9338_v2  ;;  %5495 = vmatpush.bf16.msra.mxu2 %v9083_v8  ;;  %v8703_v2 = vor.u32 %v10906_v59, %v8700_v60  ;;  %v8959_v55 = vor.u32 %v10970_v62, %v8956_v50  ;;  %v10962_v21 = vld [vmem:[#allocation10 + $0x2c4] sm:$0xf] }
 0x1cb   :  { %v11190_v4 = vld [vmem:[#allocation10 + $0x9dc] sm:$0xf0]  ;;  %5470 = vmatmul.bf16.vlgmr.msra.gmra.mxu0 %v11831_v24  ;;  %v8924_v8 = vld [vmem:[#allocation10 + $0x2e0] sm:$0xf0] }
 0x1cc   :  { %v10074_v5 = vld [vmem:[#allocation10 + $0xbc0] sm:$0xf]  ;;  %v9819_v26 = vor.u32 %v11190_v4, %v9818_v53  ;;  %5508 = vmatpush.bf16.msra.mxu3 %v9339_v10  ;;  %5483 = vmatmul.bf16.vlgmr.msra.gmra.mxu1 %v11833_v28  ;;  %v2928_v4 = vadd.f32 %v2927_v0, %v556_v56  ;;  %v10874_v62 = vld [vmem:[#allocation10 + $0x4] sm:$0xf] }
 0x1cd   :  { %v11254_v20 = vld [vmem:[#allocation10 + $0xbdc] sm:$0xf0]  ;;  %5496 = vmatmul.bf16.vlgmr.msra.gmra.mxu2 %v11835_v41  ;;  %v8572_v0 = vld [vmem:[#allocation10 + $0x20] sm:$0xf0] }
 0x1ce   :  { %v10075_v11 = vor.u32 %v11254_v20, %v10074_v5  ;;  %v9786_v13 = vld [vmem:[#allocation10 + $0x980] sm:$0xf]  ;;  %5514 = vmatpush.bf16.msrb.mxu0 %v9819_v26  ;;  %5540 = vmatpush.bf16.msrb.mxu2 %v8799_v12  ;;  %v2940_v5 = vpop.f32.mrf.mxu1  ;;  %v8671_v26 = vor.u32 %v10898_v6, %v8668_v7  ;;  %v9820_v6 = vld [vmem:[#allocation10 + $0x9e0] sm:$0xf0] }
 0x1cf   :  { %v11182_v16 = vld [vmem:[#allocation10 + $0x99c] sm:$0xf0]  ;;  %v2941_v22 = vadd.f32 %v2940_v5, %v2928_v4  ;;  %v11122_v4 = vld [vmem:[#allocation10 + $0x7c4] sm:$0xf] }
 0x1d0   :  { %v10042_v15 = vld [vmem:[#allocation10 + $0xb80] sm:$0xf]  ;;  %v9787_v25 = vor.u32 %v11182_v16, %v9786_v13  ;;  %5527 = vmatpush.bf16.msrb.mxu1 %v10075_v11  ;;  %5553 = vmatpush.bf16.msrb.mxu3 %v9055_v17  ;;  %v2953_v16 = vpop.f32.mrf.mxu2 }
 0x1d1   :  { %v11246_v61 = vld [vmem:[#allocation10 + $0xb9c] sm:$0xf0]  ;;  %v2954_v45 = vadd.f32 %v2953_v16, %v2941_v22  ;;  %v2966_v19 = vpop.f32.mrf.mxu3  ;;  %v10076_v22 = vld [vmem:[#allocation10 + $0xbe0] sm:$0xf0] }
 0x1d2   :  { %v9754_v27 = vld [vmem:[#allocation10 + $0x940] sm:$0xf]  ;;  %v10043_v29 = vor.u32 %v11246_v61, %v10042_v15  ;;  %5515 = vmatpush.bf16.msrb.mxu0 %v9787_v25  ;;  %5541 = vmatpush.bf16.msrb.mxu2 %v8767_v30  ;;  %v8927_v15 = vor.u32 %v10962_v21, %v8924_v8  ;;  %v10890_v61 = vld [vmem:[#allocation10 + $0x84] sm:$0xf]  ;;  %v2929_v30 = vpop.f32.mrf.mxu0  ;;  %v8575_v21 = vor.u32 %v10874_v62, %v8572_v0 }
 0x1d3   :  { %v11174_v14 = vld [vmem:[#allocation10 + $0x95c] sm:$0xf0]  ;;  %v8892_v25 = vld [vmem:[#allocation10 + $0x2a0] sm:$0xf0] }
 0x1d4   :  { %v10010_v43 = vld [vmem:[#allocation10 + $0xb40] sm:$0xf]  ;;  %v9755_v40 = vor.u32 %v11174_v14, %v9754_v27  ;;  %5528 = vmatpush.bf16.msrb.mxu1 %v10043_v29  ;;  %5554 = vmatpush.bf16.msrb.mxu3 %v9023_v33  ;;  %v11846_v29 = vadd.f32 %v2966_v19, %v2954_v45  ;;  %v8895_v37 = vor.u32 %v10954_v23, %v8892_v25  ;;  %v11250_v8 = vld [vmem:[#allocation10 + $0xbc4] sm:$0xf]  ;;  %v11848_v23 = vld [vmem:[#allocation1 + $0x24] sm:$0xff] }
 0x1d5   :  { %v11837_v32 = vld [vmem:[#allocation1 + $0x1b] sm:$0xff] }
 0x1d6   :  { %v11238_v34 = vld [vmem:[#allocation10 + $0xb5c] sm:$0xf0]  ;;  %5509 = vmatmul.bf16.vlgmr.msra.gmra.mxu3 %v11837_v32  ;;  %5516 = vmatpush.bf16.msrb.mxu0 %v9755_v40  ;;  %v2942_v36 = vpop.f32.mrf.mxu1  ;;  %v10882_v40 = vld [vmem:[#allocation10 + $0x44] sm:$0xf] }
 0x1d7   :  { %v9722_v44 = vld [vmem:[#allocation10 + $0x900] sm:$0xf]  ;;  %v10011_v47 = vor.u32 %v11238_v34, %v10010_v43  ;;  %5542 = vmatpush.bf16.msrb.mxu2 %v8735_v48  ;;  %v8639_v43 = vor.u32 %v10890_v61, %v8636_v18  ;;  %v8860_v48 = vld [vmem:[#allocation10 + $0x260] sm:$0xf0] }
 0x1d8   :  { %v11166_v49 = vld [vmem:[#allocation10 + $0x91c] sm:$0xf0]  ;;  %5555 = vmatpush.bf16.msrb.mxu3 %v8991_v57  ;;  %v2955_v50 = vpop.f32.mrf.mxu2  ;;  %v11114_v16 = vld [vmem:[#allocation10 + $0x784] sm:$0xf] }
 0x1d9   :  { %v9978_v52 = vld [vmem:[#allocation10 + $0xb00] sm:$0xf]  ;;  %v9723_v63 = vor.u32 %v11166_v49, %v9722_v44  ;;  %5529 = vmatpush.bf16.msrb.mxu1 %v10011_v47  ;;  %v8604_v44 = vld [vmem:[#allocation10 + $0x60] sm:$0xf0] }
 0x1da   :  { %v11230_v58 = vld [vmem:[#allocation10 + $0xb1c] sm:$0xf0]  ;;  %v10946_v47 = vld [vmem:[#allocation10 + $0x244] sm:$0xf] }
 0x1db   :  { %v9979_v1 = vor.u32 %v11230_v58, %v9978_v52  ;;  %v9690_v51 = vld [vmem:[#allocation10 + $0x8c0] sm:$0xf]  ;;  %5517 = vmatpush.bf16.msrb.mxu0 %v9723_v63  ;;  %5543 = vmatpush.bf16.msrb.mxu2 %v8703_v2  ;;  %v8607_v58 = vor.u32 %v10882_v40, %v8604_v44  ;;  %v8863_v63 = vor.u32 %v10946_v47, %v8860_v48  ;;  %v8828_v2 = vld [vmem:[#allocation10 + $0x220] sm:$0xf0] }
 0x1dc   :  { %v11158_v3 = vld [vmem:[#allocation10 + $0x8dc] sm:$0xf0]  ;;  %5556 = vmatpush.bf16.msrb.mxu3 %v8959_v55  ;;  %v9564_v55 = vld [vmem:[#allocation10 + $0x7e0] sm:$0xf0] }
 0x1dd   :  { %v9946_v53 = vld [vmem:[#allocation10 + $0xac0] sm:$0xf]  ;;  %v9691_v9 = vor.u32 %v11158_v3, %v9690_v51  ;;  %5530 = vmatpush.bf16.msrb.mxu1 %v9979_v1  ;;  %v10938_v1 = vld [vmem:[#allocation10 + $0x204] sm:$0xf]  ;;  %v2968_v51 = vpop.f32.mrf.mxu3 }
 0x1de   :  { %v11222_v20 = vld [vmem:[#allocation10 + $0xadc] sm:$0xf0]  ;;  %v11058_v3 = vld [vmem:[#allocation10 + $0x5c4] sm:$0xf] }
 0x1df   :  { %v9947_v10 = vor.u32 %v11222_v20, %v9946_v53  ;;  %v9658_v11 = vld [vmem:[#allocation10 + $0x880] sm:$0xf]  ;;  %5518 = vmatpush.bf16.msrb.mxu0 %v9691_v9  ;;  %5544 = vmatpush.bf16.msrb.mxu2 %v8671_v26  ;;  %v9308_v53 = vld [vmem:[#allocation10 + $0x5e0] sm:$0xf0]  ;;  %v8831_v9 = vor.u32 %v10938_v1, %v8828_v2  ;;  %v9567_v26 = vor.u32 %v11122_v4, %v9564_v55 }
 0x1e0   :  { %v11150_v12 = vld [vmem:[#allocation10 + $0x89c] sm:$0xf0]  ;;  %5557 = vmatpush.bf16.msrb.mxu3 %v8927_v15  ;;  %v11186_v20 = vld [vmem:[#allocation10 + $0x9c4] sm:$0xf]  ;;  %v10079_v15 = vor.u32 %v11250_v8, %v10076_v22 }
 0x1e1   :  { %v9914_v13 = vld [vmem:[#allocation10 + $0xa80] sm:$0xf]  ;;  %v9659_v27 = vor.u32 %v11150_v12, %v9658_v11  ;;  %5531 = vmatpush.bf16.msrb.mxu1 %v9947_v10  ;;  %v9311_v10 = vor.u32 %v11058_v3, %v9308_v53  ;;  %v9823_v11 = vor.u32 %v11186_v20, %v9820_v6  ;;  %v11050_v12 = vld [vmem:[#allocation10 + $0x584] sm:$0xf] }
 0x1e2   :  { %v11214_v17 = vld [vmem:[#allocation10 + $0xa9c] sm:$0xf0]  ;;  %v11178_v61 = vld [vmem:[#allocation10 + $0x984] sm:$0xf] }
 0x1e3   :  { %v9915_v14 = vor.u32 %v11214_v17, %v9914_v13  ;;  %v9626_v33 = vld [vmem:[#allocation10 + $0x840] sm:$0xf]  ;;  %5519 = vmatpush.bf16.msrb.mxu0 %v9659_v27  ;;  %5545 = vmatpush.bf16.msrb.mxu2 %v8639_v43  ;;  %v9276_v13 = vld [vmem:[#allocation10 + $0x5a0] sm:$0xf0]  ;;  %v11850_v27 = vld [vmem:[#allocation1 + $0x2d] sm:$0xff] }
 0x1e4   :  { %v11142_v34 = vld [vmem:[#allocation10 + $0x85c] sm:$0xf0]  ;;  %5558 = vmatpush.bf16.msrb.mxu3 %v8895_v37  ;;  %v9532_v17 = vld [vmem:[#allocation10 + $0x7a0] sm:$0xf0]  ;;  %v9279_v25 = vor.u32 %v11050_v12, %v9276_v13 }
 0x1e5   :  { %v9882_v35 = vld [vmem:[#allocation10 + $0xa40] sm:$0xf]  ;;  %v9627_v49 = vor.u32 %v11142_v34, %v9626_v33  ;;  %5532 = vmatpush.bf16.msrb.mxu1 %v9915_v14  ;;  %v9788_v18 = vld [vmem:[#allocation10 + $0x9a0] sm:$0xf0]  ;;  %v9535_v30 = vor.u32 %v11114_v16, %v9532_v17 }
 0x1e6   :  { %v11206_v38 = vld [vmem:[#allocation10 + $0xa5c] sm:$0xf0]  ;;  %v11242_v45 = vld [vmem:[#allocation10 + $0xb84] sm:$0xf]  ;;  %v9791_v14 = vor.u32 %v11178_v61, %v9788_v18 }
 0x1e7   :  { %v9594_v52 = vld [vmem:[#allocation10 + $0x800] sm:$0xf]  ;;  %v9883_v57 = vor.u32 %v11206_v38, %v9882_v35  ;;  %5520 = vmatpush.bf16.msrb.mxu0 %v9627_v49  ;;  %5546 = vmatpush.bf16.msrb.mxu2 %v8607_v58  ;;  %v10044_v19 = vld [vmem:[#allocation10 + $0xba0] sm:$0xf0] }
 0x1e8   :  { %v11134_v56 = vld [vmem:[#allocation10 + $0x81c] sm:$0xf0]  ;;  %5559 = vmatpush.bf16.msrb.mxu3 %v8863_v63  ;;  %v11042_v43 = vld [vmem:[#allocation10 + $0x544] sm:$0xf]  ;;  %v10047_v35 = vor.u32 %v11242_v45, %v10044_v19  ;;  %v2979_v1 = vpop.f32.mrf.mxu0 }
 0x1e9   :  { %v9850_v59 = vld [vmem:[#allocation10 + $0xa00] sm:$0xf]  ;;  %v9595_v5 = vor.u32 %v11134_v56, %v9594_v52  ;;  %5533 = vmatpush.bf16.msrb.mxu1 %v9883_v57  ;;  %v9244_v33 = vld [vmem:[#allocation10 + $0x560] sm:$0xf0]  ;;  %v2980_v3 = vadd.f32 %v2979_v1, %v11846_v29  ;;  %v2992_v55 = vpop.f32.mrf.mxu1 }
 0x1ea   :  { %v11198_v60 = vld [vmem:[#allocation10 + $0xa1c] sm:$0xf0]  ;;  %v11106_v34 = vld [vmem:[#allocation10 + $0x744] sm:$0xf]  ;;  %v9247_v47 = vor.u32 %v11042_v43, %v9244_v33 }
 0x1eb   :  { %v9851_v7 = vor.u32 %v11198_v60, %v9850_v59  ;;  %5521 = vmatpush.bf16.msrb.mxu0 %v9595_v5  ;;  %5547 = vmatpush.bf16.msrb.mxu2 %v8575_v21  ;;  %v9500_v36 = vld [vmem:[#allocation10 + $0x760] sm:$0xf0] }
 0x1ec   :  { %5560 = vmatpush.bf16.msrb.mxu3 %v8831_v9  ;;  %v11170_v37 = vld [vmem:[#allocation10 + $0x944] sm:$0xf]  ;;  %v9503_v48 = vor.u32 %v11106_v34, %v9500_v36  ;;  %v2993_v9 = vadd.f32 %v2992_v55, %v2980_v3  ;;  %v10935_v55 = vld [vmem:[#allocation10 + $0x1e4] sm:$0xf0] }
 0x1ed   :  { %5534 = vmatpush.bf16.msrb.mxu1 %v9851_v7  ;;  %v9756_v38 = vld [vmem:[#allocation10 + $0x960] sm:$0xf0] }
 0x1ee   :  { %5522 = vmatmul.bf16.vlgmr.msrb.gmra.mxu0 %v11848_v23  ;;  %v11234_v40 = vld [vmem:[#allocation10 + $0xb44] sm:$0xf]  ;;  %5548 = vmatmul.bf16.vlgmr.msrb.gmra.mxu2 %v11831_v24  ;;  %v9759_v49 = vor.u32 %v11170_v37, %v9756_v38 }
 0x1ef   :  { %5566 = vmatpush.bf16.msra.mxu0 %v9311_v10  ;;  %5592 = vmatpush.bf16.msra.mxu2 %v9823_v11  ;;  %v10012_v44 = vld [vmem:[#allocation10 + $0xb60] sm:$0xf0] }
 0x1f0   :  { %5605 = vmatpush.bf16.msra.mxu3 %v10079_v15  ;;  %5535 = vmatmul.bf16.vlgmr.msrb.gmra.mxu1 %v11850_v27  ;;  %v11034_v52 = vld [vmem:[#allocation10 + $0x504] sm:$0xf]  ;;  %v10015_v58 = vor.u32 %v11234_v40, %v10012_v44  ;;  %v3005_v12 = vpop.f32.mrf.mxu2  ;;  %v2981_v33 = vpop.f32.mrf.mxu0 }
 0x1f1   :  { %5579 = vmatpush.bf16.msra.mxu1 %v9567_v26  ;;  %5561 = vmatmul.bf16.vlgmr.msrb.gmra.mxu3 %v11833_v28  ;;  %v9212_v56 = vld [vmem:[#allocation10 + $0x520] sm:$0xf0]  ;;  %v3006_v17 = vadd.f32 %v3005_v12, %v2993_v9  ;;  %v3018_v19 = vpop.f32.mrf.mxu3  ;;  %v2994_v40 = vpop.f32.mrf.mxu1 }
 0x1f2   :  { %v11098_v57 = vld [vmem:[#allocation10 + $0x704] sm:$0xf]  ;;  %v9215_v0 = vor.u32 %v11034_v52, %v9212_v56  ;;  %v10983_v40 = vld [vmem:[#allocation10 + $0x364] sm:$0xf0] }
 0x1f3   :  { %5567 = vmatpush.bf16.msra.mxu0 %v9279_v25  ;;  %5593 = vmatpush.bf16.msra.mxu2 %v9791_v14  ;;  %v9468_v59 = vld [vmem:[#allocation10 + $0x720] sm:$0xf0]  ;;  %v11857_v43 = vadd.f32 %v3018_v19, %v3006_v17  ;;  %v9026_v17 = vld [vmem:[#allocation10 + $0x388] sm:$0xf] }
 0x1f4   :  { %5606 = vmatpush.bf16.msra.mxu3 %v10047_v35  ;;  %v11162_v60 = vld [vmem:[#allocation10 + $0x904] sm:$0xf]  ;;  %v9471_v2 = vor.u32 %v11098_v57, %v9468_v59  ;;  %v11055_v19 = vld [vmem:[#allocation10 + $0x5a4] sm:$0xf0] }
 0x1f5   :  { %5580 = vmatpush.bf16.msra.mxu1 %v9535_v30  ;;  %v9724_v62 = vld [vmem:[#allocation10 + $0x920] sm:$0xf0] }
 0x1f6   :  { %v11226_v50 = vld [vmem:[#allocation10 + $0xb04] sm:$0xf]  ;;  %v9727_v51 = vor.u32 %v11162_v60, %v9724_v62 }
 0x1f7   :  { %v9980_v63 = vld [vmem:[#allocation10 + $0xb20] sm:$0xf0]  ;;  %5568 = vmatpush.bf16.msra.mxu0 %v9247_v47  ;;  %5594 = vmatpush.bf16.msra.mxu2 %v9759_v49 }
 0x1f8   :  { %v11026_v53 = vld [vmem:[#allocation10 + $0x4c4] sm:$0xf]  ;;  %5607 = vmatpush.bf16.msra.mxu3 %v10015_v58  ;;  %v9983_v20 = vor.u32 %v11226_v50, %v9980_v63  ;;  %v3007_v1 = vpop.f32.mrf.mxu2 }
 0x1f9   :  { %5581 = vmatpush.bf16.msra.mxu1 %v9503_v48  ;;  %v9180_v4 = vld [vmem:[#allocation10 + $0x4e0] sm:$0xf0]  ;;  %v11039_v1 = vld [vmem:[#allocation10 + $0x524] sm:$0xf0] }
 0x1fa   :  { %v11090_v5 = vld [vmem:[#allocation10 + $0x6c4] sm:$0xf]  ;;  %v9183_v10 = vor.u32 %v11026_v53, %v9180_v4  ;;  %v3020_v4 = vpop.f32.mrf.mxu3 }
 0x1fb   :  { %v9436_v6 = vld [vmem:[#allocation10 + $0x6e0] sm:$0xf0]  ;;  %5569 = vmatpush.bf16.msra.mxu0 %v9215_v0  ;;  %5595 = vmatpush.bf16.msra.mxu2 %v9727_v51 }
 0x1fc   :  { %v11154_v7 = vld [vmem:[#allocation10 + $0x8c4] sm:$0xf]  ;;  %v9439_v26 = vor.u32 %v11090_v5, %v9436_v6  ;;  %5608 = vmatpush.bf16.msra.mxu3 %v9983_v20  ;;  %v8802_v5 = vld [vmem:[#allocation10 + $0x1c8] sm:$0xf] }
 0x1fd   :  { %v9692_v21 = vld [vmem:[#allocation10 + $0x8e0] sm:$0xf0]  ;;  %5582 = vmatpush.bf16.msra.mxu1 %v9471_v2  ;;  %v9058_v20 = vld [vmem:[#allocation10 + $0x3c8] sm:$0xf]  ;;  %v8803_v12 = vor.u32 %v10935_v55, %v8802_v5 }
 0x1fe   :  { %v11218_v8 = vld [vmem:[#allocation10 + $0xac4] sm:$0xf]  ;;  %v9695_v11 = vor.u32 %v11154_v7, %v9692_v21  ;;  %v10999_v7 = vld [vmem:[#allocation10 + $0x3e4] sm:$0xf0] }
 0x1ff   :  { %v9948_v22 = vld [vmem:[#allocation10 + $0xae0] sm:$0xf0]  ;;  %5570 = vmatpush.bf16.msra.mxu0 %v9183_v10  ;;  %v9314_v21 = vld [vmem:[#allocation10 + $0x5c8] sm:$0xf] }
 0x200   :  { %v11018_v29 = vld [vmem:[#allocation10 + $0x484] sm:$0xf]  ;;  %v9951_v15 = vor.u32 %v11218_v8, %v9948_v22  ;;  %5596 = vmatpush.bf16.msra.mxu2 %v9695_v11  ;;  %v11063_v8 = vld [vmem:[#allocation10 + $0x5e4] sm:$0xf0] }
 0x201   :  { %v9148_v13 = vld [vmem:[#allocation10 + $0x4a0] sm:$0xf0]  ;;  %5583 = vmatpush.bf16.msra.mxu1 %v9439_v26  ;;  %v9570_v10 = vld [vmem:[#allocation10 + $0x7c8] sm:$0xf] }
 0x202   :  { %v11082_v16 = vld [vmem:[#allocation10 + $0x684] sm:$0xf]  ;;  %v9151_v14 = vor.u32 %v11018_v29, %v9148_v13  ;;  %5609 = vmatpush.bf16.msra.mxu3 %v9951_v15  ;;  %v11127_v26 = vld [vmem:[#allocation10 + $0x7e4] sm:$0xf0]  ;;  %v9059_v29 = vor.u32 %v10999_v7, %v9058_v20  ;;  %v9315_v13 = vor.u32 %v11063_v8, %v9314_v21 }
 0x203   :  { %v9404_v61 = vld [vmem:[#allocation10 + $0x6a0] sm:$0xf0]  ;;  %v10927_v15 = vld [vmem:[#allocation10 + $0x1a4] sm:$0xf0] }
 0x204   :  { %v11146_v18 = vld [vmem:[#allocation10 + $0x884] sm:$0xf]  ;;  %v9407_v34 = vor.u32 %v11082_v16, %v9404_v61  ;;  %5571 = vmatpush.bf16.msra.mxu0 %v9151_v14  ;;  %v8770_v16 = vld [vmem:[#allocation10 + $0x188] sm:$0xf]  ;;  %v9571_v61 = vor.u32 %v11127_v26, %v9570_v10 }
 0x205   :  { %v9660_v45 = vld [vmem:[#allocation10 + $0x8a0] sm:$0xf0]  ;;  %v8771_v14 = vor.u32 %v10927_v15, %v8770_v16  ;;  %v8674_v55 = vld [vmem:[#allocation10 + $0xc8] sm:$0xf] }
 0x206   :  { %v11210_v25 = vld [vmem:[#allocation10 + $0xa84] sm:$0xf]  ;;  %v9663_v35 = vor.u32 %v11146_v18, %v9660_v45  ;;  %5584 = vmatpush.bf16.msra.mxu1 %v9407_v34  ;;  %v10991_v18 = vld [vmem:[#allocation10 + $0x3a4] sm:$0xf0] }
 0x207   :  { %v9916_v30 = vld [vmem:[#allocation10 + $0xaa0] sm:$0xf0]  ;;  %v9282_v45 = vld [vmem:[#allocation10 + $0x588] sm:$0xf]  ;;  %v9027_v33 = vor.u32 %v10991_v18, %v9026_v17 }
 0x208   :  { %v11010_v36 = vld [vmem:[#allocation10 + $0x444] sm:$0xf]  ;;  %v9919_v44 = vor.u32 %v11210_v25, %v9916_v30  ;;  %5597 = vmatpush.bf16.msra.mxu2 %v9663_v35  ;;  %v9538_v25 = vld [vmem:[#allocation10 + $0x788] sm:$0xf]  ;;  %v9283_v34 = vor.u32 %v11055_v19, %v9282_v45 }
 0x209   :  { %v9116_v37 = vld [vmem:[#allocation10 + $0x460] sm:$0xf0]  ;;  %v11119_v30 = vld [vmem:[#allocation10 + $0x7a4] sm:$0xf0]  ;;  %v3044_v21 = vpop.f32.mrf.mxu1 }
 0x20a   :  { %v11074_v38 = vld [vmem:[#allocation10 + $0x644] sm:$0xf]  ;;  %v9119_v57 = vor.u32 %v11010_v36, %v9116_v37  ;;  %5610 = vmatpush.bf16.msra.mxu3 %v9919_v44  ;;  %v8738_v35 = vld [vmem:[#allocation10 + $0x148] sm:$0xf] }
 0x20b   :  { %v9372_v47 = vld [vmem:[#allocation10 + $0x660] sm:$0xf0]  ;;  %v10919_v36 = vld [vmem:[#allocation10 + $0x164] sm:$0xf0] }
 0x20c   :  { %v11138_v48 = vld [vmem:[#allocation10 + $0x844] sm:$0xf]  ;;  %v9375_v60 = vor.u32 %v11074_v38, %v9372_v47  ;;  %5572 = vmatpush.bf16.msra.mxu0 %v9119_v57  ;;  %v8994_v37 = vld [vmem:[#allocation10 + $0x348] sm:$0xf]  ;;  %v9539_v38 = vor.u32 %v11119_v30, %v9538_v25 }
 0x20d   :  { %v9628_v49 = vld [vmem:[#allocation10 + $0x860] sm:$0xf0]  ;;  %v9250_v44 = vld [vmem:[#allocation10 + $0x548] sm:$0xf]  ;;  %v8995_v57 = vor.u32 %v10983_v40, %v8994_v37 }
 0x20e   :  { %v11202_v52 = vld [vmem:[#allocation10 + $0xa44] sm:$0xf]  ;;  %v9631_v62 = vor.u32 %v11138_v48, %v9628_v49  ;;  %5585 = vmatpush.bf16.msra.mxu1 %v9375_v60  ;;  %v11047_v47 = vld [vmem:[#allocation10 + $0x564] sm:$0xf0] }
 0x20f   :  { %v9884_v56 = vld [vmem:[#allocation10 + $0xa60] sm:$0xf0]  ;;  %v9506_v48 = vld [vmem:[#allocation10 + $0x748] sm:$0xf] }
 0x210   :  { %v11002_v58 = vld [vmem:[#allocation10 + $0x404] sm:$0xf]  ;;  %v9887_v2 = vor.u32 %v11202_v52, %v9884_v56  ;;  %5598 = vmatpush.bf16.msra.mxu2 %v9631_v62  ;;  %v11111_v49 = vld [vmem:[#allocation10 + $0x764] sm:$0xf0]  ;;  %v8739_v52 = vor.u32 %v10919_v36, %v8738_v35  ;;  %v557_v62 = vperm.slane %v11843_v54, 5 }
 0x211   :  { %v9084_v59 = vld [vmem:[#allocation10 + $0x420] sm:$0xf0]  ;;  %v8706_v56 = vld [vmem:[#allocation10 + $0x108] sm:$0xf] }
 0x212   :  { %v11066_v50 = vld [vmem:[#allocation10 + $0x604] sm:$0xf]  ;;  %v9087_v6 = vor.u32 %v11002_v58, %v9084_v59  ;;  %5611 = vmatpush.bf16.msra.mxu3 %v9887_v2  ;;  %v9251_v58 = vor.u32 %v11047_v47, %v9250_v44  ;;  %v10911_v59 = vld [vmem:[#allocation10 + $0x124] sm:$0xf0] }
 0x213   :  { %v9340_v63 = vld [vmem:[#allocation10 + $0x620] sm:$0xf0]  ;;  %v8962_v60 = vld [vmem:[#allocation10 + $0x308] sm:$0xf] }
 0x214   :  { %v11130_v0 = vld [vmem:[#allocation10 + $0x804] sm:$0xf]  ;;  %v9343_v22 = vor.u32 %v11066_v50, %v9340_v63  ;;  %5573 = vmatpush.bf16.msra.mxu0 %v9087_v6  ;;  %v9507_v50 = vor.u32 %v11111_v49, %v9506_v48  ;;  %v10975_v63 = vld [vmem:[#allocation10 + $0x324] sm:$0xf0]  ;;  %v3046_v49 = vpop.f32.mrf.mxu1 }
 0x215   :  { %v9596_v51 = vld [vmem:[#allocation10 + $0x820] sm:$0xf0]  ;;  %v9474_v2 = vld [vmem:[#allocation10 + $0x708] sm:$0xf]  ;;  %v8963_v4 = vor.u32 %v10975_v63, %v8962_v60 }
 0x216   :  { %v11194_v3 = vld [vmem:[#allocation10 + $0xa04] sm:$0xf]  ;;  %v9599_v9 = vor.u32 %v11130_v0, %v9596_v51  ;;  %5586 = vmatpush.bf16.msra.mxu1 %v9343_v22  ;;  %v9218_v0 = vld [vmem:[#allocation10 + $0x508] sm:$0xf] }
 0x217   :  { %v9852_v53 = vld [vmem:[#allocation10 + $0xa20] sm:$0xf0]  ;;  %5574 = vmatmul.bf16.vlgmr.msra.gmra.mxu0 %v11835_v41  ;;  %v11103_v51 = vld [vmem:[#allocation10 + $0x724] sm:$0xf0]  ;;  %v9219_v5 = vor.u32 %v11039_v1, %v9218_v0 }
 0x218   :  { %v9855_v11 = vor.u32 %v11194_v3, %v9852_v53  ;;  %5599 = vmatpush.bf16.msra.mxu2 %v9599_v9  ;;  %5618 = vmatpush.bf16.msrb.mxu0 %v8803_v12  ;;  %v8707_v3 = vor.u32 %v10911_v59, %v8706_v56  ;;  %v3031_v53 = vpop.f32.mrf.mxu0  ;;  %v10903_v20 = vld [vmem:[#allocation10 + $0xe4] sm:$0xf0]  ;;  %v9475_v54 = vor.u32 %v11103_v51, %v9474_v2 }
 0x219   :  { %5587 = vmatmul.bf16.vlgmr.msra.gmra.mxu1 %v11837_v32  ;;  %v8930_v6 = vld [vmem:[#allocation10 + $0x2c8] sm:$0xf]  ;;  %v3032_v7 = vadd.f32 %v3031_v53, %v557_v62  ;;  %v8675_v12 = vor.u32 %v10903_v20, %v8674_v55 }
 0x21a   :  { %5612 = vmatpush.bf16.msra.mxu3 %v9855_v11  ;;  %5631 = vmatpush.bf16.msrb.mxu1 %v9059_v29  ;;  %v10967_v8 = vld [vmem:[#allocation10 + $0x2e4] sm:$0xf0] }
 0x21b   :  { %5600 = vmatmul.bf16.vlgmr.msra.gmra.mxu2 %v11848_v23  ;;  %v9186_v22 = vld [vmem:[#allocation10 + $0x4c8] sm:$0xf]  ;;  %v3045_v11 = vadd.f32 %v3044_v21, %v3032_v7  ;;  %v8931_v29 = vor.u32 %v10967_v8, %v8930_v6 }
 0x21c   :  { %5644 = vmatpush.bf16.msrb.mxu2 %v9315_v13  ;;  %5619 = vmatpush.bf16.msrb.mxu0 %v8771_v14  ;;  %v11031_v9 = vld [vmem:[#allocation10 + $0x4e4] sm:$0xf0]  ;;  %v3070_v14 = vpop.f32.mrf.mxu3 }
 0x21d   :  { %5613 = vmatmul.bf16.vlgmr.msra.gmra.mxu3 %v11850_v27  ;;  %v9442_v10 = vld [vmem:[#allocation10 + $0x6c8] sm:$0xf]  ;;  %v9187_v13 = vor.u32 %v11031_v9, %v9186_v22  ;;  %v10931_v9 = vld [vmem:[#allocation10 + $0x1cc] sm:$0xf] }
 0x21e   :  { %5657 = vmatpush.bf16.msrb.mxu3 %v9571_v61  ;;  %5632 = vmatpush.bf16.msrb.mxu1 %v9027_v33  ;;  %v11095_v26 = vld [vmem:[#allocation10 + $0x6e4] sm:$0xf0]  ;;  %v3057_v61 = vpop.f32.mrf.mxu2 }
 0x21f   :  { %v8642_v16 = vld [vmem:[#allocation10 + $0x88] sm:$0xf]  ;;  %v9443_v18 = vor.u32 %v11095_v26, %v9442_v10  ;;  %v3058_v30 = vadd.f32 %v3057_v61, %v3045_v11  ;;  %v8804_v10 = vld [vmem:[#allocation10 + $0x1e8] sm:$0xf0] }
 0x220   :  { %5645 = vmatpush.bf16.msrb.mxu2 %v9283_v34  ;;  %5620 = vmatpush.bf16.msrb.mxu0 %v8739_v52  ;;  %v10895_v15 = vld [vmem:[#allocation10 + $0xa4] sm:$0xf0]  ;;  %v3033_v37 = vpop.f32.mrf.mxu0 }
 0x221   :  { %v8898_v17 = vld [vmem:[#allocation10 + $0x288] sm:$0xf]  ;;  %v8643_v35 = vor.u32 %v10895_v15, %v8642_v16  ;;  %v11864_v36 = vadd.f32 %v3070_v14, %v3058_v30  ;;  %v10923_v30 = vld [vmem:[#allocation10 + $0x18c] sm:$0xf] }
 0x222   :  { %5658 = vmatpush.bf16.msrb.mxu3 %v9539_v38  ;;  %5633 = vmatpush.bf16.msrb.mxu1 %v8995_v57  ;;  %v10959_v45 = vld [vmem:[#allocation10 + $0x2a4] sm:$0xf0]  ;;  %v8772_v14 = vld [vmem:[#allocation10 + $0x1a8] sm:$0xf0] }
 0x223   :  { %v9154_v19 = vld [vmem:[#allocation10 + $0x488] sm:$0xf]  ;;  %v8899_v38 = vor.u32 %v10959_v45, %v8898_v17  ;;  %v8807_v17 = vor.u32 %v10931_v9, %v8804_v10  ;;  %v10963_v9 = vld [vmem:[#allocation10 + $0x2cc] sm:$0xf] }
 0x224   :  { %5646 = vmatpush.bf16.msrb.mxu2 %v9251_v58  ;;  %5621 = vmatpush.bf16.msrb.mxu0 %v8707_v3  ;;  %v11023_v25 = vld [vmem:[#allocation10 + $0x4a4] sm:$0xf0]  ;;  %v3072_v6 = vpop.f32.mrf.mxu3  ;;  %v8932_v10 = vld [vmem:[#allocation10 + $0x2e8] sm:$0xf0] }
 0x225   :  { %v9410_v33 = vld [vmem:[#allocation10 + $0x688] sm:$0xf]  ;;  %v9155_v40 = vor.u32 %v11023_v25, %v9154_v19 }
 0x226   :  { %5659 = vmatpush.bf16.msrb.mxu3 %v9507_v50  ;;  %5634 = vmatpush.bf16.msrb.mxu1 %v8963_v4  ;;  %v11087_v34 = vld [vmem:[#allocation10 + $0x6a4] sm:$0xf0]  ;;  %v3059_v53 = vpop.f32.mrf.mxu2 }
 0x227   :  { %v8610_v44 = vld [vmem:[#allocation10 + $0x48] sm:$0xf]  ;;  %v9411_v52 = vor.u32 %v11087_v34, %v9410_v33  ;;  %v10987_v33 = vld [vmem:[#allocation10 + $0x38c] sm:$0xf] }
 0x228   :  { %5647 = vmatpush.bf16.msrb.mxu2 %v9219_v5  ;;  %5622 = vmatpush.bf16.msrb.mxu0 %v8675_v12  ;;  %v10887_v47 = vld [vmem:[#allocation10 + $0x64] sm:$0xf0]  ;;  %v10995_v12 = vld [vmem:[#allocation10 + $0x3cc] sm:$0xf]  ;;  %v3083_v53 = vpop.f32.mrf.mxu0 }
 0x229   :  { %v8866_v48 = vld [vmem:[#allocation10 + $0x248] sm:$0xf]  ;;  %v8611_v62 = vor.u32 %v10887_v47, %v8610_v44  ;;  %v9028_v34 = vld [vmem:[#allocation10 + $0x3a8] sm:$0xf0] }
 0x22a   :  { %5660 = vmatpush.bf16.msrb.mxu3 %v9475_v54  ;;  %5635 = vmatpush.bf16.msrb.mxu1 %v8931_v29  ;;  %v10951_v56 = vld [vmem:[#allocation10 + $0x264] sm:$0xf0]  ;;  %v9060_v29 = vld [vmem:[#allocation10 + $0x3e8] sm:$0xf0] }
 0x22b   :  { %v9122_v57 = vld [vmem:[#allocation10 + $0x448] sm:$0xf]  ;;  %v8867_v0 = vor.u32 %v10951_v56, %v8866_v48  ;;  %v9063_v19 = vor.u32 %v10995_v12, %v9060_v29  ;;  %v9031_v48 = vor.u32 %v10987_v33, %v9028_v34  ;;  %v8740_v56 = vld [vmem:[#allocation10 + $0x168] sm:$0xf0] }
 0x22c   :  { %5648 = vmatpush.bf16.msrb.mxu2 %v9187_v13  ;;  %v11015_v58 = vld [vmem:[#allocation10 + $0x464] sm:$0xf0]  ;;  %5623 = vmatpush.bf16.msrb.mxu0 %v8643_v35 }
 0x22d   :  { %v9378_v59 = vld [vmem:[#allocation10 + $0x648] sm:$0xf]  ;;  %v9123_v1 = vor.u32 %v11015_v58, %v9122_v57  ;;  %v10979_v57 = vld [vmem:[#allocation10 + $0x34c] sm:$0xf] }
 0x22e   :  { %5661 = vmatpush.bf16.msrb.mxu3 %v9443_v18  ;;  %v11079_v60 = vld [vmem:[#allocation10 + $0x664] sm:$0xf0]  ;;  %5636 = vmatpush.bf16.msrb.mxu1 %v8899_v38  ;;  %v8775_v38 = vor.u32 %v10923_v30, %v8772_v14  ;;  %v8996_v58 = vld [vmem:[#allocation10 + $0x368] sm:$0xf0] }
 0x22f   :  { %v8578_v50 = vld [vmem:[#allocation10 + $0x8] sm:$0xf]  ;;  %v9379_v4 = vor.u32 %v11079_v60, %v9378_v59  ;;  %v10955_v30 = vld [vmem:[#allocation10 + $0x28c] sm:$0xf] }
 0x230   :  { %v10879_v63 = vld [vmem:[#allocation10 + $0x24] sm:$0xf0]  ;;  %5649 = vmatpush.bf16.msrb.mxu2 %v9155_v40  ;;  %5624 = vmatpush.bf16.msrb.mxu0 %v8611_v62  ;;  %v8900_v14 = vld [vmem:[#allocation10 + $0x2a8] sm:$0xf0] }
 0x231   :  { %v8834_v2 = vld [vmem:[#allocation10 + $0x208] sm:$0xf]  ;;  %v8579_v8 = vor.u32 %v10879_v63, %v8578_v50 }
 0x232   :  { %v10943_v51 = vld [vmem:[#allocation10 + $0x224] sm:$0xf0]  ;;  %5662 = vmatpush.bf16.msrb.mxu3 %v9411_v52  ;;  %5637 = vmatpush.bf16.msrb.mxu1 %v8867_v0  ;;  %v10915_v52 = vld [vmem:[#allocation10 + $0x14c] sm:$0xf] }
 0x233   :  { %v9090_v3 = vld [vmem:[#allocation10 + $0x408] sm:$0xf]  ;;  %v8835_v26 = vor.u32 %v10943_v51, %v8834_v2  ;;  %v8743_v62 = vor.u32 %v10915_v52, %v8740_v56  ;;  %v10907_v2 = vld [vmem:[#allocation10 + $0x10c] sm:$0xf] }
 0x234   :  { %v11007_v5 = vld [vmem:[#allocation10 + $0x424] sm:$0xf0]  ;;  %5650 = vmatpush.bf16.msrb.mxu2 %v9123_v1  ;;  %5625 = vmatpush.bf16.msrb.mxu0 %v8579_v8  ;;  %v8999_v1 = vor.u32 %v10979_v57, %v8996_v58  ;;  %v8708_v51 = vld [vmem:[#allocation10 + $0x128] sm:$0xf0] }
 0x235   :  { %v9346_v55 = vld [vmem:[#allocation10 + $0x608] sm:$0xf]  ;;  %v9091_v11 = vor.u32 %v11007_v5, %v9090_v3  ;;  %v10971_v3 = vld [vmem:[#allocation10 + $0x30c] sm:$0xf]  ;;  %v3084_v5 = vadd.f32 %v3083_v53, %v11864_v36 }
 0x236   :  { %v11071_v20 = vld [vmem:[#allocation10 + $0x624] sm:$0xf0]  ;;  %5663 = vmatpush.bf16.msrb.mxu3 %v9379_v4  ;;  %5638 = vmatpush.bf16.msrb.mxu1 %v8835_v26  ;;  %v8711_v4 = vor.u32 %v10907_v2, %v8708_v51  ;;  %v10899_v8 = vld [vmem:[#allocation10 + $0xcc] sm:$0xf] }
 0x237   :  { %v9826_v7 = vld [vmem:[#allocation10 + $0x9c8] sm:$0xf]  ;;  %v9347_v13 = vor.u32 %v11071_v20, %v9346_v55  ;;  %5626 = vmatmul.bf16.vlgmr.msrb.gmra.mxu0 %v11831_v24  ;;  %v10883_v56 = vld [vmem:[#allocation10 + $0x4c] sm:$0xf] }
 0x238   :  { %v11191_v21 = vld [vmem:[#allocation10 + $0x9e4] sm:$0xf0]  ;;  %5651 = vmatpush.bf16.msrb.mxu2 %v9091_v11  ;;  %v8612_v57 = vld [vmem:[#allocation10 + $0x68] sm:$0xf0] }
 0x239   :  { %v10082_v54 = vld [vmem:[#allocation10 + $0xbc8] sm:$0xf]  ;;  %v9827_v16 = vor.u32 %v11191_v21, %v9826_v7  ;;  %5639 = vmatmul.bf16.vlgmr.msrb.gmra.mxu1 %v11833_v28  ;;  %v8964_v28 = vld [vmem:[#allocation10 + $0x328] sm:$0xf0]  ;;  %v3096_v7 = vpop.f32.mrf.mxu1 }
 0x23a   :  { %v11255_v22 = vld [vmem:[#allocation10 + $0xbe4] sm:$0xf0]  ;;  %5664 = vmatpush.bf16.msrb.mxu3 %v9347_v13  ;;  %v8967_v21 = vor.u32 %v10971_v3, %v8964_v28  ;;  %v3097_v26 = vadd.f32 %v3096_v7, %v3084_v5  ;;  %v3109_v13 = vpop.f32.mrf.mxu2  ;;  %v10947_v58 = vld [vmem:[#allocation10 + $0x24c] sm:$0xf] }
 0x23b   :  { %v10083_v15 = vor.u32 %v11255_v22, %v10082_v54  ;;  %v9794_v61 = vld [vmem:[#allocation10 + $0x988] sm:$0xf]  ;;  %5670 = vmatpush.bf16.msra.mxu0 %v9827_v16  ;;  %5652 = vmatmul.bf16.vlgmr.msrb.gmra.mxu2 %v11835_v41  ;;  %v8676_v22 = vld [vmem:[#allocation10 + $0xe8] sm:$0xf0] }
 0x23c   :  { %v11183_v18 = vld [vmem:[#allocation10 + $0x9a4] sm:$0xf0]  ;;  %5696 = vmatpush.bf16.msra.mxu2 %v8807_v17  ;;  %v8679_v29 = vor.u32 %v10899_v8, %v8676_v22  ;;  %v8935_v17 = vor.u32 %v10963_v9, %v8932_v10  ;;  %v10875_v2 = vld [vmem:[#allocation10 + $0xc] sm:$0xf] }
 0x23d   :  { %v10050_v45 = vld [vmem:[#allocation10 + $0xb88] sm:$0xf]  ;;  %v9795_v35 = vor.u32 %v11183_v18, %v9794_v61  ;;  %5683 = vmatpush.bf16.msra.mxu1 %v10083_v15  ;;  %5665 = vmatmul.bf16.vlgmr.msrb.gmra.mxu3 %v11837_v32  ;;  %v3110_v61 = vadd.f32 %v3109_v13, %v3097_v26  ;;  %v8580_v28 = vld [vmem:[#allocation10 + $0x28] sm:$0xf0] }
 0x23e   :  { %v11247_v25 = vld [vmem:[#allocation10 + $0xba4] sm:$0xf0]  ;;  %5709 = vmatpush.bf16.msra.mxu3 %v9063_v19  ;;  %v8644_v19 = vld [vmem:[#allocation10 + $0xa8] sm:$0xf0]  ;;  %v8583_v8 = vor.u32 %v10875_v2, %v8580_v28 }
 0x23f   :  { %v10051_v37 = vor.u32 %v11247_v25, %v10050_v45  ;;  %v9762_v40 = vld [vmem:[#allocation10 + $0x948] sm:$0xf]  ;;  %5671 = vmatpush.bf16.msra.mxu0 %v9795_v35  ;;  %v10891_v45 = vld [vmem:[#allocation10 + $0x8c] sm:$0xf]  ;;  %v3122_v25 = vpop.f32.mrf.mxu3  ;;  %v3085_v35 = vpop.f32.mrf.mxu0 }
 0x240   :  { %v11175_v44 = vld [vmem:[#allocation10 + $0x964] sm:$0xf0]  ;;  %5697 = vmatpush.bf16.msra.mxu2 %v8775_v38  ;;  %v11871_v34 = vadd.f32 %v3122_v25, %v3110_v61  ;;  %v8647_v38 = vor.u32 %v10891_v45, %v8644_v19  ;;  %v8836_v53 = vld [vmem:[#allocation10 + $0x228] sm:$0xf0] }
 0x241   :  { %v10018_v47 = vld [vmem:[#allocation10 + $0xb48] sm:$0xf]  ;;  %v9763_v59 = vor.u32 %v11175_v44, %v9762_v40  ;;  %5684 = vmatpush.bf16.msra.mxu1 %v10051_v37  ;;  %v9316_v5 = vld [vmem:[#allocation10 + $0x5e8] sm:$0xf0] }
 0x242   :  { %v11239_v49 = vld [vmem:[#allocation10 + $0xb64] sm:$0xf0]  ;;  %5710 = vmatpush.bf16.msra.mxu3 %v9031_v48  ;;  %v3098_v48 = vpop.f32.mrf.mxu1  ;;  %v3111_v51 = vpop.f32.mrf.mxu2  ;;  %v11187_v7 = vld [vmem:[#allocation10 + $0x9cc] sm:$0xf] }
 0x243   :  { %v10019_v60 = vor.u32 %v11239_v49, %v10018_v47  ;;  %v9730_v50 = vld [vmem:[#allocation10 + $0x908] sm:$0xf]  ;;  %5672 = vmatpush.bf16.msra.mxu0 %v9763_v59  ;;  %v8903_v49 = vor.u32 %v10955_v30, %v8900_v14  ;;  %v8868_v59 = vld [vmem:[#allocation10 + $0x268] sm:$0xf0] }
 0x244   :  { %v11167_v63 = vld [vmem:[#allocation10 + $0x924] sm:$0xf0]  ;;  %5698 = vmatpush.bf16.msra.mxu2 %v8743_v62  ;;  %v8871_v3 = vor.u32 %v10947_v58, %v8868_v59  ;;  %v11251_v22 = vld [vmem:[#allocation10 + $0xbcc] sm:$0xf] }
 0x245   :  { %v9986_v0 = vld [vmem:[#allocation10 + $0xb08] sm:$0xf]  ;;  %v9731_v41 = vor.u32 %v11167_v63, %v9730_v50  ;;  %5685 = vmatpush.bf16.msra.mxu1 %v10019_v60  ;;  %v10084_v9 = vld [vmem:[#allocation10 + $0xbe8] sm:$0xf0] }
 0x246   :  { %v11231_v24 = vld [vmem:[#allocation10 + $0xb24] sm:$0xf0]  ;;  %5711 = vmatpush.bf16.msra.mxu3 %v8999_v1  ;;  %v9284_v13 = vld [vmem:[#allocation10 + $0x5a8] sm:$0xf0] }
 0x247   :  { %v9987_v32 = vor.u32 %v11231_v24, %v9986_v0  ;;  %v9698_v55 = vld [vmem:[#allocation10 + $0x8c8] sm:$0xf]  ;;  %5673 = vmatpush.bf16.msra.mxu0 %v9731_v41  ;;  %v8615_v0 = vor.u32 %v10883_v56, %v8612_v57  ;;  %v10939_v41 = vld [vmem:[#allocation10 + $0x20c] sm:$0xf] }
 0x248   :  { %v11159_v20 = vld [vmem:[#allocation10 + $0x8e4] sm:$0xf0]  ;;  %5699 = vmatpush.bf16.msra.mxu2 %v8711_v4  ;;  %v11059_v4 = vld [vmem:[#allocation10 + $0x5cc] sm:$0xf]  ;;  %v8839_v10 = vor.u32 %v10939_v41, %v8836_v53  ;;  %v5471_v51 = vpop.f32.mrf.mxu0 }
 0x249   :  { %v9954_v6 = vld [vmem:[#allocation10 + $0xac8] sm:$0xf]  ;;  %v9699_v11 = vor.u32 %v11159_v20, %v9698_v55  ;;  %5686 = vmatpush.bf16.msra.mxu1 %v9987_v32  ;;  %v3124_v32 = vpop.f32.mrf.mxu3  ;;  %v11123_v55 = vld [vmem:[#allocation10 + $0x7cc] sm:$0xf]  ;;  %v9319_v26 = vor.u32 %v11059_v4, %v9316_v5 }
 0x24a   :  { %v11223_v54 = vld [vmem:[#allocation10 + $0xae4] sm:$0xf0]  ;;  %5712 = vmatpush.bf16.msra.mxu3 %v8967_v21  ;;  %v9828_v21 = vld [vmem:[#allocation10 + $0x9e8] sm:$0xf0]  ;;  %v5484_v41 = vpop.f32.mrf.mxu1 }
 0x24b   :  { %v9955_v12 = vor.u32 %v11223_v54, %v9954_v6  ;;  %v9666_v36 = vld [vmem:[#allocation10 + $0x888] sm:$0xf]  ;;  %5674 = vmatpush.bf16.msra.mxu0 %v9699_v11  ;;  %v9572_v6 = vld [vmem:[#allocation10 + $0x7e8] sm:$0xf0] }
 0x24c   :  { %v11151_v16 = vld [vmem:[#allocation10 + $0x8a4] sm:$0xf0]  ;;  %5700 = vmatpush.bf16.msra.mxu2 %v8679_v29  ;;  %v9575_v11 = vor.u32 %v11123_v55, %v9572_v6  ;;  %v11051_v29 = vld [vmem:[#allocation10 + $0x58c] sm:$0xf] }
 0x24d   :  { %v9922_v15 = vld [vmem:[#allocation10 + $0xa88] sm:$0xf]  ;;  %v9667_v33 = vor.u32 %v11151_v16, %v9666_v36  ;;  %5687 = vmatpush.bf16.msra.mxu1 %v9955_v12  ;;  %v9831_v12 = vor.u32 %v11187_v7, %v9828_v21  ;;  %v11115_v36 = vld [vmem:[#allocation10 + $0x78c] sm:$0xf]  ;;  %v10087_v16 = vor.u32 %v11251_v22, %v10084_v9  ;;  %v9287_v19 = vor.u32 %v11051_v29, %v9284_v13 }
 0x24e   :  { %v11215_v18 = vld [vmem:[#allocation10 + $0xaa4] sm:$0xf0]  ;;  %5713 = vmatpush.bf16.msra.mxu3 %v8935_v17  ;;  %v11179_v17 = vld [vmem:[#allocation10 + $0x98c] sm:$0xf] }
 0x24f   :  { %v9923_v37 = vor.u32 %v11215_v18, %v9922_v15  ;;  %v9634_v40 = vld [vmem:[#allocation10 + $0x848] sm:$0xf]  ;;  %5675 = vmatpush.bf16.msra.mxu0 %v9667_v33  ;;  %v9540_v15 = vld [vmem:[#allocation10 + $0x7a8] sm:$0xf0] }
 0x250   :  { %v11143_v44 = vld [vmem:[#allocation10 + $0x864] sm:$0xf0]  ;;  %5701 = vmatpush.bf16.msra.mxu2 %v8647_v38  ;;  %v9796_v61 = vld [vmem:[#allocation10 + $0x9a8] sm:$0xf0]  ;;  %v9543_v30 = vor.u32 %v11115_v36, %v9540_v15 }
 0x251   :  { %v9890_v47 = vld [vmem:[#allocation10 + $0xa48] sm:$0xf]  ;;  %v9635_v60 = vor.u32 %v11143_v44, %v9634_v40  ;;  %5688 = vmatpush.bf16.msra.mxu1 %v9923_v37  ;;  %v11243_v18 = vld [vmem:[#allocation10 + $0xb8c] sm:$0xf]  ;;  %v9799_v14 = vor.u32 %v11179_v17, %v9796_v61  ;;  %v11873_v37 = vld [vmem:[#allocation11] sm:$0xff]  ;;  %v5497_v17 = vpop.f32.mrf.mxu2 }
 0x252   :  { %v11207_v52 = vld [vmem:[#allocation10 + $0xa64] sm:$0xf0]  ;;  %5714 = vmatpush.bf16.msra.mxu3 %v8903_v49  ;;  %v10052_v45 = vld [vmem:[#allocation10 + $0xba8] sm:$0xf0]  ;;  %v3512_v57 = vperm.slane %v11873_v37, 0 }
 0x253   :  { %v9602_v62 = vld [vmem:[#allocation10 + $0x808] sm:$0xf]  ;;  %v9891_v63 = vor.u32 %v11207_v52, %v9890_v47  ;;  %5676 = vmatpush.bf16.msra.mxu0 %v9635_v60  ;;  %v11043_v25 = vld [vmem:[#allocation10 + $0x54c] sm:$0xf]  ;;  %v10055_v38 = vor.u32 %v11243_v18, %v10052_v45  ;;  %v5473_v45 = vpop.f32.mrf.mxu0 }
 0x254   :  { %v11135_v50 = vld [vmem:[#allocation10 + $0x824] sm:$0xf0]  ;;  %5702 = vmatpush.bf16.msra.mxu2 %v8615_v0  ;;  %v9252_v33 = vld [vmem:[#allocation10 + $0x568] sm:$0xf0]  ;;  %v5472_v28 = vadd.f32 %v5471_v51, %v3512_v57 }
 0x255   :  { %v9858_v1 = vld [vmem:[#allocation10 + $0xa08] sm:$0xf]  ;;  %v9603_v20 = vor.u32 %v11135_v50, %v9602_v62  ;;  %5689 = vmatpush.bf16.msra.mxu1 %v9891_v63  ;;  %v11107_v35 = vld [vmem:[#allocation10 + $0x74c] sm:$0xf]  ;;  %v9255_v56 = vor.u32 %v11043_v25, %v9252_v33 }
 0x256   :  { %v11199_v24 = vld [vmem:[#allocation10 + $0xa24] sm:$0xf0]  ;;  %5715 = vmatpush.bf16.msra.mxu3 %v8871_v3  ;;  %v9508_v40 = vld [vmem:[#allocation10 + $0x768] sm:$0xf0]  ;;  %v5485_v22 = vadd.f32 %v5484_v41, %v5472_v28 }
 0x257   :  { %v9859_v54 = vor.u32 %v11199_v24, %v9858_v1  ;;  %5677 = vmatpush.bf16.msra.mxu0 %v9603_v20  ;;  %v11171_v44 = vld [vmem:[#allocation10 + $0x94c] sm:$0xf]  ;;  %v11877_v52 = vld [vmem:[#allocation1] sm:$0xff] }
 0x258   :  { %5703 = vmatpush.bf16.msra.mxu2 %v8583_v8  ;;  %v9764_v47 = vld [vmem:[#allocation10 + $0x968] sm:$0xf0] }
 0x259   :  { %5690 = vmatpush.bf16.msra.mxu1 %v9859_v54  ;;  %v11235_v48 = vld [vmem:[#allocation10 + $0xb4c] sm:$0xf]  ;;  %v9767_v59 = vor.u32 %v11171_v44, %v9764_v47  ;;  %v5510_v25 = vpop.f32.mrf.mxu3  ;;  %v5499_v41 = vpop.f32.mrf.mxu2 }
 0x25a   :  { %5716 = vmatpush.bf16.msra.mxu3 %v8839_v10  ;;  %5678 = vmatmul.bf16.vlgmr.msra.gmra.mxu0 %v11848_v23  ;;  %v10020_v49 = vld [vmem:[#allocation10 + $0xb68] sm:$0xf0]  ;;  %v9511_v23 = vor.u32 %v11107_v35, %v9508_v40 }
 0x25b   :  { %5722 = vmatpush.bf16.msrb.mxu0 %v9319_v26  ;;  %5704 = vmatmul.bf16.vlgmr.msra.gmra.mxu2 %v11877_v52  ;;  %v11881_v58 = vld [vmem:[#allocation1 + $0x9] sm:$0xff]  ;;  %v10023_v50 = vor.u32 %v11235_v48, %v10020_v49 }
 0x25c   :  { %5748 = vmatpush.bf16.msrb.mxu2 %v9831_v12  ;;  %5691 = vmatmul.bf16.vlgmr.msra.gmra.mxu1 %v11850_v27  ;;  %v11035_v60 = vld [vmem:[#allocation10 + $0x50c] sm:$0xf] }
 0x25d   :  { %5735 = vmatpush.bf16.msrb.mxu1 %v9575_v11  ;;  %5717 = vmatmul.bf16.vlgmr.msra.gmra.mxu3 %v11881_v58  ;;  %v9220_v27 = vld [vmem:[#allocation10 + $0x528] sm:$0xf0] }
 0x25e   :  { %5761 = vmatpush.bf16.msrb.mxu3 %v10087_v16  ;;  %v11099_v62 = vld [vmem:[#allocation10 + $0x70c] sm:$0xf]  ;;  %v9223_v3 = vor.u32 %v11035_v60, %v9220_v27 }
 0x25f   :  { %5723 = vmatpush.bf16.msrb.mxu0 %v9287_v19  ;;  %v9476_v63 = vld [vmem:[#allocation10 + $0x728] sm:$0xf0]  ;;  %v5498_v19 = vadd.f32 %v5497_v17, %v5485_v22  ;;  %v11128_v22 = vld [vmem:[#allocation10 + $0x7ec] sm:$0xf0] }
 0x260   :  { %5749 = vmatpush.bf16.msrb.mxu2 %v9799_v14  ;;  %v11163_v0 = vld [vmem:[#allocation10 + $0x90c] sm:$0xf]  ;;  %v9479_v53 = vor.u32 %v11099_v62, %v9476_v63  ;;  %v5486_v14 = vpop.f32.mrf.mxu1  ;;  %v11056_v17 = vld [vmem:[#allocation10 + $0x5ac] sm:$0xf0] }
 0x261   :  { %5736 = vmatpush.bf16.msrb.mxu1 %v9543_v30  ;;  %v9732_v1 = vld [vmem:[#allocation10 + $0x928] sm:$0xf0]  ;;  %v11884_v47 = vadd.f32 %v5510_v25, %v5498_v19  ;;  %v10920_v14 = vld [vmem:[#allocation10 + $0x16c] sm:$0xf0] }
 0x262   :  { %5762 = vmatpush.bf16.msrb.mxu3 %v10055_v38  ;;  %v11227_v24 = vld [vmem:[#allocation10 + $0xb0c] sm:$0xf]  ;;  %v9735_v32 = vor.u32 %v11163_v0, %v9732_v1 }
 0x263   :  { %v9988_v2 = vld [vmem:[#allocation10 + $0xb28] sm:$0xf0]  ;;  %5724 = vmatpush.bf16.msrb.mxu0 %v9255_v56 }
 0x264   :  { %5750 = vmatpush.bf16.msrb.mxu2 %v9767_v59  ;;  %v11027_v4 = vld [vmem:[#allocation10 + $0x4cc] sm:$0xf]  ;;  %v9991_v20 = vor.u32 %v11227_v24, %v9988_v2 }
 0x265   :  { %5737 = vmatpush.bf16.msrb.mxu1 %v9511_v23  ;;  %v9188_v5 = vld [vmem:[#allocation10 + $0x4e8] sm:$0xf0] }
 0x266   :  { %v11091_v55 = vld [vmem:[#allocation10 + $0x6cc] sm:$0xf]  ;;  %5763 = vmatpush.bf16.msrb.mxu3 %v10023_v50  ;;  %v9191_v9 = vor.u32 %v11027_v4, %v9188_v5  ;;  %v9066_v4 = vld [vmem:[#allocation10 + $0x3d0] sm:$0xf]  ;;  %v5512_v5 = vpop.f32.mrf.mxu3 }
 0x267   :  { %v9444_v6 = vld [vmem:[#allocation10 + $0x6e8] sm:$0xf0]  ;;  %5725 = vmatpush.bf16.msrb.mxu0 %v9223_v3 }
 0x268   :  { %v11155_v7 = vld [vmem:[#allocation10 + $0x8cc] sm:$0xf]  ;;  %5751 = vmatpush.bf16.msrb.mxu2 %v9735_v32  ;;  %v9447_v10 = vor.u32 %v11091_v55, %v9444_v6  ;;  %v10936_v32 = vld [vmem:[#allocation10 + $0x1ec] sm:$0xf0] }
 0x269   :  { %v9700_v21 = vld [vmem:[#allocation10 + $0x8e8] sm:$0xf0]  ;;  %5738 = vmatpush.bf16.msrb.mxu1 %v9479_v53  ;;  %v8810_v53 = vld [vmem:[#allocation10 + $0x1d0] sm:$0xf] }
 0x26a   :  { %v11219_v54 = vld [vmem:[#allocation10 + $0xacc] sm:$0xf]  ;;  %v9703_v26 = vor.u32 %v11155_v7, %v9700_v21  ;;  %5764 = vmatpush.bf16.msrb.mxu3 %v9991_v20  ;;  %v11000_v20 = vld [vmem:[#allocation10 + $0x3ec] sm:$0xf0] }
 0x26b   :  { %v9956_v8 = vld [vmem:[#allocation10 + $0xae8] sm:$0xf0]  ;;  %5726 = vmatpush.bf16.msrb.mxu0 %v9191_v9  ;;  %v9322_v6 = vld [vmem:[#allocation10 + $0x5d0] sm:$0xf]  ;;  %v11898_v41 = vpop.f32.mrf.mxu0 }
 0x26c   :  { %v11019_v11 = vld [vmem:[#allocation10 + $0x48c] sm:$0xf]  ;;  %v9959_v13 = vor.u32 %v11219_v54, %v9956_v8  ;;  %5752 = vmatpush.bf16.msrb.mxu2 %v9703_v26  ;;  %v11064_v7 = vld [vmem:[#allocation10 + $0x5ec] sm:$0xf0]  ;;  %v9067_v26 = vor.u32 %v11000_v20, %v9066_v4 }
 0x26d   :  { %v9156_v12 = vld [vmem:[#allocation10 + $0x4a8] sm:$0xf0]  ;;  %5739 = vmatpush.bf16.msrb.mxu1 %v9447_v10  ;;  %v9578_v8 = vld [vmem:[#allocation10 + $0x7d0] sm:$0xf]  ;;  %v8811_v10 = vor.u32 %v10936_v32, %v8810_v53  ;;  %v11900_v32 = vpop.f32.mrf.mxu1 }
 0x26e   :  { %v11083_v29 = vld [vmem:[#allocation10 + $0x68c] sm:$0xf]  ;;  %v9159_v30 = vor.u32 %v11019_v11, %v9156_v12  ;;  %5765 = vmatpush.bf16.msrb.mxu3 %v9959_v13  ;;  %v9323_v11 = vor.u32 %v11064_v7, %v9322_v6  ;;  %v8778_v12 = vld [vmem:[#allocation10 + $0x190] sm:$0xf] }
 0x26f   :  { %v9412_v36 = vld [vmem:[#allocation10 + $0x6a8] sm:$0xf0]  ;;  %v9034_v13 = vld [vmem:[#allocation10 + $0x390] sm:$0xf] }
 0x270   :  { %v11147_v16 = vld [vmem:[#allocation10 + $0x88c] sm:$0xf]  ;;  %v9415_v33 = vor.u32 %v11083_v29, %v9412_v36  ;;  %5727 = vmatpush.bf16.msrb.mxu0 %v9159_v30  ;;  %v10928_v29 = vld [vmem:[#allocation10 + $0x1ac] sm:$0xf0]  ;;  %v9579_v36 = vor.u32 %v11128_v22, %v9578_v8 }
 0x271   :  { %v9668_v15 = vld [vmem:[#allocation10 + $0x8a8] sm:$0xf0]  ;;  %v8779_v45 = vor.u32 %v10928_v29, %v8778_v12  ;;  %v8746_v30 = vld [vmem:[#allocation10 + $0x150] sm:$0xf] }
 0x272   :  { %v11211_v61 = vld [vmem:[#allocation10 + $0xa8c] sm:$0xf]  ;;  %v9671_v35 = vor.u32 %v11147_v16, %v9668_v15  ;;  %5740 = vmatpush.bf16.msrb.mxu1 %v9415_v33  ;;  %v10992_v16 = vld [vmem:[#allocation10 + $0x3ac] sm:$0xf0] }
 0x273   :  { %v9924_v18 = vld [vmem:[#allocation10 + $0xaa8] sm:$0xf0]  ;;  %v9290_v15 = vld [vmem:[#allocation10 + $0x590] sm:$0xf]  ;;  %v9035_v19 = vor.u32 %v10992_v16, %v9034_v13 }
 0x274   :  { %v11011_v38 = vld [vmem:[#allocation10 + $0x44c] sm:$0xf]  ;;  %v9927_v48 = vor.u32 %v11211_v61, %v9924_v18  ;;  %5753 = vmatpush.bf16.msrb.mxu2 %v9671_v35  ;;  %v9546_v61 = vld [vmem:[#allocation10 + $0x790] sm:$0xf]  ;;  %v9291_v25 = vor.u32 %v11056_v17, %v9290_v15 }
 0x275   :  { %v9124_v40 = vld [vmem:[#allocation10 + $0x468] sm:$0xf0]  ;;  %v11120_v18 = vld [vmem:[#allocation10 + $0x7ac] sm:$0xf0] }
 0x276   :  { %v11075_v44 = vld [vmem:[#allocation10 + $0x64c] sm:$0xf]  ;;  %v9127_v60 = vor.u32 %v11011_v38, %v9124_v40  ;;  %5766 = vmatpush.bf16.msrb.mxu3 %v9927_v48  ;;  %v9002_v33 = vld [vmem:[#allocation10 + $0x350] sm:$0xf]  ;;  %v9547_v35 = vor.u32 %v11120_v18, %v9546_v61  ;;  %v11886_v48 = vld [vmem:[#allocation1 + $0x12] sm:$0xff] }
 0x277   :  { %v9380_v49 = vld [vmem:[#allocation10 + $0x668] sm:$0xf0]  ;;  %v10984_v38 = vld [vmem:[#allocation10 + $0x36c] sm:$0xf0] }
 0x278   :  { %v11139_v56 = vld [vmem:[#allocation10 + $0x84c] sm:$0xf]  ;;  %v9383_v50 = vor.u32 %v11075_v44, %v9380_v49  ;;  %5728 = vmatpush.bf16.msrb.mxu0 %v9127_v60  ;;  %v9258_v40 = vld [vmem:[#allocation10 + $0x550] sm:$0xf] }
 0x279   :  { %v9636_v57 = vld [vmem:[#allocation10 + $0x868] sm:$0xf0]  ;;  %v11048_v44 = vld [vmem:[#allocation10 + $0x56c] sm:$0xf0] }
 0x27a   :  { %v11203_v23 = vld [vmem:[#allocation10 + $0xa4c] sm:$0xf]  ;;  %v9639_v63 = vor.u32 %v11139_v56, %v9636_v57  ;;  %5741 = vmatpush.bf16.msrb.mxu1 %v9383_v50  ;;  %v9514_v49 = vld [vmem:[#allocation10 + $0x750] sm:$0xf]  ;;  %v11889_v57 = vld [vmem:[#allocation1 + $0x1b] sm:$0xff] }
 0x27b   :  { %v9892_v59 = vld [vmem:[#allocation10 + $0xa68] sm:$0xf0]  ;;  %v11112_v56 = vld [vmem:[#allocation10 + $0x76c] sm:$0xf0] }
 0x27c   :  { %v11003_v27 = vld [vmem:[#allocation10 + $0x40c] sm:$0xf]  ;;  %v9895_v2 = vor.u32 %v11203_v23, %v9892_v59  ;;  %5754 = vmatpush.bf16.msrb.mxu2 %v9639_v63  ;;  %v8747_v59 = vor.u32 %v10920_v14, %v8746_v30  ;;  %v11895_v60 = vld [vmem:[#allocation1 + $0x2d] sm:$0xff] }
 0x27d   :  { %v9092_v62 = vld [vmem:[#allocation10 + $0x428] sm:$0xf0]  ;;  %v8714_v50 = vld [vmem:[#allocation10 + $0x110] sm:$0xf] }
 0x27e   :  { %v11067_v0 = vld [vmem:[#allocation10 + $0x60c] sm:$0xf]  ;;  %v9095_v55 = vor.u32 %v11003_v27, %v9092_v62  ;;  %5767 = vmatpush.bf16.msrb.mxu3 %v9895_v2  ;;  %v9003_v27 = vor.u32 %v10984_v38, %v9002_v33  ;;  %v9259_v62 = vor.u32 %v11048_v44, %v9258_v40  ;;  %v10912_v63 = vld [vmem:[#allocation10 + $0x12c] sm:$0xf0] }
 0x27f   :  { %v9348_v1 = vld [vmem:[#allocation10 + $0x628] sm:$0xf0]  ;;  %v9226_v2 = vld [vmem:[#allocation10 + $0x510] sm:$0xf]  ;;  %v8715_v53 = vor.u32 %v10912_v63, %v8714_v50 }
 0x280   :  { %v11131_v24 = vld [vmem:[#allocation10 + $0x80c] sm:$0xf]  ;;  %v9351_v21 = vor.u32 %v11067_v0, %v9348_v1  ;;  %5729 = vmatpush.bf16.msrb.mxu0 %v9095_v55  ;;  %v8970_v0 = vld [vmem:[#allocation10 + $0x310] sm:$0xf]  ;;  %v9515_v1 = vor.u32 %v11112_v56, %v9514_v49 }
 0x281   :  { %v9604_v51 = vld [vmem:[#allocation10 + $0x828] sm:$0xf0]  ;;  %v8682_v55 = vld [vmem:[#allocation10 + $0xd0] sm:$0xf] }
 0x282   :  { %v11195_v3 = vld [vmem:[#allocation10 + $0xa0c] sm:$0xf]  ;;  %v9607_v54 = vor.u32 %v11131_v24, %v9604_v51  ;;  %5742 = vmatpush.bf16.msrb.mxu1 %v9351_v21  ;;  %v10976_v24 = vld [vmem:[#allocation10 + $0x32c] sm:$0xf0] }
 0x283   :  { %v9860_v28 = vld [vmem:[#allocation10 + $0xa28] sm:$0xf0]  ;;  %5730 = vmatmul.bf16.vlgmr.msrb.gmra.mxu0 %v11886_v48  ;;  %v11040_v51 = vld [vmem:[#allocation10 + $0x52c] sm:$0xf0]  ;;  %v8971_v4 = vor.u32 %v10976_v24, %v8970_v0  ;;  %v3513_v0 = vperm.slane %v11873_v37, 1 }
 0x284   :  { %v9863_v9 = vor.u32 %v11195_v3, %v9860_v28  ;;  %5755 = vmatpush.bf16.msrb.mxu2 %v9607_v54  ;;  %5774 = vmatpush.bf16.msra.mxu0 %v8811_v10  ;;  %v11892_v23 = vld [vmem:[#allocation1 + $0x24] sm:$0xff]  ;;  %v9482_v3 = vld [vmem:[#allocation10 + $0x710] sm:$0xf]  ;;  %v9227_v5 = vor.u32 %v11040_v51, %v9226_v2 }
 0x285   :  { %5743 = vmatmul.bf16.vlgmr.msrb.gmra.mxu1 %v11889_v57  ;;  %v11104_v28 = vld [vmem:[#allocation10 + $0x72c] sm:$0xf0] }
 0x286   :  { %5768 = vmatpush.bf16.msrb.mxu3 %v9863_v9  ;;  %5787 = vmatpush.bf16.msra.mxu1 %v9067_v26  ;;  %v10904_v20 = vld [vmem:[#allocation10 + $0xec] sm:$0xf0]  ;;  %v9483_v7 = vor.u32 %v11104_v28, %v9482_v3 }
 0x287   :  { %5756 = vmatmul.bf16.vlgmr.msrb.gmra.mxu2 %v11892_v23  ;;  %v8938_v6 = vld [vmem:[#allocation10 + $0x2d0] sm:$0xf]  ;;  %v8683_v10 = vor.u32 %v10904_v20, %v8682_v55 }
 0x288   :  { %5800 = vmatpush.bf16.msra.mxu2 %v9323_v11  ;;  %5775 = vmatpush.bf16.msra.mxu0 %v8779_v45  ;;  %v10968_v21 = vld [vmem:[#allocation10 + $0x2ec] sm:$0xf0]  ;;  %v5525_v45 = vpop.f32.mrf.mxu0 }
 0x289   :  { %5769 = vmatmul.bf16.vlgmr.msrb.gmra.mxu3 %v11895_v60  ;;  %v9194_v54 = vld [vmem:[#allocation10 + $0x4d0] sm:$0xf]  ;;  %v8939_v26 = vor.u32 %v10968_v21, %v8938_v6 }
 0x28a   :  { %5813 = vmatpush.bf16.msra.mxu3 %v9579_v36  ;;  %5788 = vmatpush.bf16.msra.mxu1 %v9035_v19  ;;  %v11032_v8 = vld [vmem:[#allocation10 + $0x4ec] sm:$0xf0] }
 0x28b   :  { %v9450_v22 = vld [vmem:[#allocation10 + $0x6d0] sm:$0xf]  ;;  %v9195_v11 = vor.u32 %v11032_v8, %v9194_v54 }
 0x28c   :  { %5801 = vmatpush.bf16.msra.mxu2 %v9291_v25  ;;  %5776 = vmatpush.bf16.msra.mxu0 %v8747_v59  ;;  %v11096_v9 = vld [vmem:[#allocation10 + $0x6ec] sm:$0xf0]  ;;  %v5538_v25 = vpop.f32.mrf.mxu1 }
 0x28d   :  { %v8650_v12 = vld [vmem:[#allocation10 + $0x90] sm:$0xf]  ;;  %v9451_v36 = vor.u32 %v11096_v9, %v9450_v22  ;;  %v10932_v22 = vld [vmem:[#allocation10 + $0x1d4] sm:$0xf] }
 0x28e   :  { %5814 = vmatpush.bf16.msra.mxu3 %v9547_v35  ;;  %5789 = vmatpush.bf16.msra.mxu1 %v9003_v27  ;;  %v10896_v29 = vld [vmem:[#allocation10 + $0xac] sm:$0xf0]  ;;  %v8812_v9 = vld [vmem:[#allocation10 + $0x1f0] sm:$0xf0] }
 0x28f   :  { %v8906_v13 = vld [vmem:[#allocation10 + $0x290] sm:$0xf]  ;;  %v8651_v19 = vor.u32 %v10896_v29, %v8650_v12  ;;  %v10996_v12 = vld [vmem:[#allocation10 + $0x3d4] sm:$0xf] }
 0x290   :  { %5802 = vmatpush.bf16.msra.mxu2 %v9259_v62  ;;  %5777 = vmatpush.bf16.msra.mxu0 %v8715_v53  ;;  %v10960_v16 = vld [vmem:[#allocation10 + $0x2ac] sm:$0xf0]  ;;  %v9068_v29 = vld [vmem:[#allocation10 + $0x3f0] sm:$0xf0] }
 0x291   :  { %v9162_v15 = vld [vmem:[#allocation10 + $0x490] sm:$0xf]  ;;  %v8907_v30 = vor.u32 %v10960_v16, %v8906_v13 }
 0x292   :  { %5815 = vmatpush.bf16.msra.mxu3 %v9515_v1  ;;  %5790 = vmatpush.bf16.msra.mxu1 %v8971_v4  ;;  %v11024_v17 = vld [vmem:[#allocation10 + $0x4ac] sm:$0xf0]  ;;  %v5549_v1 = vpop.f32.mrf.mxu2 }
 0x293   :  { %v9418_v61 = vld [vmem:[#allocation10 + $0x690] sm:$0xf]  ;;  %v9163_v14 = vor.u32 %v11024_v17, %v9162_v15  ;;  %v5550_v20 = vadd.f32 %v5549_v1, %v3513_v0  ;;  %v8815_v17 = vor.u32 %v10932_v22, %v8812_v9  ;;  %v8748_v0 = vld [vmem:[#allocation10 + $0x170] sm:$0xf0] }
 0x294   :  { %5803 = vmatpush.bf16.msra.mxu2 %v9227_v5  ;;  %v11088_v18 = vld [vmem:[#allocation10 + $0x6ac] sm:$0xf0]  ;;  %5778 = vmatpush.bf16.msra.mxu0 %v8683_v10  ;;  %v5562_v10 = vpop.f32.mrf.mxu3 }
 0x295   :  { %v8618_v33 = vld [vmem:[#allocation10 + $0x50] sm:$0xf]  ;;  %v9419_v40 = vor.u32 %v11088_v18, %v9418_v61  ;;  %v5563_v13 = vadd.f32 %v5562_v10, %v5550_v20 }
 0x296   :  { %5816 = vmatpush.bf16.msra.mxu3 %v9483_v7  ;;  %5791 = vmatpush.bf16.msra.mxu1 %v8939_v26  ;;  %v10888_v35 = vld [vmem:[#allocation10 + $0x6c] sm:$0xf0]  ;;  %v5588_v10 = vpop.f32.mrf.mxu1 }
 0x297   :  { %v8874_v38 = vld [vmem:[#allocation10 + $0x250] sm:$0xf]  ;;  %v8619_v62 = vor.u32 %v10888_v35, %v8618_v33  ;;  %v10988_v35 = vld [vmem:[#allocation10 + $0x394] sm:$0xf] }
 0x298   :  { %5804 = vmatpush.bf16.msra.mxu2 %v9195_v11  ;;  %v10952_v44 = vld [vmem:[#allocation10 + $0x26c] sm:$0xf0]  ;;  %5779 = vmatpush.bf16.msra.mxu0 %v8651_v19  ;;  %v9071_v19 = vor.u32 %v10996_v12, %v9068_v29 }
 0x299   :  { %v9130_v49 = vld [vmem:[#allocation10 + $0x450] sm:$0xf]  ;;  %v8875_v24 = vor.u32 %v10952_v44, %v8874_v38  ;;  %v9036_v38 = vld [vmem:[#allocation10 + $0x3b0] sm:$0xf0] }
 0x29a   :  { %5817 = vmatpush.bf16.msra.mxu3 %v9451_v36  ;;  %v11016_v56 = vld [vmem:[#allocation10 + $0x46c] sm:$0xf0]  ;;  %5792 = vmatpush.bf16.msra.mxu1 %v8907_v30  ;;  %v10924_v30 = vld [vmem:[#allocation10 + $0x194] sm:$0xf]  ;;  %v5551_v33 = vpop.f32.mrf.mxu2 }
 0x29b   :  { %v9386_v59 = vld [vmem:[#allocation10 + $0x650] sm:$0xf]  ;;  %v9131_v2 = vor.u32 %v11016_v56, %v9130_v49 }
 0x29c   :  { %v11080_v27 = vld [vmem:[#allocation10 + $0x66c] sm:$0xf0]  ;;  %5805 = vmatpush.bf16.msra.mxu2 %v9163_v14  ;;  %5780 = vmatpush.bf16.msra.mxu0 %v8619_v62  ;;  %v8780_v14 = vld [vmem:[#allocation10 + $0x1b0] sm:$0xf0]  ;;  %v9039_v62 = vor.u32 %v10988_v35, %v9036_v38  ;;  %v5564_v1 = vpop.f32.mrf.mxu3 }
 0x29d   :  { %v8586_v50 = vld [vmem:[#allocation10 + $0x10] sm:$0xf]  ;;  %v9387_v53 = vor.u32 %v11080_v27, %v9386_v59  ;;  %v8783_v49 = vor.u32 %v10924_v30, %v8780_v14 }
 0x29e   :  { %v10880_v63 = vld [vmem:[#allocation10 + $0x2c] sm:$0xf0]  ;;  %5818 = vmatpush.bf16.msra.mxu3 %v9419_v40  ;;  %5793 = vmatpush.bf16.msra.mxu1 %v8875_v24  ;;  %v10980_v24 = vld [vmem:[#allocation10 + $0x354] sm:$0xf]  ;;  %v5590_v1 = vpop.f32.mrf.mxu1 }
 0x29f   :  { %v8842_v51 = vld [vmem:[#allocation10 + $0x210] sm:$0xf]  ;;  %v8587_v54 = vor.u32 %v10880_v63, %v8586_v50  ;;  %v10916_v63 = vld [vmem:[#allocation10 + $0x154] sm:$0xf] }
 0x2a0   :  { %v10944_v3 = vld [vmem:[#allocation10 + $0x22c] sm:$0xf0]  ;;  %5806 = vmatpush.bf16.msra.mxu2 %v9131_v2  ;;  %v9004_v2 = vld [vmem:[#allocation10 + $0x370] sm:$0xf0] }
 0x2a1   :  { %v9098_v28 = vld [vmem:[#allocation10 + $0x410] sm:$0xf]  ;;  %v8843_v26 = vor.u32 %v10944_v3, %v8842_v51  ;;  %5781 = vmatpush.bf16.msra.mxu0 %v8587_v54  ;;  %v8972_v54 = vld [vmem:[#allocation10 + $0x330] sm:$0xf0] }
 0x2a2   :  { %v11008_v4 = vld [vmem:[#allocation10 + $0x42c] sm:$0xf0]  ;;  %5819 = vmatpush.bf16.msra.mxu3 %v9387_v53  ;;  %v9804_v1 = vld [vmem:[#allocation10 + $0x9b0] sm:$0xf0] }
 0x2a3   :  { %v9354_v5 = vld [vmem:[#allocation10 + $0x610] sm:$0xf]  ;;  %v9099_v11 = vor.u32 %v11008_v4, %v9098_v28  ;;  %5794 = vmatpush.bf16.msra.mxu1 %v8843_v26  ;;  %v8751_v28 = vor.u32 %v10916_v63, %v8748_v0 }
 0x2a4   :  { %v11072_v55 = vld [vmem:[#allocation10 + $0x62c] sm:$0xf0]  ;;  %5782 = vmatmul.bf16.vlgmr.msra.gmra.mxu0 %v11877_v52  ;;  %v5614_v63 = vpop.f32.mrf.mxu3 }
 0x2a5   :  { %v9834_v6 = vld [vmem:[#allocation10 + $0x9d0] sm:$0xf]  ;;  %v9355_v36 = vor.u32 %v11072_v55, %v9354_v5  ;;  %5807 = vmatpush.bf16.msra.mxu2 %v9099_v11  ;;  %v9007_v55 = vor.u32 %v10980_v24, %v9004_v2 }
 0x2a6   :  { %v11192_v7 = vld [vmem:[#allocation10 + $0x9ec] sm:$0xf0]  ;;  %5795 = vmatmul.bf16.vlgmr.msra.gmra.mxu1 %v11881_v58 }
 0x2a7   :  { %v10090_v21 = vld [vmem:[#allocation10 + $0xbd0] sm:$0xf]  ;;  %v9835_v16 = vor.u32 %v11192_v7, %v9834_v6  ;;  %5820 = vmatpush.bf16.msra.mxu3 %v9355_v36  ;;  %v10908_v6 = vld [vmem:[#allocation10 + $0x114] sm:$0xf] }
 0x2a8   :  { %v11256_v8 = vld [vmem:[#allocation10 + $0xbec] sm:$0xf0]  ;;  %5808 = vmatmul.bf16.vlgmr.msra.gmra.mxu2 %v11886_v48  ;;  %v8716_v7 = vld [vmem:[#allocation10 + $0x130] sm:$0xf0] }
 0x2a9   :  { %v10091_v15 = vor.u32 %v11256_v8, %v10090_v21  ;;  %v9802_v61 = vld [vmem:[#allocation10 + $0x990] sm:$0xf]  ;;  %5826 = vmatpush.bf16.msrb.mxu0 %v9835_v16  ;;  %5852 = vmatpush.bf16.msrb.mxu2 %v8815_v17  ;;  %v10972_v21 = vld [vmem:[#allocation10 + $0x314] sm:$0xf]  ;;  %v5575_v8 = vpop.f32.mrf.mxu0  ;;  %v8719_v11 = vor.u32 %v10908_v6, %v8716_v7 }
 0x2aa   :  { %v11184_v18 = vld [vmem:[#allocation10 + $0x9ac] sm:$0xf0]  ;;  %5821 = vmatmul.bf16.vlgmr.msra.gmra.mxu3 %v11889_v57  ;;  %v5576_v9 = vadd.f32 %v5575_v8, %v5563_v13  ;;  %v8975_v16 = vor.u32 %v10972_v21, %v8972_v54  ;;  %v10900_v17 = vld [vmem:[#allocation10 + $0xd4] sm:$0xf] }
 0x2ab   :  { %v10058_v45 = vld [vmem:[#allocation10 + $0xb90] sm:$0xf]  ;;  %v9803_v40 = vor.u32 %v11184_v18, %v9802_v61  ;;  %5839 = vmatpush.bf16.msrb.mxu1 %v10091_v15  ;;  %5865 = vmatpush.bf16.msrb.mxu3 %v9071_v19  ;;  %v8684_v61 = vld [vmem:[#allocation10 + $0xf0] sm:$0xf0] }
 0x2ac   :  { %v11248_v25 = vld [vmem:[#allocation10 + $0xbac] sm:$0xf0]  ;;  %v10964_v18 = vld [vmem:[#allocation10 + $0x2d4] sm:$0xf]  ;;  %v5589_v19 = vadd.f32 %v5588_v10, %v5576_v9  ;;  %v8687_v30 = vor.u32 %v10900_v17, %v8684_v61 }
 0x2ad   :  { %v10059_v44 = vor.u32 %v11248_v25, %v10058_v45  ;;  %v9770_v56 = vld [vmem:[#allocation10 + $0x950] sm:$0xf]  ;;  %5827 = vmatpush.bf16.msrb.mxu0 %v9803_v40  ;;  %5853 = vmatpush.bf16.msrb.mxu2 %v8783_v49  ;;  %v8940_v45 = vld [vmem:[#allocation10 + $0x2f0] sm:$0xf0] }
 0x2ae   :  { %v11176_v59 = vld [vmem:[#allocation10 + $0x96c] sm:$0xf0]  ;;  %v8943_v38 = vor.u32 %v10964_v18, %v8940_v45  ;;  %v8652_v49 = vld [vmem:[#allocation10 + $0xb0] sm:$0xf0]  ;;  %v5616_v45 = vpop.f32.mrf.mxu3 }
 0x2af   :  { %v10026_v27 = vld [vmem:[#allocation10 + $0xb50] sm:$0xf]  ;;  %v9771_v51 = vor.u32 %v11176_v59, %v9770_v56  ;;  %5840 = vmatpush.bf16.msrb.mxu1 %v10059_v44  ;;  %5866 = vmatpush.bf16.msrb.mxu3 %v9039_v62  ;;  %v10892_v44 = vld [vmem:[#allocation10 + $0x94] sm:$0xf]  ;;  %v5601_v56 = vpop.f32.mrf.mxu2 }
 0x2b0   :  { %v11240_v50 = vld [vmem:[#allocation10 + $0xb6c] sm:$0xf0]  ;;  %v10956_v59 = vld [vmem:[#allocation10 + $0x294] sm:$0xf]  ;;  %v8655_v2 = vor.u32 %v10892_v44, %v8652_v49 }
 0x2b1   :  { %v10027_v3 = vor.u32 %v11240_v50, %v10026_v27  ;;  %v9738_v53 = vld [vmem:[#allocation10 + $0x910] sm:$0xf]  ;;  %5828 = vmatpush.bf16.msrb.mxu0 %v9771_v51  ;;  %5854 = vmatpush.bf16.msrb.mxu2 %v8751_v28  ;;  %v8908_v27 = vld [vmem:[#allocation10 + $0x2b0] sm:$0xf0]  ;;  %v5577_v62 = vpop.f32.mrf.mxu0  ;;  %v5602_v50 = vadd.f32 %v5601_v56, %v5589_v19 }
 0x2b2   :  { %v11168_v4 = vld [vmem:[#allocation10 + $0x92c] sm:$0xf0]  ;;  %v10948_v6 = vld [vmem:[#allocation10 + $0x254] sm:$0xf] }
 0x2b3   :  { %v9994_v5 = vld [vmem:[#allocation10 + $0xb10] sm:$0xf]  ;;  %v9739_v22 = vor.u32 %v11168_v4, %v9738_v53  ;;  %5841 = vmatpush.bf16.msrb.mxu1 %v10027_v3  ;;  %5867 = vmatpush.bf16.msrb.mxu3 %v9007_v55  ;;  %v11907_v53 = vadd.f32 %v5614_v63, %v5602_v50  ;;  %v8911_v4 = vor.u32 %v10956_v59, %v8908_v27  ;;  %v10884_v55 = vld [vmem:[#allocation10 + $0x54] sm:$0xf] }
 0x2b4   :  { %v11232_v20 = vld [vmem:[#allocation10 + $0xb2c] sm:$0xf0]  ;;  %v8876_v7 = vld [vmem:[#allocation10 + $0x270] sm:$0xf0] }
 0x2b5   :  { %v9995_v26 = vor.u32 %v11232_v20, %v9994_v5  ;;  %v9706_v12 = vld [vmem:[#allocation10 + $0x8d0] sm:$0xf]  ;;  %5829 = vmatpush.bf16.msrb.mxu0 %v9739_v22  ;;  %5855 = vmatpush.bf16.msrb.mxu2 %v8719_v11  ;;  %v8620_v20 = vld [vmem:[#allocation10 + $0x70] sm:$0xf0] }
 0x2b6   :  { %v11160_v29 = vld [vmem:[#allocation10 + $0x8ec] sm:$0xf0]  ;;  %v8623_v9 = vor.u32 %v10884_v55, %v8620_v20  ;;  %v10876_v11 = vld [vmem:[#allocation10 + $0x14] sm:$0xf] }
 0x2b7   :  { %v9962_v36 = vld [vmem:[#allocation10 + $0xad0] sm:$0xf]  ;;  %v9707_v25 = vor.u32 %v11160_v29, %v9706_v12  ;;  %5842 = vmatpush.bf16.msrb.mxu1 %v9995_v26  ;;  %5868 = vmatpush.bf16.msrb.mxu3 %v8975_v16  ;;  %v8879_v12 = vor.u32 %v10948_v6, %v8876_v7  ;;  %v8588_v29 = vld [vmem:[#allocation10 + $0x30] sm:$0xf0] }
 0x2b8   :  { %v11224_v15 = vld [vmem:[#allocation10 + $0xaec] sm:$0xf0]  ;;  %v8844_v16 = vld [vmem:[#allocation10 + $0x230] sm:$0xf0] }
 0x2b9   :  { %v9963_v13 = vor.u32 %v11224_v15, %v9962_v36  ;;  %v9674_v14 = vld [vmem:[#allocation10 + $0x890] sm:$0xf]  ;;  %5830 = vmatpush.bf16.msrb.mxu0 %v9707_v25  ;;  %5856 = vmatpush.bf16.msrb.mxu2 %v8687_v30  ;;  %v10940_v36 = vld [vmem:[#allocation10 + $0x214] sm:$0xf]  ;;  %v5603_v15 = vpop.f32.mrf.mxu2 }
 0x2ba   :  { %v11152_v33 = vld [vmem:[#allocation10 + $0x8ac] sm:$0xf0]  ;;  %v11060_v17 = vld [vmem:[#allocation10 + $0x5d4] sm:$0xf] }
 0x2bb   :  { %v9930_v35 = vld [vmem:[#allocation10 + $0xa90] sm:$0xf]  ;;  %v9675_v0 = vor.u32 %v11152_v33, %v9674_v14  ;;  %5843 = vmatpush.bf16.msrb.mxu1 %v9963_v13  ;;  %5869 = vmatpush.bf16.msrb.mxu3 %v8943_v38  ;;  %v9324_v61 = vld [vmem:[#allocation10 + $0x5f0] sm:$0xf0]  ;;  %v8591_v33 = vor.u32 %v10876_v11, %v8588_v29 }
 0x2bc   :  { %v11216_v40 = vld [vmem:[#allocation10 + $0xaac] sm:$0xf0]  ;;  %v11124_v18 = vld [vmem:[#allocation10 + $0x7d4] sm:$0xf]  ;;  %v9327_v44 = vor.u32 %v11060_v17, %v9324_v61 }
 0x2bd   :  { %v9931_v24 = vor.u32 %v11216_v40, %v9930_v35  ;;  %v9642_v51 = vld [vmem:[#allocation10 + $0x850] sm:$0xf]  ;;  %5831 = vmatpush.bf16.msrb.mxu0 %v9675_v0  ;;  %5857 = vmatpush.bf16.msrb.mxu2 %v8655_v2  ;;  %v9580_v25 = vld [vmem:[#allocation10 + $0x7f0] sm:$0xf0]  ;;  %v8847_v40 = vor.u32 %v10940_v36, %v8844_v16 }
 0x2be   :  { %v11144_v3 = vld [vmem:[#allocation10 + $0x86c] sm:$0xf0]  ;;  %v11188_v13 = vld [vmem:[#allocation10 + $0x9d4] sm:$0xf]  ;;  %v9583_v49 = vor.u32 %v11124_v18, %v9580_v25  ;;  %v5627_v18 = vpop.f32.mrf.mxu0 }
 0x2bf   :  { %v9898_v28 = vld [vmem:[#allocation10 + $0xa50] sm:$0xf]  ;;  %v9643_v21 = vor.u32 %v11144_v3, %v9642_v51  ;;  %5844 = vmatpush.bf16.msrb.mxu1 %v9931_v24  ;;  %5870 = vmatpush.bf16.msrb.mxu3 %v8911_v4  ;;  %v9836_v30 = vld [vmem:[#allocation10 + $0x9f0] sm:$0xf0] }
 0x2c0   :  { %v11208_v5 = vld [vmem:[#allocation10 + $0xa6c] sm:$0xf0]  ;;  %v11252_v35 = vld [vmem:[#allocation10 + $0xbd4] sm:$0xf]  ;;  %v9839_v56 = vor.u32 %v11188_v13, %v9836_v30 }
 0x2c1   :  { %v9610_v54 = vld [vmem:[#allocation10 + $0x810] sm:$0xf]  ;;  %v9899_v22 = vor.u32 %v11208_v5, %v9898_v28  ;;  %5832 = vmatpush.bf16.msrb.mxu0 %v9643_v21  ;;  %5858 = vmatpush.bf16.msrb.mxu2 %v8623_v9  ;;  %v10092_v38 = vld [vmem:[#allocation10 + $0xbf0] sm:$0xf0]  ;;  %v3514_v9 = vperm.slane %v11873_v37, 2 }
 0x2c2   :  { %v11136_v8 = vld [vmem:[#allocation10 + $0x82c] sm:$0xf0]  ;;  %v11052_v59 = vld [vmem:[#allocation10 + $0x594] sm:$0xf]  ;;  %v10095_v50 = vor.u32 %v11252_v35, %v10092_v38 }
 0x2c3   :  { %v9866_v10 = vld [vmem:[#allocation10 + $0xa10] sm:$0xf]  ;;  %v9611_v19 = vor.u32 %v11136_v8, %v9610_v54  ;;  %5845 = vmatpush.bf16.msrb.mxu1 %v9899_v22  ;;  %5871 = vmatpush.bf16.msrb.mxu3 %v8879_v12  ;;  %v9292_v27 = vld [vmem:[#allocation10 + $0x5b0] sm:$0xf0] }
 0x2c4   :  { %v11200_v26 = vld [vmem:[#allocation10 + $0xa2c] sm:$0xf0]  ;;  %v11116_v62 = vld [vmem:[#allocation10 + $0x794] sm:$0xf]  ;;  %v9295_v51 = vor.u32 %v11052_v59, %v9292_v27 }
 0x2c5   :  { %v9867_v14 = vor.u32 %v11200_v26, %v9866_v10  ;;  %5833 = vmatpush.bf16.msrb.mxu0 %v9611_v19  ;;  %v9548_v63 = vld [vmem:[#allocation10 + $0x7b0] sm:$0xf0]  ;;  %5859 = vmatpush.bf16.msrb.mxu2 %v8591_v33  ;;  %v5640_v19 = vpop.f32.mrf.mxu1 }
 0x2c6   :  { %v11180_v0 = vld [vmem:[#allocation10 + $0x994] sm:$0xf]  ;;  %v9551_v3 = vor.u32 %v11116_v62, %v9548_v63 }
 0x2c7   :  { %5846 = vmatpush.bf16.msrb.mxu1 %v9867_v14  ;;  %v11244_v24 = vld [vmem:[#allocation10 + $0xb94] sm:$0xf]  ;;  %5872 = vmatpush.bf16.msrb.mxu3 %v8847_v40  ;;  %v9807_v28 = vor.u32 %v11180_v0, %v9804_v1 }
 0x2c8   :  { %v10060_v2 = vld [vmem:[#allocation10 + $0xbb0] sm:$0xf0]  ;;  %5834 = vmatmul.bf16.vlgmr.msrb.gmra.mxu0 %v11892_v23  ;;  %5860 = vmatmul.bf16.vlgmr.msrb.gmra.mxu2 %v11877_v52 }
 0x2c9   :  { %5878 = vmatpush.bf16.msra.mxu0 %v9327_v44  ;;  %5904 = vmatpush.bf16.msra.mxu2 %v9839_v56  ;;  %v11044_v4 = vld [vmem:[#allocation10 + $0x554] sm:$0xf]  ;;  %v10063_v20 = vor.u32 %v11244_v24, %v10060_v2 }
 0x2ca   :  { %v9260_v5 = vld [vmem:[#allocation10 + $0x570] sm:$0xf0]  ;;  %5847 = vmatmul.bf16.vlgmr.msrb.gmra.mxu1 %v11895_v60  ;;  %5873 = vmatmul.bf16.vlgmr.msrb.gmra.mxu3 %v11881_v58  ;;  %v5628_v58 = vadd.f32 %v5627_v18, %v3514_v9 }
 0x2cb   :  { %5891 = vmatpush.bf16.msra.mxu1 %v9583_v49  ;;  %v11108_v55 = vld [vmem:[#allocation10 + $0x754] sm:$0xf]  ;;  %5917 = vmatpush.bf16.msra.mxu3 %v10095_v50  ;;  %v9263_v22 = vor.u32 %v11044_v4, %v9260_v5  ;;  %v5629_v5 = vpop.f32.mrf.mxu0 }
 0x2cc   :  { %v9516_v6 = vld [vmem:[#allocation10 + $0x770] sm:$0xf0]  ;;  %v5641_v56 = vadd.f32 %v5640_v19, %v5628_v58  ;;  %v10993_v5 = vld [vmem:[#allocation10 + $0x3b4] sm:$0xf0] }
 0x2cd   :  { %v11172_v7 = vld [vmem:[#allocation10 + $0x954] sm:$0xf]  ;;  %5879 = vmatpush.bf16.msra.mxu0 %v9295_v51  ;;  %5905 = vmatpush.bf16.msra.mxu2 %v9807_v28  ;;  %v9519_v10 = vor.u32 %v11108_v55, %v9516_v6 }
 0x2ce   :  { %v9772_v21 = vld [vmem:[#allocation10 + $0x970] sm:$0xf0] }
 0x2cf   :  { %v11236_v54 = vld [vmem:[#allocation10 + $0xb54] sm:$0xf]  ;;  %5892 = vmatpush.bf16.msra.mxu1 %v9551_v3  ;;  %v9775_v26 = vor.u32 %v11172_v7, %v9772_v21  ;;  %5918 = vmatpush.bf16.msra.mxu3 %v10063_v20  ;;  %v5653_v3 = vpop.f32.mrf.mxu2  ;;  %v5666_v20 = vpop.f32.mrf.mxu3 }
 0x2d0   :  { %v10028_v8 = vld [vmem:[#allocation10 + $0xb70] sm:$0xf0]  ;;  %v5654_v55 = vadd.f32 %v5653_v3, %v5641_v56  ;;  %v5642_v7 = vpop.f32.mrf.mxu1  ;;  %v9330_v56 = vld [vmem:[#allocation10 + $0x5d8] sm:$0xf] }
 0x2d1   :  { %v11036_v11 = vld [vmem:[#allocation10 + $0x514] sm:$0xf]  ;;  %v10031_v36 = vor.u32 %v11236_v54, %v10028_v8  ;;  %5880 = vmatpush.bf16.msra.mxu0 %v9263_v22  ;;  %5906 = vmatpush.bf16.msra.mxu2 %v9775_v26  ;;  %v10929_v3 = vld [vmem:[#allocation10 + $0x1b4] sm:$0xf0] }
 0x2d2   :  { %v9228_v12 = vld [vmem:[#allocation10 + $0x530] sm:$0xf0]  ;;  %v11121_v7 = vld [vmem:[#allocation10 + $0x7b4] sm:$0xf0] }
 0x2d3   :  { %v11100_v29 = vld [vmem:[#allocation10 + $0x714] sm:$0xf]  ;;  %v9231_v45 = vor.u32 %v11036_v11, %v9228_v12  ;;  %5893 = vmatpush.bf16.msra.mxu1 %v9519_v10  ;;  %5919 = vmatpush.bf16.msra.mxu3 %v10031_v36  ;;  %v11914_v10 = vadd.f32 %v5666_v20, %v5654_v55  ;;  %v9298_v55 = vld [vmem:[#allocation10 + $0x598] sm:$0xf] }
 0x2d4   :  { %v9484_v16 = vld [vmem:[#allocation10 + $0x730] sm:$0xf0]  ;;  %v11057_v20 = vld [vmem:[#allocation10 + $0x5b4] sm:$0xf0] }
 0x2d5   :  { %v11164_v15 = vld [vmem:[#allocation10 + $0x914] sm:$0xf]  ;;  %v9487_v37 = vor.u32 %v11100_v29, %v9484_v16  ;;  %5881 = vmatpush.bf16.msra.mxu0 %v9231_v45 }
 0x2d6   :  { %v9740_v17 = vld [vmem:[#allocation10 + $0x930] sm:$0xf0] }
 0x2d7   :  { %v11228_v61 = vld [vmem:[#allocation10 + $0xb14] sm:$0xf]  ;;  %v9743_v25 = vor.u32 %v11164_v15, %v9740_v17  ;;  %5894 = vmatpush.bf16.msra.mxu1 %v9487_v37 }
 0x2d8   :  { %v9996_v52 = vld [vmem:[#allocation10 + $0xb30] sm:$0xf0] }
 0x2d9   :  { %v11028_v13 = vld [vmem:[#allocation10 + $0x4d4] sm:$0xf]  ;;  %v9999_v33 = vor.u32 %v11228_v61, %v9996_v52  ;;  %5907 = vmatpush.bf16.msra.mxu2 %v9743_v25 }
 0x2da   :  { %v9196_v30 = vld [vmem:[#allocation10 + $0x4f0] sm:$0xf0] }
 0x2db   :  { %v11092_v14 = vld [vmem:[#allocation10 + $0x6d4] sm:$0xf]  ;;  %v9199_v59 = vor.u32 %v11028_v13, %v9196_v30  ;;  %5920 = vmatpush.bf16.msra.mxu3 %v9999_v33  ;;  %v8818_v33 = vld [vmem:[#allocation10 + $0x1d8] sm:$0xf] }
 0x2dc   :  { %v9452_v35 = vld [vmem:[#allocation10 + $0x6f0] sm:$0xf0] }
 0x2dd   :  { %v11156_v38 = vld [vmem:[#allocation10 + $0x8d4] sm:$0xf]  ;;  %v9455_v27 = vor.u32 %v11092_v14, %v9452_v35  ;;  %5882 = vmatpush.bf16.msra.mxu0 %v9199_v59  ;;  %v5655_v14 = vpop.f32.mrf.mxu2  ;;  %v10937_v35 = vld [vmem:[#allocation10 + $0x1f4] sm:$0xf0] }
 0x2de   :  { %v9708_v40 = vld [vmem:[#allocation10 + $0x8f0] sm:$0xf0]  ;;  %v11065_v59 = vld [vmem:[#allocation10 + $0x5f4] sm:$0xf0]  ;;  %v5692_v14 = vpop.f32.mrf.mxu1 }
 0x2df   :  { %v11220_v44 = vld [vmem:[#allocation10 + $0xad4] sm:$0xf]  ;;  %v9711_v62 = vor.u32 %v11156_v38, %v9708_v40  ;;  %5895 = vmatpush.bf16.msra.mxu1 %v9455_v27  ;;  %v9074_v38 = vld [vmem:[#allocation10 + $0x3d8] sm:$0xf]  ;;  %v5668_v40 = vpop.f32.mrf.mxu3 }
 0x2e0   :  { %v9964_v49 = vld [vmem:[#allocation10 + $0xaf0] sm:$0xf0]  ;;  %v10905_v40 = vld [vmem:[#allocation10 + $0xf4] sm:$0xf0] }
 0x2e1   :  { %v11020_v50 = vld [vmem:[#allocation10 + $0x494] sm:$0xf]  ;;  %v9967_v1 = vor.u32 %v11220_v44, %v9964_v49  ;;  %5908 = vmatpush.bf16.msra.mxu2 %v9711_v62  ;;  %v11001_v49 = vld [vmem:[#allocation10 + $0x3f4] sm:$0xf0] }
 0x2e2   :  { %v9164_v63 = vld [vmem:[#allocation10 + $0x4b0] sm:$0xf0] }
 0x2e3   :  { %v11084_v0 = vld [vmem:[#allocation10 + $0x694] sm:$0xf]  ;;  %v9167_v6 = vor.u32 %v11020_v50, %v9164_v63  ;;  %5921 = vmatpush.bf16.msra.mxu3 %v9967_v1  ;;  %v9586_v50 = vld [vmem:[#allocation10 + $0x7d8] sm:$0xf]  ;;  %v8819_v1 = vor.u32 %v10937_v35, %v8818_v33 }
 0x2e4   :  { %v9420_v24 = vld [vmem:[#allocation10 + $0x6b0] sm:$0xf0]  ;;  %v11129_v63 = vld [vmem:[#allocation10 + $0x7f4] sm:$0xf0] }
 0x2e5   :  { %v11148_v2 = vld [vmem:[#allocation10 + $0x894] sm:$0xf]  ;;  %v9423_v21 = vor.u32 %v11084_v0, %v9420_v24  ;;  %5883 = vmatpush.bf16.msra.mxu0 %v9167_v6  ;;  %v9075_v24 = vor.u32 %v11001_v49, %v9074_v38  ;;  %v9554_v6 = vld [vmem:[#allocation10 + $0x798] sm:$0xf] }
 0x2e6   :  { %v9676_v51 = vld [vmem:[#allocation10 + $0x8b0] sm:$0xf0]  ;;  %v8690_v38 = vld [vmem:[#allocation10 + $0xd8] sm:$0xf] }
 0x2e7   :  { %v11212_v28 = vld [vmem:[#allocation10 + $0xa94] sm:$0xf]  ;;  %v9679_v54 = vor.u32 %v11148_v2, %v9676_v51  ;;  %5896 = vmatpush.bf16.msra.mxu1 %v9423_v21  ;;  %v9331_v2 = vor.u32 %v11065_v59, %v9330_v56  ;;  %v8786_v51 = vld [vmem:[#allocation10 + $0x198] sm:$0xf] }
 0x2e8   :  { %v9932_v4 = vld [vmem:[#allocation10 + $0xab0] sm:$0xf0]  ;;  %v8787_v21 = vor.u32 %v10929_v3, %v8786_v51  ;;  %v10969_v56 = vld [vmem:[#allocation10 + $0x2f4] sm:$0xf0] }
 0x2e9   :  { %v11012_v8 = vld [vmem:[#allocation10 + $0x454] sm:$0xf]  ;;  %v9935_v26 = vor.u32 %v11212_v28, %v9932_v4  ;;  %5909 = vmatpush.bf16.msra.mxu2 %v9679_v54  ;;  %v9042_v28 = vld [vmem:[#allocation10 + $0x398] sm:$0xf]  ;;  %v9587_v4 = vor.u32 %v11129_v63, %v9586_v50 }
 0x2ea   :  { %v9132_v22 = vld [vmem:[#allocation10 + $0x470] sm:$0xf0]  ;;  %v9043_v54 = vor.u32 %v10993_v5, %v9042_v28  ;;  %v9202_v59 = vld [vmem:[#allocation10 + $0x4d8] sm:$0xf] }
 0x2eb   :  { %v11076_v9 = vld [vmem:[#allocation10 + $0x654] sm:$0xf]  ;;  %v9135_v15 = vor.u32 %v11012_v8, %v9132_v22  ;;  %5922 = vmatpush.bf16.msra.mxu3 %v9935_v26  ;;  %v9299_v8 = vor.u32 %v11057_v20, %v9298_v55  ;;  %v8754_v22 = vld [vmem:[#allocation10 + $0x158] sm:$0xf] }
 0x2ec   :  { %v9388_v11 = vld [vmem:[#allocation10 + $0x670] sm:$0xf0]  ;;  %v9010_v26 = vld [vmem:[#allocation10 + $0x358] sm:$0xf] }
 0x2ed   :  { %v11140_v12 = vld [vmem:[#allocation10 + $0x854] sm:$0xf]  ;;  %v9391_v52 = vor.u32 %v11076_v9, %v9388_v11  ;;  %5884 = vmatpush.bf16.msra.mxu0 %v9135_v15  ;;  %v10921_v9 = vld [vmem:[#allocation10 + $0x174] sm:$0xf0]  ;;  %v9555_v11 = vor.u32 %v11121_v7, %v9554_v6 }
 0x2ee   :  { %v9644_v29 = vld [vmem:[#allocation10 + $0x870] sm:$0xf0]  ;;  %v11113_v15 = vld [vmem:[#allocation10 + $0x774] sm:$0xf0] }
 0x2ef   :  { %v11204_v36 = vld [vmem:[#allocation10 + $0xa54] sm:$0xf]  ;;  %v9647_v18 = vor.u32 %v11140_v12, %v9644_v29  ;;  %5897 = vmatpush.bf16.msra.mxu1 %v9391_v52  ;;  %v10985_v12 = vld [vmem:[#allocation10 + $0x374] sm:$0xf0] }
 0x2f0   :  { %v9900_v16 = vld [vmem:[#allocation10 + $0xa70] sm:$0xf0]  ;;  %v9266_v29 = vld [vmem:[#allocation10 + $0x558] sm:$0xf] }
 0x2f1   :  { %v11004_v17 = vld [vmem:[#allocation10 + $0x414] sm:$0xf]  ;;  %v9903_v37 = vor.u32 %v11204_v36, %v9900_v16  ;;  %5910 = vmatpush.bf16.msra.mxu2 %v9647_v18  ;;  %v11049_v36 = vld [vmem:[#allocation10 + $0x574] sm:$0xf0] }
 0x2f2   :  { %v9100_v61 = vld [vmem:[#allocation10 + $0x430] sm:$0xf0]  ;;  %v9522_v16 = vld [vmem:[#allocation10 + $0x758] sm:$0xf]  ;;  %v9267_v52 = vor.u32 %v11049_v36, %v9266_v29 }
 0x2f3   :  { %v11068_v45 = vld [vmem:[#allocation10 + $0x614] sm:$0xf]  ;;  %v9103_v44 = vor.u32 %v11004_v17, %v9100_v61  ;;  %5923 = vmatpush.bf16.msra.mxu3 %v9903_v37  ;;  %v8755_v17 = vor.u32 %v10921_v9, %v8754_v22  ;;  %v9011_v61 = vor.u32 %v10985_v12, %v9010_v26  ;;  %v8722_v18 = vld [vmem:[#allocation10 + $0x118] sm:$0xf] }
 0x2f4   :  { %v9356_v58 = vld [vmem:[#allocation10 + $0x630] sm:$0xf0]  ;;  %v9234_v37 = vld [vmem:[#allocation10 + $0x518] sm:$0xf] }
 0x2f5   :  { %v11132_v19 = vld [vmem:[#allocation10 + $0x814] sm:$0xf]  ;;  %v9359_v27 = vor.u32 %v11068_v45, %v9356_v58  ;;  %5885 = vmatpush.bf16.msra.mxu0 %v9103_v44  ;;  %v8978_v45 = vld [vmem:[#allocation10 + $0x318] sm:$0xf]  ;;  %v9523_v58 = vor.u32 %v11113_v15, %v9522_v16 }
 0x2f6   :  { %v9612_v25 = vld [vmem:[#allocation10 + $0x830] sm:$0xf0]  ;;  %v8946_v44 = vld [vmem:[#allocation10 + $0x2d8] sm:$0xf] }
 0x2f7   :  { %v11196_v13 = vld [vmem:[#allocation10 + $0xa14] sm:$0xf]  ;;  %v9615_v62 = vor.u32 %v11132_v19, %v9612_v25  ;;  %5898 = vmatpush.bf16.msra.mxu1 %v9359_v27  ;;  %v10977_v19 = vld [vmem:[#allocation10 + $0x334] sm:$0xf0] }
 0x2f8   :  { %v9868_v30 = vld [vmem:[#allocation10 + $0xa30] sm:$0xf0]  ;;  %5886 = vmatmul.bf16.vlgmr.msra.gmra.mxu0 %v11886_v48  ;;  %v11041_v48 = vld [vmem:[#allocation10 + $0x534] sm:$0xf0]  ;;  %v8979_v33 = vor.u32 %v10977_v19, %v8978_v45 }
 0x2f9   :  { %v9871_v0 = vor.u32 %v11196_v13, %v9868_v30  ;;  %5911 = vmatpush.bf16.msra.mxu2 %v9615_v62  ;;  %5930 = vmatpush.bf16.msrb.mxu0 %v8819_v1  ;;  %v9490_v25 = vld [vmem:[#allocation10 + $0x718] sm:$0xf]  ;;  %v5679_v13 = vpop.f32.mrf.mxu0  ;;  %v9235_v35 = vor.u32 %v11041_v48, %v9234_v37 }
 0x2fa   :  { %5899 = vmatmul.bf16.vlgmr.msra.gmra.mxu1 %v11889_v57  ;;  %v5680_v57 = vadd.f32 %v5679_v13, %v11914_v10  ;;  %v11033_v27 = vld [vmem:[#allocation10 + $0x4f4] sm:$0xf0]  ;;  %v8947_v10 = vor.u32 %v10969_v56, %v8946_v44  ;;  %v11925_v44 = vpop.f32.mrf.mxu3 }
 0x2fb   :  { %5924 = vmatpush.bf16.msra.mxu3 %v9871_v0  ;;  %5943 = vmatpush.bf16.msrb.mxu1 %v9075_v24  ;;  %v9458_v50 = vld [vmem:[#allocation10 + $0x6d8] sm:$0xf]  ;;  %v8691_v0 = vor.u32 %v10905_v40, %v8690_v38  ;;  %v9203_v1 = vor.u32 %v11033_v27, %v9202_v59  ;;  %v10933_v38 = vld [vmem:[#allocation10 + $0x1dc] sm:$0xf] }
 0x2fc   :  { %5912 = vmatmul.bf16.vlgmr.msra.gmra.mxu2 %v11892_v23  ;;  %v10913_v23 = vld [vmem:[#allocation10 + $0x134] sm:$0xf0]  ;;  %v11921_v62 = vadd.f32 %v5692_v14, %v5680_v57  ;;  %v8820_v40 = vld [vmem:[#allocation10 + $0x1f8] sm:$0xf0] }
 0x2fd   :  { %5956 = vmatpush.bf16.msrb.mxu2 %v9331_v2  ;;  %5931 = vmatpush.bf16.msrb.mxu0 %v8787_v21  ;;  %v8723_v30 = vor.u32 %v10913_v23, %v8722_v18  ;;  %v11097_v63 = vld [vmem:[#allocation10 + $0x6f4] sm:$0xf0]  ;;  %v5694_v21 = vpop.f32.mrf.mxu1  ;;  %v11923_v18 = vpop.f32.mrf.mxu2  ;;  %v10997_v59 = vld [vmem:[#allocation10 + $0x3dc] sm:$0xf] }
 0x2fe   :  { %5925 = vmatmul.bf16.vlgmr.msra.gmra.mxu3 %v11895_v60  ;;  %v11105_v60 = vld [vmem:[#allocation10 + $0x734] sm:$0xf0]  ;;  %v9459_v3 = vor.u32 %v11097_v63, %v9458_v50  ;;  %v9076_v27 = vld [vmem:[#allocation10 + $0x3f8] sm:$0xf0] }
 0x2ff   :  { %5969 = vmatpush.bf16.msrb.mxu3 %v9587_v4  ;;  %5944 = vmatpush.bf16.msrb.mxu1 %v9043_v54  ;;  %v9491_v49 = vor.u32 %v11105_v60, %v9490_v25  ;;  %v8658_v24 = vld [vmem:[#allocation10 + $0x98] sm:$0xf] }
 0x300   :  { %v10897_v2 = vld [vmem:[#allocation10 + $0xb4] sm:$0xf0] }
 0x301   :  { %5957 = vmatpush.bf16.msrb.mxu2 %v9299_v8  ;;  %5932 = vmatpush.bf16.msrb.mxu0 %v8755_v17  ;;  %v8914_v51 = vld [vmem:[#allocation10 + $0x298] sm:$0xf]  ;;  %v5681_v6 = vpop.f32.mrf.mxu0  ;;  %v8659_v7 = vor.u32 %v10897_v2, %v8658_v24 }
 0x302   :  { %v10961_v28 = vld [vmem:[#allocation10 + $0x2b4] sm:$0xf0] }
 0x303   :  { %5970 = vmatpush.bf16.msrb.mxu3 %v9555_v11  ;;  %5945 = vmatpush.bf16.msrb.mxu1 %v9011_v61  ;;  %v9170_v4 = vld [vmem:[#allocation10 + $0x498] sm:$0xf]  ;;  %v8915_v54 = vor.u32 %v10961_v28, %v8914_v51  ;;  %v9079_v51 = vor.u32 %v10997_v59, %v9076_v27  ;;  %v10925_v28 = vld [vmem:[#allocation10 + $0x19c] sm:$0xf] }
 0x304   :  { %v11025_v5 = vld [vmem:[#allocation10 + $0x4b4] sm:$0xf0] }
 0x305   :  { %5958 = vmatpush.bf16.msrb.mxu2 %v9267_v52  ;;  %5933 = vmatpush.bf16.msrb.mxu0 %v8723_v30  ;;  %v9426_v55 = vld [vmem:[#allocation10 + $0x698] sm:$0xf]  ;;  %v9171_v8 = vor.u32 %v11025_v5, %v9170_v4  ;;  %v8788_v4 = vld [vmem:[#allocation10 + $0x1b8] sm:$0xf0]  ;;  %v5707_v5 = vpop.f32.mrf.mxu2 }
 0x306   :  { %v11089_v20 = vld [vmem:[#allocation10 + $0x6b4] sm:$0xf0]  ;;  %v8791_v21 = vor.u32 %v10925_v28, %v8788_v4 }
 0x307   :  { %5971 = vmatpush.bf16.msrb.mxu3 %v9523_v58  ;;  %5946 = vmatpush.bf16.msrb.mxu1 %v8979_v33  ;;  %v8626_v22 = vld [vmem:[#allocation10 + $0x58] sm:$0xf]  ;;  %v9427_v11 = vor.u32 %v11089_v20, %v9426_v55  ;;  %v10989_v55 = vld [vmem:[#allocation10 + $0x39c] sm:$0xf] }
 0x308   :  { %v10889_v9 = vld [vmem:[#allocation10 + $0x74] sm:$0xf0]  ;;  %v9044_v20 = vld [vmem:[#allocation10 + $0x3b8] sm:$0xf0] }
 0x309   :  { %5959 = vmatpush.bf16.msrb.mxu2 %v9235_v35  ;;  %5934 = vmatpush.bf16.msrb.mxu0 %v8691_v0  ;;  %v8882_v26 = vld [vmem:[#allocation10 + $0x258] sm:$0xf]  ;;  %v8627_v17 = vor.u32 %v10889_v9, %v8626_v22  ;;  %v9047_v9 = vor.u32 %v10989_v55, %v9044_v20 }
 0x30a   :  { %v10953_v12 = vld [vmem:[#allocation10 + $0x274] sm:$0xf0] }
 0x30b   :  { %5972 = vmatpush.bf16.msrb.mxu3 %v9491_v49  ;;  %5947 = vmatpush.bf16.msrb.mxu1 %v8947_v10  ;;  %v9138_v29 = vld [vmem:[#allocation10 + $0x458] sm:$0xf]  ;;  %v8883_v23 = vor.u32 %v10953_v12, %v8882_v26  ;;  %v8823_v10 = vor.u32 %v10933_v38, %v8820_v40  ;;  %v8756_v12 = vld [vmem:[#allocation10 + $0x178] sm:$0xf0]  ;;  %v11941_v38 = vpop.f32.mrf.mxu1 }
 0x30c   :  { %v11017_v36 = vld [vmem:[#allocation10 + $0x474] sm:$0xf0] }
 0x30d   :  { %5960 = vmatpush.bf16.msrb.mxu2 %v9203_v1  ;;  %v9394_v16 = vld [vmem:[#allocation10 + $0x658] sm:$0xf]  ;;  %5935 = vmatpush.bf16.msrb.mxu0 %v8659_v7  ;;  %v9139_v45 = vor.u32 %v11017_v36, %v9138_v29  ;;  %v11927_v29 = vld [vmem:[#allocation1] sm:$0xff]  ;;  %v5720_v36 = vpop.f32.mrf.mxu3 }
 0x30e   :  { %v11081_v15 = vld [vmem:[#allocation10 + $0x674] sm:$0xf0] }
 0x30f   :  { %5973 = vmatpush.bf16.msrb.mxu3 %v9459_v3  ;;  %v8594_v61 = vld [vmem:[#allocation10 + $0x18] sm:$0xf]  ;;  %5948 = vmatpush.bf16.msrb.mxu1 %v8915_v54  ;;  %v9395_v48 = vor.u32 %v11081_v15, %v9394_v16  ;;  %v10981_v16 = vld [vmem:[#allocation10 + $0x35c] sm:$0xf] }
 0x310   :  { %v10881_v52 = vld [vmem:[#allocation10 + $0x34] sm:$0xf0]  ;;  %v9012_v15 = vld [vmem:[#allocation10 + $0x378] sm:$0xf0] }
 0x311   :  { %5961 = vmatpush.bf16.msrb.mxu2 %v9171_v8  ;;  %v8850_v58 = vld [vmem:[#allocation10 + $0x218] sm:$0xf]  ;;  %5936 = vmatpush.bf16.msrb.mxu0 %v8627_v17  ;;  %v8595_v33 = vor.u32 %v10881_v52, %v8594_v61  ;;  %v11930_v17 = vld [vmem:[#allocation1 + $0x9] sm:$0xff] }
 0x312   :  { %v10945_v19 = vld [vmem:[#allocation10 + $0x234] sm:$0xf0] }
 0x313   :  { %v9106_v37 = vld [vmem:[#allocation10 + $0x418] sm:$0xf]  ;;  %5974 = vmatpush.bf16.msrb.mxu3 %v9427_v11  ;;  %5949 = vmatpush.bf16.msrb.mxu1 %v8883_v23  ;;  %v8851_v49 = vor.u32 %v10945_v19, %v8850_v58  ;;  %v10917_v11 = vld [vmem:[#allocation10 + $0x15c] sm:$0xf] }
 0x314   :  { %v11009_v25 = vld [vmem:[#allocation10 + $0x434] sm:$0xf0]  ;;  %v11936_v23 = vld [vmem:[#allocation1 + $0x1b] sm:$0xff]  ;;  %v8759_v58 = vor.u32 %v10917_v11, %v8756_v12  ;;  %v5746_v11 = vpop.f32.mrf.mxu1 }
 0x315   :  { %v9362_v60 = vld [vmem:[#allocation10 + $0x618] sm:$0xf]  ;;  %5962 = vmatpush.bf16.msrb.mxu2 %v9139_v45  ;;  %v9107_v56 = vor.u32 %v11009_v25, %v9106_v37  ;;  %5937 = vmatpush.bf16.msrb.mxu0 %v8595_v33  ;;  %v9015_v25 = vor.u32 %v10981_v16, %v9012_v15  ;;  %v11939_v33 = vpop.f32.mrf.mxu0  ;;  %v11117_v11 = vld [vmem:[#allocation10 + $0x79c] sm:$0xf] }
 0x316   :  { %v11073_v13 = vld [vmem:[#allocation10 + $0x634] sm:$0xf0] }
 0x317   :  { %v9842_v30 = vld [vmem:[#allocation10 + $0x9d8] sm:$0xf]  ;;  %5975 = vmatpush.bf16.msrb.mxu3 %v9395_v48  ;;  %v9363_v50 = vor.u32 %v11073_v13, %v9362_v60  ;;  %5950 = vmatpush.bf16.msrb.mxu1 %v8851_v49  ;;  %v10909_v13 = vld [vmem:[#allocation10 + $0x11c] sm:$0xf] }
 0x318   :  { %v11193_v57 = vld [vmem:[#allocation10 + $0x9f4] sm:$0xf0]  ;;  %5938 = vmatmul.bf16.vlgmr.msrb.gmra.mxu0 %v11927_v29 }
 0x319   :  { %v10098_v14 = vld [vmem:[#allocation10 + $0xbd8] sm:$0xf]  ;;  %v9843_v63 = vor.u32 %v11193_v57, %v9842_v30  ;;  %5963 = vmatpush.bf16.msrb.mxu2 %v9107_v56  ;;  %v8724_v30 = vld [vmem:[#allocation10 + $0x138] sm:$0xf0] }
 0x31a   :  { %v11257_v35 = vld [vmem:[#allocation10 + $0xbf4] sm:$0xf0]  ;;  %5951 = vmatmul.bf16.vlgmr.msrb.gmra.mxu1 %v11930_v17  ;;  %v10973_v57 = vld [vmem:[#allocation10 + $0x31c] sm:$0xf]  ;;  %v8727_v49 = vor.u32 %v10909_v13, %v8724_v30 }
 0x31b   :  { %v10099_v0 = vor.u32 %v11257_v35, %v10098_v14  ;;  %v9810_v1 = vld [vmem:[#allocation10 + $0x998] sm:$0xf]  ;;  %5976 = vmatpush.bf16.msrb.mxu3 %v9363_v50  ;;  %5982 = vmatpush.bf16.msra.mxu0 %v9843_v63  ;;  %v8980_v14 = vld [vmem:[#allocation10 + $0x338] sm:$0xf0] }
 0x31c   :  { %v11185_v24 = vld [vmem:[#allocation10 + $0x9b4] sm:$0xf0]  ;;  %v8983_v50 = vor.u32 %v10973_v57, %v8980_v14 }
 0x31d   :  { %v10066_v2 = vld [vmem:[#allocation10 + $0xb98] sm:$0xf]  ;;  %v9811_v6 = vor.u32 %v11185_v24, %v9810_v1  ;;  %5995 = vmatpush.bf16.msra.mxu1 %v10099_v0  ;;  %6008 = vmatpush.bf16.msra.mxu2 %v8823_v10  ;;  %v10901_v0 = vld [vmem:[#allocation10 + $0xdc] sm:$0xf] }
 0x31e   :  { %v11249_v3 = vld [vmem:[#allocation10 + $0xbb4] sm:$0xf0]  ;;  %5977 = vmatmul.bf16.vlgmr.msrb.gmra.mxu3 %v11936_v23  ;;  %v8692_v10 = vld [vmem:[#allocation10 + $0xf8] sm:$0xf0] }
 0x31f   :  { %v10067_v7 = vor.u32 %v11249_v3, %v10066_v2  ;;  %v9778_v54 = vld [vmem:[#allocation10 + $0x958] sm:$0xf]  ;;  %6021 = vmatpush.bf16.msra.mxu3 %v9079_v51  ;;  %5983 = vmatpush.bf16.msra.mxu0 %v9811_v6  ;;  %v10965_v1 = vld [vmem:[#allocation10 + $0x2dc] sm:$0xf]  ;;  %v8695_v3 = vor.u32 %v10901_v0, %v8692_v10 }
 0x320   :  { %v11177_v8 = vld [vmem:[#allocation10 + $0x974] sm:$0xf0]  ;;  %v8948_v24 = vld [vmem:[#allocation10 + $0x2f8] sm:$0xf0] }
 0x321   :  { %v10034_v22 = vld [vmem:[#allocation10 + $0xb58] sm:$0xf]  ;;  %v9779_v52 = vor.u32 %v11177_v8, %v9778_v54  ;;  %5996 = vmatpush.bf16.msra.mxu1 %v10067_v7  ;;  %6009 = vmatpush.bf16.msra.mxu2 %v8791_v21  ;;  %v8951_v55 = vor.u32 %v10965_v1, %v8948_v24  ;;  %v10893_v6 = vld [vmem:[#allocation10 + $0x9c] sm:$0xf]  ;;  %v11943_v21 = vpop.f32.mrf.mxu2 }
 0x322   :  { %v11241_v26 = vld [vmem:[#allocation10 + $0xb74] sm:$0xf0]  ;;  %v8660_v7 = vld [vmem:[#allocation10 + $0xb8] sm:$0xf0] }
 0x323   :  { %v11933_v61 = vld [vmem:[#allocation1 + $0x12] sm:$0xff]  ;;  %v10035_v45 = vor.u32 %v11241_v26, %v10034_v22  ;;  %6022 = vmatpush.bf16.msra.mxu3 %v9047_v9  ;;  %5984 = vmatpush.bf16.msra.mxu0 %v9779_v52  ;;  %v5733_v22 = vpop.f32.mrf.mxu0  ;;  %v11945_v9 = vpop.f32.mrf.mxu3  ;;  %v8663_v36 = vor.u32 %v10893_v6, %v8660_v7 }
 0x324   :  { %5964 = vmatmul.bf16.vlgmr.msrb.gmra.mxu2 %v11933_v61  ;;  %v9746_v19 = vld [vmem:[#allocation10 + $0x918] sm:$0xf]  ;;  %v10957_v54 = vld [vmem:[#allocation10 + $0x29c] sm:$0xf] }
 0x325   :  { %v11169_v37 = vld [vmem:[#allocation10 + $0x934] sm:$0xf0]  ;;  %5997 = vmatpush.bf16.msra.mxu1 %v10035_v45  ;;  %6010 = vmatpush.bf16.msra.mxu2 %v8759_v58  ;;  %v8916_v8 = vld [vmem:[#allocation10 + $0x2b8] sm:$0xf0] }
 0x326   :  { %v10002_v48 = vld [vmem:[#allocation10 + $0xb18] sm:$0xf]  ;;  %v9747_v35 = vor.u32 %v11169_v37, %v9746_v19  ;;  %v8919_v45 = vor.u32 %v10957_v54, %v8916_v8  ;;  %v10885_v19 = vld [vmem:[#allocation10 + $0x5c] sm:$0xf] }
 0x327   :  { %v11233_v60 = vld [vmem:[#allocation10 + $0xb34] sm:$0xf0]  ;;  %6023 = vmatpush.bf16.msra.mxu3 %v9015_v25  ;;  %v8628_v37 = vld [vmem:[#allocation10 + $0x78] sm:$0xf0] }
 0x328   :  { %v10003_v40 = vor.u32 %v11233_v60, %v10002_v48  ;;  %v9714_v56 = vld [vmem:[#allocation10 + $0x8d8] sm:$0xf]  ;;  %5985 = vmatpush.bf16.msra.mxu0 %v9747_v35  ;;  %v10949_v48 = vld [vmem:[#allocation10 + $0x25c] sm:$0xf]  ;;  %v8631_v14 = vor.u32 %v10885_v19, %v8628_v37 }
 0x329   :  { %v11161_v59 = vld [vmem:[#allocation10 + $0x8f4] sm:$0xf0]  ;;  %6011 = vmatpush.bf16.msra.mxu2 %v8727_v49  ;;  %v8884_v25 = vld [vmem:[#allocation10 + $0x278] sm:$0xf0] }
 0x32a   :  { %v9970_v27 = vld [vmem:[#allocation10 + $0xad8] sm:$0xf]  ;;  %v9715_v2 = vor.u32 %v11161_v59, %v9714_v56  ;;  %5998 = vmatpush.bf16.msra.mxu1 %v10003_v40  ;;  %v10877_v49 = vld [vmem:[#allocation10 + $0x1c] sm:$0xf]  ;;  %v8887_v56 = vor.u32 %v10949_v48, %v8884_v25 }
 0x32b   :  { %v11225_v63 = vld [vmem:[#allocation10 + $0xaf4] sm:$0xf0]  ;;  %6024 = vmatpush.bf16.msra.mxu3 %v8983_v50  ;;  %v8596_v59 = vld [vmem:[#allocation10 + $0x38] sm:$0xf0]  ;;  %v5772_v24 = vpop.f32.mrf.mxu3 }
 0x32c   :  { %v9971_v51 = vor.u32 %v11225_v63, %v9970_v27  ;;  %v9682_v28 = vld [vmem:[#allocation10 + $0x898] sm:$0xf]  ;;  %5986 = vmatpush.bf16.msra.mxu0 %v9715_v2  ;;  %v10941_v27 = vld [vmem:[#allocation10 + $0x21c] sm:$0xf]  ;;  %v5759_v63 = vpop.f32.mrf.mxu2 }
 0x32d   :  { %v11153_v4 = vld [vmem:[#allocation10 + $0x8b4] sm:$0xf0]  ;;  %6012 = vmatpush.bf16.msra.mxu2 %v8695_v3  ;;  %v8852_v50 = vld [vmem:[#allocation10 + $0x238] sm:$0xf0] }
 0x32e   :  { %v9938_v5 = vld [vmem:[#allocation10 + $0xa98] sm:$0xf]  ;;  %v9683_v26 = vor.u32 %v11153_v4, %v9682_v28  ;;  %5999 = vmatpush.bf16.msra.mxu1 %v9971_v51  ;;  %v11061_v0 = vld [vmem:[#allocation10 + $0x5dc] sm:$0xf]  ;;  %v8855_v6 = vor.u32 %v10941_v27, %v8852_v50 }
 0x32f   :  { %v11217_v20 = vld [vmem:[#allocation10 + $0xab4] sm:$0xf0]  ;;  %6025 = vmatpush.bf16.msra.mxu3 %v8951_v55  ;;  %v9332_v10 = vld [vmem:[#allocation10 + $0x5f8] sm:$0xf0] }
 0x330   :  { %v9939_v12 = vor.u32 %v11217_v20, %v9938_v5  ;;  %v9650_v16 = vld [vmem:[#allocation10 + $0x858] sm:$0xf]  ;;  %5987 = vmatpush.bf16.msra.mxu0 %v9683_v26  ;;  %v11125_v1 = vld [vmem:[#allocation10 + $0x7dc] sm:$0xf]  ;;  %v8599_v5 = vor.u32 %v10877_v49, %v8596_v59  ;;  %v9335_v7 = vor.u32 %v11061_v0, %v9332_v10 }
 0x331   :  { %v11145_v15 = vld [vmem:[#allocation10 + $0x874] sm:$0xf0]  ;;  %6013 = vmatpush.bf16.msra.mxu2 %v8663_v36  ;;  %v9588_v51 = vld [vmem:[#allocation10 + $0x7f8] sm:$0xf0] }
 0x332   :  { %v9906_v52 = vld [vmem:[#allocation10 + $0xa58] sm:$0xf]  ;;  %v9651_v60 = vor.u32 %v11145_v15, %v9650_v16  ;;  %6000 = vmatpush.bf16.msra.mxu1 %v9939_v12  ;;  %v11189_v3 = vld [vmem:[#allocation10 + $0x9dc] sm:$0xf]  ;;  %v9591_v54 = vor.u32 %v11125_v1, %v9588_v51 }
 0x333   :  { %v11209_v58 = vld [vmem:[#allocation10 + $0xa74] sm:$0xf0]  ;;  %6026 = vmatpush.bf16.msra.mxu3 %v8919_v45  ;;  %v9844_v28 = vld [vmem:[#allocation10 + $0x9f8] sm:$0xf0] }
 0x334   :  { %v9618_v13 = vld [vmem:[#allocation10 + $0x818] sm:$0xf]  ;;  %v9907_v57 = vor.u32 %v11209_v58, %v9906_v52  ;;  %5988 = vmatpush.bf16.msra.mxu0 %v9651_v60  ;;  %v11253_v55 = vld [vmem:[#allocation10 + $0xbdc] sm:$0xf]  ;;  %v9847_v8 = vor.u32 %v11189_v3, %v9844_v28  ;;  %v11947_v52 = vld [vmem:[#allocation11] sm:$0xff] }
 0x335   :  { %v11137_v30 = vld [vmem:[#allocation10 + $0x834] sm:$0xf0]  ;;  %6014 = vmatpush.bf16.msra.mxu2 %v8631_v14  ;;  %v10100_v20 = vld [vmem:[#allocation10 + $0xbf8] sm:$0xf0]  ;;  %v3515_v45 = vperm.slane %v11947_v52, 3  ;;  %v3516_v0 = vperm.slane %v11947_v52, 4 }
 0x336   :  { %v9874_v35 = vld [vmem:[#allocation10 + $0xa18] sm:$0xf]  ;;  %v9619_v2 = vor.u32 %v11137_v30, %v9618_v13  ;;  %6001 = vmatpush.bf16.msra.mxu1 %v9907_v57  ;;  %v11053_v22 = vld [vmem:[#allocation10 + $0x59c] sm:$0xf]  ;;  %v10103_v12 = vor.u32 %v11253_v55, %v10100_v20  ;;  %v11950_v57 = vld [vmem:[#allocation1 + $0x24] sm:$0xff]  ;;  %v5783_v20 = vpop.f32.mrf.mxu0 }
 0x337   :  { %v11201_v40 = vld [vmem:[#allocation10 + $0xa34] sm:$0xf0]  ;;  %6027 = vmatpush.bf16.msra.mxu3 %v8887_v56  ;;  %v9300_v26 = vld [vmem:[#allocation10 + $0x5b8] sm:$0xf0]  ;;  %v5706_v56 = vadd.f32 %v11923_v18, %v3515_v45 }
 0x338   :  { %v9875_v4 = vor.u32 %v11201_v40, %v9874_v35  ;;  %5989 = vmatpush.bf16.msra.mxu0 %v9619_v2  ;;  %v9556_v36 = vld [vmem:[#allocation10 + $0x7b8] sm:$0xf0]  ;;  %v9303_v37 = vor.u32 %v11053_v22, %v9300_v26  ;;  %v11954_v59 = vld [vmem:[#allocation1 + $0x2d] sm:$0xff] }
 0x339   :  { %v11181_v16 = vld [vmem:[#allocation10 + $0x99c] sm:$0xf]  ;;  %6015 = vmatpush.bf16.msra.mxu2 %v8599_v5  ;;  %v9559_v48 = vor.u32 %v11117_v11, %v9556_v36 }
 0x33a   :  { %v9812_v15 = vld [vmem:[#allocation10 + $0x9b8] sm:$0xf0]  ;;  %6002 = vmatpush.bf16.msra.mxu1 %v9875_v4 }
 0x33b   :  { %v11245_v58 = vld [vmem:[#allocation10 + $0xb9c] sm:$0xf]  ;;  %6028 = vmatpush.bf16.msra.mxu3 %v8855_v6  ;;  %v9815_v25 = vor.u32 %v11181_v16, %v9812_v15  ;;  %5990 = vmatmul.bf16.vlgmr.msra.gmra.mxu0 %v11950_v57  ;;  %v5784_v6 = vadd.f32 %v5783_v20, %v3516_v0 }
 0x33c   :  { %v10068_v19 = vld [vmem:[#allocation10 + $0xbb8] sm:$0xf0]  ;;  %6034 = vmatpush.bf16.msrb.mxu0 %v9335_v7  ;;  %6016 = vmatmul.bf16.vlgmr.msra.gmra.mxu2 %v11927_v29  ;;  %v5719_v29 = vadd.f32 %v11925_v44, %v5706_v56  ;;  %v5796_v7 = vpop.f32.mrf.mxu1  ;;  %v5809_v56 = vpop.f32.mrf.mxu2 }
 0x33d   :  { %6060 = vmatpush.bf16.msrb.mxu2 %v9847_v8  ;;  %v11045_v60 = vld [vmem:[#allocation10 + $0x55c] sm:$0xf]  ;;  %v10071_v14 = vor.u32 %v11245_v58, %v10068_v19  ;;  %6003 = vmatmul.bf16.vlgmr.msra.gmra.mxu1 %v11954_v59  ;;  %v5797_v44 = vadd.f32 %v5796_v7, %v5784_v6 }
 0x33e   :  { %6047 = vmatpush.bf16.msrb.mxu1 %v9591_v54  ;;  %v9268_v13 = vld [vmem:[#allocation10 + $0x578] sm:$0xf0]  ;;  %6029 = vmatmul.bf16.vlgmr.msra.gmra.mxu3 %v11930_v17  ;;  %v5732_v45 = vadd.f32 %v11939_v33, %v5719_v29 }
 0x33f   :  { %v11109_v30 = vld [vmem:[#allocation10 + $0x75c] sm:$0xf]  ;;  %6073 = vmatpush.bf16.msrb.mxu3 %v10103_v12  ;;  %v9271_v63 = vor.u32 %v11045_v60, %v9268_v13  ;;  %v5810_v0 = vadd.f32 %v5809_v56, %v5797_v44 }
 0x340   :  { %v9524_v35 = vld [vmem:[#allocation10 + $0x778] sm:$0xf0]  ;;  %6035 = vmatpush.bf16.msrb.mxu0 %v9303_v37 }
 0x341   :  { %v11173_v40 = vld [vmem:[#allocation10 + $0x95c] sm:$0xf]  ;;  %6061 = vmatpush.bf16.msrb.mxu2 %v9815_v25  ;;  %v9527_v10 = vor.u32 %v11109_v30, %v9524_v35 }
 0x342   :  { %v9780_v49 = vld [vmem:[#allocation10 + $0x978] sm:$0xf0]  ;;  %6048 = vmatpush.bf16.msrb.mxu1 %v9559_v48 }
 0x343   :  { %v11237_v27 = vld [vmem:[#allocation10 + $0xb5c] sm:$0xf]  ;;  %v9783_v1 = vor.u32 %v11173_v40, %v9780_v49  ;;  %6074 = vmatpush.bf16.msrb.mxu3 %v10071_v14 }
 0x344   :  { %v10036_v50 = vld [vmem:[#allocation10 + $0xb78] sm:$0xf0]  ;;  %6036 = vmatpush.bf16.msrb.mxu0 %v9271_v63  ;;  %v5785_v63 = vpop.f32.mrf.mxu0  ;;  %v5811_v44 = vpop.f32.mrf.mxu2 }
 0x345   :  { %v11037_v24 = vld [vmem:[#allocation10 + $0x51c] sm:$0xf]  ;;  %v10039_v51 = vor.u32 %v11237_v27, %v10036_v50  ;;  %6062 = vmatpush.bf16.msrb.mxu2 %v9783_v1  ;;  %v5745_v27 = vadd.f32 %v11941_v38, %v5732_v45 }
 0x346   :  { %v9236_v18 = vld [vmem:[#allocation10 + $0x538] sm:$0xf0]  ;;  %6049 = vmatpush.bf16.msrb.mxu1 %v9527_v10  ;;  %v5822_v10 = vpop.f32.mrf.mxu3 }
 0x347   :  { %v11101_v2 = vld [vmem:[#allocation10 + $0x71c] sm:$0xf]  ;;  %v9239_v17 = vor.u32 %v11037_v24, %v9236_v18  ;;  %6075 = vmatpush.bf16.msrb.mxu3 %v10039_v51  ;;  %v5798_v24 = vpop.f32.mrf.mxu1  ;;  %v5758_v20 = vadd.f32 %v11943_v21, %v5745_v27 }
 0x348   :  { %v9492_v3 = vld [vmem:[#allocation10 + $0x738] sm:$0xf0] }
 0x349   :  { %v11165_v28 = vld [vmem:[#allocation10 + $0x91c] sm:$0xf]  ;;  %v9495_v54 = vor.u32 %v11101_v2, %v9492_v3  ;;  %6037 = vmatpush.bf16.msrb.mxu0 %v9239_v17  ;;  %v5771_v45 = vadd.f32 %v11945_v9, %v5758_v20 }
 0x34a   :  { %v9748_v4 = vld [vmem:[#allocation10 + $0x938] sm:$0xf0] }
 0x34b   :  { %v11229_v5 = vld [vmem:[#allocation10 + $0xb1c] sm:$0xf]  ;;  %v9751_v8 = vor.u32 %v11165_v28, %v9748_v4  ;;  %6050 = vmatpush.bf16.msrb.mxu1 %v9495_v54  ;;  %v5823_v4 = vadd.f32 %v5822_v10, %v5810_v0 }
 0x34c   :  { %v10004_v55 = vld [vmem:[#allocation10 + $0xb38] sm:$0xf0] }
 0x34d   :  { %v11029_v22 = vld [vmem:[#allocation10 + $0x4dc] sm:$0xf]  ;;  %v10007_v12 = vor.u32 %v11229_v5, %v10004_v55  ;;  %6063 = vmatpush.bf16.msrb.mxu2 %v9751_v8 }
 0x34e   :  { %v9204_v26 = vld [vmem:[#allocation10 + $0x4f8] sm:$0xf0] }
 0x34f   :  { %v11093_v11 = vld [vmem:[#allocation10 + $0x6dc] sm:$0xf]  ;;  %v9207_v37 = vor.u32 %v11029_v22, %v9204_v26  ;;  %6076 = vmatpush.bf16.msrb.mxu3 %v10007_v12 }
 0x350   :  { %v9460_v36 = vld [vmem:[#allocation10 + $0x6f8] sm:$0xf0] }
 0x351   :  { %v11157_v16 = vld [vmem:[#allocation10 + $0x8dc] sm:$0xf]  ;;  %v9463_v48 = vor.u32 %v11093_v11, %v9460_v36  ;;  %6038 = vmatpush.bf16.msrb.mxu0 %v9207_v37  ;;  %v5524_v37 = vadd.f32 %v11898_v41, %v11884_v47  ;;  %v5835_v41 = vpop.f32.mrf.mxu0 }
 0x352   :  { %v9716_v15 = vld [vmem:[#allocation10 + $0x8f8] sm:$0xf0] }
 0x353   :  { %v11221_v58 = vld [vmem:[#allocation10 + $0xadc] sm:$0xf]  ;;  %v9719_v25 = vor.u32 %v11157_v16, %v9716_v15  ;;  %6051 = vmatpush.bf16.msrb.mxu1 %v9463_v48  ;;  %v5537_v9 = vadd.f32 %v11900_v32, %v5524_v37  ;;  %v5836_v32 = vadd.f32 %v5835_v41, %v5823_v4 }
 0x354   :  { %v9972_v19 = vld [vmem:[#allocation10 + $0xaf8] sm:$0xf0] }
 0x355   :  { %v11021_v60 = vld [vmem:[#allocation10 + $0x49c] sm:$0xf]  ;;  %v9975_v14 = vor.u32 %v11221_v58, %v9972_v19  ;;  %6064 = vmatpush.bf16.msrb.mxu2 %v9719_v25  ;;  %v5824_v19 = vpop.f32.mrf.mxu3 }
 0x356   :  { %v9172_v13 = vld [vmem:[#allocation10 + $0x4b8] sm:$0xf0] }
 0x357   :  { %v11085_v30 = vld [vmem:[#allocation10 + $0x69c] sm:$0xf]  ;;  %v9175_v1 = vor.u32 %v11021_v60, %v9172_v13  ;;  %6077 = vmatpush.bf16.msrb.mxu3 %v9975_v14  ;;  %v6153_v13 = vpack.c.bf16 %v11921_v62, %v11921_v62  ;;  %v6154_v14 = vpack.c.bf16 %v5771_v45, %v5771_v45  ;;  %v5848_v62 = vpop.f32.mrf.mxu1 }
 0x358   :  { %v9428_v35 = vld [vmem:[#allocation10 + $0x6b8] sm:$0xf0] }
 0x359   :  { %v11149_v40 = vld [vmem:[#allocation10 + $0x89c] sm:$0xf]  ;;  %v9431_v18 = vor.u32 %v11085_v30, %v9428_v35  ;;  %6039 = vmatpush.bf16.msrb.mxu0 %v9175_v1  ;;  %v6161_v35 = vsel %vm6159_vm0, %v6153_v13, 0  ;;  %v6164_v47 = vsel %vm6159_vm0, %v6154_v14, 0 }
 0x35a   :  { %v9684_v49 = vld [vmem:[#allocation10 + $0x8b8] sm:$0xf0] }
 0x35b   :  { %v11213_v33 = vld [vmem:[#allocation10 + $0xa9c] sm:$0xf]  ;;  %v9687_v2 = vor.u32 %v11149_v40, %v9684_v49  ;;  %6052 = vmatpush.bf16.msrb.mxu1 %v9431_v18  ;;  %v5849_v40 = vadd.f32 %v5848_v62, %v5836_v32  ;;  %v3517_v49 = vperm.slane %v11947_v52, 5 }
 0x35c   :  { %v9940_v50 = vld [vmem:[#allocation10 + $0xab8] sm:$0xf0] }
 0x35d   :  { %v11013_v51 = vld [vmem:[#allocation10 + $0x45c] sm:$0xf]  ;;  %v9943_v29 = vor.u32 %v11213_v33, %v9940_v50  ;;  %6065 = vmatpush.bf16.msrb.mxu2 %v9687_v2  ;;  %v11977_v56 = vadd.f32 %v5849_v40, %v11815_v46  ;;  %v5874_v33 = vpop.f32.mrf.mxu3  ;;  %v5837_v50 = vpop.f32.mrf.mxu0 }
 0x35e   :  { %v9140_v3 = vld [vmem:[#allocation10 + $0x478] sm:$0xf0] }
 0x35f   :  { %v11077_v28 = vld [vmem:[#allocation10 + $0x65c] sm:$0xf]  ;;  %v9143_v7 = vor.u32 %v11013_v51, %v9140_v3  ;;  %6078 = vmatpush.bf16.msrb.mxu3 %v9943_v29 }
 0x360   :  { %v9396_v5 = vld [vmem:[#allocation10 + $0x678] sm:$0xf0] }
 0x361   :  { %v11141_v38 = vld [vmem:[#allocation10 + $0x85c] sm:$0xf]  ;;  %v9399_v54 = vor.u32 %v11077_v28, %v9396_v5  ;;  %6040 = vmatpush.bf16.msrb.mxu0 %v9143_v7 }
 0x362   :  { %v9652_v55 = vld [vmem:[#allocation10 + $0x878] sm:$0xf0] }
 0x363   :  { %v11205_v17 = vld [vmem:[#allocation10 + $0xa5c] sm:$0xf]  ;;  %v9655_v8 = vor.u32 %v11141_v38, %v9652_v55  ;;  %6053 = vmatpush.bf16.msrb.mxu1 %v9399_v54 }
 0x364   :  { %v9908_v6 = vld [vmem:[#allocation10 + $0xa78] sm:$0xf0] }
 0x365   :  { %v11005_v22 = vld [vmem:[#allocation10 + $0x41c] sm:$0xf]  ;;  %v9911_v12 = vor.u32 %v11205_v17, %v9908_v6  ;;  %6066 = vmatpush.bf16.msrb.mxu2 %v9655_v8 }
 0x366   :  { %v9108_v26 = vld [vmem:[#allocation10 + $0x438] sm:$0xf0] }
 0x367   :  { %v11069_v11 = vld [vmem:[#allocation10 + $0x61c] sm:$0xf]  ;;  %v9111_v48 = vor.u32 %v11005_v22, %v9108_v26  ;;  %6079 = vmatpush.bf16.msrb.mxu3 %v9911_v12 }
 0x368   :  { %v9364_v36 = vld [vmem:[#allocation10 + $0x638] sm:$0xf0] }
 0x369   :  { %v11133_v16 = vld [vmem:[#allocation10 + $0x81c] sm:$0xf]  ;;  %v9367_v25 = vor.u32 %v11069_v11, %v9364_v36  ;;  %6041 = vmatpush.bf16.msrb.mxu0 %v9111_v48 }
 0x36a   :  { %v9620_v15 = vld [vmem:[#allocation10 + $0x838] sm:$0xf0] }
 0x36b   :  { %v11197_v21 = vld [vmem:[#allocation10 + $0xa1c] sm:$0xf]  ;;  %v9623_v60 = vor.u32 %v11133_v16, %v9620_v15  ;;  %6054 = vmatpush.bf16.msrb.mxu1 %v9367_v25  ;;  %v3519_v16 = vperm.slane %v11947_v52, 7 }
 0x36c   :  { %v9876_v58 = vld [vmem:[#allocation10 + $0xa38] sm:$0xf0]  ;;  %6042 = vmatmul.bf16.vlgmr.msrb.gmra.mxu0 %v11933_v61  ;;  %v5850_v61 = vpop.f32.mrf.mxu1 }
 0x36d   :  { %v9879_v30 = vor.u32 %v11197_v21, %v9876_v58  ;;  %6067 = vmatpush.bf16.msrb.mxu2 %v9623_v60  ;;  %6101 = vmatpush.xpose.msra.mxu0 %v5537_v9 }
 0x36e   :  { %6055 = vmatmul.bf16.vlgmr.msrb.gmra.mxu1 %v11936_v23 }
 0x36f   :  { %6080 = vmatpush.bf16.msrb.mxu3 %v9879_v30  ;;  %6121 = vmatpush.xpose.msra.mxu1 %v11907_v53  ;;  %v5861_v53 = vpop.f32.mrf.mxu2 }
 0x370   :  { %6068 = vmatmul.bf16.vlgmr.msrb.gmra.mxu2 %v11950_v57  ;;  %v5862_v27 = vadd.f32 %v5861_v53, %v3517_v49  ;;  %v5876_v57 = vpop.f32.mrf.mxu3 }
 0x371   :  { %6173 = vmatpush.bf16.msra.mxu2 %v6161_v35 }
 0x372   :  { %6081 = vmatmul.bf16.vlgmr.msrb.gmra.mxu3 %v11954_v59  ;;  %v5875_v63 = vadd.f32 %v5874_v33, %v5862_v27 }
 0x373   :  { %6186 = vmatpush.bf16.msra.mxu3 %v6164_v47 }
 0x375   :  { %v5887_v59 = vpop.f32.mrf.mxu0 }
 0x376   :  { %v5888_v0 = vadd.f32 %v5887_v59, %v5875_v63 }
 0x377   :  { %v5863_v23 = vpop.f32.mrf.mxu2  ;;  %v5900_v10 = vpop.f32.mrf.mxu1 }
 0x378   :  { %v5901_v1 = vadd.f32 %v5900_v10, %v5888_v0  ;;  %v11288_v0 = vld [vmem:[#allocation13 + $0xec] sm:$0xf0]  ;;  %v10348_v10 = vld [vmem:[#allocation13 + $0x1e0] sm:$0xf] }
 0x37c   :  { %6102 = vmatmul.f32.vlgmr.msra.gmra.mxu0 %v11785_v42  ;;  %v3518_v42 = vperm.slane %v11947_v52, 6 }
 0x37d   :  { %v5889_v51 = vpop.f32.mrf.mxu0 }
 0x37e   :  { %6122 = vmatmul.f32.vlgmr.msra.gmra.mxu1 %v11799_v39 }
 0x37f   :  { %v5913_v24 = vpop.f32.mrf.mxu2  ;;  %v5902_v3 = vpop.f32.mrf.mxu1 }
 0x380   :  { %v5914_v18 = vadd.f32 %v5913_v24, %v5901_v1  ;;  %v11320_v24 = vld [vmem:[#allocation13 + $0x1ec] sm:$0xf0]  ;;  %v11318_v3 = vld [vmem:[#allocation13 + $0x1e4] sm:$0xf] }
 0x381   :  { %v5926_v46 = vpop.f32.mrf.mxu3 }
 0x382   :  { %v5927_v2 = vadd.f32 %v5926_v46, %v5914_v18  ;;  %v11286_v18 = vld [vmem:[#allocation13 + $0xe4] sm:$0xf]  ;;  %v10222_v46 = vld [vmem:[#allocation13 + $0xf0] sm:$0xf0] }
 0x383   :  { %v10225_v51 = vor.u32 %v11286_v18, %v10222_v46  ;;  %v11300_v46 = vld [vmem:[#allocation13 + $0x14c] sm:$0xf0] }
 0x384   :  { %v11982_v28 = vadd.f32 %v5927_v2, %v11829_v31  ;;  %v10349_v2 = vor.u32 %v11320_v24, %v10348_v10  ;;  %v11268_v10 = vld [vmem:[#allocation13 + $0x4c] sm:$0xf0] }
 0x385   :  { %6608 = vmatpush.bf16.msrb.mxu2 %v10225_v51  ;;  %v10142_v51 = vld [vmem:[#allocation13 + $0x50] sm:$0xf0] }
 0x386   :  { %6595 = vmatpush.bf16.msrb.mxu1 %v10349_v2  ;;  %v11266_v2 = vld [vmem:[#allocation13 + $0x44] sm:$0xf] }
 0x387   :  { %v5915_v4 = vpop.f32.mrf.mxu2 }
 0x388   :  { %v10350_v4 = vld [vmem:[#allocation13 + $0x1f0] sm:$0xf0] }
 0x389   :  { %v5928_v29 = vpop.f32.mrf.mxu3 }
 0x38a   :  { %v10204_v29 = vld [vmem:[#allocation13 + $0xc0] sm:$0xf] }
 0x395   :  { %v5939_v39 = vpop.f32.mrf.mxu0 }
 0x396   :  { %v5940_v5 = vadd.f32 %v5939_v39, %v3518_v42  ;;  %v10353_v42 = vor.u32 %v11318_v3, %v10350_v4  ;;  %v11284_v39 = vld [vmem:[#allocation13 + $0xcc] sm:$0xf0]  ;;  %v11298_v4 = vld [vmem:[#allocation13 + $0x144] sm:$0xf] }
 0x397   :  { %v5952_v38 = vpop.f32.mrf.mxu1 }
 0x398   :  { %v5953_v55 = vadd.f32 %v5952_v38, %v5940_v5  ;;  %v10332_v5 = vld [vmem:[#allocation13 + $0x1c0] sm:$0xf]  ;;  %v11316_v38 = vld [vmem:[#allocation13 + $0x1cc] sm:$0xf0]  ;;  %6621 = vmatpush.bf16.msrb.mxu3 %v10353_v42 }
 0x39d   :  { %v5941_v17 = vpop.f32.mrf.mxu0 }
 0x39e   :  { %v11282_v17 = vld [vmem:[#allocation13 + $0xc4] sm:$0xf] }
 0x39f   :  { %v5954_v54 = vpop.f32.mrf.mxu1 }
 0x3a1   :  { %v5978_v7 = vpop.f32.mrf.mxu3 }
 0x3a7   :  { %v5965_v20 = vpop.f32.mrf.mxu2 }
 0x3a8   :  { %v5966_v6 = vadd.f32 %v5965_v20, %v5953_v55  ;;  %v10205_v55 = vor.u32 %v11284_v39, %v10204_v29  ;;  %v10333_v20 = vor.u32 %v11316_v38, %v10332_v5  ;;  %v10270_v29 = vld [vmem:[#allocation13 + $0x150] sm:$0xf0]  ;;  %v10124_v5 = vld [vmem:[#allocation13 + $0x20] sm:$0xf] }
 0x3a9   :  { %v5980_v26 = vpop.f32.mrf.mxu3 }
 0x3aa   :  { %v5979_v8 = vadd.f32 %v5978_v7, %v5966_v6  ;;  %v10206_v6 = vld [vmem:[#allocation13 + $0xd0] sm:$0xf0]  ;;  %v11314_v7 = vld [vmem:[#allocation13 + $0x1c4] sm:$0xf]  ;;  %v11280_v26 = vld [vmem:[#allocation13 + $0xac] sm:$0xf0]  ;;  %6596 = vmatpush.bf16.msrb.mxu1 %v10333_v20 }
 0x3ab   :  { %v10209_v54 = vor.u32 %v11282_v17, %v10206_v6  ;;  %v10145_v17 = vor.u32 %v11266_v2, %v10142_v51  ;;  %v11264_v6 = vld [vmem:[#allocation13 + $0x2c] sm:$0xf0]  ;;  %v11317_v2 = vld [vmem:[#allocation13 + $0x1d4] sm:$0xf0]  ;;  %v11283_v51 = vld [vmem:[#allocation13 + $0xcc] sm:$0xf] }
 0x3ad   :  { %6609 = vmatpush.bf16.msrb.mxu2 %v10209_v54  ;;  %v10273_v54 = vor.u32 %v11298_v4, %v10270_v29  ;;  %v11315_v4 = vld [vmem:[#allocation13 + $0x1cc] sm:$0xf]  ;;  %v10342_v29 = vld [vmem:[#allocation13 + $0x1d8] sm:$0xf0] }
 0x3af   :  { %v5967_v22 = vpop.f32.mrf.mxu2 }
 0x3b0   :  { %v10188_v22 = vld [vmem:[#allocation13 + $0xa0] sm:$0xf] }
 0x3b8   :  { %v5991_v11 = vpop.f32.mrf.mxu0 }
 0x3b9   :  { %v5992_v12 = vadd.f32 %v5991_v11, %v5979_v8  ;;  %v10334_v8 = vld [vmem:[#allocation13 + $0x1d0] sm:$0xf0] }
 0x3ba   :  { %v6004_v31 = vpop.f32.mrf.mxu1  ;;  %v10337_v11 = vor.u32 %v11314_v7, %v10334_v8  ;;  %v10252_v7 = vld [vmem:[#allocation13 + $0x120] sm:$0xf]  ;;  %v11296_v8 = vld [vmem:[#allocation13 + $0x12c] sm:$0xf0] }
 0x3bb   :  { %v6005_v36 = vadd.f32 %v6004_v31, %v5992_v12  ;;  %v10316_v12 = vld [vmem:[#allocation13 + $0x1a0] sm:$0xf]  ;;  %v11312_v31 = vld [vmem:[#allocation13 + $0x1ac] sm:$0xf0] }
 0x3bc   :  { %6622 = vmatpush.bf16.msrb.mxu3 %v10337_v11 }
 0x3bd   :  { %v11987_v15 = vadd.f32 %v6005_v36, %v11857_v43  ;;  %v11278_v36 = vld [vmem:[#allocation13 + $0xa4] sm:$0xf] }
 0x3bf   :  { %v6017_v44 = vpop.f32.mrf.mxu2 }
 0x3c0   :  { %v5993_v45 = vpop.f32.mrf.mxu0  ;;  %v6018_v21 = vadd.f32 %v6017_v44, %v3519_v16  ;;  %v10189_v16 = vor.u32 %v11280_v26, %v10188_v22  ;;  %v10190_v44 = vld [vmem:[#allocation13 + $0xb0] sm:$0xf0]  ;;  %v11262_v22 = vld [vmem:[#allocation13 + $0x24] sm:$0xf] }
 0x3c1   :  { %v6030_v58 = vpop.f32.mrf.mxu3  ;;  %v11310_v45 = vld [vmem:[#allocation13 + $0x1a4] sm:$0xf]  ;;  %v10126_v26 = vld [vmem:[#allocation13 + $0x30] sm:$0xf0] }
 0x3c2   :  { %v6006_v19 = vpop.f32.mrf.mxu1  ;;  %v6031_v37 = vadd.f32 %v6030_v58, %v6018_v21  ;;  %v10318_v21 = vld [vmem:[#allocation13 + $0x1b0] sm:$0xf0]  ;;  %v10317_v58 = vor.u32 %v11312_v31, %v10316_v12  ;;  %v11294_v12 = vld [vmem:[#allocation13 + $0x124] sm:$0xf] }
 0x3c3   :  { %v10193_v19 = vor.u32 %v11278_v36, %v10190_v44  ;;  %v10254_v31 = vld [vmem:[#allocation13 + $0x130] sm:$0xf0]  ;;  %v10180_v36 = vld [vmem:[#allocation13 + $0x88] sm:$0xf] }
 0x3c4   :  { %6597 = vmatpush.bf16.msrb.mxu1 %v10317_v58  ;;  %v10253_v58 = vor.u32 %v11296_v8, %v10252_v7  ;;  %v11279_v7 = vld [vmem:[#allocation13 + $0xac] sm:$0xf] }
 0x3c5   :  { %6610 = vmatpush.bf16.msrb.mxu2 %v10193_v19  ;;  %v10129_v19 = vor.u32 %v11262_v22, %v10126_v26  ;;  %v11311_v8 = vld [vmem:[#allocation13 + $0x1ac] sm:$0xf]  ;;  %v10326_v22 = vld [vmem:[#allocation13 + $0x1b8] sm:$0xf0] }
 0x3c7   :  { %v6019_v48 = vpop.f32.mrf.mxu2 }
 0x3c8   :  { %v11276_v48 = vld [vmem:[#allocation13 + $0x8c] sm:$0xf0] }
 0x3c9   :  { %v6032_v25 = vpop.f32.mrf.mxu3 }
 0x3ca   :  { %v10300_v25 = vld [vmem:[#allocation13 + $0x180] sm:$0xf] }
 0x3e9   :  { %v6043_v60 = vpop.f32.mrf.mxu0 }
 0x3ea   :  { %v6044_v13 = vadd.f32 %v6043_v60, %v6031_v37  ;;  %v10172_v37 = vld [vmem:[#allocation13 + $0x80] sm:$0xf]  ;;  %v10321_v60 = vor.u32 %v11310_v45, %v10318_v21 }
 0x3eb   :  { %v6056_v30 = vpop.f32.mrf.mxu1 }
 0x3ec   :  { %v6057_v14 = vadd.f32 %v6056_v30, %v6044_v13  ;;  %v11308_v13 = vld [vmem:[#allocation13 + $0x18c] sm:$0xf0]  ;;  %v11274_v30 = vld [vmem:[#allocation13 + $0x84] sm:$0xf]  ;;  %6623 = vmatpush.bf16.msrb.mxu3 %v10321_v60  ;;  %v10236_v60 = vld [vmem:[#allocation13 + $0x100] sm:$0xf] }
 0x3f1   :  { %v6045_v47 = vpop.f32.mrf.mxu0 }
 0x3f2   :  { %v10302_v47 = vld [vmem:[#allocation13 + $0x190] sm:$0xf0] }
 0x3f3   :  { %v6069_v9 = vpop.f32.mrf.mxu2  ;;  %v6058_v52 = vpop.f32.mrf.mxu1 }
 0x3f4   :  { %v6070_v35 = vadd.f32 %v6069_v9, %v6057_v14  ;;  %v10174_v14 = vld [vmem:[#allocation13 + $0x90] sm:$0xf0]  ;;  %v10301_v52 = vor.u32 %v11308_v13, %v10300_v25  ;;  %v10257_v25 = vor.u32 %v11294_v12, %v10254_v31  ;;  %v11292_v13 = vld [vmem:[#allocation13 + $0x10c] sm:$0xf0]  ;;  %v10329_v31 = vor.u32 %v11311_v8, %v10326_v22  ;;  %v10118_v8 = vld [vmem:[#allocation13 + $0x18] sm:$0xf0] }
 0x3f5   :  { %v6082_v41 = vpop.f32.mrf.mxu3  ;;  %v11291_v22 = vld [vmem:[#allocation13 + $0x10c] sm:$0xf] }
 0x3f6   :  { %v6083_v32 = vadd.f32 %v6082_v41, %v6070_v35  ;;  %v11306_v35 = vld [vmem:[#allocation13 + $0x184] sm:$0xf]  ;;  %v10173_v41 = vor.u32 %v11276_v48, %v10172_v37  ;;  %6598 = vmatpush.bf16.msrb.mxu1 %v10301_v52  ;;  %v10108_v37 = vld [vmem:[#allocation13] sm:$0xf]  ;;  %v11260_v48 = vld [vmem:[#allocation13 + $0xc] sm:$0xf0] }
 0x3f7   :  { %v10109_v52 = vor.u32 %v11260_v48, %v10108_v37 }
 0x3f8   :  { %v11990_v43 = vadd.f32 %v6083_v32, %v11871_v34  ;;  %v10220_v34 = vld [vmem:[#allocation13 + $0xe0] sm:$0xf]  ;;  %v10177_v32 = vor.u32 %v11274_v30, %v10174_v14  ;;  %v11258_v30 = vld [vmem:[#allocation13 + $0x4] sm:$0xf] }
 0x3f9   :  { %v6103_v40 = vpop.f32.mrf.mxu0  ;;  %v10221_v1 = vor.u32 %v11288_v0, %v10220_v34  ;;  %v10140_v0 = vld [vmem:[#allocation13 + $0x40] sm:$0xf] }
 0x3fa   :  { %6611 = vmatpush.bf16.msrb.mxu2 %v10177_v32  ;;  %v10141_v39 = vor.u32 %v11268_v10, %v10140_v0  ;;  %v10228_v32 = vld [vmem:[#allocation13 + $0xe8] sm:$0xf] }
 0x3fb   :  { %v6071_v62 = vpop.f32.mrf.mxu2  ;;  %v6123_v53 = vpop.f32.mrf.mxu1  ;;  %6582 = vmatpush.bf16.msrb.mxu0 %v10221_v1  ;;  %v10268_v1 = vld [vmem:[#allocation13 + $0x140] sm:$0xf] }
 0x3fc   :  { %v6124_v27 = vadd.f32 %v6123_v53, %v6103_v40  ;;  %v10156_v62 = vld [vmem:[#allocation13 + $0x60] sm:$0xf]  ;;  %v11272_v40 = vld [vmem:[#allocation13 + $0x6c] sm:$0xf0]  ;;  %v10305_v53 = vor.u32 %v11306_v35, %v10302_v47  ;;  %v10269_v20 = vor.u32 %v11300_v46, %v10268_v1  ;;  %v11290_v35 = vld [vmem:[#allocation13 + $0x104] sm:$0xf] }
 0x3fd   :  { %v6084_v49 = vpop.f32.mrf.mxu3  ;;  %v10238_v47 = vld [vmem:[#allocation13 + $0x110] sm:$0xf0] }
 0x3fe   :  { %v6126_v33 = vmul.f32 0.0625, %v6124_v27  ;;  %v10284_v49 = vld [vmem:[#allocation13 + $0x160] sm:$0xf]  ;;  %v11304_v27 = vld [vmem:[#allocation13 + $0x16c] sm:$0xf0]  ;;  %6624 = vmatpush.bf16.msrb.mxu3 %v10305_v53 }
 0x3ff   :  { %6583 = vmatpush.bf16.msrb.mxu0 %v10205_v55  ;;  %v11321_v53 = vld [vmem:[#allocation13 + $0x1f4] sm:$0xf0] }
 0x400   :  { %v6128_v50 = vsel %vm6127_vm1, %v6126_v33, -inf }
 0x401   :  { %6129 = vmax.xlane.f32.xlu0 %v6128_v50  ;;  %v10158_v50 = vld [vmem:[#allocation13 + $0x70] sm:$0xf0] }
 0x403   :  { %6584 = vmatpush.bf16.msrb.mxu0 %v10189_v16  ;;  %v10125_v16 = vor.u32 %v11264_v6, %v10124_v5  ;;  %v11313_v6 = vld [vmem:[#allocation13 + $0x1b4] sm:$0xf0] }
 0x407   :  { %6585 = vmatpush.bf16.msrb.mxu0 %v10173_v41 }
 0x474   :  { %v6130_v61 = vpop.xlane.xlu0 %6129 }
 0x475   :  { %v6131_v63 = vsub.f32 %v6126_v33, %v6130_v61  ;;  %v11270_v33 = vld [vmem:[#allocation13 + $0x64] sm:$0xf] }
 0x476   :  { %v11302_v61 = vld [vmem:[#allocation13 + $0x164] sm:$0xf]  ;;  %v10161_v34 = vor.u32 %v11270_v33, %v10158_v50  ;;  %v10230_v33 = vld [vmem:[#allocation13 + $0xf8] sm:$0xf0]  ;;  %v10237_v50 = vor.u32 %v11292_v13, %v10236_v60 }
 0x477   :  { %v6132_v23 = vmul.f32 1.442695, %v6131_v63  ;;  %v10286_v63 = vld [vmem:[#allocation13 + $0x170] sm:$0xf0]  ;;  %v10310_v60 = vld [vmem:[#allocation13 + $0x198] sm:$0xf0] }
 0x478   :  { %v10289_v18 = vor.u32 %v11302_v61, %v10286_v63  ;;  %6612 = vmatpush.bf16.msrb.mxu2 %v10161_v34  ;;  %v11319_v63 = vld [vmem:[#allocation13 + $0x1ec] sm:$0xf]  ;;  %v10241_v34 = vor.u32 %v11290_v35, %v10238_v47  ;;  %v11305_v47 = vld [vmem:[#allocation13 + $0x174] sm:$0xf0] }
 0x479   :  { %11373 = vpow2.f32 %v6132_v23  ;;  %v10157_v23 = vor.u32 %v11272_v40, %v10156_v62  ;;  %v11289_v62 = vld [vmem:[#allocation13 + $0xf4] sm:$0xf0]  ;;  %v10356_v40 = vld [vmem:[#allocation13 + $0x1e8] sm:$0xf] }
 0x47a   :  { %6625 = vmatpush.bf16.msrb.mxu3 %v10289_v18  ;;  %v10229_v0 = vor.u32 %v11289_v62, %v10228_v32  ;;  %v10357_v10 = vor.u32 %v11321_v53, %v10356_v40  ;;  %v11285_v18 = vld [vmem:[#allocation13 + $0xd4] sm:$0xf0]  ;;  %v11303_v40 = vld [vmem:[#allocation13 + $0x16c] sm:$0xf] }
 0x47b   :  { %6586 = vmatpush.bf16.msrb.mxu0 %v10157_v23  ;;  %v10358_v23 = vld [vmem:[#allocation13 + $0x1f8] sm:$0xf0] }
 0x47c   :  { %6613 = vmatpush.bf16.msrb.mxu2 %v10145_v17  ;;  %v10361_v46 = vor.u32 %v11319_v63, %v10358_v23  ;;  %v10345_v17 = vor.u32 %v11315_v4, %v10342_v29  ;;  %v11301_v63 = vld [vmem:[#allocation13 + $0x154] sm:$0xf0]  ;;  %v11267_v23 = vld [vmem:[#allocation13 + $0x4c] sm:$0xf]  ;;  %v10134_v29 = vld [vmem:[#allocation13 + $0x38] sm:$0xf0] }
 0x47d   :  { %v11263_v4 = vld [vmem:[#allocation13 + $0x2c] sm:$0xf] }
 0x47e   :  { %6626 = vmatpush.bf16.msrb.mxu3 %v10273_v54  ;;  %v10198_v54 = vld [vmem:[#allocation13 + $0xb8] sm:$0xf0] }
 0x47f   :  { %v11992_v57 = vpop.eup %11373  ;;  %6587 = vmatpush.bf16.msrb.mxu0 %v10141_v39  ;;  %v10201_v12 = vor.u32 %v11279_v7, %v10198_v54  ;;  %v11259_v7 = vld [vmem:[#allocation13 + $0xc] sm:$0xf] }
 0x480   :  { %v6134_v59 = vsel %vm6127_vm1, %v11992_v57, 0.0  ;;  %6614 = vmatpush.bf16.msrb.mxu2 %v10129_v19  ;;  %v10182_v19 = vld [vmem:[#allocation13 + $0x98] sm:$0xf0] }
 0x481   :  { %6135 = vadd.xlane.f32.xlu0 %v6134_v59  ;;  %v10285_v59 = vor.u32 %v11304_v27, %v10284_v49  ;;  %v11287_v27 = vld [vmem:[#allocation13 + $0xec] sm:$0xf] }
 0x482   :  { %6627 = vmatpush.bf16.msrb.mxu3 %v10257_v25  ;;  %v10233_v1 = vor.u32 %v11287_v27, %v10230_v33  ;;  %v11307_v25 = vld [vmem:[#allocation13 + $0x18c] sm:$0xf]  ;;  %v10148_v27 = vld [vmem:[#allocation13 + $0x48] sm:$0xf]  ;;  %v11269_v33 = vld [vmem:[#allocation13 + $0x54] sm:$0xf0] }
 0x483   :  { %6599 = vmatpush.bf16.msrb.mxu1 %v10285_v59  ;;  %6588 = vmatpush.bf16.msrb.mxu0 %v10125_v16  ;;  %v11277_v16 = vld [vmem:[#allocation13 + $0x94] sm:$0xf0]  ;;  %v10313_v13 = vor.u32 %v11307_v25, %v10310_v60  ;;  %v11344_v25 = vld [vmem:[#allocation14 + $0xb0] sm:$0xff] }
 0x484   :  { %v10181_v45 = vor.u32 %v11277_v16, %v10180_v36 }
 0x486   :  { %6628 = vmatpush.bf16.msrb.mxu3 %v10241_v34 }
 0x487   :  { %6600 = vmatpush.bf16.msrb.mxu1 %v10269_v20  ;;  %6589 = vmatpush.bf16.msrb.mxu0 %v10109_v52  ;;  %v10324_v20 = vld [vmem:[#allocation13 + $0x1a8] sm:$0xf]  ;;  %v10166_v52 = vld [vmem:[#allocation13 + $0x78] sm:$0xf0] }
 0x48b   :  { %6601 = vmatpush.bf16.msrb.mxu1 %v10253_v58  ;;  %6634 = vmatpush.bf16.msra.mxu0 %v10229_v0  ;;  %v11275_v58 = vld [vmem:[#allocation13 + $0x8c] sm:$0xf] }
 0x48c   :  { %v10185_v48 = vor.u32 %v11275_v58, %v10182_v19  ;;  %v11337_v58 = vld [vmem:[#allocation14 + $0x78] sm:$0xff] }
 0x48d   :  { %v11345_v19 = vld [vmem:[#allocation14 + $0xb8] sm:$0xff] }
 0x48f   :  { %6602 = vmatpush.bf16.msrb.mxu1 %v10237_v50  ;;  %v10276_v50 = vld [vmem:[#allocation13 + $0x148] sm:$0xf] }
 0x490   :  { %v10277_v34 = vor.u32 %v11301_v63, %v10276_v50  ;;  %v11331_v50 = vld [vmem:[#allocation14 + $0x48] sm:$0xff]  ;;  %v11341_v63 = vld [vmem:[#allocation14 + $0x98] sm:$0xff] }
 0x493   :  { %6647 = vmatpush.bf16.msra.mxu1 %v10357_v10  ;;  %v11299_v10 = vld [vmem:[#allocation13 + $0x14c] sm:$0xf] }
 0x4f4   :  { %v11995_v9 = vpop.xlane.xlu0 %6135 }
 0x4f5   :  { %11375 = vrcp.f32 %v11995_v9  ;;  %v6146_v42 = vand.u32 2147483647, %v11995_v9  ;;  %v6148_v55 = vand.u32 2147483648, %v11995_v9  ;;  %vm6142_vm3 = vweird.f32 %v11995_v9 }
 0x4f7   :  { %vm12002_vm4 = vcmp.eq.f32.partialorder %v6146_v42, 8.507059e+37  ;;  %v6149_v21 = vor.u32 1.1754944e-38, %v6148_v55  ;;  %v11281_v55 = vld [vmem:[#allocation13 + $0xb4] sm:$0xf0] }
 0x4fb   :  { %v11376_v24 = vpop.eup %11375 }
 0x4fc   :  { %v6138_v3 = vmul.f32 %v11376_v24, %v11995_v9  ;;  %vm6143_vm2 = vweird.f32 %v11376_v24  ;;  %v10110_v9 = vld [vmem:[#allocation13 + $0x10] sm:$0xf0] }
 0x4fd   :  { %vm12006_vm5 = vmor %vm6142_vm3, %vm6143_vm2  ;;  %v10113_v61 = vor.u32 %v11258_v30, %v10110_v9  ;;  %v10164_v30 = vld [vmem:[#allocation13 + $0x68] sm:$0xf] }
 0x4fe   :  { %v6139_v38 = vsub.f32 1.0, %v6138_v3  ;;  %v10214_v3 = vld [vmem:[#allocation13 + $0xd8] sm:$0xf0]  ;;  %v10292_v9 = vld [vmem:[#allocation13 + $0x168] sm:$0xf] }
 0x4ff   :  { %6615 = vmatpush.bf16.msrb.mxu2 %v10113_v61  ;;  %v10217_v5 = vor.u32 %v11283_v51, %v10214_v3  ;;  %v10293_v32 = vor.u32 %v11305_v47, %v10292_v9  ;;  %v10149_v61 = vor.u32 %v11269_v33, %v10148_v27  ;;  %v11326_v9 = vld [vmem:[#allocation14 + $0x20] sm:$0xff]  ;;  %v11325_v47 = vld [vmem:[#allocation14 + $0x18] sm:$0xff] }
 0x500   :  { %v6140_v11 = vmul.f32 %v11376_v24, %v6139_v38  ;;  %v10196_v38 = vld [vmem:[#allocation13 + $0xa8] sm:$0xf]  ;;  %v11322_v27 = vld [vmem:[#allocation14] sm:$0xff] }
 0x501   :  { %v10197_v26 = vor.u32 %v11281_v55, %v10196_v38  ;;  %v10116_v38 = vld [vmem:[#allocation13 + $0x8] sm:$0xf]  ;;  %v11261_v55 = vld [vmem:[#allocation13 + $0x14] sm:$0xf0]  ;;  %v11342_v33 = vld [vmem:[#allocation14 + $0xa0] sm:$0xff] }
 0x502   :  { %v6141_v44 = vadd.f32 %v11376_v24, %v6140_v11  ;;  %v10325_v11 = vor.u32 %v11313_v6, %v10324_v20  ;;  %v11293_v6 = vld [vmem:[#allocation13 + $0x114] sm:$0xf0]  ;;  %v10117_v54 = vor.u32 %v11261_v55, %v10116_v38 }
 0x504   :  { %v6145_v14 = vsel %vm12006_vm5, %v11376_v24, %v6141_v44  ;;  %v10212_v24 = vld [vmem:[#allocation13 + $0xc8] sm:$0xf] }
 0x505   :  { %v6150_v41 = vsel %vm12002_vm4, %v6149_v21, %v6145_v14  ;;  %v10213_v42 = vor.u32 %v11285_v18, %v10212_v24  ;;  %v10308_v44 = vld [vmem:[#allocation13 + $0x188] sm:$0xf]  ;;  %v11309_v21 = vld [vmem:[#allocation13 + $0x194] sm:$0xf0] }
 0x506   :  { %v6151_v49 = vmul.f32 %v11992_v57, %v6150_v41  ;;  %v10340_v57 = vld [vmem:[#allocation13 + $0x1c8] sm:$0xf]  ;;  %v10309_v37 = vor.u32 %v11309_v21, %v10308_v44  ;;  %v11273_v14 = vld [vmem:[#allocation13 + $0x74] sm:$0xf0]  ;;  %v11271_v41 = vld [vmem:[#allocation13 + $0x6c] sm:$0xf] }
 0x507   :  { %v10341_v39 = vor.u32 %v11317_v2, %v10340_v57  ;;  %6635 = vmatpush.bf16.msra.mxu0 %v10213_v42  ;;  %v10165_v35 = vor.u32 %v11273_v14, %v10164_v30  ;;  %v10169_v62 = vor.u32 %v11271_v41, %v10166_v52  ;;  %v10132_v24 = vld [vmem:[#allocation13 + $0x28] sm:$0xf]  ;;  %v11265_v57 = vld [vmem:[#allocation13 + $0x34] sm:$0xf0]  ;;  %v11295_v42 = vld [vmem:[#allocation13 + $0x12c] sm:$0xf] }
 0x508   :  { %v6152_v59 = vpack.c.bf16 %v6151_v49, %v6151_v49  ;;  %v10294_v49 = vld [vmem:[#allocation13 + $0x178] sm:$0xf0]  ;;  %v11297_v2 = vld [vmem:[#allocation13 + $0x134] sm:$0xf0]  ;;  %v10133_v51 = vor.u32 %v11265_v57, %v10132_v24  ;;  %v11327_v30 = vld [vmem:[#allocation14 + $0x28] sm:$0xff] }
 0x509   :  { %6648 = vmatpush.bf16.msra.mxu1 %v10341_v39  ;;  %v10297_v53 = vor.u32 %v11303_v40, %v10294_v49  ;;  %v10137_v39 = vor.u32 %v11263_v4, %v10134_v29  ;;  %v11329_v21 = vld [vmem:[#allocation14 + $0x38] sm:$0xff]  ;;  %v11335_v14 = vld [vmem:[#allocation14 + $0x68] sm:$0xff]  ;;  %v11324_v41 = vld [vmem:[#allocation14 + $0x10] sm:$0xff] }
 0x50a   :  { %10104 = vmatmul.msk.bf16.vlgmr.msra.gmra.mxu2 %vm6155_vm6, %v6152_v59  ;;  %10105 = vmatmul.msk.bf16.vlgmr.msra.gmra.mxu3 %vm6155_vm6, %v6152_v59  ;;  %v10150_v59 = vld [vmem:[#allocation13 + $0x58] sm:$0xf0]  ;;  %v11343_v40 = vld [vmem:[#allocation14 + $0xa8] sm:$0xff]  ;;  %v11332_v49 = vld [vmem:[#allocation14 + $0x50] sm:$0xff] }
 0x50b   :  { %6660 = vmatpush.bf16.msra.mxu2 %v10233_v1  ;;  %6673 = vmatpush.bf16.msra.mxu3 %v10361_v46  ;;  %v10153_v0 = vor.u32 %v11267_v23, %v10150_v59  ;;  %v10278_v1 = vld [vmem:[#allocation13 + $0x158] sm:$0xf0]  ;;  %v10260_v46 = vld [vmem:[#allocation13 + $0x128] sm:$0xf]  ;;  %v11330_v23 = vld [vmem:[#allocation14 + $0x40] sm:$0xff] }
 0x50c   :  { %6636 = vmatpush.bf16.msra.mxu0 %v10197_v26  ;;  %v10281_v18 = vor.u32 %v11299_v10, %v10278_v1  ;;  %v10261_v3 = vor.u32 %v11297_v2, %v10260_v46  ;;  %v10246_v26 = vld [vmem:[#allocation13 + $0x118] sm:$0xf0]  ;;  %v11350_v59 = vld [vmem:[#allocation14 + $0xe0] sm:$0xff]  ;;  %v11339_v10 = vld [vmem:[#allocation14 + $0x88] sm:$0xff] }
 0x50d   :  { %6649 = vmatpush.bf16.msra.mxu1 %v10325_v11  ;;  %v11333_v52 = vld [vmem:[#allocation14 + $0x58] sm:$0xff]  ;;  %v11348_v1 = vld [vmem:[#allocation14 + $0xd0] sm:$0xff]  ;;  %v11338_v24 = vld [vmem:[#allocation14 + $0x80] sm:$0xff] }
 0x50e   :  { %v11346_v57 = vld [vmem:[#allocation14 + $0xc0] sm:$0xff] }
 0x50f   :  { %6661 = vmatpush.bf16.msra.mxu2 %v10217_v5  ;;  %6674 = vmatpush.bf16.msra.mxu3 %v10345_v17  ;;  %v10262_v5 = vld [vmem:[#allocation13 + $0x138] sm:$0xf0]  ;;  %v10244_v17 = vld [vmem:[#allocation13 + $0x108] sm:$0xf] }
 0x510   :  { %6637 = vmatpush.bf16.msra.mxu0 %v10181_v45  ;;  %v10265_v20 = vor.u32 %v11295_v42, %v10262_v5  ;;  %v10245_v11 = vor.u32 %v11293_v6, %v10244_v17 }
 0x511   :  { %6650 = vmatpush.bf16.msra.mxu1 %v10309_v37  ;;  %v11328_v37 = vld [vmem:[#allocation14 + $0x30] sm:$0xff] }
 0x513   :  { %6662 = vmatpush.bf16.msra.mxu2 %v10201_v12  ;;  %6675 = vmatpush.bf16.msra.mxu3 %v10329_v31  ;;  %v10121_v12 = vor.u32 %v11259_v7, %v10118_v8  ;;  %v10249_v31 = vor.u32 %v11291_v22, %v10246_v26 }
 0x514   :  { %6638 = vmatpush.bf16.msra.mxu0 %v10165_v35  ;;  %v11334_v35 = vld [vmem:[#allocation14 + $0x60] sm:$0xff] }
 0x515   :  { %6651 = vmatpush.bf16.msra.mxu1 %v10293_v32  ;;  %v11353_v32 = vld [vmem:[#allocation14 + $0xf8] sm:$0xff] }
 0x517   :  { %6663 = vmatpush.bf16.msra.mxu2 %v10185_v48  ;;  %6676 = vmatpush.bf16.msra.mxu3 %v10313_v13  ;;  %v11336_v48 = vld [vmem:[#allocation14 + $0x70] sm:$0xff] }
 0x518   :  { %6639 = vmatpush.bf16.msra.mxu0 %v10149_v61  ;;  %v11351_v61 = vld [vmem:[#allocation14 + $0xe8] sm:$0xff] }
 0x519   :  { %6652 = vmatpush.bf16.msra.mxu1 %v10277_v34  ;;  %v11340_v34 = vld [vmem:[#allocation14 + $0x90] sm:$0xff] }
 0x51b   :  { %6664 = vmatpush.bf16.msra.mxu2 %v10169_v62  ;;  %6677 = vmatpush.bf16.msra.mxu3 %v10297_v53  ;;  %v11323_v62 = vld [vmem:[#allocation14 + $0x8] sm:$0xff]  ;;  %v11352_v53 = vld [vmem:[#allocation14 + $0xf0] sm:$0xff] }
 0x51c   :  { %6640 = vmatpush.bf16.msra.mxu0 %v10133_v51 }
 0x51d   :  { %6653 = vmatpush.bf16.msra.mxu1 %v10261_v3 }
 0x51f   :  { %6665 = vmatpush.bf16.msra.mxu2 %v10153_v0  ;;  %6678 = vmatpush.bf16.msra.mxu3 %v10281_v18  ;;  %v11349_v0 = vld [vmem:[#allocation14 + $0xd8] sm:$0xff]  ;;  %v11347_v18 = vld [vmem:[#allocation14 + $0xc8] sm:$0xff] }
 0x520   :  { %6641 = vmatpush.bf16.msra.mxu0 %v10117_v54 }
 0x521   :  { %6654 = vmatpush.bf16.msra.mxu1 %v10245_v11 }
 0x523   :  { %6666 = vmatpush.bf16.msra.mxu2 %v10137_v39  ;;  %6679 = vmatpush.bf16.msra.mxu3 %v10265_v20 }
 0x527   :  { %6667 = vmatpush.bf16.msra.mxu2 %v10121_v12  ;;  %6680 = vmatpush.bf16.msra.mxu3 %v10249_v31 }
 0x58d   :  { %v6175_v36 = vpop.f32.mrf.mxu2  ;;  %v6188_v16 = vpop.f32.mrf.mxu3 }
 0x58e   :  { %v6196_v44 = vpack.c.bf16 %v6175_v36, %v6175_v36  ;;  %v6197_v45 = vpack.c.bf16 %v6188_v16, %v6188_v16 }
 0x590   :  { %6590 = vmatmul.bf16.vlgmr.msrb.gmra.mxu0 %v6196_v44  ;;  %6603 = vmatmul.bf16.vlgmr.msrb.gmra.mxu1 %v6197_v45 }
 0x591   :  { %6616 = vmatmul.bf16.vlgmr.msrb.gmra.mxu2 %v6196_v44  ;;  %6629 = vmatmul.bf16.vlgmr.msrb.gmra.mxu3 %v6197_v45 }
 0x592   :  { %6958 = vmatpush.bf16.msrb.mxu0 %v11329_v21  ;;  %6971 = vmatpush.bf16.msrb.mxu1 %v11337_v58 }
 0x593   :  { %6984 = vmatpush.bf16.msrb.mxu2 %v11345_v19  ;;  %6997 = vmatpush.bf16.msrb.mxu3 %v11353_v32 }
 0x595   :  { %v6177_v60 = vpop.f32.mrf.mxu2  ;;  %v6190_v13 = vpop.f32.mrf.mxu3 }
 0x596   :  { %6959 = vmatpush.bf16.msrb.mxu0 %v11328_v37  ;;  %6972 = vmatpush.bf16.msrb.mxu1 %v11336_v48 }
 0x597   :  { %6985 = vmatpush.bf16.msrb.mxu2 %v11344_v25  ;;  %6998 = vmatpush.bf16.msrb.mxu3 %v11352_v53 }
 0x59a   :  { %6960 = vmatpush.bf16.msrb.mxu0 %v11327_v30  ;;  %6973 = vmatpush.bf16.msrb.mxu1 %v11335_v14 }
 0x59b   :  { %6986 = vmatpush.bf16.msrb.mxu2 %v11343_v40  ;;  %6999 = vmatpush.bf16.msrb.mxu3 %v11351_v61 }
 0x59e   :  { %6961 = vmatpush.bf16.msrb.mxu0 %v11326_v9  ;;  %6974 = vmatpush.bf16.msrb.mxu1 %v11334_v35 }
 0x59f   :  { %6987 = vmatpush.bf16.msrb.mxu2 %v11342_v33  ;;  %7000 = vmatpush.bf16.msrb.mxu3 %v11350_v59 }
 0x5a0   :  { %6642 = vmatmul.bf16.vlgmr.msra.gmra.mxu0 %v6196_v44  ;;  %6655 = vmatmul.bf16.vlgmr.msra.gmra.mxu1 %v6197_v45 }
 0x5a1   :  { %6668 = vmatmul.bf16.vlgmr.msra.gmra.mxu2 %v6196_v44  ;;  %6681 = vmatmul.bf16.vlgmr.msra.gmra.mxu3 %v6197_v45 }
 0x5a2   :  { %6962 = vmatpush.bf16.msrb.mxu0 %v11325_v47  ;;  %6975 = vmatpush.bf16.msrb.mxu1 %v11333_v52 }
 0x5a3   :  { %6988 = vmatpush.bf16.msrb.mxu2 %v11341_v63  ;;  %7001 = vmatpush.bf16.msrb.mxu3 %v11349_v0 }
 0x5a6   :  { %6963 = vmatpush.bf16.msrb.mxu0 %v11324_v41  ;;  %6976 = vmatpush.bf16.msrb.mxu1 %v11332_v49 }
 0x5a7   :  { %6989 = vmatpush.bf16.msrb.mxu2 %v11340_v34  ;;  %7002 = vmatpush.bf16.msrb.mxu3 %v11348_v1 }
 0x5aa   :  { %6964 = vmatpush.bf16.msrb.mxu0 %v11323_v62  ;;  %6977 = vmatpush.bf16.msrb.mxu1 %v11331_v50 }
 0x5ab   :  { %6990 = vmatpush.bf16.msrb.mxu2 %v11339_v10  ;;  %7003 = vmatpush.bf16.msrb.mxu3 %v11347_v18 }
 0x5ae   :  { %6965 = vmatpush.bf16.msrb.mxu0 %v11322_v27  ;;  %6978 = vmatpush.bf16.msrb.mxu1 %v11330_v23 }
 0x5af   :  { %6991 = vmatpush.bf16.msrb.mxu2 %v11338_v24  ;;  %7004 = vmatpush.bf16.msrb.mxu3 %v11346_v57 }
 0x60d   :  { %v6591_v46 = vpop.f32.mrf.mxu0  ;;  %v6604_v2 = vpop.f32.mrf.mxu1 }
 0x60e   :  { %v6605_v51 = vadd.f32 %v6604_v2, %v6591_v46 }
 0x610   :  { %v6686_v3 = vadd.f32 %v6605_v51, %v11977_v56 }
 0x612   :  { %v6690_v4 = vmax.f32 %v6686_v3, 0.0 }
 0x614   :  { %v6694_v29 = vpack.c.bf16 %v6690_v4, %v6690_v4  ;;  %v6617_v42 = vpop.f32.mrf.mxu2  ;;  %v6630_v39 = vpop.f32.mrf.mxu3 }
 0x615   :  { %v6631_v5 = vadd.f32 %v6630_v39, %v6617_v42  ;;  %v6593_v38 = vpop.f32.mrf.mxu0  ;;  %v6606_v55 = vpop.f32.mrf.mxu1 }
 0x616   :  { %6966 = vmatmul.bf16.vlgmr.msrb.gmra.mxu0 %v6694_v29 }
 0x617   :  { %v6687_v20 = vadd.f32 %v6631_v5, %v11982_v28 }
 0x619   :  { %v6691_v17 = vmax.f32 %v6687_v20, 0.0 }
 0x61b   :  { %v6695_v6 = vpack.c.bf16 %v6691_v17, %v6691_v17 }
 0x61c   :  { %v6619_v7 = vpop.f32.mrf.mxu2  ;;  %v6632_v54 = vpop.f32.mrf.mxu3 }
 0x61d   :  { %6979 = vmatmul.bf16.vlgmr.msrb.gmra.mxu1 %v6695_v6  ;;  %v6643_v8 = vpop.f32.mrf.mxu0  ;;  %v6656_v22 = vpop.f32.mrf.mxu1 }
 0x61e   :  { %v6657_v26 = vadd.f32 %v6656_v22, %v6643_v8 }
 0x620   :  { %v6688_v56 = vadd.f32 %v6657_v26, %v11987_v15  ;;  %v11372_v15 = vld [vmem:[#allocation16] ss:$0 sm:$0xff] }
 0x622   :  { %v6692_v11 = vmax.f32 %v6688_v56, 0.0 }
 0x624   :  { %v6696_v12 = vpack.c.bf16 %v6692_v11, %v6692_v11  ;;  %v6669_v31 = vpop.f32.mrf.mxu2  ;;  %v6682_v36 = vpop.f32.mrf.mxu3 }
 0x625   :  { %v6683_v16 = vadd.f32 %v6682_v36, %v6669_v31  ;;  %v6645_v44 = vpop.f32.mrf.mxu0  ;;  %v6658_v45 = vpop.f32.mrf.mxu1 }
 0x626   :  { %6992 = vmatmul.bf16.vlgmr.msrb.gmra.mxu2 %v6696_v12 }
 0x627   :  { %v6689_v28 = vadd.f32 %v6683_v16, %v11990_v43 }
 0x629   :  { %v6693_v21 = vmax.f32 %v6689_v28, 0.0 }
 0x62b   :  { %v6697_v58 = vpack.c.bf16 %v6693_v21, %v6693_v21 }
 0x62c   :  { %v6671_v19 = vpop.f32.mrf.mxu2  ;;  %v6684_v37 = vpop.f32.mrf.mxu3 }
 0x62d   :  { %7005 = vmatmul.bf16.vlgmr.msrb.gmra.mxu3 %v6697_v58 }
 0x693   :  { %v6967_v48 = vpop.f32.mrf.mxu0 }
 0x694   :  { %v6968_v14 = vadd.f32 %v11372_v15, %v6967_v48 }
 0x69a   :  { %v6980_v25 = vpop.f32.mrf.mxu1 }
 0x69b   :  { %v6969_v60 = vpop.f32.mrf.mxu0  ;;  %v6981_v9 = vadd.f32 %v6980_v25, %v6968_v14 }
 0x6a2   :  { %v6982_v13 = vpop.f32.mrf.mxu1 }
 0x6a9   :  { %v6993_v30 = vpop.f32.mrf.mxu2 }
 0x6aa   :  { %v6994_v43 = vadd.f32 %v6993_v30, %v6981_v9 }
 0x6b0   :  { %v7006_v35 = vpop.f32.mrf.mxu3 }
 0x6b1   :  { %v7007_v47 = vadd.f32 %v7006_v35, %v6994_v43  ;;  %v6995_v41 = vpop.f32.mrf.mxu2 }
 0x6b3   :  { %7010 = vst [vmem:[#allocation17] sm:$0x3] %v7007_v47 }
 0x6b4   :  { %7021 = dma.vmem_to_hbm [thread:$0]  %s7017_s8, 32, %s7019_s7, [#allocation4]  }
 0x6b8   :  { %v7008_v52 = vpop.f32.mrf.mxu3 }
 0x6b9   :  { %11642 = dma.done.wait [#allocation4], 32  }
 0x6ba   :  { %11643 = vsyncadd [#allocation4], 4294967264 }
 0x6bb   :  { %7026 = vsyncpa [#allocation3], 1 }
 0x6bc   :  { %7027 = vsyncpa [#allocation6], 1 }
 0x6bd   :  { %7028 = vsyncpa [#allocation9], 1 }
 0x6be   :  { %7029 = vsyncpa [#allocation12], 1 }
 0x6bf   :  { %7030 = vsyncpa [#allocation15], 1 }
 0x6c0   :  { %7031 = vsyncpa [#allocation4], 1 }

</bundles_post_ra>
